<compile_context>
chip_gen: v6e
topology: v6e:2x2x1
jax: 0.10.0
libtpu: 0.0.40
codegen_flags: <defaults>
</compile_context>

<pallas_src>
import jax
import jax.numpy as jnp
from jax import lax
from jax.experimental import pallas as pl
from jax.experimental.pallas import tpu as pltpu

EMB_DIM = 128       # fixed by the module: nn.Embedding(vocab, 128), GRU input size 128
_UNROLL_T = 32      # fully unroll the serial time loop (vreg-resident h) up to this T


# --------------------------------------------------------------------------------------
# Fused bidirectional GRU layer kernel (both directions, full-sequence recurrence)
# --------------------------------------------------------------------------------------
def _bigru_body(x_ref, wih_ref, whh_ref, bx_ref, bhn_ref, out_ref, hT_ref, xp_ref):
    """x_ref  : (T, bb, Din) bf16 time-major input block
       wih_ref: (Din, 6H) bf16 = [Wih_fwd^T | Wih_bwd^T]
       whh_ref: (2H, 6H) bf16 block-diag(Whh_fwd^T, Whh_bwd^T)
       bx_ref : (1, 6H) f32  = b_ih + [b_hh_r, b_hh_z, 0]  (folded, per direction)
       bhn_ref: (1, 2H) f32  = [b_hh_n_fwd | b_hh_n_bwd]
       out_ref: (T, bb, 2H) per-step hiddens (fwd at [...,:H], bwd at [...,H:]) or None
       hT_ref : (bb, 2H) f32 final hiddens [h_fwd | h_bwd]
       xp_ref : (T*bb, 6H) f32 scratch holding the folded input projections."""
    T, bb, Din = x_ref.shape
    H = whh_ref.shape[0] // 2
    H3 = 3 * H

    # (1) all-timestep input projections for BOTH directions in one bf16 MXU matmul,
    #     with biases (b_ih + r/z parts of b_hh) already folded in.
    x2 = x_ref[...].reshape(T * bb, Din)
    xp_ref[...] = (jnp.dot(x2, wih_ref[...], preferred_element_type=jnp.float32)
                   + bx_ref[...])

    whh = whh_ref[...]
    # hoist the n-gate recurrent-bias broadcasts out of the serial time loop
    bhn_f = jnp.broadcast_to(bhn_ref[:, 0:H], (bb, H))
    bhn_b = jnp.broadcast_to(bhn_ref[:, H:2 * H], (bb, H))

    def step(t, h_f, h_b):
        tb = T - 1 - t
        # one joint recurrent matmul: [h_f | h_b] (bb,2H) @ block-diag (2H,6H)
        h_cat = jnp.concatenate([h_f, h_b], axis=1).astype(whh.dtype)
        gh = jnp.dot(h_cat, whh, preferred_element_type=jnp.float32)      # (bb, 6H)
        gx_f = xp_ref[pl.ds(t * bb, bb), 0:H3]                             # (bb, 3H)
        gx_b = xp_ref[pl.ds(tb * bb, bb), H3:2 * H3]                       # (bb, 3H)
        # forward direction (time t), gate order [r, z, n]
        r_f = jax.nn.sigmoid(gx_f[:, 0:H] + gh[:, 0:H])
        z_f = jax.nn.sigmoid(gx_f[:, H:2 * H] + gh[:, H:2 * H])
        n_f = jnp.tanh(gx_f[:, 2 * H:H3] + r_f * (gh[:, 2 * H:H3] + bhn_f))
        h_f = (1.0 - z_f) * n_f + z_f * h_f
        # backward direction (time T-1-t)
        r_b = jax.nn.sigmoid(gx_b[:, 0:H] + gh[:, H3:H3 + H])
        z_b = jax.nn.sigmoid(gx_b[:, H:2 * H] + gh[:, H3 + H:H3 + 2 * H])
        n_b = jnp.tanh(gx_b[:, 2 * H:H3] + r_b * (gh[:, H3 + 2 * H:2 * H3] + bhn_b))
        h_b = (1.0 - z_b) * n_b + z_b * h_b
        if out_ref is not None:
            # time-major lane-dense stores: one contiguous (bb, H) slab per direction
            out_ref[pl.ds(t, 1), :, 0:H] = h_f[None].astype(out_ref.dtype)
            out_ref[pl.ds(tb, 1), :, H:2 * H] = h_b[None].astype(out_ref.dtype)
        return h_f, h_b

    h0 = jnp.zeros((bb, H), jnp.float32)
    if T <= _UNROLL_T:
        # static full unroll: hidden state stays vreg-resident, scheduler sees the chain
        h_f, h_b = h0, h0
        for t in range(T):
            h_f, h_b = step(t, h_f, h_b)
    else:
        h_f, h_b = lax.fori_loop(0, T, lambda t, c: step(t, *c), (h0, h0))

    hT_ref[...] = jnp.concatenate([h_f, h_b], axis=1)


def _bigru_kernel_seq(x_ref, wih_ref, whh_ref, bx_ref, bhn_ref, out_ref, hT_ref, xp_ref):
    _bigru_body(x_ref, wih_ref, whh_ref, bx_ref, bhn_ref, out_ref, hT_ref, xp_ref)


def _bigru_kernel_noseq(x_ref, wih_ref, whh_ref, bx_ref, bhn_ref, hT_ref, xp_ref):
    _bigru_body(x_ref, wih_ref, whh_ref, bx_ref, bhn_ref, None, hT_ref, xp_ref)


def bigru_layer(x_tbd, wih, whh, bx, bhn, *, seq_out=True, batch_block=None):
    """One fused bidirectional GRU layer on time-major input x_tbd:(T,B,Din).
    Returns (out:(T,B,2H) bf16 or None, hT:(B,2H) f32 final hiddens [fwd|bwd])."""
    T, B, Din = x_tbd.shape
    H = whh.shape[0] // 2
    bb = B if batch_block is None else batch_block
    assert B % bb == 0 and (bb == B or bb % 8 == 0), "batch_block must tile B (mult of 8)"
    grid = (B // bb,)

    full = lambda s: pl.BlockSpec(s, lambda i: (0,) * len(s))
    in_specs = [
        pl.BlockSpec((T, bb, Din), lambda i: (0, i, 0)),
        full((Din, 6 * H)),
        full((2 * H, 6 * H)),
        full((1, 6 * H)),
        full((1, 2 * H)),
    ]
    hT_spec = pl.BlockSpec((bb, 2 * H), lambda i: (i, 0))
    hT_shape = jax.ShapeDtypeStruct((B, 2 * H), jnp.float32)
    if seq_out:
        kernel = _bigru_kernel_seq
        out_specs = (pl.BlockSpec((T, bb, 2 * H), lambda i: (0, i, 0)), hT_spec)
        out_shape = (jax.ShapeDtypeStruct((T, B, 2 * H), jnp.bfloat16), hT_shape)
    else:
        kernel = _bigru_kernel_noseq
        out_specs = hT_spec
        out_shape = hT_shape

    # explicit VMEM budget: double-buffered I/O blocks + xp scratch, with headroom
    bf2, f4 = 2, 4
    est = 2 * (T * bb * Din * bf2 + Din * 6 * H * bf2 + 2 * H * 6 * H * bf2
               + T * bb * 2 * H * bf2 + bb * 2 * H * f4 + 8 * H * f4)
    est += T * bb * 6 * H * f4
    vmem_limit = int(min(max(2 * est, 16 << 20), 64 << 20))
    # TODO(synk): for very long sequences, tile the xp precompute over T chunks instead
    # of keeping the whole (T*bb, 6H) projection resident (v7x has only 64 MiB VMEM).

    res = pl.pallas_call(
        kernel,
        out_shape=out_shape,
        grid=grid,
        in_specs=in_specs,
        out_specs=out_specs,
        scratch_shapes=[pltpu.VMEM((T * bb, 6 * H), jnp.float32)],
        compiler_params=pltpu.CompilerParams(
            dimension_semantics=("parallel",),   # batch blocks shard over v7x TCs
            vmem_limit_bytes=vmem_limit),
    )(x_tbd, wih, whh, bx, bhn)
    if seq_out:
        return res[0], res[1]
    return None, res


# --------------------------------------------------------------------------------------
# Parameter packing (PyTorch layout -> fused kernel layout)
# --------------------------------------------------------------------------------------
def pack_layer_params(layer_params):
    """(fwd, bwd) tuples of (w_ih:(3H,Din), w_hh:(3H,H), b_ih:(3H,), b_hh:(3H,)) ->
       (wih:(Din,6H) bf16, whh:(2H,6H) bf16 block-diag, bx:(1,6H) f32, bhn:(1,2H) f32)."""
    (w_ih_f, w_hh_f, b_ih_f, b_hh_f), (w_ih_b, w_hh_b, b_ih_b, b_hh_b) = layer_params
    H = w_hh_f.shape[1]
    wih = jnp.concatenate([w_ih_f.T, w_ih_b.T], axis=1)                   # (Din, 6H)
    whh = jnp.zeros((2 * H, 6 * H), jnp.float32)
    whh = whh.at[:H, :3 * H].set(w_hh_f.T)
    whh = whh.at[H:, 3 * H:].set(w_hh_b.T)

    def fold(b_ih, b_hh):  # fold b_ih + [b_hh_r, b_hh_z, 0] into the input projection
        return b_ih + jnp.concatenate([b_hh[:2 * H], jnp.zeros((H,), b_hh.dtype)])

    bx = jnp.concatenate([fold(b_ih_f, b_hh_f), fold(b_ih_b, b_hh_b)]).reshape(1, 6 * H)
    bhn = jnp.concatenate([b_hh_f[2 * H:], b_hh_b[2 * H:]]).reshape(1, 2 * H)
    return (wih.astype(jnp.bfloat16), whh.astype(jnp.bfloat16),
            bx.astype(jnp.float32), bhn.astype(jnp.float32))


# --------------------------------------------------------------------------------------
# Encoder forward (Pallas-backed) and parameter init
# --------------------------------------------------------------------------------------
def init_params(key, vocab_size, hidden_size, latent_size, num_layers):
    keys = iter(jax.random.split(key, 64))
    params = {'embedding': jax.random.normal(next(keys), (vocab_size, EMB_DIM),
                                             jnp.float32)}
    k = 1.0 / (hidden_size ** 0.5)
    gru = []
    for layer in range(num_layers):
        in_dim = EMB_DIM if layer == 0 else 2 * hidden_size
        layer_p = []
        for _direction in range(2):
            w_ih = jax.random.uniform(next(keys), (3 * hidden_size, in_dim),
                                      jnp.float32, -k, k)
            w_hh = jax.random.uniform(next(keys), (3 * hidden_size, hidden_size),
                                      jnp.float32, -k, k)
            b_ih = jax.random.uniform(next(keys), (3 * hidden_size,), jnp.float32, -k, k)
            b_hh = jax.random.uniform(next(keys), (3 * hidden_size,), jnp.float32, -k, k)
            layer_p.append((w_ih, w_hh, b_ih, b_hh))
        gru.append(layer_p)
    params['gru'] = gru
    kl = 1.0 / ((2 * hidden_size) ** 0.5)
    params['w_mu'] = jax.random.uniform(next(keys), (latent_size, 2 * hidden_size),
                                        jnp.float32, -kl, kl)
    params['b_mu'] = jax.random.uniform(next(keys), (latent_size,), jnp.float32, -kl, kl)
    params['w_sig'] = jax.random.uniform(next(keys), (latent_size, 2 * hidden_size),
                                         jnp.float32, -kl, kl)
    params['b_sig'] = jax.random.uniform(next(keys), (latent_size,), jnp.float32, -kl, kl)
    return params


def encoder_forward(params, x, num_layers, *, batch_block=None):
    B, T = x.shape
    H = params['gru'][0][0][1].shape[1]
    # Embedding lookup is a data-dependent gather -- kept as plain JAX glue. Time-major
    # (T, B, 128) bf16 so the GRU kernels never transpose / reverse activations in HBM.
    inp = jnp.take(params['embedding'], x.T, axis=0).astype(jnp.bfloat16)
    hT = None
    for layer in range(num_layers):
        last = layer == num_layers - 1
        wih, whh, bx, bhn = pack_layer_params(params['gru'][layer])
        out, hT = bigru_layer(inp, wih, whh, bx, bhn,
                              seq_out=not last, batch_block=batch_block)
        if not last:
            inp = out
    h_fwd, h_bwd = hT[:, :H], hT[:, H:]
    # Faithful to PyTorch's h.view(num_layers, 2, B, -1)[-1].view(B, -1): row-major
    # flatten of the (2, B, H) last-layer block (mixes batch rows for B > 1).
    h_cat = jnp.stack([h_fwd, h_bwd], axis=0).reshape(B, -1)
    # Tiny (B,2H)@(2H,L) latent head left to XLA (a separate pallas_call is pure
    # launch / DMA overhead per the perf review); keeps full f32 precision.
    mu = jnp.dot(h_cat, params['w_mu'].T,
                 precision=lax.Precision.HIGHEST) + params['b_mu']
    sig = jax.nn.softplus(jnp.dot(h_cat, params['w_sig'].T,
                                  precision=lax.Precision.HIGHEST) + params['b_sig'])
    return mu, sig


# --------------------------------------------------------------------------------------
# Pure-JAX reference (for correctness check only)
# --------------------------------------------------------------------------------------
def _gru_direction_ref(x_seq, w_ih, w_hh, b_ih, b_hh):
    B, T, _ = x_seq.shape
    H = w_hh.shape[1]
    hp = jnp.zeros((B, H), jnp.float32)
    outs = []
    for t in range(T):
        gx = jnp.dot(x_seq[:, t, :], w_ih.T, precision=lax.Precision.HIGHEST) + b_ih
        gh = jnp.dot(hp, w_hh.T, precision=lax.Precision.HIGHEST) + b_hh
        r = jax.nn.sigmoid(gx[:, :H] + gh[:, :H])
        z = jax.nn.sigmoid(gx[:, H:2 * H] + gh[:, H:2 * H])
        n = jnp.tanh(gx[:, 2 * H:] + r * gh[:, 2 * H:])
        hp = (1.0 - z) * n + z * hp
        outs.append(hp)
    return jnp.stack(outs, axis=1), hp


def encoder_forward_ref(params, x, num_layers):
    B, _ = x.shape
    inp = jnp.take(params['embedding'], x, axis=0)
    h_fwd = h_bwd = None
    for layer in range(num_layers):
        w_ih_f, w_hh_f, b_ih_f, b_hh_f = params['gru'][layer][0]
        w_ih_b, w_hh_b, b_ih_b, b_hh_b = params['gru'][layer][1]
        out_f, h_fwd = _gru_direction_ref(inp, w_ih_f, w_hh_f, b_ih_f, b_hh_f)
        out_b_rev, h_bwd = _gru_direction_ref(inp[:, ::-1, :], w_ih_b, w_hh_b,
                                              b_ih_b, b_hh_b)
        inp = jnp.concatenate([out_f, out_b_rev[:, ::-1, :]], axis=-1)
    h_cat = jnp.stack([h_fwd, h_bwd], axis=0).reshape(B, -1)
    mu = jnp.dot(h_cat, params['w_mu'].T, precision=lax.Precision.HIGHEST) + params['b_mu']
    sig = jax.nn.softplus(
        jnp.dot(h_cat, params['w_sig'].T, precision=lax.Precision.HIGHEST)
        + params['b_sig'])
    return mu, sig


if __name__ == "__main__":
    # small shapes consistent with the module
    vocab_size, hidden_size, latent_size, seq_size, num_layers = 16, 128, 32, 8, 2
    batch = 2

    key = jax.random.PRNGKey(0)
    pkey, xkey = jax.random.split(key)
    params = init_params(pkey, vocab_size, hidden_size, latent_size, num_layers)
    x = jax.random.randint(xkey, (batch, seq_size), 0, vocab_size, dtype=jnp.int32)

    fwd = jax.jit(lambda p, ids: encoder_forward(p, ids, num_layers))
    mu, sig = fwd(params, x)
    (mu, sig) = jax.block_until_ready((mu, sig))

    mu_ref, sig_ref = encoder_forward_ref(params, x, num_layers)
    assert mu.shape == (batch, latent_size) and sig.shape == (batch, latent_size)
    # kernel uses bf16 MXU operands (f32 accumulate / gate math); reference is f32
    # HIGHEST, so the tolerance is widened accordingly (perf-review correctness note).
    assert jnp.allclose(mu, mu_ref, atol=2e-2, rtol=2e-2), "mu mismatch vs reference"
    assert jnp.allclose(sig, sig_ref, atol=2e-2, rtol=2e-2), "sig mismatch vs reference"
    assert bool(jnp.all(sig > 0)), "softplus output must be positive"
    print("KERNEL_OK")
</pallas_src>

<mosaic_0001>
module attributes {stable_mosaic.version = 11 : i64} {
  func.func @_bigru_kernel_noseq(%arg0: i32, %arg1: memref<8x2x256xbf16, #tpu.memory_space<vmem>>, %arg2: memref<256x768xbf16, #tpu.memory_space<vmem>>, %arg3: memref<256x768xbf16, #tpu.memory_space<vmem>>, %arg4: memref<1x768xf32, #tpu.memory_space<vmem>>, %arg5: memref<1x256xf32, #tpu.memory_space<vmem>>, %arg6: memref<2x256xf32, #tpu.memory_space<vmem>>, %arg7: memref<16x768xf32, #tpu.memory_space<vmem>>) attributes {dimension_semantics = [#tpu.dimension_semantics<parallel>], iteration_bounds = array<i64: 1>, scalar_prefetch = 0 : i64, scratch_operands = 1 : i64, tpu.core_type = #tpu.core_type<tc>, window_params = [{transform_indices = @transform_0, window_bounds = array<i64: 8, 2, 256>}, {pipeline_mode = #tpu.pipeline_mode<synchronous>, transform_indices = @transform_1, window_bounds = array<i64: 256, 768>}, {pipeline_mode = #tpu.pipeline_mode<synchronous>, transform_indices = @transform_2, window_bounds = array<i64: 256, 768>}, {pipeline_mode = #tpu.pipeline_mode<synchronous>, transform_indices = @transform_3, window_bounds = array<i64: 1, 768>}, {pipeline_mode = #tpu.pipeline_mode<synchronous>, transform_indices = @transform_4, window_bounds = array<i64: 1, 256>}, {transform_indices = @transform_5, window_bounds = array<i64: 2, 256>}]} {
    %c0 = arith.constant 0 : index
    %c0_0 = arith.constant 0 : index
    %c0_1 = arith.constant 0 : index
    %0 = vector.load %arg1[%c0, %c0_0, %c0_1] : memref<8x2x256xbf16, #tpu.memory_space<vmem>>, vector<8x2x256xbf16>
    %1 = vector.shape_cast %0 : vector<8x2x256xbf16> to vector<16x256xbf16>
    %c0_2 = arith.constant 0 : index
    %c0_3 = arith.constant 0 : index
    %2 = vector.load %arg2[%c0_2, %c0_3] : memref<256x768xbf16, #tpu.memory_space<vmem>>, vector<256x768xbf16>
    %cst = arith.constant dense<0.000000e+00> : vector<16x768xf32>
    %3 = tpu.matmul %1, %2, %cst {dimension_numbers = #tpu.dot_dimension_numbers<[1], [0], [0], [1], [0, 0, 1, 1], [], []>} : vector<16x256xbf16>, vector<256x768xbf16>, vector<16x768xf32> -> vector<16x768xf32>
    %c0_4 = arith.constant 0 : index
    %c0_5 = arith.constant 0 : index
    %4 = vector.load %arg4[%c0_4, %c0_5] : memref<1x768xf32, #tpu.memory_space<vmem>>, vector<1x768xf32>
    %5 = vector.broadcast %4 : vector<1x768xf32> to vector<16x768xf32>
    %6 = arith.addf %3, %5 : vector<16x768xf32>
    %c0_6 = arith.constant 0 : index
    %c0_7 = arith.constant 0 : index
    %7 = vector.load %arg7[%c0_6, %c0_7] : memref<16x768xf32, #tpu.memory_space<vmem>>, vector<16x768xf32>
    tpu.vector_store %arg7[%c0_6, %c0_7], %6 {strides = array<i32>} : memref<16x768xf32, #tpu.memory_space<vmem>>, vector<16x768xf32>,
    %c0_8 = arith.constant 0 : index
    %c0_9 = arith.constant 0 : index
    %8 = vector.load %arg3[%c0_8, %c0_9] : memref<256x768xbf16, #tpu.memory_space<vmem>>, vector<256x768xbf16>
    %c0_10 = arith.constant 0 : index
    %c0_11 = arith.constant 0 : index
    %9 = vector.load %arg5[%c0_10, %c0_11] : memref<1x256xf32, #tpu.memory_space<vmem>>, vector<1x128xf32>
    %10 = vector.shape_cast %9 : vector<1x128xf32> to vector<1x128xf32>
    %11 = vector.broadcast %10 : vector<1x128xf32> to vector<2x128xf32>
    %c0_12 = arith.constant 0 : index
    %c128 = arith.constant 128 : index
    %12 = vector.load %arg5[%c0_12, %c128] : memref<1x256xf32, #tpu.memory_space<vmem>>, vector<1x128xf32>
    %13 = vector.shape_cast %12 : vector<1x128xf32> to vector<1x128xf32>
    %14 = vector.broadcast %13 : vector<1x128xf32> to vector<2x128xf32>
    %cst_13 = arith.constant 0.000000e+00 : f32
    %15 = vector.broadcast %cst_13 : f32 to vector<2x128xf32>
    %16 = tpu.concatenate %15, %15 in 1 : vector<2x128xf32>, vector<2x128xf32> -> vector<2x256xf32>
    %17 = arith.truncf %16 : vector<2x256xf32> to vector<2x256xbf16>
    %cst_14 = arith.constant dense<0.000000e+00> : vector<2x768xf32>
    %18 = tpu.matmul %17, %8, %cst_14 {dimension_numbers = #tpu.dot_dimension_numbers<[1], [0], [0], [1], [0, 0, 1, 1], [], []>} : vector<2x256xbf16>, vector<256x768xbf16>, vector<2x768xf32> -> vector<2x768xf32>
    %c0_15 = arith.constant 0 : index
    %c0_16 = arith.constant 0 : index
    %19 = vector.load %arg7[%c0_15, %c0_16] : memref<16x768xf32, #tpu.memory_space<vmem>>, vector<2x384xf32>
    %c14 = arith.constant 14 : index
    %c384 = arith.constant 384 : index
    %20 = vector.load %arg7[%c14, %c384] : memref<16x768xf32, #tpu.memory_space<vmem>>, vector<2x384xf32>
    %21 = vector.extract_strided_slice %19 {offsets = [0, 0], sizes = [2, 128], strides = [1, 1]} : vector<2x384xf32> to vector<2x128xf32>
    %22 = vector.extract_strided_slice %18 {offsets = [0, 0], sizes = [2, 128], strides = [1, 1]} : vector<2x768xf32> to vector<2x128xf32>
    %23 = arith.addf %21, %22 : vector<2x128xf32>
    %24 = arith.negf %23 : vector<2x128xf32>
    %25 = math.exp %24 : vector<2x128xf32>
    %cst_17 = arith.constant 1.000000e+00 : f32
    %26 = vector.broadcast %cst_17 : f32 to vector<2x128xf32>
    %27 = arith.addf %26, %25 : vector<2x128xf32>
    %28 = arith.divf %26, %27 : vector<2x128xf32>
    %29 = vector.extract_strided_slice %19 {offsets = [0, 128], sizes = [2, 128], strides = [1, 1]} : vector<2x384xf32> to vector<2x128xf32>
    %30 = vector.extract_strided_slice %18 {offsets = [0, 128], sizes = [2, 128], strides = [1, 1]} : vector<2x768xf32> to vector<2x128xf32>
    %31 = arith.addf %29, %30 : vector<2x128xf32>
    %32 = arith.negf %31 : vector<2x128xf32>
    %33 = math.exp %32 : vector<2x128xf32>
    %cst_18 = arith.constant 1.000000e+00 : f32
    %34 = vector.broadcast %cst_18 : f32 to vector<2x128xf32>
    %35 = arith.addf %34, %33 : vector<2x128xf32>
    %36 = arith.divf %34, %35 : vector<2x128xf32>
    %37 = vector.extract_strided_slice %19 {offsets = [0, 256], sizes = [2, 128], strides = [1, 1]} : vector<2x384xf32> to vector<2x128xf32>
    %38 = vector.extract_strided_slice %18 {offsets = [0, 256], sizes = [2, 128], strides = [1, 1]} : vector<2x768xf32> to vector<2x128xf32>
    %39 = arith.addf %38, %11 : vector<2x128xf32>
    %40 = arith.mulf %28, %39 : vector<2x128xf32>
    %41 = arith.addf %37, %40 : vector<2x128xf32>
    %42 = math.tanh %41 : vector<2x128xf32>
    %cst_19 = arith.constant 1.000000e+00 : f32
    %43 = vector.broadcast %cst_19 : f32 to vector<2x128xf32>
    %44 = arith.subf %43, %36 : vector<2x128xf32>
    %45 = arith.mulf %44, %42 : vector<2x128xf32>
    %46 = arith.mulf %36, %15 : vector<2x128xf32>
    %47 = arith.addf %45, %46 : vector<2x128xf32>
    %48 = vector.extract_strided_slice %20 {offsets = [0, 0], sizes = [2, 128], strides = [1, 1]} : vector<2x384xf32> to vector<2x128xf32>
    %49 = vector.extract_strided_slice %18 {offsets = [0, 384], sizes = [2, 128], strides = [1, 1]} : vector<2x768xf32> to vector<2x128xf32>
    %50 = arith.addf %48, %49 : vector<2x128xf32>
    %51 = arith.negf %50 : vector<2x128xf32>
    %52 = math.exp %51 : vector<2x128xf32>
    %cst_20 = arith.constant 1.000000e+00 : f32
    %53 = vector.broadcast %cst_20 : f32 to vector<2x128xf32>
    %54 = arith.addf %53, %52 : vector<2x128xf32>
    %55 = arith.divf %53, %54 : vector<2x128xf32>
    %56 = vector.extract_strided_slice %20 {offsets = [0, 128], sizes = [2, 128], strides = [1, 1]} : vector<2x384xf32> to vector<2x128xf32>
    %57 = vector.extract_strided_slice %18 {offsets = [0, 512], sizes = [2, 128], strides = [1, 1]} : vector<2x768xf32> to vector<2x128xf32>
    %58 = arith.addf %56, %57 : vector<2x128xf32>
    %59 = arith.negf %58 : vector<2x128xf32>
    %60 = math.exp %59 : vector<2x128xf32>
    %cst_21 = arith.constant 1.000000e+00 : f32
    %61 = vector.broadcast %cst_21 : f32 to vector<2x128xf32>
    %62 = arith.addf %61, %60 : vector<2x128xf32>
    %63 = arith.divf %61, %62 : vector<2x128xf32>
    %64 = vector.extract_strided_slice %20 {offsets = [0, 256], sizes = [2, 128], strides = [1, 1]} : vector<2x384xf32> to vector<2x128xf32>
    %65 = vector.extract_strided_slice %18 {offsets = [0, 640], sizes = [2, 128], strides = [1, 1]} : vector<2x768xf32> to vector<2x128xf32>
    %66 = arith.addf %65, %14 : vector<2x128xf32>
    %67 = arith.mulf %55, %66 : vector<2x128xf32>
    %68 = arith.addf %64, %67 : vector<2x128xf32>
    %69 = math.tanh %68 : vector<2x128xf32>
    %cst_22 = arith.constant 1.000000e+00 : f32
    %70 = vector.broadcast %cst_22 : f32 to vector<2x128xf32>
    %71 = arith.subf %70, %63 : vector<2x128xf32>
    %72 = arith.mulf %71, %69 : vector<2x128xf32>
    %73 = arith.mulf %63, %15 : vector<2x128xf32>
    %74 = arith.addf %72, %73 : vector<2x128xf32>
    %75 = tpu.concatenate %47, %74 in 1 : vector<2x128xf32>, vector<2x128xf32> -> vector<2x256xf32>
    %76 = arith.truncf %75 : vector<2x256xf32> to vector<2x256xbf16>
    %cst_23 = arith.constant dense<0.000000e+00> : vector<2x768xf32>
    %77 = tpu.matmul %76, %8, %cst_23 {dimension_numbers = #tpu.dot_dimension_numbers<[1], [0], [0], [1], [0, 0, 1, 1], [], []>} : vector<2x256xbf16>, vector<256x768xbf16>, vector<2x768xf32> -> vector<2x768xf32>
    %c2 = arith.constant 2 : index
    %c0_24 = arith.constant 0 : index
    %78 = vector.load %arg7[%c2, %c0_24] : memref<16x768xf32, #tpu.memory_space<vmem>>, vector<2x384xf32>
    %c12 = arith.constant 12 : index
    %c384_25 = arith.constant 384 : index
    %79 = vector.load %arg7[%c12, %c384_25] : memref<16x768xf32, #tpu.memory_space<vmem>>, vector<2x384xf32>
    %80 = vector.extract_strided_slice %78 {offsets = [0, 0], sizes = [2, 128], strides = [1, 1]} : vector<2x384xf32> to vector<2x128xf32>
    %81 = vector.extract_strided_slice %77 {offsets = [0, 0], sizes = [2, 128], strides = [1, 1]} : vector<2x768xf32> to vector<2x128xf32>
    %82 = arith.addf %80, %81 : vector<2x128xf32>
    %83 = arith.negf %82 : vector<2x128xf32>
    %84 = math.exp %83 : vector<2x128xf32>
    %cst_26 = arith.constant 1.000000e+00 : f32
    %85 = vector.broadcast %cst_26 : f32 to vector<2x128xf32>
    %86 = arith.addf %85, %84 : vector<2x128xf32>
    %87 = arith.divf %85, %86 : vector<2x128xf32>
    %88 = vector.extract_strided_slice %78 {offsets = [0, 128], sizes = [2, 128], strides = [1, 1]} : vector<2x384xf32> to vector<2x128xf32>
    %89 = vector.extract_strided_slice %77 {offsets = [0, 128], sizes = [2, 128], strides = [1, 1]} : vector<2x768xf32> to vector<2x128xf32>
    %90 = arith.addf %88, %89 : vector<2x128xf32>
    %91 = arith.negf %90 : vector<2x128xf32>
    %92 = math.exp %91 : vector<2x128xf32>
    %cst_27 = arith.constant 1.000000e+00 : f32
    %93 = vector.broadcast %cst_27 : f32 to vector<2x128xf32>
    %94 = arith.addf %93, %92 : vector<2x128xf32>
    %95 = arith.divf %93, %94 : vector<2x128xf32>
    %96 = vector.extract_strided_slice %78 {offsets = [0, 256], sizes = [2, 128], strides = [1, 1]} : vector<2x384xf32> to vector<2x128xf32>
    %97 = vector.extract_strided_slice %77 {offsets = [0, 256], sizes = [2, 128], strides = [1, 1]} : vector<2x768xf32> to vector<2x128xf32>
    %98 = arith.addf %97, %11 : vector<2x128xf32>
    %99 = arith.mulf %87, %98 : vector<2x128xf32>
    %100 = arith.addf %96, %99 : vector<2x128xf32>
    %101 = math.tanh %100 : vector<2x128xf32>
    %cst_28 = arith.constant 1.000000e+00 : f32
    %102 = vector.broadcast %cst_28 : f32 to vector<2x128xf32>
    %103 = arith.subf %102, %95 : vector<2x128xf32>
    %104 = arith.mulf %103, %101 : vector<2x128xf32>
    %105 = arith.mulf %95, %47 : vector<2x128xf32>
    %106 = arith.addf %104, %105 : vector<2x128xf32>
    %107 = vector.extract_strided_slice %79 {offsets = [0, 0], sizes = [2, 128], strides = [1, 1]} : vector<2x384xf32> to vector<2x128xf32>
    %108 = vector.extract_strided_slice %77 {offsets = [0, 384], sizes = [2, 128], strides = [1, 1]} : vector<2x768xf32> to vector<2x128xf32>
    %109 = arith.addf %107, %108 : vector<2x128xf32>
    %110 = arith.negf %109 : vector<2x128xf32>
    %111 = math.exp %110 : vector<2x128xf32>
    %cst_29 = arith.constant 1.000000e+00 : f32
    %112 = vector.broadcast %cst_29 : f32 to vector<2x128xf32>
    %113 = arith.addf %112, %111 : vector<2x128xf32>
    %114 = arith.divf %112, %113 : vector<2x128xf32>
    %115 = vector.extract_strided_slice %79 {offsets = [0, 128], sizes = [2, 128], strides = [1, 1]} : vector<2x384xf32> to vector<2x128xf32>
    %116 = vector.extract_strided_slice %77 {offsets = [0, 512], sizes = [2, 128], strides = [1, 1]} : vector<2x768xf32> to vector<2x128xf32>
    %117 = arith.addf %115, %116 : vector<2x128xf32>
    %118 = arith.negf %117 : vector<2x128xf32>
    %119 = math.exp %118 : vector<2x128xf32>
    %cst_30 = arith.constant 1.000000e+00 : f32
    %120 = vector.broadcast %cst_30 : f32 to vector<2x128xf32>
    %121 = arith.addf %120, %119 : vector<2x128xf32>
    %122 = arith.divf %120, %121 : vector<2x128xf32>
    %123 = vector.extract_strided_slice %79 {offsets = [0, 256], sizes = [2, 128], strides = [1, 1]} : vector<2x384xf32> to vector<2x128xf32>
    %124 = vector.extract_strided_slice %77 {offsets = [0, 640], sizes = [2, 128], strides = [1, 1]} : vector<2x768xf32> to vector<2x128xf32>
    %125 = arith.addf %124, %14 : vector<2x128xf32>
    %126 = arith.mulf %114, %125 : vector<2x128xf32>
    %127 = arith.addf %123, %126 : vector<2x128xf32>
    %128 = math.tanh %127 : vector<2x128xf32>
    %cst_31 = arith.constant 1.000000e+00 : f32
    %129 = vector.broadcast %cst_31 : f32 to vector<2x128xf32>
    %130 = arith.subf %129, %122 : vector<2x128xf32>
    %131 = arith.mulf %130, %128 : vector<2x128xf32>
    %132 = arith.mulf %122, %74 : vector<2x128xf32>
    %133 = arith.addf %131, %132 : vector<2x128xf32>
    %134 = tpu.concatenate %106, %133 in 1 : vector<2x128xf32>, vector<2x128xf32> -> vector<2x256xf32>
    %135 = arith.truncf %134 : vector<2x256xf32> to vector<2x256xbf16>
    %cst_32 = arith.constant dense<0.000000e+00> : vector<2x768xf32>
    %136 = tpu.matmul %135, %8, %cst_32 {dimension_numbers = #tpu.dot_dimension_numbers<[1], [0], [0], [1], [0, 0, 1, 1], [], []>} : vector<2x256xbf16>, vector<256x768xbf16>, vector<2x768xf32> -> vector<2x768xf32>
    %c4 = arith.constant 4 : index
    %c0_33 = arith.constant 0 : index
    %137 = vector.load %arg7[%c4, %c0_33] : memref<16x768xf32, #tpu.memory_space<vmem>>, vector<2x384xf32>
    %c10 = arith.constant 10 : index
    %c384_34 = arith.constant 384 : index
    %138 = vector.load %arg7[%c10, %c384_34] : memref<16x768xf32, #tpu.memory_space<vmem>>, vector<2x384xf32>
    %139 = vector.extract_strided_slice %137 {offsets = [0, 0], sizes = [2, 128], strides = [1, 1]} : vector<2x384xf32> to vector<2x128xf32>
    %140 = vector.extract_strided_slice %136 {offsets = [0, 0], sizes = [2, 128], strides = [1, 1]} : vector<2x768xf32> to vector<2x128xf32>
    %141 = arith.addf %139, %140 : vector<2x128xf32>
    %142 = arith.negf %141 : vector<2x128xf32>
    %143 = math.exp %142 : vector<2x128xf32>
    %cst_35 = arith.constant 1.000000e+00 : f32
    %144 = vector.broadcast %cst_35 : f32 to vector<2x128xf32>
    %145 = arith.addf %144, %143 : vector<2x128xf32>
    %146 = arith.divf %144, %145 : vector<2x128xf32>
    %147 = vector.extract_strided_slice %137 {offsets = [0, 128], sizes = [2, 128], strides = [1, 1]} : vector<2x384xf32> to vector<2x128xf32>
    %148 = vector.extract_strided_slice %136 {offsets = [0, 128], sizes = [2, 128], strides = [1, 1]} : vector<2x768xf32> to vector<2x128xf32>
    %149 = arith.addf %147, %148 : vector<2x128xf32>
    %150 = arith.negf %149 : vector<2x128xf32>
    %151 = math.exp %150 : vector<2x128xf32>
    %cst_36 = arith.constant 1.000000e+00 : f32
    %152 = vector.broadcast %cst_36 : f32 to vector<2x128xf32>
    %153 = arith.addf %152, %151 : vector<2x128xf32>
    %154 = arith.divf %152, %153 : vector<2x128xf32>
    %155 = vector.extract_strided_slice %137 {offsets = [0, 256], sizes = [2, 128], strides = [1, 1]} : vector<2x384xf32> to vector<2x128xf32>
    %156 = vector.extract_strided_slice %136 {offsets = [0, 256], sizes = [2, 128], strides = [1, 1]} : vector<2x768xf32> to vector<2x128xf32>
    %157 = arith.addf %156, %11 : vector<2x128xf32>
    %158 = arith.mulf %146, %157 : vector<2x128xf32>
    %159 = arith.addf %155, %158 : vector<2x128xf32>
    %160 = math.tanh %159 : vector<2x128xf32>
    %cst_37 = arith.constant 1.000000e+00 : f32
    %161 = vector.broadcast %cst_37 : f32 to vector<2x128xf32>
    %162 = arith.subf %161, %154 : vector<2x128xf32>
    %163 = arith.mulf %162, %160 : vector<2x128xf32>
    %164 = arith.mulf %154, %106 : vector<2x128xf32>
    %165 = arith.addf %163, %164 : vector<2x128xf32>
    %166 = vector.extract_strided_slice %138 {offsets = [0, 0], sizes = [2, 128], strides = [1, 1]} : vector<2x384xf32> to vector<2x128xf32>
    %167 = vector.extract_strided_slice %136 {offsets = [0, 384], sizes = [2, 128], strides = [1, 1]} : vector<2x768xf32> to vector<2x128xf32>
    %168 = arith.addf %166, %167 : vector<2x128xf32>
    %169 = arith.negf %168 : vector<2x128xf32>
    %170 = math.exp %169 : vector<2x128xf32>
    %cst_38 = arith.constant 1.000000e+00 : f32
    %171 = vector.broadcast %cst_38 : f32 to vector<2x128xf32>
    %172 = arith.addf %171, %170 : vector<2x128xf32>
    %173 = arith.divf %171, %172 : vector<2x128xf32>
    %174 = vector.extract_strided_slice %138 {offsets = [0, 128], sizes = [2, 128], strides = [1, 1]} : vector<2x384xf32> to vector<2x128xf32>
    %175 = vector.extract_strided_slice %136 {offsets = [0, 512], sizes = [2, 128], strides = [1, 1]} : vector<2x768xf32> to vector<2x128xf32>
    %176 = arith.addf %174, %175 : vector<2x128xf32>
    %177 = arith.negf %176 : vector<2x128xf32>
    %178 = math.exp %177 : vector<2x128xf32>
    %cst_39 = arith.constant 1.000000e+00 : f32
    %179 = vector.broadcast %cst_39 : f32 to vector<2x128xf32>
    %180 = arith.addf %179, %178 : vector<2x128xf32>
    %181 = arith.divf %179, %180 : vector<2x128xf32>
    %182 = vector.extract_strided_slice %138 {offsets = [0, 256], sizes = [2, 128], strides = [1, 1]} : vector<2x384xf32> to vector<2x128xf32>
    %183 = vector.extract_strided_slice %136 {offsets = [0, 640], sizes = [2, 128], strides = [1, 1]} : vector<2x768xf32> to vector<2x128xf32>
    %184 = arith.addf %183, %14 : vector<2x128xf32>
    %185 = arith.mulf %173, %184 : vector<2x128xf32>
    %186 = arith.addf %182, %185 : vector<2x128xf32>
    %187 = math.tanh %186 : vector<2x128xf32>
    %cst_40 = arith.constant 1.000000e+00 : f32
    %188 = vector.broadcast %cst_40 : f32 to vector<2x128xf32>
    %189 = arith.subf %188, %181 : vector<2x128xf32>
    %190 = arith.mulf %189, %187 : vector<2x128xf32>
    %191 = arith.mulf %181, %133 : vector<2x128xf32>
    %192 = arith.addf %190, %191 : vector<2x128xf32>
    %193 = tpu.concatenate %165, %192 in 1 : vector<2x128xf32>, vector<2x128xf32> -> vector<2x256xf32>
    %194 = arith.truncf %193 : vector<2x256xf32> to vector<2x256xbf16>
    %cst_41 = arith.constant dense<0.000000e+00> : vector<2x768xf32>
    %195 = tpu.matmul %194, %8, %cst_41 {dimension_numbers = #tpu.dot_dimension_numbers<[1], [0], [0], [1], [0, 0, 1, 1], [], []>} : vector<2x256xbf16>, vector<256x768xbf16>, vector<2x768xf32> -> vector<2x768xf32>
    %c6 = arith.constant 6 : index
    %c0_42 = arith.constant 0 : index
    %196 = vector.load %arg7[%c6, %c0_42] : memref<16x768xf32, #tpu.memory_space<vmem>>, vector<2x384xf32>
    %c8 = arith.constant 8 : index
    %c384_43 = arith.constant 384 : index
    %197 = vector.load %arg7[%c8, %c384_43] : memref<16x768xf32, #tpu.memory_space<vmem>>, vector<2x384xf32>
    %198 = vector.extract_strided_slice %196 {offsets = [0, 0], sizes = [2, 128], strides = [1, 1]} : vector<2x384xf32> to vector<2x128xf32>
    %199 = vector.extract_strided_slice %195 {offsets = [0, 0], sizes = [2, 128], strides = [1, 1]} : vector<2x768xf32> to vector<2x128xf32>
    %200 = arith.addf %198, %199 : vector<2x128xf32>
    %201 = arith.negf %200 : vector<2x128xf32>
    %202 = math.exp %201 : vector<2x128xf32>
    %cst_44 = arith.constant 1.000000e+00 : f32
    %203 = vector.broadcast %cst_44 : f32 to vector<2x128xf32>
    %204 = arith.addf %203, %202 : vector<2x128xf32>
    %205 = arith.divf %203, %204 : vector<2x128xf32>
    %206 = vector.extract_strided_slice %196 {offsets = [0, 128], sizes = [2, 128], strides = [1, 1]} : vector<2x384xf32> to vector<2x128xf32>
    %207 = vector.extract_strided_slice %195 {offsets = [0, 128], sizes = [2, 128], strides = [1, 1]} : vector<2x768xf32> to vector<2x128xf32>
    %208 = arith.addf %206, %207 : vector<2x128xf32>
    %209 = arith.negf %208 : vector<2x128xf32>
    %210 = math.exp %209 : vector<2x128xf32>
    %cst_45 = arith.constant 1.000000e+00 : f32
    %211 = vector.broadcast %cst_45 : f32 to vector<2x128xf32>
    %212 = arith.addf %211, %210 : vector<2x128xf32>
    %213 = arith.divf %211, %212 : vector<2x128xf32>
    %214 = vector.extract_strided_slice %196 {offsets = [0, 256], sizes = [2, 128], strides = [1, 1]} : vector<2x384xf32> to vector<2x128xf32>
    %215 = vector.extract_strided_slice %195 {offsets = [0, 256], sizes = [2, 128], strides = [1, 1]} : vector<2x768xf32> to vector<2x128xf32>
    %216 = arith.addf %215, %11 : vector<2x128xf32>
    %217 = arith.mulf %205, %216 : vector<2x128xf32>
    %218 = arith.addf %214, %217 : vector<2x128xf32>
    %219 = math.tanh %218 : vector<2x128xf32>
    %cst_46 = arith.constant 1.000000e+00 : f32
    %220 = vector.broadcast %cst_46 : f32 to vector<2x128xf32>
    %221 = arith.subf %220, %213 : vector<2x128xf32>
    %222 = arith.mulf %221, %219 : vector<2x128xf32>
    %223 = arith.mulf %213, %165 : vector<2x128xf32>
    %224 = arith.addf %222, %223 : vector<2x128xf32>
    %225 = vector.extract_strided_slice %197 {offsets = [0, 0], sizes = [2, 128], strides = [1, 1]} : vector<2x384xf32> to vector<2x128xf32>
    %226 = vector.extract_strided_slice %195 {offsets = [0, 384], sizes = [2, 128], strides = [1, 1]} : vector<2x768xf32> to vector<2x128xf32>
    %227 = arith.addf %225, %226 : vector<2x128xf32>
    %228 = arith.negf %227 : vector<2x128xf32>
    %229 = math.exp %228 : vector<2x128xf32>
    %cst_47 = arith.constant 1.000000e+00 : f32
    %230 = vector.broadcast %cst_47 : f32 to vector<2x128xf32>
    %231 = arith.addf %230, %229 : vector<2x128xf32>
    %232 = arith.divf %230, %231 : vector<2x128xf32>
    %233 = vector.extract_strided_slice %197 {offsets = [0, 128], sizes = [2, 128], strides = [1, 1]} : vector<2x384xf32> to vector<2x128xf32>
    %234 = vector.extract_strided_slice %195 {offsets = [0, 512], sizes = [2, 128], strides = [1, 1]} : vector<2x768xf32> to vector<2x128xf32>
    %235 = arith.addf %233, %234 : vector<2x128xf32>
    %236 = arith.negf %235 : vector<2x128xf32>
    %237 = math.exp %236 : vector<2x128xf32>
    %cst_48 = arith.constant 1.000000e+00 : f32
    %238 = vector.broadcast %cst_48 : f32 to vector<2x128xf32>
    %239 = arith.addf %238, %237 : vector<2x128xf32>
    %240 = arith.divf %238, %239 : vector<2x128xf32>
    %241 = vector.extract_strided_slice %197 {offsets = [0, 256], sizes = [2, 128], strides = [1, 1]} : vector<2x384xf32> to vector<2x128xf32>
    %242 = vector.extract_strided_slice %195 {offsets = [0, 640], sizes = [2, 128], strides = [1, 1]} : vector<2x768xf32> to vector<2x128xf32>
    %243 = arith.addf %242, %14 : vector<2x128xf32>
    %244 = arith.mulf %232, %243 : vector<2x128xf32>
    %245 = arith.addf %241, %244 : vector<2x128xf32>
    %246 = math.tanh %245 : vector<2x128xf32>
    %cst_49 = arith.constant 1.000000e+00 : f32
    %247 = vector.broadcast %cst_49 : f32 to vector<2x128xf32>
    %248 = arith.subf %247, %240 : vector<2x128xf32>
    %249 = arith.mulf %248, %246 : vector<2x128xf32>
    %250 = arith.mulf %240, %192 : vector<2x128xf32>
    %251 = arith.addf %249, %250 : vector<2x128xf32>
    %252 = tpu.concatenate %224, %251 in 1 : vector<2x128xf32>, vector<2x128xf32> -> vector<2x256xf32>
    %253 = arith.truncf %252 : vector<2x256xf32> to vector<2x256xbf16>
    %cst_50 = arith.constant dense<0.000000e+00> : vector<2x768xf32>
    %254 = tpu.matmul %253, %8, %cst_50 {dimension_numbers = #tpu.dot_dimension_numbers<[1], [0], [0], [1], [0, 0, 1, 1], [], []>} : vector<2x256xbf16>, vector<256x768xbf16>, vector<2x768xf32> -> vector<2x768xf32>
    %c8_51 = arith.constant 8 : index
    %c0_52 = arith.constant 0 : index
    %255 = vector.load %arg7[%c8_51, %c0_52] : memref<16x768xf32, #tpu.memory_space<vmem>>, vector<2x384xf32>
    %c6_53 = arith.constant 6 : index
    %c384_54 = arith.constant 384 : index
    %256 = vector.load %arg7[%c6_53, %c384_54] : memref<16x768xf32, #tpu.memory_space<vmem>>, vector<2x384xf32>
    %257 = vector.extract_strided_slice %255 {offsets = [0, 0], sizes = [2, 128], strides = [1, 1]} : vector<2x384xf32> to vector<2x128xf32>
    %258 = vector.extract_strided_slice %254 {offsets = [0, 0], sizes = [2, 128], strides = [1, 1]} : vector<2x768xf32> to vector<2x128xf32>
    %259 = arith.addf %257, %258 : vector<2x128xf32>
    %260 = arith.negf %259 : vector<2x128xf32>
    %261 = math.exp %260 : vector<2x128xf32>
    %cst_55 = arith.constant 1.000000e+00 : f32
    %262 = vector.broadcast %cst_55 : f32 to vector<2x128xf32>
    %263 = arith.addf %262, %261 : vector<2x128xf32>
    %264 = arith.divf %262, %263 : vector<2x128xf32>
    %265 = vector.extract_strided_slice %255 {offsets = [0, 128], sizes = [2, 128], strides = [1, 1]} : vector<2x384xf32> to vector<2x128xf32>
    %266 = vector.extract_strided_slice %254 {offsets = [0, 128], sizes = [2, 128], strides = [1, 1]} : vector<2x768xf32> to vector<2x128xf32>
    %267 = arith.addf %265, %266 : vector<2x128xf32>
    %268 = arith.negf %267 : vector<2x128xf32>
    %269 = math.exp %268 : vector<2x128xf32>
    %cst_56 = arith.constant 1.000000e+00 : f32
    %270 = vector.broadcast %cst_56 : f32 to vector<2x128xf32>
    %271 = arith.addf %270, %269 : vector<2x128xf32>
    %272 = arith.divf %270, %271 : vector<2x128xf32>
    %273 = vector.extract_strided_slice %255 {offsets = [0, 256], sizes = [2, 128], strides = [1, 1]} : vector<2x384xf32> to vector<2x128xf32>
    %274 = vector.extract_strided_slice %254 {offsets = [0, 256], sizes = [2, 128], strides = [1, 1]} : vector<2x768xf32> to vector<2x128xf32>
    %275 = arith.addf %274, %11 : vector<2x128xf32>
    %276 = arith.mulf %264, %275 : vector<2x128xf32>
    %277 = arith.addf %273, %276 : vector<2x128xf32>
    %278 = math.tanh %277 : vector<2x128xf32>
    %cst_57 = arith.constant 1.000000e+00 : f32
    %279 = vector.broadcast %cst_57 : f32 to vector<2x128xf32>
    %280 = arith.subf %279, %272 : vector<2x128xf32>
    %281 = arith.mulf %280, %278 : vector<2x128xf32>
    %282 = arith.mulf %272, %224 : vector<2x128xf32>
    %283 = arith.addf %281, %282 : vector<2x128xf32>
    %284 = vector.extract_strided_slice %256 {offsets = [0, 0], sizes = [2, 128], strides = [1, 1]} : vector<2x384xf32> to vector<2x128xf32>
    %285 = vector.extract_strided_slice %254 {offsets = [0, 384], sizes = [2, 128], strides = [1, 1]} : vector<2x768xf32> to vector<2x128xf32>
    %286 = arith.addf %284, %285 : vector<2x128xf32>
    %287 = arith.negf %286 : vector<2x128xf32>
    %288 = math.exp %287 : vector<2x128xf32>
    %cst_58 = arith.constant 1.000000e+00 : f32
    %289 = vector.broadcast %cst_58 : f32 to vector<2x128xf32>
    %290 = arith.addf %289, %288 : vector<2x128xf32>
    %291 = arith.divf %289, %290 : vector<2x128xf32>
    %292 = vector.extract_strided_slice %256 {offsets = [0, 128], sizes = [2, 128], strides = [1, 1]} : vector<2x384xf32> to vector<2x128xf32>
    %293 = vector.extract_strided_slice %254 {offsets = [0, 512], sizes = [2, 128], strides = [1, 1]} : vector<2x768xf32> to vector<2x128xf32>
    %294 = arith.addf %292, %293 : vector<2x128xf32>
    %295 = arith.negf %294 : vector<2x128xf32>
    %296 = math.exp %295 : vector<2x128xf32>
    %cst_59 = arith.constant 1.000000e+00 : f32
    %297 = vector.broadcast %cst_59 : f32 to vector<2x128xf32>
    %298 = arith.addf %297, %296 : vector<2x128xf32>
    %299 = arith.divf %297, %298 : vector<2x128xf32>
    %300 = vector.extract_strided_slice %256 {offsets = [0, 256], sizes = [2, 128], strides = [1, 1]} : vector<2x384xf32> to vector<2x128xf32>
    %301 = vector.extract_strided_slice %254 {offsets = [0, 640], sizes = [2, 128], strides = [1, 1]} : vector<2x768xf32> to vector<2x128xf32>
    %302 = arith.addf %301, %14 : vector<2x128xf32>
    %303 = arith.mulf %291, %302 : vector<2x128xf32>
    %304 = arith.addf %300, %303 : vector<2x128xf32>
    %305 = math.tanh %304 : vector<2x128xf32>
    %cst_60 = arith.constant 1.000000e+00 : f32
    %306 = vector.broadcast %cst_60 : f32 to vector<2x128xf32>
    %307 = arith.subf %306, %299 : vector<2x128xf32>
    %308 = arith.mulf %307, %305 : vector<2x128xf32>
    %309 = arith.mulf %299, %251 : vector<2x128xf32>
    %310 = arith.addf %308, %309 : vector<2x128xf32>
    %311 = tpu.concatenate %283, %310 in 1 : vector<2x128xf32>, vector<2x128xf32> -> vector<2x256xf32>
    %312 = arith.truncf %311 : vector<2x256xf32> to vector<2x256xbf16>
    %cst_61 = arith.constant dense<0.000000e+00> : vector<2x768xf32>
    %313 = tpu.matmul %312, %8, %cst_61 {dimension_numbers = #tpu.dot_dimension_numbers<[1], [0], [0], [1], [0, 0, 1, 1], [], []>} : vector<2x256xbf16>, vector<256x768xbf16>, vector<2x768xf32> -> vector<2x768xf32>
    %c10_62 = arith.constant 10 : index
    %c0_63 = arith.constant 0 : index
    %314 = vector.load %arg7[%c10_62, %c0_63] : memref<16x768xf32, #tpu.memory_space<vmem>>, vector<2x384xf32>
    %c4_64 = arith.constant 4 : index
    %c384_65 = arith.constant 384 : index
    %315 = vector.load %arg7[%c4_64, %c384_65] : memref<16x768xf32, #tpu.memory_space<vmem>>, vector<2x384xf32>
    %316 = vector.extract_strided_slice %314 {offsets = [0, 0], sizes = [2, 128], strides = [1, 1]} : vector<2x384xf32> to vector<2x128xf32>
    %317 = vector.extract_strided_slice %313 {offsets = [0, 0], sizes = [2, 128], strides = [1, 1]} : vector<2x768xf32> to vector<2x128xf32>
    %318 = arith.addf %316, %317 : vector<2x128xf32>
    %319 = arith.negf %318 : vector<2x128xf32>
    %320 = math.exp %319 : vector<2x128xf32>
    %cst_66 = arith.constant 1.000000e+00 : f32
    %321 = vector.broadcast %cst_66 : f32 to vector<2x128xf32>
    %322 = arith.addf %321, %320 : vector<2x128xf32>
    %323 = arith.divf %321, %322 : vector<2x128xf32>
    %324 = vector.extract_strided_slice %314 {offsets = [0, 128], sizes = [2, 128], strides = [1, 1]} : vector<2x384xf32> to vector<2x128xf32>
    %325 = vector.extract_strided_slice %313 {offsets = [0, 128], sizes = [2, 128], strides = [1, 1]} : vector<2x768xf32> to vector<2x128xf32>
    %326 = arith.addf %324, %325 : vector<2x128xf32>
    %327 = arith.negf %326 : vector<2x128xf32>
    %328 = math.exp %327 : vector<2x128xf32>
    %cst_67 = arith.constant 1.000000e+00 : f32
    %329 = vector.broadcast %cst_67 : f32 to vector<2x128xf32>
    %330 = arith.addf %329, %328 : vector<2x128xf32>
    %331 = arith.divf %329, %330 : vector<2x128xf32>
    %332 = vector.extract_strided_slice %314 {offsets = [0, 256], sizes = [2, 128], strides = [1, 1]} : vector<2x384xf32> to vector<2x128xf32>
    %333 = vector.extract_strided_slice %313 {offsets = [0, 256], sizes = [2, 128], strides = [1, 1]} : vector<2x768xf32> to vector<2x128xf32>
    %334 = arith.addf %333, %11 : vector<2x128xf32>
    %335 = arith.mulf %323, %334 : vector<2x128xf32>
    %336 = arith.addf %332, %335 : vector<2x128xf32>
    %337 = math.tanh %336 : vector<2x128xf32>
    %cst_68 = arith.constant 1.000000e+00 : f32
    %338 = vector.broadcast %cst_68 : f32 to vector<2x128xf32>
    %339 = arith.subf %338, %331 : vector<2x128xf32>
    %340 = arith.mulf %339, %337 : vector<2x128xf32>
    %341 = arith.mulf %331, %283 : vector<2x128xf32>
    %342 = arith.addf %340, %341 : vector<2x128xf32>
    %343 = vector.extract_strided_slice %315 {offsets = [0, 0], sizes = [2, 128], strides = [1, 1]} : vector<2x384xf32> to vector<2x128xf32>
    %344 = vector.extract_strided_slice %313 {offsets = [0, 384], sizes = [2, 128], strides = [1, 1]} : vector<2x768xf32> to vector<2x128xf32>
    %345 = arith.addf %343, %344 : vector<2x128xf32>
    %346 = arith.negf %345 : vector<2x128xf32>
    %347 = math.exp %346 : vector<2x128xf32>
    %cst_69 = arith.constant 1.000000e+00 : f32
    %348 = vector.broadcast %cst_69 : f32 to vector<2x128xf32>
    %349 = arith.addf %348, %347 : vector<2x128xf32>
    %350 = arith.divf %348, %349 : vector<2x128xf32>
    %351 = vector.extract_strided_slice %315 {offsets = [0, 128], sizes = [2, 128], strides = [1, 1]} : vector<2x384xf32> to vector<2x128xf32>
    %352 = vector.extract_strided_slice %313 {offsets = [0, 512], sizes = [2, 128], strides = [1, 1]} : vector<2x768xf32> to vector<2x128xf32>
    %353 = arith.addf %351, %352 : vector<2x128xf32>
    %354 = arith.negf %353 : vector<2x128xf32>
    %355 = math.exp %354 : vector<2x128xf32>
    %cst_70 = arith.constant 1.000000e+00 : f32
    %356 = vector.broadcast %cst_70 : f32 to vector<2x128xf32>
    %357 = arith.addf %356, %355 : vector<2x128xf32>
    %358 = arith.divf %356, %357 : vector<2x128xf32>
    %359 = vector.extract_strided_slice %315 {offsets = [0, 256], sizes = [2, 128], strides = [1, 1]} : vector<2x384xf32> to vector<2x128xf32>
    %360 = vector.extract_strided_slice %313 {offsets = [0, 640], sizes = [2, 128], strides = [1, 1]} : vector<2x768xf32> to vector<2x128xf32>
    %361 = arith.addf %360, %14 : vector<2x128xf32>
    %362 = arith.mulf %350, %361 : vector<2x128xf32>
    %363 = arith.addf %359, %362 : vector<2x128xf32>
    %364 = math.tanh %363 : vector<2x128xf32>
    %cst_71 = arith.constant 1.000000e+00 : f32
    %365 = vector.broadcast %cst_71 : f32 to vector<2x128xf32>
    %366 = arith.subf %365, %358 : vector<2x128xf32>
    %367 = arith.mulf %366, %364 : vector<2x128xf32>
    %368 = arith.mulf %358, %310 : vector<2x128xf32>
    %369 = arith.addf %367, %368 : vector<2x128xf32>
    %370 = tpu.concatenate %342, %369 in 1 : vector<2x128xf32>, vector<2x128xf32> -> vector<2x256xf32>
    %371 = arith.truncf %370 : vector<2x256xf32> to vector<2x256xbf16>
    %cst_72 = arith.constant dense<0.000000e+00> : vector<2x768xf32>
    %372 = tpu.matmul %371, %8, %cst_72 {dimension_numbers = #tpu.dot_dimension_numbers<[1], [0], [0], [1], [0, 0, 1, 1], [], []>} : vector<2x256xbf16>, vector<256x768xbf16>, vector<2x768xf32> -> vector<2x768xf32>
    %c12_73 = arith.constant 12 : index
    %c0_74 = arith.constant 0 : index
    %373 = vector.load %arg7[%c12_73, %c0_74] : memref<16x768xf32, #tpu.memory_space<vmem>>, vector<2x384xf32>
    %c2_75 = arith.constant 2 : index
    %c384_76 = arith.constant 384 : index
    %374 = vector.load %arg7[%c2_75, %c384_76] : memref<16x768xf32, #tpu.memory_space<vmem>>, vector<2x384xf32>
    %375 = vector.extract_strided_slice %373 {offsets = [0, 0], sizes = [2, 128], strides = [1, 1]} : vector<2x384xf32> to vector<2x128xf32>
    %376 = vector.extract_strided_slice %372 {offsets = [0, 0], sizes = [2, 128], strides = [1, 1]} : vector<2x768xf32> to vector<2x128xf32>
    %377 = arith.addf %375, %376 : vector<2x128xf32>
    %378 = arith.negf %377 : vector<2x128xf32>
    %379 = math.exp %378 : vector<2x128xf32>
    %cst_77 = arith.constant 1.000000e+00 : f32
    %380 = vector.broadcast %cst_77 : f32 to vector<2x128xf32>
    %381 = arith.addf %380, %379 : vector<2x128xf32>
    %382 = arith.divf %380, %381 : vector<2x128xf32>
    %383 = vector.extract_strided_slice %373 {offsets = [0, 128], sizes = [2, 128], strides = [1, 1]} : vector<2x384xf32> to vector<2x128xf32>
    %384 = vector.extract_strided_slice %372 {offsets = [0, 128], sizes = [2, 128], strides = [1, 1]} : vector<2x768xf32> to vector<2x128xf32>
    %385 = arith.addf %383, %384 : vector<2x128xf32>
    %386 = arith.negf %385 : vector<2x128xf32>
    %387 = math.exp %386 : vector<2x128xf32>
    %cst_78 = arith.constant 1.000000e+00 : f32
    %388 = vector.broadcast %cst_78 : f32 to vector<2x128xf32>
    %389 = arith.addf %388, %387 : vector<2x128xf32>
    %390 = arith.divf %388, %389 : vector<2x128xf32>
    %391 = vector.extract_strided_slice %373 {offsets = [0, 256], sizes = [2, 128], strides = [1, 1]} : vector<2x384xf32> to vector<2x128xf32>
    %392 = vector.extract_strided_slice %372 {offsets = [0, 256], sizes = [2, 128], strides = [1, 1]} : vector<2x768xf32> to vector<2x128xf32>
    %393 = arith.addf %392, %11 : vector<2x128xf32>
    %394 = arith.mulf %382, %393 : vector<2x128xf32>
    %395 = arith.addf %391, %394 : vector<2x128xf32>
    %396 = math.tanh %395 : vector<2x128xf32>
    %cst_79 = arith.constant 1.000000e+00 : f32
    %397 = vector.broadcast %cst_79 : f32 to vector<2x128xf32>
    %398 = arith.subf %397, %390 : vector<2x128xf32>
    %399 = arith.mulf %398, %396 : vector<2x128xf32>
    %400 = arith.mulf %390, %342 : vector<2x128xf32>
    %401 = arith.addf %399, %400 : vector<2x128xf32>
    %402 = vector.extract_strided_slice %374 {offsets = [0, 0], sizes = [2, 128], strides = [1, 1]} : vector<2x384xf32> to vector<2x128xf32>
    %403 = vector.extract_strided_slice %372 {offsets = [0, 384], sizes = [2, 128], strides = [1, 1]} : vector<2x768xf32> to vector<2x128xf32>
    %404 = arith.addf %402, %403 : vector<2x128xf32>
    %405 = arith.negf %404 : vector<2x128xf32>
    %406 = math.exp %405 : vector<2x128xf32>
    %cst_80 = arith.constant 1.000000e+00 : f32
    %407 = vector.broadcast %cst_80 : f32 to vector<2x128xf32>
    %408 = arith.addf %407, %406 : vector<2x128xf32>
    %409 = arith.divf %407, %408 : vector<2x128xf32>
    %410 = vector.extract_strided_slice %374 {offsets = [0, 128], sizes = [2, 128], strides = [1, 1]} : vector<2x384xf32> to vector<2x128xf32>
    %411 = vector.extract_strided_slice %372 {offsets = [0, 512], sizes = [2, 128], strides = [1, 1]} : vector<2x768xf32> to vector<2x128xf32>
    %412 = arith.addf %410, %411 : vector<2x128xf32>
    %413 = arith.negf %412 : vector<2x128xf32>
    %414 = math.exp %413 : vector<2x128xf32>
    %cst_81 = arith.constant 1.000000e+00 : f32
    %415 = vector.broadcast %cst_81 : f32 to vector<2x128xf32>
    %416 = arith.addf %415, %414 : vector<2x128xf32>
    %417 = arith.divf %415, %416 : vector<2x128xf32>
    %418 = vector.extract_strided_slice %374 {offsets = [0, 256], sizes = [2, 128], strides = [1, 1]} : vector<2x384xf32> to vector<2x128xf32>
    %419 = vector.extract_strided_slice %372 {offsets = [0, 640], sizes = [2, 128], strides = [1, 1]} : vector<2x768xf32> to vector<2x128xf32>
    %420 = arith.addf %419, %14 : vector<2x128xf32>
    %421 = arith.mulf %409, %420 : vector<2x128xf32>
    %422 = arith.addf %418, %421 : vector<2x128xf32>
    %423 = math.tanh %422 : vector<2x128xf32>
    %cst_82 = arith.constant 1.000000e+00 : f32
    %424 = vector.broadcast %cst_82 : f32 to vector<2x128xf32>
    %425 = arith.subf %424, %417 : vector<2x128xf32>
    %426 = arith.mulf %425, %423 : vector<2x128xf32>
    %427 = arith.mulf %417, %369 : vector<2x128xf32>
    %428 = arith.addf %426, %427 : vector<2x128xf32>
    %429 = tpu.concatenate %401, %428 in 1 : vector<2x128xf32>, vector<2x128xf32> -> vector<2x256xf32>
    %430 = arith.truncf %429 : vector<2x256xf32> to vector<2x256xbf16>
    %cst_83 = arith.constant dense<0.000000e+00> : vector<2x768xf32>
    %431 = tpu.matmul %430, %8, %cst_83 {dimension_numbers = #tpu.dot_dimension_numbers<[1], [0], [0], [1], [0, 0, 1, 1], [], []>} : vector<2x256xbf16>, vector<256x768xbf16>, vector<2x768xf32> -> vector<2x768xf32>
    %c14_84 = arith.constant 14 : index
    %c0_85 = arith.constant 0 : index
    %432 = vector.load %arg7[%c14_84, %c0_85] : memref<16x768xf32, #tpu.memory_space<vmem>>, vector<2x384xf32>
    %c0_86 = arith.constant 0 : index
    %c384_87 = arith.constant 384 : index
    %433 = vector.load %arg7[%c0_86, %c384_87] : memref<16x768xf32, #tpu.memory_space<vmem>>, vector<2x384xf32>
    %434 = vector.extract_strided_slice %432 {offsets = [0, 0], sizes = [2, 128], strides = [1, 1]} : vector<2x384xf32> to vector<2x128xf32>
    %435 = vector.extract_strided_slice %431 {offsets = [0, 0], sizes = [2, 128], strides = [1, 1]} : vector<2x768xf32> to vector<2x128xf32>
    %436 = arith.addf %434, %435 : vector<2x128xf32>
    %437 = arith.negf %436 : vector<2x128xf32>
    %438 = math.exp %437 : vector<2x128xf32>
    %cst_88 = arith.constant 1.000000e+00 : f32
    %439 = vector.broadcast %cst_88 : f32 to vector<2x128xf32>
    %440 = arith.addf %439, %438 : vector<2x128xf32>
    %441 = arith.divf %439, %440 : vector<2x128xf32>
    %442 = vector.extract_strided_slice %432 {offsets = [0, 128], sizes = [2, 128], strides = [1, 1]} : vector<2x384xf32> to vector<2x128xf32>
    %443 = vector.extract_strided_slice %431 {offsets = [0, 128], sizes = [2, 128], strides = [1, 1]} : vector<2x768xf32> to vector<2x128xf32>
    %444 = arith.addf %442, %443 : vector<2x128xf32>
    %445 = arith.negf %444 : vector<2x128xf32>
    %446 = math.exp %445 : vector<2x128xf32>
    %cst_89 = arith.constant 1.000000e+00 : f32
    %447 = vector.broadcast %cst_89 : f32 to vector<2x128xf32>
    %448 = arith.addf %447, %446 : vector<2x128xf32>
    %449 = arith.divf %447, %448 : vector<2x128xf32>
    %450 = vector.extract_strided_slice %432 {offsets = [0, 256], sizes = [2, 128], strides = [1, 1]} : vector<2x384xf32> to vector<2x128xf32>
    %451 = vector.extract_strided_slice %431 {offsets = [0, 256], sizes = [2, 128], strides = [1, 1]} : vector<2x768xf32> to vector<2x128xf32>
    %452 = arith.addf %451, %11 : vector<2x128xf32>
    %453 = arith.mulf %441, %452 : vector<2x128xf32>
    %454 = arith.addf %450, %453 : vector<2x128xf32>
    %455 = math.tanh %454 : vector<2x128xf32>
    %cst_90 = arith.constant 1.000000e+00 : f32
    %456 = vector.broadcast %cst_90 : f32 to vector<2x128xf32>
    %457 = arith.subf %456, %449 : vector<2x128xf32>
    %458 = arith.mulf %457, %455 : vector<2x128xf32>
    %459 = arith.mulf %449, %401 : vector<2x128xf32>
    %460 = arith.addf %458, %459 : vector<2x128xf32>
    %461 = vector.extract_strided_slice %433 {offsets = [0, 0], sizes = [2, 128], strides = [1, 1]} : vector<2x384xf32> to vector<2x128xf32>
    %462 = vector.extract_strided_slice %431 {offsets = [0, 384], sizes = [2, 128], strides = [1, 1]} : vector<2x768xf32> to vector<2x128xf32>
    %463 = arith.addf %461, %462 : vector<2x128xf32>
    %464 = arith.negf %463 : vector<2x128xf32>
    %465 = math.exp %464 : vector<2x128xf32>
    %cst_91 = arith.constant 1.000000e+00 : f32
    %466 = vector.broadcast %cst_91 : f32 to vector<2x128xf32>
    %467 = arith.addf %466, %465 : vector<2x128xf32>
    %468 = arith.divf %466, %467 : vector<2x128xf32>
    %469 = vector.extract_strided_slice %433 {offsets = [0, 128], sizes = [2, 128], strides = [1, 1]} : vector<2x384xf32> to vector<2x128xf32>
    %470 = vector.extract_strided_slice %431 {offsets = [0, 512], sizes = [2, 128], strides = [1, 1]} : vector<2x768xf32> to vector<2x128xf32>
    %471 = arith.addf %469, %470 : vector<2x128xf32>
    %472 = arith.negf %471 : vector<2x128xf32>
    %473 = math.exp %472 : vector<2x128xf32>
    %cst_92 = arith.constant 1.000000e+00 : f32
    %474 = vector.broadcast %cst_92 : f32 to vector<2x128xf32>
    %475 = arith.addf %474, %473 : vector<2x128xf32>
    %476 = arith.divf %474, %475 : vector<2x128xf32>
    %477 = vector.extract_strided_slice %433 {offsets = [0, 256], sizes = [2, 128], strides = [1, 1]} : vector<2x384xf32> to vector<2x128xf32>
    %478 = vector.extract_strided_slice %431 {offsets = [0, 640], sizes = [2, 128], strides = [1, 1]} : vector<2x768xf32> to vector<2x128xf32>
    %479 = arith.addf %478, %14 : vector<2x128xf32>
    %480 = arith.mulf %468, %479 : vector<2x128xf32>
    %481 = arith.addf %477, %480 : vector<2x128xf32>
    %482 = math.tanh %481 : vector<2x128xf32>
    %cst_93 = arith.constant 1.000000e+00 : f32
    %483 = vector.broadcast %cst_93 : f32 to vector<2x128xf32>
    %484 = arith.subf %483, %476 : vector<2x128xf32>
    %485 = arith.mulf %484, %482 : vector<2x128xf32>
    %486 = arith.mulf %476, %428 : vector<2x128xf32>
    %487 = arith.addf %485, %486 : vector<2x128xf32>
    %488 = tpu.concatenate %460, %487 in 1 : vector<2x128xf32>, vector<2x128xf32> -> vector<2x256xf32>
    %c0_94 = arith.constant 0 : index
    %c0_95 = arith.constant 0 : index
    %489 = vector.load %arg6[%c0_94, %c0_95] : memref<2x256xf32, #tpu.memory_space<vmem>>, vector<2x256xf32>
    tpu.vector_store %arg6[%c0_94, %c0_95], %488 {strides = array<i32>} : memref<2x256xf32, #tpu.memory_space<vmem>>, vector<2x256xf32>,
    return
  }
  func.func @transform_0(%arg0: i32) -> (i32, i32, i32) {
    %c0_i32 = arith.constant 0 : i32
    %c0_i32_0 = arith.constant 0 : i32
    %c0_i32_1 = arith.constant 0 : i32
    return %c0_i32, %arg0, %c0_i32_0 : i32, i32, i32
  }
  func.func @transform_1(%arg0: i32) -> (i32, i32) {
    %c0_i32 = arith.constant 0 : i32
    %c0_i32_0 = arith.constant 0 : i32
    %c0_i32_1 = arith.constant 0 : i32
    return %c0_i32, %c0_i32_0 : i32, i32
  }
  func.func @transform_2(%arg0: i32) -> (i32, i32) {
    %c0_i32 = arith.constant 0 : i32
    %c0_i32_0 = arith.constant 0 : i32
    %c0_i32_1 = arith.constant 0 : i32
    return %c0_i32, %c0_i32_0 : i32, i32
  }
  func.func @transform_3(%arg0: i32) -> (i32, i32) {
    %c0_i32 = arith.constant 0 : i32
    %c0_i32_0 = arith.constant 0 : i32
    %c0_i32_1 = arith.constant 0 : i32
    return %c0_i32, %c0_i32_0 : i32, i32
  }
  func.func @transform_4(%arg0: i32) -> (i32, i32) {
    %c0_i32 = arith.constant 0 : i32
    %c0_i32_0 = arith.constant 0 : i32
    %c0_i32_1 = arith.constant 0 : i32
    return %c0_i32, %c0_i32_0 : i32, i32
  }
  func.func @transform_5(%arg0: i32) -> (i32, i32) {
    %c0_i32 = arith.constant 0 : i32
    %c0_i32_0 = arith.constant 0 : i32
    return %arg0, %c0_i32 : i32, i32
  }
}

module attributes {stable_mosaic.version = 11 : i64} {
  func.func @_bigru_kernel_seq(%arg0: i32, %arg1: memref<8x2x128xbf16, #tpu.memory_space<vmem>>, %arg2: memref<128x768xbf16, #tpu.memory_space<vmem>>, %arg3: memref<256x768xbf16, #tpu.memory_space<vmem>>, %arg4: memref<1x768xf32, #tpu.memory_space<vmem>>, %arg5: memref<1x256xf32, #tpu.memory_space<vmem>>, %arg6: memref<8x2x256xbf16, #tpu.memory_space<vmem>>, %arg7: memref<2x256xf32, #tpu.memory_space<vmem>>, %arg8: memref<16x768xf32, #tpu.memory_space<vmem>>) attributes {dimension_semantics = [#tpu.dimension_semantics<parallel>], iteration_bounds = array<i64: 1>, scalar_prefetch = 0 : i64, scratch_operands = 1 : i64, tpu.core_type = #tpu.core_type<tc>, window_params = [{transform_indices = @transform_0, window_bounds = array<i64: 8, 2, 128>}, {pipeline_mode = #tpu.pipeline_mode<synchronous>, transform_indices = @transform_1, window_bounds = array<i64: 128, 768>}, {pipeline_mode = #tpu.pipeline_mode<synchronous>, transform_indices = @transform_2, window_bounds = array<i64: 256, 768>}, {pipeline_mode = #tpu.pipeline_mode<synchronous>, transform_indices = @transform_3, window_bounds = array<i64: 1, 768>}, {pipeline_mode = #tpu.pipeline_mode<synchronous>, transform_indices = @transform_4, window_bounds = array<i64: 1, 256>}, {transform_indices = @transform_5, window_bounds = array<i64: 8, 2, 256>}, {transform_indices = @transform_6, window_bounds = array<i64: 2, 256>}]} {
    %c0 = arith.constant 0 : index
    %c0_0 = arith.constant 0 : index
    %c0_1 = arith.constant 0 : index
    %0 = vector.load %arg1[%c0, %c0_0, %c0_1] : memref<8x2x128xbf16, #tpu.memory_space<vmem>>, vector<8x2x128xbf16>
    %1 = vector.shape_cast %0 : vector<8x2x128xbf16> to vector<16x128xbf16>
    %c0_2 = arith.constant 0 : index
    %c0_3 = arith.constant 0 : index
    %2 = vector.load %arg2[%c0_2, %c0_3] : memref<128x768xbf16, #tpu.memory_space<vmem>>, vector<128x768xbf16>
    %cst = arith.constant dense<0.000000e+00> : vector<16x768xf32>
    %3 = tpu.matmul %1, %2, %cst {dimension_numbers = #tpu.dot_dimension_numbers<[1], [0], [0], [1], [0, 0, 1, 1], [], []>} : vector<16x128xbf16>, vector<128x768xbf16>, vector<16x768xf32> -> vector<16x768xf32>
    %c0_4 = arith.constant 0 : index
    %c0_5 = arith.constant 0 : index
    %4 = vector.load %arg4[%c0_4, %c0_5] : memref<1x768xf32, #tpu.memory_space<vmem>>, vector<1x768xf32>
    %5 = vector.broadcast %4 : vector<1x768xf32> to vector<16x768xf32>
    %6 = arith.addf %3, %5 : vector<16x768xf32>
    %c0_6 = arith.constant 0 : index
    %c0_7 = arith.constant 0 : index
    %7 = vector.load %arg8[%c0_6, %c0_7] : memref<16x768xf32, #tpu.memory_space<vmem>>, vector<16x768xf32>
    tpu.vector_store %arg8[%c0_6, %c0_7], %6 {strides = array<i32>} : memref<16x768xf32, #tpu.memory_space<vmem>>, vector<16x768xf32>,
    %c0_8 = arith.constant 0 : index
    %c0_9 = arith.constant 0 : index
    %8 = vector.load %arg3[%c0_8, %c0_9] : memref<256x768xbf16, #tpu.memory_space<vmem>>, vector<256x768xbf16>
    %c0_10 = arith.constant 0 : index
    %c0_11 = arith.constant 0 : index
    %9 = vector.load %arg5[%c0_10, %c0_11] : memref<1x256xf32, #tpu.memory_space<vmem>>, vector<1x128xf32>
    %10 = vector.shape_cast %9 : vector<1x128xf32> to vector<1x128xf32>
    %11 = vector.broadcast %10 : vector<1x128xf32> to vector<2x128xf32>
    %c0_12 = arith.constant 0 : index
    %c128 = arith.constant 128 : index
    %12 = vector.load %arg5[%c0_12, %c128] : memref<1x256xf32, #tpu.memory_space<vmem>>, vector<1x128xf32>
    %13 = vector.shape_cast %12 : vector<1x128xf32> to vector<1x128xf32>
    %14 = vector.broadcast %13 : vector<1x128xf32> to vector<2x128xf32>
    %cst_13 = arith.constant 0.000000e+00 : f32
    %15 = vector.broadcast %cst_13 : f32 to vector<2x128xf32>
    %16 = tpu.concatenate %15, %15 in 1 : vector<2x128xf32>, vector<2x128xf32> -> vector<2x256xf32>
    %17 = arith.truncf %16 : vector<2x256xf32> to vector<2x256xbf16>
    %cst_14 = arith.constant dense<0.000000e+00> : vector<2x768xf32>
    %18 = tpu.matmul %17, %8, %cst_14 {dimension_numbers = #tpu.dot_dimension_numbers<[1], [0], [0], [1], [0, 0, 1, 1], [], []>} : vector<2x256xbf16>, vector<256x768xbf16>, vector<2x768xf32> -> vector<2x768xf32>
    %c0_15 = arith.constant 0 : index
    %c0_16 = arith.constant 0 : index
    %19 = vector.load %arg8[%c0_15, %c0_16] : memref<16x768xf32, #tpu.memory_space<vmem>>, vector<2x384xf32>
    %c14 = arith.constant 14 : index
    %c384 = arith.constant 384 : index
    %20 = vector.load %arg8[%c14, %c384] : memref<16x768xf32, #tpu.memory_space<vmem>>, vector<2x384xf32>
    %21 = vector.extract_strided_slice %19 {offsets = [0, 0], sizes = [2, 128], strides = [1, 1]} : vector<2x384xf32> to vector<2x128xf32>
    %22 = vector.extract_strided_slice %18 {offsets = [0, 0], sizes = [2, 128], strides = [1, 1]} : vector<2x768xf32> to vector<2x128xf32>
    %23 = arith.addf %21, %22 : vector<2x128xf32>
    %24 = arith.negf %23 : vector<2x128xf32>
    %25 = math.exp %24 : vector<2x128xf32>
    %cst_17 = arith.constant 1.000000e+00 : f32
    %26 = vector.broadcast %cst_17 : f32 to vector<2x128xf32>
    %27 = arith.addf %26, %25 : vector<2x128xf32>
    %28 = arith.divf %26, %27 : vector<2x128xf32>
    %29 = vector.extract_strided_slice %19 {offsets = [0, 128], sizes = [2, 128], strides = [1, 1]} : vector<2x384xf32> to vector<2x128xf32>
    %30 = vector.extract_strided_slice %18 {offsets = [0, 128], sizes = [2, 128], strides = [1, 1]} : vector<2x768xf32> to vector<2x128xf32>
    %31 = arith.addf %29, %30 : vector<2x128xf32>
    %32 = arith.negf %31 : vector<2x128xf32>
    %33 = math.exp %32 : vector<2x128xf32>
    %cst_18 = arith.constant 1.000000e+00 : f32
    %34 = vector.broadcast %cst_18 : f32 to vector<2x128xf32>
    %35 = arith.addf %34, %33 : vector<2x128xf32>
    %36 = arith.divf %34, %35 : vector<2x128xf32>
    %37 = vector.extract_strided_slice %19 {offsets = [0, 256], sizes = [2, 128], strides = [1, 1]} : vector<2x384xf32> to vector<2x128xf32>
    %38 = vector.extract_strided_slice %18 {offsets = [0, 256], sizes = [2, 128], strides = [1, 1]} : vector<2x768xf32> to vector<2x128xf32>
    %39 = arith.addf %38, %11 : vector<2x128xf32>
    %40 = arith.mulf %28, %39 : vector<2x128xf32>
    %41 = arith.addf %37, %40 : vector<2x128xf32>
    %42 = math.tanh %41 : vector<2x128xf32>
    %cst_19 = arith.constant 1.000000e+00 : f32
    %43 = vector.broadcast %cst_19 : f32 to vector<2x128xf32>
    %44 = arith.subf %43, %36 : vector<2x128xf32>
    %45 = arith.mulf %44, %42 : vector<2x128xf32>
    %46 = arith.mulf %36, %15 : vector<2x128xf32>
    %47 = arith.addf %45, %46 : vector<2x128xf32>
    %48 = vector.extract_strided_slice %20 {offsets = [0, 0], sizes = [2, 128], strides = [1, 1]} : vector<2x384xf32> to vector<2x128xf32>
    %49 = vector.extract_strided_slice %18 {offsets = [0, 384], sizes = [2, 128], strides = [1, 1]} : vector<2x768xf32> to vector<2x128xf32>
    %50 = arith.addf %48, %49 : vector<2x128xf32>
    %51 = arith.negf %50 : vector<2x128xf32>
    %52 = math.exp %51 : vector<2x128xf32>
    %cst_20 = arith.constant 1.000000e+00 : f32
    %53 = vector.broadcast %cst_20 : f32 to vector<2x128xf32>
    %54 = arith.addf %53, %52 : vector<2x128xf32>
    %55 = arith.divf %53, %54 : vector<2x128xf32>
    %56 = vector.extract_strided_slice %20 {offsets = [0, 128], sizes = [2, 128], strides = [1, 1]} : vector<2x384xf32> to vector<2x128xf32>
    %57 = vector.extract_strided_slice %18 {offsets = [0, 512], sizes = [2, 128], strides = [1, 1]} : vector<2x768xf32> to vector<2x128xf32>
    %58 = arith.addf %56, %57 : vector<2x128xf32>
    %59 = arith.negf %58 : vector<2x128xf32>
    %60 = math.exp %59 : vector<2x128xf32>
    %cst_21 = arith.constant 1.000000e+00 : f32
    %61 = vector.broadcast %cst_21 : f32 to vector<2x128xf32>
    %62 = arith.addf %61, %60 : vector<2x128xf32>
    %63 = arith.divf %61, %62 : vector<2x128xf32>
    %64 = vector.extract_strided_slice %20 {offsets = [0, 256], sizes = [2, 128], strides = [1, 1]} : vector<2x384xf32> to vector<2x128xf32>
    %65 = vector.extract_strided_slice %18 {offsets = [0, 640], sizes = [2, 128], strides = [1, 1]} : vector<2x768xf32> to vector<2x128xf32>
    %66 = arith.addf %65, %14 : vector<2x128xf32>
    %67 = arith.mulf %55, %66 : vector<2x128xf32>
    %68 = arith.addf %64, %67 : vector<2x128xf32>
    %69 = math.tanh %68 : vector<2x128xf32>
    %cst_22 = arith.constant 1.000000e+00 : f32
    %70 = vector.broadcast %cst_22 : f32 to vector<2x128xf32>
    %71 = arith.subf %70, %63 : vector<2x128xf32>
    %72 = arith.mulf %71, %69 : vector<2x128xf32>
    %73 = arith.mulf %63, %15 : vector<2x128xf32>
    %74 = arith.addf %72, %73 : vector<2x128xf32>
    %75 = vector.shape_cast %47 : vector<2x128xf32> to vector<1x2x128xf32>
    %76 = arith.truncf %75 : vector<1x2x128xf32> to vector<1x2x128xbf16>
    %c0_23 = arith.constant 0 : index
    %c0_24 = arith.constant 0 : index
    %c0_25 = arith.constant 0 : index
    %77 = vector.load %arg6[%c0_23, %c0_24, %c0_25] : memref<8x2x256xbf16, #tpu.memory_space<vmem>>, vector<1x2x128xbf16>
    tpu.vector_store %arg6[%c0_23, %c0_24, %c0_25], %76 {strides = array<i32>} : memref<8x2x256xbf16, #tpu.memory_space<vmem>>, vector<1x2x128xbf16>,
    %78 = vector.shape_cast %74 : vector<2x128xf32> to vector<1x2x128xf32>
    %79 = arith.truncf %78 : vector<1x2x128xf32> to vector<1x2x128xbf16>
    %c7 = arith.constant 7 : index
    %c0_26 = arith.constant 0 : index
    %c128_27 = arith.constant 128 : index
    %80 = vector.load %arg6[%c7, %c0_26, %c128_27] : memref<8x2x256xbf16, #tpu.memory_space<vmem>>, vector<1x2x128xbf16>
    tpu.vector_store %arg6[%c7, %c0_26, %c128_27], %79 {strides = array<i32>} : memref<8x2x256xbf16, #tpu.memory_space<vmem>>, vector<1x2x128xbf16>,
    %81 = tpu.concatenate %47, %74 in 1 : vector<2x128xf32>, vector<2x128xf32> -> vector<2x256xf32>
    %82 = arith.truncf %81 : vector<2x256xf32> to vector<2x256xbf16>
    %cst_28 = arith.constant dense<0.000000e+00> : vector<2x768xf32>
    %83 = tpu.matmul %82, %8, %cst_28 {dimension_numbers = #tpu.dot_dimension_numbers<[1], [0], [0], [1], [0, 0, 1, 1], [], []>} : vector<2x256xbf16>, vector<256x768xbf16>, vector<2x768xf32> -> vector<2x768xf32>
    %c2 = arith.constant 2 : index
    %c0_29 = arith.constant 0 : index
    %84 = vector.load %arg8[%c2, %c0_29] : memref<16x768xf32, #tpu.memory_space<vmem>>, vector<2x384xf32>
    %c12 = arith.constant 12 : index
    %c384_30 = arith.constant 384 : index
    %85 = vector.load %arg8[%c12, %c384_30] : memref<16x768xf32, #tpu.memory_space<vmem>>, vector<2x384xf32>
    %86 = vector.extract_strided_slice %84 {offsets = [0, 0], sizes = [2, 128], strides = [1, 1]} : vector<2x384xf32> to vector<2x128xf32>
    %87 = vector.extract_strided_slice %83 {offsets = [0, 0], sizes = [2, 128], strides = [1, 1]} : vector<2x768xf32> to vector<2x128xf32>
    %88 = arith.addf %86, %87 : vector<2x128xf32>
    %89 = arith.negf %88 : vector<2x128xf32>
    %90 = math.exp %89 : vector<2x128xf32>
    %cst_31 = arith.constant 1.000000e+00 : f32
    %91 = vector.broadcast %cst_31 : f32 to vector<2x128xf32>
    %92 = arith.addf %91, %90 : vector<2x128xf32>
    %93 = arith.divf %91, %92 : vector<2x128xf32>
    %94 = vector.extract_strided_slice %84 {offsets = [0, 128], sizes = [2, 128], strides = [1, 1]} : vector<2x384xf32> to vector<2x128xf32>
    %95 = vector.extract_strided_slice %83 {offsets = [0, 128], sizes = [2, 128], strides = [1, 1]} : vector<2x768xf32> to vector<2x128xf32>
    %96 = arith.addf %94, %95 : vector<2x128xf32>
    %97 = arith.negf %96 : vector<2x128xf32>
    %98 = math.exp %97 : vector<2x128xf32>
    %cst_32 = arith.constant 1.000000e+00 : f32
    %99 = vector.broadcast %cst_32 : f32 to vector<2x128xf32>
    %100 = arith.addf %99, %98 : vector<2x128xf32>
    %101 = arith.divf %99, %100 : vector<2x128xf32>
    %102 = vector.extract_strided_slice %84 {offsets = [0, 256], sizes = [2, 128], strides = [1, 1]} : vector<2x384xf32> to vector<2x128xf32>
    %103 = vector.extract_strided_slice %83 {offsets = [0, 256], sizes = [2, 128], strides = [1, 1]} : vector<2x768xf32> to vector<2x128xf32>
    %104 = arith.addf %103, %11 : vector<2x128xf32>
    %105 = arith.mulf %93, %104 : vector<2x128xf32>
    %106 = arith.addf %102, %105 : vector<2x128xf32>
    %107 = math.tanh %106 : vector<2x128xf32>
    %cst_33 = arith.constant 1.000000e+00 : f32
    %108 = vector.broadcast %cst_33 : f32 to vector<2x128xf32>
    %109 = arith.subf %108, %101 : vector<2x128xf32>
    %110 = arith.mulf %109, %107 : vector<2x128xf32>
    %111 = arith.mulf %101, %47 : vector<2x128xf32>
    %112 = arith.addf %110, %111 : vector<2x128xf32>
    %113 = vector.extract_strided_slice %85 {offsets = [0, 0], sizes = [2, 128], strides = [1, 1]} : vector<2x384xf32> to vector<2x128xf32>
    %114 = vector.extract_strided_slice %83 {offsets = [0, 384], sizes = [2, 128], strides = [1, 1]} : vector<2x768xf32> to vector<2x128xf32>
    %115 = arith.addf %113, %114 : vector<2x128xf32>
    %116 = arith.negf %115 : vector<2x128xf32>
    %117 = math.exp %116 : vector<2x128xf32>
    %cst_34 = arith.constant 1.000000e+00 : f32
    %118 = vector.broadcast %cst_34 : f32 to vector<2x128xf32>
    %119 = arith.addf %118, %117 : vector<2x128xf32>
    %120 = arith.divf %118, %119 : vector<2x128xf32>
    %121 = vector.extract_strided_slice %85 {offsets = [0, 128], sizes = [2, 128], strides = [1, 1]} : vector<2x384xf32> to vector<2x128xf32>
    %122 = vector.extract_strided_slice %83 {offsets = [0, 512], sizes = [2, 128], strides = [1, 1]} : vector<2x768xf32> to vector<2x128xf32>
    %123 = arith.addf %121, %122 : vector<2x128xf32>
    %124 = arith.negf %123 : vector<2x128xf32>
    %125 = math.exp %124 : vector<2x128xf32>
    %cst_35 = arith.constant 1.000000e+00 : f32
    %126 = vector.broadcast %cst_35 : f32 to vector<2x128xf32>
    %127 = arith.addf %126, %125 : vector<2x128xf32>
    %128 = arith.divf %126, %127 : vector<2x128xf32>
    %129 = vector.extract_strided_slice %85 {offsets = [0, 256], sizes = [2, 128], strides = [1, 1]} : vector<2x384xf32> to vector<2x128xf32>
    %130 = vector.extract_strided_slice %83 {offsets = [0, 640], sizes = [2, 128], strides = [1, 1]} : vector<2x768xf32> to vector<2x128xf32>
    %131 = arith.addf %130, %14 : vector<2x128xf32>
    %132 = arith.mulf %120, %131 : vector<2x128xf32>
    %133 = arith.addf %129, %132 : vector<2x128xf32>
    %134 = math.tanh %133 : vector<2x128xf32>
    %cst_36 = arith.constant 1.000000e+00 : f32
    %135 = vector.broadcast %cst_36 : f32 to vector<2x128xf32>
    %136 = arith.subf %135, %128 : vector<2x128xf32>
    %137 = arith.mulf %136, %134 : vector<2x128xf32>
    %138 = arith.mulf %128, %74 : vector<2x128xf32>
    %139 = arith.addf %137, %138 : vector<2x128xf32>
    %140 = vector.shape_cast %112 : vector<2x128xf32> to vector<1x2x128xf32>
    %141 = arith.truncf %140 : vector<1x2x128xf32> to vector<1x2x128xbf16>
    %c1 = arith.constant 1 : index
    %c0_37 = arith.constant 0 : index
    %c0_38 = arith.constant 0 : index
    %142 = vector.load %arg6[%c1, %c0_37, %c0_38] : memref<8x2x256xbf16, #tpu.memory_space<vmem>>, vector<1x2x128xbf16>
    tpu.vector_store %arg6[%c1, %c0_37, %c0_38], %141 {strides = array<i32>} : memref<8x2x256xbf16, #tpu.memory_space<vmem>>, vector<1x2x128xbf16>,
    %143 = vector.shape_cast %139 : vector<2x128xf32> to vector<1x2x128xf32>
    %144 = arith.truncf %143 : vector<1x2x128xf32> to vector<1x2x128xbf16>
    %c6 = arith.constant 6 : index
    %c0_39 = arith.constant 0 : index
    %c128_40 = arith.constant 128 : index
    %145 = vector.load %arg6[%c6, %c0_39, %c128_40] : memref<8x2x256xbf16, #tpu.memory_space<vmem>>, vector<1x2x128xbf16>
    tpu.vector_store %arg6[%c6, %c0_39, %c128_40], %144 {strides = array<i32>} : memref<8x2x256xbf16, #tpu.memory_space<vmem>>, vector<1x2x128xbf16>,
    %146 = tpu.concatenate %112, %139 in 1 : vector<2x128xf32>, vector<2x128xf32> -> vector<2x256xf32>
    %147 = arith.truncf %146 : vector<2x256xf32> to vector<2x256xbf16>
    %cst_41 = arith.constant dense<0.000000e+00> : vector<2x768xf32>
    %148 = tpu.matmul %147, %8, %cst_41 {dimension_numbers = #tpu.dot_dimension_numbers<[1], [0], [0], [1], [0, 0, 1, 1], [], []>} : vector<2x256xbf16>, vector<256x768xbf16>, vector<2x768xf32> -> vector<2x768xf32>
    %c4 = arith.constant 4 : index
    %c0_42 = arith.constant 0 : index
    %149 = vector.load %arg8[%c4, %c0_42] : memref<16x768xf32, #tpu.memory_space<vmem>>, vector<2x384xf32>
    %c10 = arith.constant 10 : index
    %c384_43 = arith.constant 384 : index
    %150 = vector.load %arg8[%c10, %c384_43] : memref<16x768xf32, #tpu.memory_space<vmem>>, vector<2x384xf32>
    %151 = vector.extract_strided_slice %149 {offsets = [0, 0], sizes = [2, 128], strides = [1, 1]} : vector<2x384xf32> to vector<2x128xf32>
    %152 = vector.extract_strided_slice %148 {offsets = [0, 0], sizes = [2, 128], strides = [1, 1]} : vector<2x768xf32> to vector<2x128xf32>
    %153 = arith.addf %151, %152 : vector<2x128xf32>
    %154 = arith.negf %153 : vector<2x128xf32>
    %155 = math.exp %154 : vector<2x128xf32>
    %cst_44 = arith.constant 1.000000e+00 : f32
    %156 = vector.broadcast %cst_44 : f32 to vector<2x128xf32>
    %157 = arith.addf %156, %155 : vector<2x128xf32>
    %158 = arith.divf %156, %157 : vector<2x128xf32>
    %159 = vector.extract_strided_slice %149 {offsets = [0, 128], sizes = [2, 128], strides = [1, 1]} : vector<2x384xf32> to vector<2x128xf32>
    %160 = vector.extract_strided_slice %148 {offsets = [0, 128], sizes = [2, 128], strides = [1, 1]} : vector<2x768xf32> to vector<2x128xf32>
    %161 = arith.addf %159, %160 : vector<2x128xf32>
    %162 = arith.negf %161 : vector<2x128xf32>
    %163 = math.exp %162 : vector<2x128xf32>
    %cst_45 = arith.constant 1.000000e+00 : f32
    %164 = vector.broadcast %cst_45 : f32 to vector<2x128xf32>
    %165 = arith.addf %164, %163 : vector<2x128xf32>
    %166 = arith.divf %164, %165 : vector<2x128xf32>
    %167 = vector.extract_strided_slice %149 {offsets = [0, 256], sizes = [2, 128], strides = [1, 1]} : vector<2x384xf32> to vector<2x128xf32>
    %168 = vector.extract_strided_slice %148 {offsets = [0, 256], sizes = [2, 128], strides = [1, 1]} : vector<2x768xf32> to vector<2x128xf32>
    %169 = arith.addf %168, %11 : vector<2x128xf32>
    %170 = arith.mulf %158, %169 : vector<2x128xf32>
    %171 = arith.addf %167, %170 : vector<2x128xf32>
    %172 = math.tanh %171 : vector<2x128xf32>
    %cst_46 = arith.constant 1.000000e+00 : f32
    %173 = vector.broadcast %cst_46 : f32 to vector<2x128xf32>
    %174 = arith.subf %173, %166 : vector<2x128xf32>
    %175 = arith.mulf %174, %172 : vector<2x128xf32>
    %176 = arith.mulf %166, %112 : vector<2x128xf32>
    %177 = arith.addf %175, %176 : vector<2x128xf32>
    %178 = vector.extract_strided_slice %150 {offsets = [0, 0], sizes = [2, 128], strides = [1, 1]} : vector<2x384xf32> to vector<2x128xf32>
    %179 = vector.extract_strided_slice %148 {offsets = [0, 384], sizes = [2, 128], strides = [1, 1]} : vector<2x768xf32> to vector<2x128xf32>
    %180 = arith.addf %178, %179 : vector<2x128xf32>
    %181 = arith.negf %180 : vector<2x128xf32>
    %182 = math.exp %181 : vector<2x128xf32>
    %cst_47 = arith.constant 1.000000e+00 : f32
    %183 = vector.broadcast %cst_47 : f32 to vector<2x128xf32>
    %184 = arith.addf %183, %182 : vector<2x128xf32>
    %185 = arith.divf %183, %184 : vector<2x128xf32>
    %186 = vector.extract_strided_slice %150 {offsets = [0, 128], sizes = [2, 128], strides = [1, 1]} : vector<2x384xf32> to vector<2x128xf32>
    %187 = vector.extract_strided_slice %148 {offsets = [0, 512], sizes = [2, 128], strides = [1, 1]} : vector<2x768xf32> to vector<2x128xf32>
    %188 = arith.addf %186, %187 : vector<2x128xf32>
    %189 = arith.negf %188 : vector<2x128xf32>
    %190 = math.exp %189 : vector<2x128xf32>
    %cst_48 = arith.constant 1.000000e+00 : f32
    %191 = vector.broadcast %cst_48 : f32 to vector<2x128xf32>
    %192 = arith.addf %191, %190 : vector<2x128xf32>
    %193 = arith.divf %191, %192 : vector<2x128xf32>
    %194 = vector.extract_strided_slice %150 {offsets = [0, 256], sizes = [2, 128], strides = [1, 1]} : vector<2x384xf32> to vector<2x128xf32>
    %195 = vector.extract_strided_slice %148 {offsets = [0, 640], sizes = [2, 128], strides = [1, 1]} : vector<2x768xf32> to vector<2x128xf32>
    %196 = arith.addf %195, %14 : vector<2x128xf32>
    %197 = arith.mulf %185, %196 : vector<2x128xf32>
    %198 = arith.addf %194, %197 : vector<2x128xf32>
    %199 = math.tanh %198 : vector<2x128xf32>
    %cst_49 = arith.constant 1.000000e+00 : f32
    %200 = vector.broadcast %cst_49 : f32 to vector<2x128xf32>
    %201 = arith.subf %200, %193 : vector<2x128xf32>
    %202 = arith.mulf %201, %199 : vector<2x128xf32>
    %203 = arith.mulf %193, %139 : vector<2x128xf32>
    %204 = arith.addf %202, %203 : vector<2x128xf32>
    %205 = vector.shape_cast %177 : vector<2x128xf32> to vector<1x2x128xf32>
    %206 = arith.truncf %205 : vector<1x2x128xf32> to vector<1x2x128xbf16>
    %c2_50 = arith.constant 2 : index
    %c0_51 = arith.constant 0 : index
    %c0_52 = arith.constant 0 : index
    %207 = vector.load %arg6[%c2_50, %c0_51, %c0_52] : memref<8x2x256xbf16, #tpu.memory_space<vmem>>, vector<1x2x128xbf16>
    tpu.vector_store %arg6[%c2_50, %c0_51, %c0_52], %206 {strides = array<i32>} : memref<8x2x256xbf16, #tpu.memory_space<vmem>>, vector<1x2x128xbf16>,
    %208 = vector.shape_cast %204 : vector<2x128xf32> to vector<1x2x128xf32>
    %209 = arith.truncf %208 : vector<1x2x128xf32> to vector<1x2x128xbf16>
    %c5 = arith.constant 5 : index
    %c0_53 = arith.constant 0 : index
    %c128_54 = arith.constant 128 : index
    %210 = vector.load %arg6[%c5, %c0_53, %c128_54] : memref<8x2x256xbf16, #tpu.memory_space<vmem>>, vector<1x2x128xbf16>
    tpu.vector_store %arg6[%c5, %c0_53, %c128_54], %209 {strides = array<i32>} : memref<8x2x256xbf16, #tpu.memory_space<vmem>>, vector<1x2x128xbf16>,
    %211 = tpu.concatenate %177, %204 in 1 : vector<2x128xf32>, vector<2x128xf32> -> vector<2x256xf32>
    %212 = arith.truncf %211 : vector<2x256xf32> to vector<2x256xbf16>
    %cst_55 = arith.constant dense<0.000000e+00> : vector<2x768xf32>
    %213 = tpu.matmul %212, %8, %cst_55 {dimension_numbers = #tpu.dot_dimension_numbers<[1], [0], [0], [1], [0, 0, 1, 1], [], []>} : vector<2x256xbf16>, vector<256x768xbf16>, vector<2x768xf32> -> vector<2x768xf32>
    %c6_56 = arith.constant 6 : index
    %c0_57 = arith.constant 0 : index
    %214 = vector.load %arg8[%c6_56, %c0_57] : memref<16x768xf32, #tpu.memory_space<vmem>>, vector<2x384xf32>
    %c8 = arith.constant 8 : index
    %c384_58 = arith.constant 384 : index
    %215 = vector.load %arg8[%c8, %c384_58] : memref<16x768xf32, #tpu.memory_space<vmem>>, vector<2x384xf32>
    %216 = vector.extract_strided_slice %214 {offsets = [0, 0], sizes = [2, 128], strides = [1, 1]} : vector<2x384xf32> to vector<2x128xf32>
    %217 = vector.extract_strided_slice %213 {offsets = [0, 0], sizes = [2, 128], strides = [1, 1]} : vector<2x768xf32> to vector<2x128xf32>
    %218 = arith.addf %216, %217 : vector<2x128xf32>
    %219 = arith.negf %218 : vector<2x128xf32>
    %220 = math.exp %219 : vector<2x128xf32>
    %cst_59 = arith.constant 1.000000e+00 : f32
    %221 = vector.broadcast %cst_59 : f32 to vector<2x128xf32>
    %222 = arith.addf %221, %220 : vector<2x128xf32>
    %223 = arith.divf %221, %222 : vector<2x128xf32>
    %224 = vector.extract_strided_slice %214 {offsets = [0, 128], sizes = [2, 128], strides = [1, 1]} : vector<2x384xf32> to vector<2x128xf32>
    %225 = vector.extract_strided_slice %213 {offsets = [0, 128], sizes = [2, 128], strides = [1, 1]} : vector<2x768xf32> to vector<2x128xf32>
    %226 = arith.addf %224, %225 : vector<2x128xf32>
    %227 = arith.negf %226 : vector<2x128xf32>
    %228 = math.exp %227 : vector<2x128xf32>
    %cst_60 = arith.constant 1.000000e+00 : f32
    %229 = vector.broadcast %cst_60 : f32 to vector<2x128xf32>
    %230 = arith.addf %229, %228 : vector<2x128xf32>
    %231 = arith.divf %229, %230 : vector<2x128xf32>
    %232 = vector.extract_strided_slice %214 {offsets = [0, 256], sizes = [2, 128], strides = [1, 1]} : vector<2x384xf32> to vector<2x128xf32>
    %233 = vector.extract_strided_slice %213 {offsets = [0, 256], sizes = [2, 128], strides = [1, 1]} : vector<2x768xf32> to vector<2x128xf32>
    %234 = arith.addf %233, %11 : vector<2x128xf32>
    %235 = arith.mulf %223, %234 : vector<2x128xf32>
    %236 = arith.addf %232, %235 : vector<2x128xf32>
    %237 = math.tanh %236 : vector<2x128xf32>
    %cst_61 = arith.constant 1.000000e+00 : f32
    %238 = vector.broadcast %cst_61 : f32 to vector<2x128xf32>
    %239 = arith.subf %238, %231 : vector<2x128xf32>
    %240 = arith.mulf %239, %237 : vector<2x128xf32>
    %241 = arith.mulf %231, %177 : vector<2x128xf32>
    %242 = arith.addf %240, %241 : vector<2x128xf32>
    %243 = vector.extract_strided_slice %215 {offsets = [0, 0], sizes = [2, 128], strides = [1, 1]} : vector<2x384xf32> to vector<2x128xf32>
    %244 = vector.extract_strided_slice %213 {offsets = [0, 384], sizes = [2, 128], strides = [1, 1]} : vector<2x768xf32> to vector<2x128xf32>
    %245 = arith.addf %243, %244 : vector<2x128xf32>
    %246 = arith.negf %245 : vector<2x128xf32>
    %247 = math.exp %246 : vector<2x128xf32>
    %cst_62 = arith.constant 1.000000e+00 : f32
    %248 = vector.broadcast %cst_62 : f32 to vector<2x128xf32>
    %249 = arith.addf %248, %247 : vector<2x128xf32>
    %250 = arith.divf %248, %249 : vector<2x128xf32>
    %251 = vector.extract_strided_slice %215 {offsets = [0, 128], sizes = [2, 128], strides = [1, 1]} : vector<2x384xf32> to vector<2x128xf32>
    %252 = vector.extract_strided_slice %213 {offsets = [0, 512], sizes = [2, 128], strides = [1, 1]} : vector<2x768xf32> to vector<2x128xf32>
    %253 = arith.addf %251, %252 : vector<2x128xf32>
    %254 = arith.negf %253 : vector<2x128xf32>
    %255 = math.exp %254 : vector<2x128xf32>
    %cst_63 = arith.constant 1.000000e+00 : f32
    %256 = vector.broadcast %cst_63 : f32 to vector<2x128xf32>
    %257 = arith.addf %256, %255 : vector<2x128xf32>
    %258 = arith.divf %256, %257 : vector<2x128xf32>
    %259 = vector.extract_strided_slice %215 {offsets = [0, 256], sizes = [2, 128], strides = [1, 1]} : vector<2x384xf32> to vector<2x128xf32>
    %260 = vector.extract_strided_slice %213 {offsets = [0, 640], sizes = [2, 128], strides = [1, 1]} : vector<2x768xf32> to vector<2x128xf32>
    %261 = arith.addf %260, %14 : vector<2x128xf32>
    %262 = arith.mulf %250, %261 : vector<2x128xf32>
    %263 = arith.addf %259, %262 : vector<2x128xf32>
    %264 = math.tanh %263 : vector<2x128xf32>
    %cst_64 = arith.constant 1.000000e+00 : f32
    %265 = vector.broadcast %cst_64 : f32 to vector<2x128xf32>
    %266 = arith.subf %265, %258 : vector<2x128xf32>
    %267 = arith.mulf %266, %264 : vector<2x128xf32>
    %268 = arith.mulf %258, %204 : vector<2x128xf32>
    %269 = arith.addf %267, %268 : vector<2x128xf32>
    %270 = vector.shape_cast %242 : vector<2x128xf32> to vector<1x2x128xf32>
    %271 = arith.truncf %270 : vector<1x2x128xf32> to vector<1x2x128xbf16>
    %c3 = arith.constant 3 : index
    %c0_65 = arith.constant 0 : index
    %c0_66 = arith.constant 0 : index
    %272 = vector.load %arg6[%c3, %c0_65, %c0_66] : memref<8x2x256xbf16, #tpu.memory_space<vmem>>, vector<1x2x128xbf16>
    tpu.vector_store %arg6[%c3, %c0_65, %c0_66], %271 {strides = array<i32>} : memref<8x2x256xbf16, #tpu.memory_space<vmem>>, vector<1x2x128xbf16>,
    %273 = vector.shape_cast %269 : vector<2x128xf32> to vector<1x2x128xf32>
    %274 = arith.truncf %273 : vector<1x2x128xf32> to vector<1x2x128xbf16>
    %c4_67 = arith.constant 4 : index
    %c0_68 = arith.constant 0 : index
    %c128_69 = arith.constant 128 : index
    %275 = vector.load %arg6[%c4_67, %c0_68, %c128_69] : memref<8x2x256xbf16, #tpu.memory_space<vmem>>, vector<1x2x128xbf16>
    tpu.vector_store %arg6[%c4_67, %c0_68, %c128_69], %274 {strides = array<i32>} : memref<8x2x256xbf16, #tpu.memory_space<vmem>>, vector<1x2x128xbf16>,
    %276 = tpu.concatenate %242, %269 in 1 : vector<2x128xf32>, vector<2x128xf32> -> vector<2x256xf32>
    %277 = arith.truncf %276 : vector<2x256xf32> to vector<2x256xbf16>
    %cst_70 = arith.constant dense<0.000000e+00> : vector<2x768xf32>
    %278 = tpu.matmul %277, %8, %cst_70 {dimension_numbers = #tpu.dot_dimension_numbers<[1], [0], [0], [1], [0, 0, 1, 1], [], []>} : vector<2x256xbf16>, vector<256x768xbf16>, vector<2x768xf32> -> vector<2x768xf32>
    %c8_71 = arith.constant 8 : index
    %c0_72 = arith.constant 0 : index
    %279 = vector.load %arg8[%c8_71, %c0_72] : memref<16x768xf32, #tpu.memory_space<vmem>>, vector<2x384xf32>
    %c6_73 = arith.constant 6 : index
    %c384_74 = arith.constant 384 : index
    %280 = vector.load %arg8[%c6_73, %c384_74] : memref<16x768xf32, #tpu.memory_space<vmem>>, vector<2x384xf32>
    %281 = vector.extract_strided_slice %279 {offsets = [0, 0], sizes = [2, 128], strides = [1, 1]} : vector<2x384xf32> to vector<2x128xf32>
    %282 = vector.extract_strided_slice %278 {offsets = [0, 0], sizes = [2, 128], strides = [1, 1]} : vector<2x768xf32> to vector<2x128xf32>
    %283 = arith.addf %281, %282 : vector<2x128xf32>
    %284 = arith.negf %283 : vector<2x128xf32>
    %285 = math.exp %284 : vector<2x128xf32>
    %cst_75 = arith.constant 1.000000e+00 : f32
    %286 = vector.broadcast %cst_75 : f32 to vector<2x128xf32>
    %287 = arith.addf %286, %285 : vector<2x128xf32>
    %288 = arith.divf %286, %287 : vector<2x128xf32>
    %289 = vector.extract_strided_slice %279 {offsets = [0, 128], sizes = [2, 128], strides = [1, 1]} : vector<2x384xf32> to vector<2x128xf32>
    %290 = vector.extract_strided_slice %278 {offsets = [0, 128], sizes = [2, 128], strides = [1, 1]} : vector<2x768xf32> to vector<2x128xf32>
    %291 = arith.addf %289, %290 : vector<2x128xf32>
    %292 = arith.negf %291 : vector<2x128xf32>
    %293 = math.exp %292 : vector<2x128xf32>
    %cst_76 = arith.constant 1.000000e+00 : f32
    %294 = vector.broadcast %cst_76 : f32 to vector<2x128xf32>
    %295 = arith.addf %294, %293 : vector<2x128xf32>
    %296 = arith.divf %294, %295 : vector<2x128xf32>
    %297 = vector.extract_strided_slice %279 {offsets = [0, 256], sizes = [2, 128], strides = [1, 1]} : vector<2x384xf32> to vector<2x128xf32>
    %298 = vector.extract_strided_slice %278 {offsets = [0, 256], sizes = [2, 128], strides = [1, 1]} : vector<2x768xf32> to vector<2x128xf32>
    %299 = arith.addf %298, %11 : vector<2x128xf32>
    %300 = arith.mulf %288, %299 : vector<2x128xf32>
    %301 = arith.addf %297, %300 : vector<2x128xf32>
    %302 = math.tanh %301 : vector<2x128xf32>
    %cst_77 = arith.constant 1.000000e+00 : f32
    %303 = vector.broadcast %cst_77 : f32 to vector<2x128xf32>
    %304 = arith.subf %303, %296 : vector<2x128xf32>
    %305 = arith.mulf %304, %302 : vector<2x128xf32>
    %306 = arith.mulf %296, %242 : vector<2x128xf32>
    %307 = arith.addf %305, %306 : vector<2x128xf32>
    %308 = vector.extract_strided_slice %280 {offsets = [0, 0], sizes = [2, 128], strides = [1, 1]} : vector<2x384xf32> to vector<2x128xf32>
    %309 = vector.extract_strided_slice %278 {offsets = [0, 384], sizes = [2, 128], strides = [1, 1]} : vector<2x768xf32> to vector<2x128xf32>
    %310 = arith.addf %308, %309 : vector<2x128xf32>
    %311 = arith.negf %310 : vector<2x128xf32>
    %312 = math.exp %311 : vector<2x128xf32>
    %cst_78 = arith.constant 1.000000e+00 : f32
    %313 = vector.broadcast %cst_78 : f32 to vector<2x128xf32>
    %314 = arith.addf %313, %312 : vector<2x128xf32>
    %315 = arith.divf %313, %314 : vector<2x128xf32>
    %316 = vector.extract_strided_slice %280 {offsets = [0, 128], sizes = [2, 128], strides = [1, 1]} : vector<2x384xf32> to vector<2x128xf32>
    %317 = vector.extract_strided_slice %278 {offsets = [0, 512], sizes = [2, 128], strides = [1, 1]} : vector<2x768xf32> to vector<2x128xf32>
    %318 = arith.addf %316, %317 : vector<2x128xf32>
    %319 = arith.negf %318 : vector<2x128xf32>
    %320 = math.exp %319 : vector<2x128xf32>
    %cst_79 = arith.constant 1.000000e+00 : f32
    %321 = vector.broadcast %cst_79 : f32 to vector<2x128xf32>
    %322 = arith.addf %321, %320 : vector<2x128xf32>
    %323 = arith.divf %321, %322 : vector<2x128xf32>
    %324 = vector.extract_strided_slice %280 {offsets = [0, 256], sizes = [2, 128], strides = [1, 1]} : vector<2x384xf32> to vector<2x128xf32>
    %325 = vector.extract_strided_slice %278 {offsets = [0, 640], sizes = [2, 128], strides = [1, 1]} : vector<2x768xf32> to vector<2x128xf32>
    %326 = arith.addf %325, %14 : vector<2x128xf32>
    %327 = arith.mulf %315, %326 : vector<2x128xf32>
    %328 = arith.addf %324, %327 : vector<2x128xf32>
    %329 = math.tanh %328 : vector<2x128xf32>
    %cst_80 = arith.constant 1.000000e+00 : f32
    %330 = vector.broadcast %cst_80 : f32 to vector<2x128xf32>
    %331 = arith.subf %330, %323 : vector<2x128xf32>
    %332 = arith.mulf %331, %329 : vector<2x128xf32>
    %333 = arith.mulf %323, %269 : vector<2x128xf32>
    %334 = arith.addf %332, %333 : vector<2x128xf32>
    %335 = vector.shape_cast %307 : vector<2x128xf32> to vector<1x2x128xf32>
    %336 = arith.truncf %335 : vector<1x2x128xf32> to vector<1x2x128xbf16>
    %c4_81 = arith.constant 4 : index
    %c0_82 = arith.constant 0 : index
    %c0_83 = arith.constant 0 : index
    %337 = vector.load %arg6[%c4_81, %c0_82, %c0_83] : memref<8x2x256xbf16, #tpu.memory_space<vmem>>, vector<1x2x128xbf16>
    tpu.vector_store %arg6[%c4_81, %c0_82, %c0_83], %336 {strides = array<i32>} : memref<8x2x256xbf16, #tpu.memory_space<vmem>>, vector<1x2x128xbf16>,
    %338 = vector.shape_cast %334 : vector<2x128xf32> to vector<1x2x128xf32>
    %339 = arith.truncf %338 : vector<1x2x128xf32> to vector<1x2x128xbf16>
    %c3_84 = arith.constant 3 : index
    %c0_85 = arith.constant 0 : index
    %c128_86 = arith.constant 128 : index
    %340 = vector.load %arg6[%c3_84, %c0_85, %c128_86] : memref<8x2x256xbf16, #tpu.memory_space<vmem>>, vector<1x2x128xbf16>
    tpu.vector_store %arg6[%c3_84, %c0_85, %c128_86], %339 {strides = array<i32>} : memref<8x2x256xbf16, #tpu.memory_space<vmem>>, vector<1x2x128xbf16>,
    %341 = tpu.concatenate %307, %334 in 1 : vector<2x128xf32>, vector<2x128xf32> -> vector<2x256xf32>
    %342 = arith.truncf %341 : vector<2x256xf32> to vector<2x256xbf16>
    %cst_87 = arith.constant dense<0.000000e+00> : vector<2x768xf32>
    %343 = tpu.matmul %342, %8, %cst_87 {dimension_numbers = #tpu.dot_dimension_numbers<[1], [0], [0], [1], [0, 0, 1, 1], [], []>} : vector<2x256xbf16>, vector<256x768xbf16>, vector<2x768xf32> -> vector<2x768xf32>
    %c10_88 = arith.constant 10 : index
    %c0_89 = arith.constant 0 : index
    %344 = vector.load %arg8[%c10_88, %c0_89] : memref<16x768xf32, #tpu.memory_space<vmem>>, vector<2x384xf32>
    %c4_90 = arith.constant 4 : index
    %c384_91 = arith.constant 384 : index
    %345 = vector.load %arg8[%c4_90, %c384_91] : memref<16x768xf32, #tpu.memory_space<vmem>>, vector<2x384xf32>
    %346 = vector.extract_strided_slice %344 {offsets = [0, 0], sizes = [2, 128], strides = [1, 1]} : vector<2x384xf32> to vector<2x128xf32>
    %347 = vector.extract_strided_slice %343 {offsets = [0, 0], sizes = [2, 128], strides = [1, 1]} : vector<2x768xf32> to vector<2x128xf32>
    %348 = arith.addf %346, %347 : vector<2x128xf32>
    %349 = arith.negf %348 : vector<2x128xf32>
    %350 = math.exp %349 : vector<2x128xf32>
    %cst_92 = arith.constant 1.000000e+00 : f32
    %351 = vector.broadcast %cst_92 : f32 to vector<2x128xf32>
    %352 = arith.addf %351, %350 : vector<2x128xf32>
    %353 = arith.divf %351, %352 : vector<2x128xf32>
    %354 = vector.extract_strided_slice %344 {offsets = [0, 128], sizes = [2, 128], strides = [1, 1]} : vector<2x384xf32> to vector<2x128xf32>
    %355 = vector.extract_strided_slice %343 {offsets = [0, 128], sizes = [2, 128], strides = [1, 1]} : vector<2x768xf32> to vector<2x128xf32>
    %356 = arith.addf %354, %355 : vector<2x128xf32>
    %357 = arith.negf %356 : vector<2x128xf32>
    %358 = math.exp %357 : vector<2x128xf32>
    %cst_93 = arith.constant 1.000000e+00 : f32
    %359 = vector.broadcast %cst_93 : f32 to vector<2x128xf32>
    %360 = arith.addf %359, %358 : vector<2x128xf32>
    %361 = arith.divf %359, %360 : vector<2x128xf32>
    %362 = vector.extract_strided_slice %344 {offsets = [0, 256], sizes = [2, 128], strides = [1, 1]} : vector<2x384xf32> to vector<2x128xf32>
    %363 = vector.extract_strided_slice %343 {offsets = [0, 256], sizes = [2, 128], strides = [1, 1]} : vector<2x768xf32> to vector<2x128xf32>
    %364 = arith.addf %363, %11 : vector<2x128xf32>
    %365 = arith.mulf %353, %364 : vector<2x128xf32>
    %366 = arith.addf %362, %365 : vector<2x128xf32>
    %367 = math.tanh %366 : vector<2x128xf32>
    %cst_94 = arith.constant 1.000000e+00 : f32
    %368 = vector.broadcast %cst_94 : f32 to vector<2x128xf32>
    %369 = arith.subf %368, %361 : vector<2x128xf32>
    %370 = arith.mulf %369, %367 : vector<2x128xf32>
    %371 = arith.mulf %361, %307 : vector<2x128xf32>
    %372 = arith.addf %370, %371 : vector<2x128xf32>
    %373 = vector.extract_strided_slice %345 {offsets = [0, 0], sizes = [2, 128], strides = [1, 1]} : vector<2x384xf32> to vector<2x128xf32>
    %374 = vector.extract_strided_slice %343 {offsets = [0, 384], sizes = [2, 128], strides = [1, 1]} : vector<2x768xf32> to vector<2x128xf32>
    %375 = arith.addf %373, %374 : vector<2x128xf32>
    %376 = arith.negf %375 : vector<2x128xf32>
    %377 = math.exp %376 : vector<2x128xf32>
    %cst_95 = arith.constant 1.000000e+00 : f32
    %378 = vector.broadcast %cst_95 : f32 to vector<2x128xf32>
    %379 = arith.addf %378, %377 : vector<2x128xf32>
    %380 = arith.divf %378, %379 : vector<2x128xf32>
    %381 = vector.extract_strided_slice %345 {offsets = [0, 128], sizes = [2, 128], strides = [1, 1]} : vector<2x384xf32> to vector<2x128xf32>
    %382 = vector.extract_strided_slice %343 {offsets = [0, 512], sizes = [2, 128], strides = [1, 1]} : vector<2x768xf32> to vector<2x128xf32>
    %383 = arith.addf %381, %382 : vector<2x128xf32>
    %384 = arith.negf %383 : vector<2x128xf32>
    %385 = math.exp %384 : vector<2x128xf32>
    %cst_96 = arith.constant 1.000000e+00 : f32
    %386 = vector.broadcast %cst_96 : f32 to vector<2x128xf32>
    %387 = arith.addf %386, %385 : vector<2x128xf32>
    %388 = arith.divf %386, %387 : vector<2x128xf32>
    %389 = vector.extract_strided_slice %345 {offsets = [0, 256], sizes = [2, 128], strides = [1, 1]} : vector<2x384xf32> to vector<2x128xf32>
    %390 = vector.extract_strided_slice %343 {offsets = [0, 640], sizes = [2, 128], strides = [1, 1]} : vector<2x768xf32> to vector<2x128xf32>
    %391 = arith.addf %390, %14 : vector<2x128xf32>
    %392 = arith.mulf %380, %391 : vector<2x128xf32>
    %393 = arith.addf %389, %392 : vector<2x128xf32>
    %394 = math.tanh %393 : vector<2x128xf32>
    %cst_97 = arith.constant 1.000000e+00 : f32
    %395 = vector.broadcast %cst_97 : f32 to vector<2x128xf32>
    %396 = arith.subf %395, %388 : vector<2x128xf32>
    %397 = arith.mulf %396, %394 : vector<2x128xf32>
    %398 = arith.mulf %388, %334 : vector<2x128xf32>
    %399 = arith.addf %397, %398 : vector<2x128xf32>
    %400 = vector.shape_cast %372 : vector<2x128xf32> to vector<1x2x128xf32>
    %401 = arith.truncf %400 : vector<1x2x128xf32> to vector<1x2x128xbf16>
    %c5_98 = arith.constant 5 : index
    %c0_99 = arith.constant 0 : index
    %c0_100 = arith.constant 0 : index
    %402 = vector.load %arg6[%c5_98, %c0_99, %c0_100] : memref<8x2x256xbf16, #tpu.memory_space<vmem>>, vector<1x2x128xbf16>
    tpu.vector_store %arg6[%c5_98, %c0_99, %c0_100], %401 {strides = array<i32>} : memref<8x2x256xbf16, #tpu.memory_space<vmem>>, vector<1x2x128xbf16>,
    %403 = vector.shape_cast %399 : vector<2x128xf32> to vector<1x2x128xf32>
    %404 = arith.truncf %403 : vector<1x2x128xf32> to vector<1x2x128xbf16>
    %c2_101 = arith.constant 2 : index
    %c0_102 = arith.constant 0 : index
    %c128_103 = arith.constant 128 : index
    %405 = vector.load %arg6[%c2_101, %c0_102, %c128_103] : memref<8x2x256xbf16, #tpu.memory_space<vmem>>, vector<1x2x128xbf16>
    tpu.vector_store %arg6[%c2_101, %c0_102, %c128_103], %404 {strides = array<i32>} : memref<8x2x256xbf16, #tpu.memory_space<vmem>>, vector<1x2x128xbf16>,
    %406 = tpu.concatenate %372, %399 in 1 : vector<2x128xf32>, vector<2x128xf32> -> vector<2x256xf32>
    %407 = arith.truncf %406 : vector<2x256xf32> to vector<2x256xbf16>
    %cst_104 = arith.constant dense<0.000000e+00> : vector<2x768xf32>
    %408 = tpu.matmul %407, %8, %cst_104 {dimension_numbers = #tpu.dot_dimension_numbers<[1], [0], [0], [1], [0, 0, 1, 1], [], []>} : vector<2x256xbf16>, vector<256x768xbf16>, vector<2x768xf32> -> vector<2x768xf32>
    %c12_105 = arith.constant 12 : index
    %c0_106 = arith.constant 0 : index
    %409 = vector.load %arg8[%c12_105, %c0_106] : memref<16x768xf32, #tpu.memory_space<vmem>>, vector<2x384xf32>
    %c2_107 = arith.constant 2 : index
    %c384_108 = arith.constant 384 : index
    %410 = vector.load %arg8[%c2_107, %c384_108] : memref<16x768xf32, #tpu.memory_space<vmem>>, vector<2x384xf32>
    %411 = vector.extract_strided_slice %409 {offsets = [0, 0], sizes = [2, 128], strides = [1, 1]} : vector<2x384xf32> to vector<2x128xf32>
    %412 = vector.extract_strided_slice %408 {offsets = [0, 0], sizes = [2, 128], strides = [1, 1]} : vector<2x768xf32> to vector<2x128xf32>
    %413 = arith.addf %411, %412 : vector<2x128xf32>
    %414 = arith.negf %413 : vector<2x128xf32>
    %415 = math.exp %414 : vector<2x128xf32>
    %cst_109 = arith.constant 1.000000e+00 : f32
    %416 = vector.broadcast %cst_109 : f32 to vector<2x128xf32>
    %417 = arith.addf %416, %415 : vector<2x128xf32>
    %418 = arith.divf %416, %417 : vector<2x128xf32>
    %419 = vector.extract_strided_slice %409 {offsets = [0, 128], sizes = [2, 128], strides = [1, 1]} : vector<2x384xf32> to vector<2x128xf32>
    %420 = vector.extract_strided_slice %408 {offsets = [0, 128], sizes = [2, 128], strides = [1, 1]} : vector<2x768xf32> to vector<2x128xf32>
    %421 = arith.addf %419, %420 : vector<2x128xf32>
    %422 = arith.negf %421 : vector<2x128xf32>
    %423 = math.exp %422 : vector<2x128xf32>
    %cst_110 = arith.constant 1.000000e+00 : f32
    %424 = vector.broadcast %cst_110 : f32 to vector<2x128xf32>
    %425 = arith.addf %424, %423 : vector<2x128xf32>
    %426 = arith.divf %424, %425 : vector<2x128xf32>
    %427 = vector.extract_strided_slice %409 {offsets = [0, 256], sizes = [2, 128], strides = [1, 1]} : vector<2x384xf32> to vector<2x128xf32>
    %428 = vector.extract_strided_slice %408 {offsets = [0, 256], sizes = [2, 128], strides = [1, 1]} : vector<2x768xf32> to vector<2x128xf32>
    %429 = arith.addf %428, %11 : vector<2x128xf32>
    %430 = arith.mulf %418, %429 : vector<2x128xf32>
    %431 = arith.addf %427, %430 : vector<2x128xf32>
    %432 = math.tanh %431 : vector<2x128xf32>
    %cst_111 = arith.constant 1.000000e+00 : f32
    %433 = vector.broadcast %cst_111 : f32 to vector<2x128xf32>
    %434 = arith.subf %433, %426 : vector<2x128xf32>
    %435 = arith.mulf %434, %432 : vector<2x128xf32>
    %436 = arith.mulf %426, %372 : vector<2x128xf32>
    %437 = arith.addf %435, %436 : vector<2x128xf32>
    %438 = vector.extract_strided_slice %410 {offsets = [0, 0], sizes = [2, 128], strides = [1, 1]} : vector<2x384xf32> to vector<2x128xf32>
    %439 = vector.extract_strided_slice %408 {offsets = [0, 384], sizes = [2, 128], strides = [1, 1]} : vector<2x768xf32> to vector<2x128xf32>
    %440 = arith.addf %438, %439 : vector<2x128xf32>
    %441 = arith.negf %440 : vector<2x128xf32>
    %442 = math.exp %441 : vector<2x128xf32>
    %cst_112 = arith.constant 1.000000e+00 : f32
    %443 = vector.broadcast %cst_112 : f32 to vector<2x128xf32>
    %444 = arith.addf %443, %442 : vector<2x128xf32>
    %445 = arith.divf %443, %444 : vector<2x128xf32>
    %446 = vector.extract_strided_slice %410 {offsets = [0, 128], sizes = [2, 128], strides = [1, 1]} : vector<2x384xf32> to vector<2x128xf32>
    %447 = vector.extract_strided_slice %408 {offsets = [0, 512], sizes = [2, 128], strides = [1, 1]} : vector<2x768xf32> to vector<2x128xf32>
    %448 = arith.addf %446, %447 : vector<2x128xf32>
    %449 = arith.negf %448 : vector<2x128xf32>
    %450 = math.exp %449 : vector<2x128xf32>
    %cst_113 = arith.constant 1.000000e+00 : f32
    %451 = vector.broadcast %cst_113 : f32 to vector<2x128xf32>
    %452 = arith.addf %451, %450 : vector<2x128xf32>
    %453 = arith.divf %451, %452 : vector<2x128xf32>
    %454 = vector.extract_strided_slice %410 {offsets = [0, 256], sizes = [2, 128], strides = [1, 1]} : vector<2x384xf32> to vector<2x128xf32>
    %455 = vector.extract_strided_slice %408 {offsets = [0, 640], sizes = [2, 128], strides = [1, 1]} : vector<2x768xf32> to vector<2x128xf32>
    %456 = arith.addf %455, %14 : vector<2x128xf32>
    %457 = arith.mulf %445, %456 : vector<2x128xf32>
    %458 = arith.addf %454, %457 : vector<2x128xf32>
    %459 = math.tanh %458 : vector<2x128xf32>
    %cst_114 = arith.constant 1.000000e+00 : f32
    %460 = vector.broadcast %cst_114 : f32 to vector<2x128xf32>
    %461 = arith.subf %460, %453 : vector<2x128xf32>
    %462 = arith.mulf %461, %459 : vector<2x128xf32>
    %463 = arith.mulf %453, %399 : vector<2x128xf32>
    %464 = arith.addf %462, %463 : vector<2x128xf32>
    %465 = vector.shape_cast %437 : vector<2x128xf32> to vector<1x2x128xf32>
    %466 = arith.truncf %465 : vector<1x2x128xf32> to vector<1x2x128xbf16>
    %c6_115 = arith.constant 6 : index
    %c0_116 = arith.constant 0 : index
    %c0_117 = arith.constant 0 : index
    %467 = vector.load %arg6[%c6_115, %c0_116, %c0_117] : memref<8x2x256xbf16, #tpu.memory_space<vmem>>, vector<1x2x128xbf16>
    tpu.vector_store %arg6[%c6_115, %c0_116, %c0_117], %466 {strides = array<i32>} : memref<8x2x256xbf16, #tpu.memory_space<vmem>>, vector<1x2x128xbf16>,
    %468 = vector.shape_cast %464 : vector<2x128xf32> to vector<1x2x128xf32>
    %469 = arith.truncf %468 : vector<1x2x128xf32> to vector<1x2x128xbf16>
    %c1_118 = arith.constant 1 : index
    %c0_119 = arith.constant 0 : index
    %c128_120 = arith.constant 128 : index
    %470 = vector.load %arg6[%c1_118, %c0_119, %c128_120] : memref<8x2x256xbf16, #tpu.memory_space<vmem>>, vector<1x2x128xbf16>
    tpu.vector_store %arg6[%c1_118, %c0_119, %c128_120], %469 {strides = array<i32>} : memref<8x2x256xbf16, #tpu.memory_space<vmem>>, vector<1x2x128xbf16>,
    %471 = tpu.concatenate %437, %464 in 1 : vector<2x128xf32>, vector<2x128xf32> -> vector<2x256xf32>
    %472 = arith.truncf %471 : vector<2x256xf32> to vector<2x256xbf16>
    %cst_121 = arith.constant dense<0.000000e+00> : vector<2x768xf32>
    %473 = tpu.matmul %472, %8, %cst_121 {dimension_numbers = #tpu.dot_dimension_numbers<[1], [0], [0], [1], [0, 0, 1, 1], [], []>} : vector<2x256xbf16>, vector<256x768xbf16>, vector<2x768xf32> -> vector<2x768xf32>
    %c14_122 = arith.constant 14 : index
    %c0_123 = arith.constant 0 : index
    %474 = vector.load %arg8[%c14_122, %c0_123] : memref<16x768xf32, #tpu.memory_space<vmem>>, vector<2x384xf32>
    %c0_124 = arith.constant 0 : index
    %c384_125 = arith.constant 384 : index
    %475 = vector.load %arg8[%c0_124, %c384_125] : memref<16x768xf32, #tpu.memory_space<vmem>>, vector<2x384xf32>
    %476 = vector.extract_strided_slice %474 {offsets = [0, 0], sizes = [2, 128], strides = [1, 1]} : vector<2x384xf32> to vector<2x128xf32>
    %477 = vector.extract_strided_slice %473 {offsets = [0, 0], sizes = [2, 128], strides = [1, 1]} : vector<2x768xf32> to vector<2x128xf32>
    %478 = arith.addf %476, %477 : vector<2x128xf32>
    %479 = arith.negf %478 : vector<2x128xf32>
    %480 = math.exp %479 : vector<2x128xf32>
    %cst_126 = arith.constant 1.000000e+00 : f32
    %481 = vector.broadcast %cst_126 : f32 to vector<2x128xf32>
    %482 = arith.addf %481, %480 : vector<2x128xf32>
    %483 = arith.divf %481, %482 : vector<2x128xf32>
    %484 = vector.extract_strided_slice %474 {offsets = [0, 128], sizes = [2, 128], strides = [1, 1]} : vector<2x384xf32> to vector<2x128xf32>
    %485 = vector.extract_strided_slice %473 {offsets = [0, 128], sizes = [2, 128], strides = [1, 1]} : vector<2x768xf32> to vector<2x128xf32>
    %486 = arith.addf %484, %485 : vector<2x128xf32>
    %487 = arith.negf %486 : vector<2x128xf32>
    %488 = math.exp %487 : vector<2x128xf32>
    %cst_127 = arith.constant 1.000000e+00 : f32
    %489 = vector.broadcast %cst_127 : f32 to vector<2x128xf32>
    %490 = arith.addf %489, %488 : vector<2x128xf32>
    %491 = arith.divf %489, %490 : vector<2x128xf32>
    %492 = vector.extract_strided_slice %474 {offsets = [0, 256], sizes = [2, 128], strides = [1, 1]} : vector<2x384xf32> to vector<2x128xf32>
    %493 = vector.extract_strided_slice %473 {offsets = [0, 256], sizes = [2, 128], strides = [1, 1]} : vector<2x768xf32> to vector<2x128xf32>
    %494 = arith.addf %493, %11 : vector<2x128xf32>
    %495 = arith.mulf %483, %494 : vector<2x128xf32>
    %496 = arith.addf %492, %495 : vector<2x128xf32>
    %497 = math.tanh %496 : vector<2x128xf32>
    %cst_128 = arith.constant 1.000000e+00 : f32
    %498 = vector.broadcast %cst_128 : f32 to vector<2x128xf32>
    %499 = arith.subf %498, %491 : vector<2x128xf32>
    %500 = arith.mulf %499, %497 : vector<2x128xf32>
    %501 = arith.mulf %491, %437 : vector<2x128xf32>
    %502 = arith.addf %500, %501 : vector<2x128xf32>
    %503 = vector.extract_strided_slice %475 {offsets = [0, 0], sizes = [2, 128], strides = [1, 1]} : vector<2x384xf32> to vector<2x128xf32>
    %504 = vector.extract_strided_slice %473 {offsets = [0, 384], sizes = [2, 128], strides = [1, 1]} : vector<2x768xf32> to vector<2x128xf32>
    %505 = arith.addf %503, %504 : vector<2x128xf32>
    %506 = arith.negf %505 : vector<2x128xf32>
    %507 = math.exp %506 : vector<2x128xf32>
    %cst_129 = arith.constant 1.000000e+00 : f32
    %508 = vector.broadcast %cst_129 : f32 to vector<2x128xf32>
    %509 = arith.addf %508, %507 : vector<2x128xf32>
    %510 = arith.divf %508, %509 : vector<2x128xf32>
    %511 = vector.extract_strided_slice %475 {offsets = [0, 128], sizes = [2, 128], strides = [1, 1]} : vector<2x384xf32> to vector<2x128xf32>
    %512 = vector.extract_strided_slice %473 {offsets = [0, 512], sizes = [2, 128], strides = [1, 1]} : vector<2x768xf32> to vector<2x128xf32>
    %513 = arith.addf %511, %512 : vector<2x128xf32>
    %514 = arith.negf %513 : vector<2x128xf32>
    %515 = math.exp %514 : vector<2x128xf32>
    %cst_130 = arith.constant 1.000000e+00 : f32
    %516 = vector.broadcast %cst_130 : f32 to vector<2x128xf32>
    %517 = arith.addf %516, %515 : vector<2x128xf32>
    %518 = arith.divf %516, %517 : vector<2x128xf32>
    %519 = vector.extract_strided_slice %475 {offsets = [0, 256], sizes = [2, 128], strides = [1, 1]} : vector<2x384xf32> to vector<2x128xf32>
    %520 = vector.extract_strided_slice %473 {offsets = [0, 640], sizes = [2, 128], strides = [1, 1]} : vector<2x768xf32> to vector<2x128xf32>
    %521 = arith.addf %520, %14 : vector<2x128xf32>
    %522 = arith.mulf %510, %521 : vector<2x128xf32>
    %523 = arith.addf %519, %522 : vector<2x128xf32>
    %524 = math.tanh %523 : vector<2x128xf32>
    %cst_131 = arith.constant 1.000000e+00 : f32
    %525 = vector.broadcast %cst_131 : f32 to vector<2x128xf32>
    %526 = arith.subf %525, %518 : vector<2x128xf32>
    %527 = arith.mulf %526, %524 : vector<2x128xf32>
    %528 = arith.mulf %518, %464 : vector<2x128xf32>
    %529 = arith.addf %527, %528 : vector<2x128xf32>
    %530 = vector.shape_cast %502 : vector<2x128xf32> to vector<1x2x128xf32>
    %531 = arith.truncf %530 : vector<1x2x128xf32> to vector<1x2x128xbf16>
    %c7_132 = arith.constant 7 : index
    %c0_133 = arith.constant 0 : index
    %c0_134 = arith.constant 0 : index
    %532 = vector.load %arg6[%c7_132, %c0_133, %c0_134] : memref<8x2x256xbf16, #tpu.memory_space<vmem>>, vector<1x2x128xbf16>
    tpu.vector_store %arg6[%c7_132, %c0_133, %c0_134], %531 {strides = array<i32>} : memref<8x2x256xbf16, #tpu.memory_space<vmem>>, vector<1x2x128xbf16>,
    %533 = vector.shape_cast %529 : vector<2x128xf32> to vector<1x2x128xf32>
    %534 = arith.truncf %533 : vector<1x2x128xf32> to vector<1x2x128xbf16>
    %c0_135 = arith.constant 0 : index
    %c0_136 = arith.constant 0 : index
    %c128_137 = arith.constant 128 : index
    %535 = vector.load %arg6[%c0_135, %c0_136, %c128_137] : memref<8x2x256xbf16, #tpu.memory_space<vmem>>, vector<1x2x128xbf16>
    tpu.vector_store %arg6[%c0_135, %c0_136, %c128_137], %534 {strides = array<i32>} : memref<8x2x256xbf16, #tpu.memory_space<vmem>>, vector<1x2x128xbf16>,
    %536 = tpu.concatenate %502, %529 in 1 : vector<2x128xf32>, vector<2x128xf32> -> vector<2x256xf32>
    %c0_138 = arith.constant 0 : index
    %c0_139 = arith.constant 0 : index
    %537 = vector.load %arg7[%c0_138, %c0_139] : memref<2x256xf32, #tpu.memory_space<vmem>>, vector<2x256xf32>
    tpu.vector_store %arg7[%c0_138, %c0_139], %536 {strides = array<i32>} : memref<2x256xf32, #tpu.memory_space<vmem>>, vector<2x256xf32>,
    return
  }
  func.func @transform_0(%arg0: i32) -> (i32, i32, i32) {
    %c0_i32 = arith.constant 0 : i32
    %c0_i32_0 = arith.constant 0 : i32
    %c0_i32_1 = arith.constant 0 : i32
    return %c0_i32, %arg0, %c0_i32_0 : i32, i32, i32
  }
  func.func @transform_1(%arg0: i32) -> (i32, i32) {
    %c0_i32 = arith.constant 0 : i32
    %c0_i32_0 = arith.constant 0 : i32
    %c0_i32_1 = arith.constant 0 : i32
    return %c0_i32, %c0_i32_0 : i32, i32
  }
  func.func @transform_2(%arg0: i32) -> (i32, i32) {
    %c0_i32 = arith.constant 0 : i32
    %c0_i32_0 = arith.constant 0 : i32
    %c0_i32_1 = arith.constant 0 : i32
    return %c0_i32, %c0_i32_0 : i32, i32
  }
  func.func @transform_3(%arg0: i32) -> (i32, i32) {
    %c0_i32 = arith.constant 0 : i32
    %c0_i32_0 = arith.constant 0 : i32
    %c0_i32_1 = arith.constant 0 : i32
    return %c0_i32, %c0_i32_0 : i32, i32
  }
  func.func @transform_4(%arg0: i32) -> (i32, i32) {
    %c0_i32 = arith.constant 0 : i32
    %c0_i32_0 = arith.constant 0 : i32
    %c0_i32_1 = arith.constant 0 : i32
    return %c0_i32, %c0_i32_0 : i32, i32
  }
  func.func @transform_5(%arg0: i32) -> (i32, i32, i32) {
    %c0_i32 = arith.constant 0 : i32
    %c0_i32_0 = arith.constant 0 : i32
    %c0_i32_1 = arith.constant 0 : i32
    return %c0_i32, %arg0, %c0_i32_0 : i32, i32, i32
  }
  func.func @transform_6(%arg0: i32) -> (i32, i32) {
    %c0_i32 = arith.constant 0 : i32
    %c0_i32_0 = arith.constant 0 : i32
    return %arg0, %c0_i32 : i32, i32
  }
}

</mosaic_0001>

<bundles_post_ra>
// kernel: _lambda_.2
= control target key start
LH: loop header
LB: loop body
LE: loop exit
PB: predicated region body
PF: predicated region fallthrough
CT: control target
= control target key end

     0   :  { %v3790_v2 = vmov 0   ;;  %v82_v18 = vlaneseq  ;;  %v3791_v19 = vmov 1966171168   ;;  %s6464_s0 = inlined_call_operand.vmem [shape: bf16[8,2,128], index: 0, kind: input, shape index: {}]   ;;  %s6465_s1 = inlined_call_operand.vmem [shape: bf16[128,768], index: 1, kind: input, shape index: {}]   ;;  %s6466_s2 = inlined_call_operand.vmem [shape: bf16[256,768], index: 2, kind: input, shape index: {}]   ;;  %s6467_s3 = inlined_call_operand.vmem [shape: f32[1,768], index: 3, kind: input, shape index: {}]   ;;  %s6468_s4 = inlined_call_operand.vmem [shape: f32[1,256], index: 4, kind: input, shape index: {}]   ;;  %s6469_s5 = inlined_call_operand.vmem [shape: bf16[8,2,256], index: 5, kind: output, shape index: {0}]   ;;  %s6470_s6 = inlined_call_operand.hbm [shape: f32[2,256], index: 6, kind: output, shape index: {1}]  }
   0x1   :  { %v3196_v0 = vld [vmem:[%s6465_s1 + $0x154] ss:$24 sps:$4 sm:$0xff]   ;;  %485 = vmatprep.mubr.bf16.mxu1 %v3790_v2  ;;  %442 = vmatprep.mubr.bf16.mxu0 %v3790_v2  ;;  %v3200_v3 = vld [vmem:[%s6465_s1 + $0x150] ss:$24 sps:$4 sm:$0xff]   ;;  %v3202_v5 = vld [vmem:[%s6465_s1 + $0x124] ss:$24 sps:$4 sm:$0xff]   ;;  %v125_v20 = vunpack.c.l.s4 %v3791_v19 }
   0x2   :  { %v3198_v1 = vld [vmem:[%s6465_s1 + $0x15c] ss:$24 sps:$4 sm:$0xff]   ;;  %410 = vmatprep.subr.bf16.mxu0 %v3196_v0  ;;  %v3201_v4 = vld [vmem:[%s6465_s1 + $0x158] ss:$24 sps:$4 sm:$0xff]   ;;  %v3204_v6 = vld [vmem:[%s6465_s1 + $0x12c] ss:$24 sps:$4 sm:$0xff]  }
   0x3   :  { %453 = vmatprep.subr.bf16.mxu1 %v3198_v1  ;;  %411 = vmatpush1.bf16.msra.mxu0 %v3200_v3  ;;  %v3206_v7 = vld [vmem:[%s6465_s1 + $0x120] ss:$24 sps:$4 sm:$0xff]   ;;  %v3208_v9 = vld [vmem:[%s6465_s1 + $0xf4] ss:$24 sps:$4 sm:$0xff]   ;;  %v3212_v11 = vld [vmem:[%s6465_s1 + $0xf0] ss:$24 sps:$4 sm:$0xff]   ;;  %v126_v26 = vunpack.c.0.s8 %v125_v20 }
   0x4   :  { %454 = vmatpush1.bf16.msra.mxu1 %v3201_v4  ;;  %412 = vmatprep.subr.bf16.mxu0 %v3202_v5  ;;  %v3207_v8 = vld [vmem:[%s6465_s1 + $0x128] ss:$24 sps:$4 sm:$0xff]   ;;  %v3210_v10 = vld [vmem:[%s6465_s1 + $0xfc] ss:$24 sps:$4 sm:$0xff]   ;;  %v3213_v12 = vld [vmem:[%s6465_s1 + $0xf8] ss:$24 sps:$4 sm:$0xff]  }
   0x5   :  { %455 = vmatprep.subr.bf16.mxu1 %v3204_v6  ;;  %v3214_v13 = vld [vmem:[%s6465_s1 + $0xc4] ss:$24 sps:$4 sm:$0xff]   ;;  %v3218_v15 = vld [vmem:[%s6465_s1 + $0xc0] ss:$24 sps:$4 sm:$0xff]   ;;  %v3220_v17 = vld [vmem:[%s6465_s1 + $0x94] ss:$24 sps:$4 sm:$0xff]  }
   0x6   :  { %v3216_v14 = vld [vmem:[%s6465_s1 + $0xcc] ss:$24 sps:$4 sm:$0xff]   ;;  %v3219_v16 = vld [vmem:[%s6465_s1 + $0xc8] ss:$24 sps:$4 sm:$0xff]   ;;  %v3222_v21 = vld [vmem:[%s6465_s1 + $0x9c] ss:$24 sps:$4 sm:$0xff]  }
   0x7   :  { %413 = vmatpush1.bf16.msra.mxu0 %v3206_v7  ;;  %v3224_v22 = vld [vmem:[%s6465_s1 + $0x90] ss:$24 sps:$4 sm:$0xff]   ;;  %v3226_v24 = vld [vmem:[%s6465_s1 + $0x64] ss:$24 sps:$4 sm:$0xff]   ;;  %v3895_v25 = vshrl.u32 %v82_v18, 7  ;;  %v6471_v7 = vmov 0.0|0.0  }
   0x8   :  { %456 = vmatpush1.bf16.msra.mxu1 %v3207_v8  ;;  %414 = vmatprep.subr.bf16.mxu0 %v3208_v9  ;;  %v3225_v23 = vld [vmem:[%s6465_s1 + $0x98] ss:$24 sps:$4 sm:$0xff]   ;;  %v3228_v27 = vld [vmem:[%s6465_s1 + $0x6c] ss:$24 sps:$4 sm:$0xff]   ;;  %v3231_v29 = vld [vmem:[%s6465_s1 + $0x68] ss:$24 sps:$4 sm:$0xff]  }
   0x9   :  { %457 = vmatprep.subr.bf16.mxu1 %v3210_v10  ;;  %6665 = vst [vmem:[#allocation6_spill] sm:$0xff] %v3895_v25  ;;  %v3230_v28 = vld [vmem:[%s6465_s1 + $0x60] ss:$24 sps:$4 sm:$0xff]   ;;  %v3232_v30 = vld [vmem:[%s6465_s1 + $0x34] ss:$24 sps:$4 sm:$0xff]   ;;  %v3910_v31 = vsub.s32 %v126_v26, %v3895_v25 }
   0xa   :  { %v3234_v32 = vld [vmem:[%s6465_s1 + $0x3c] ss:$24 sps:$4 sm:$0xff]   ;;  %v24_v33 = vld [vmem:[%s6464_s0] sm:$0x1]  ;;  %v25_v34 = vld [vmem:[%s6464_s0 + $0x1] sm:$0x1] }
   0xb   :  { %415 = vmatpush1.bf16.msra.mxu0 %v3212_v11  ;;  %6666 = vst [vmem:[#allocation7_spill] sm:$0xff] %v3910_v31  ;;  %v3236_v35 = vld [vmem:[%s6465_s1 + $0x30] ss:$24 sps:$4 sm:$0xff]   ;;  %v26_v37 = vld [vmem:[%s6464_s0 + $0x2] sm:$0x1]  ;;  %v120_v40 = vcombine.low %v24_v33, %v25_v34 }
   0xc   :  { %458 = vmatpush1.bf16.msra.mxu1 %v3213_v12  ;;  %416 = vmatprep.subr.bf16.mxu0 %v3214_v13  ;;  %v3237_v36 = vld [vmem:[%s6465_s1 + $0x38] ss:$24 sps:$4 sm:$0xff]   ;;  %v27_v38 = vld [vmem:[%s6464_s0 + $0x3] sm:$0x1]  ;;  %v28_v39 = vld [vmem:[%s6464_s0 + $0x4] sm:$0x1] }
   0xd   :  { %459 = vmatprep.subr.bf16.mxu1 %v3216_v14  ;;  %v29_v41 = vld [vmem:[%s6464_s0 + $0x5] sm:$0x1]  ;;  %v30_v42 = vld [vmem:[%s6464_s0 + $0x6] sm:$0x1]  ;;  %v31_v43 = vld [vmem:[%s6464_s0 + $0x7] sm:$0x1]  ;;  %v121_v44 = vcombine.low %v26_v37, %v27_v38  ;;  %v130_v48 = vrot.slane %v120_v40, %v3910_v31 }
   0xe   :  { %v3238_v45 = vld [vmem:[%s6465_s1 + $0x4] ss:$24 sps:$4 sm:$0xff]   ;;  %v122_v46 = vcombine.low %v28_v39, %v29_v41  ;;  %v123_v47 = vcombine.low %v30_v42, %v31_v43  ;;  %v3242_v53 = vld [vmem:[%s6465_s1] ss:$24 sps:$4 sm:$0xff]   ;;  %v3968_v59 = vld [vmem:[%s6466_s2 + $0x154] ss:$24 sps:$4 sm:$0xff]  }
   0xf   :  { %417 = vmatpush1.bf16.msra.mxu0 %v3218_v15  ;;  %v3240_v49 = vld [vmem:[%s6465_s1 + $0xc] ss:$24 sps:$4 sm:$0xff]   ;;  %v137_v50 = vrot.slane %v121_v44, %v3910_v31  ;;  %v3243_v54 = vld [vmem:[%s6465_s1 + $0x8] ss:$24 sps:$4 sm:$0xff]   ;;  %v4130_v34 = vld [vmem:[%s6466_s2 + $0x158] ss:$24 sps:$4 sm:$0xff]  }
  0x10   :  { %460 = vmatpush1.bf16.msra.mxu1 %v3219_v16  ;;  %418 = vmatprep.subr.bf16.mxu0 %v3220_v17  ;;  %v144_v51 = vrot.slane %v122_v46, %v3910_v31  ;;  %v151_v52 = vrot.slane %v123_v47, %v3910_v31  ;;  %v3246_v57 = vld [vmem:[%s6465_s1 + $0x164] ss:$24 sps:$4 sm:$0xff]   ;;  %v3244_v61 = vld [vmem:[%s6465_s1 + $0x160] ss:$24 sps:$4 sm:$0xff]   ;;  %v3977_v62 = vld [vmem:[%s6466_s2 + $0x150] ss:$24 sps:$4 sm:$0xff]  }
  0x11   :  { %461 = vmatprep.subr.bf16.mxu1 %v3222_v21  ;;  %v152_v55 = vcombine.low %v130_v48, %v137_v50  ;;  %v3252_v0 = vld [vmem:[%s6465_s1 + $0x134] ss:$24 sps:$4 sm:$0xff]   ;;  %v3988_v1 = vld [vmem:[%s6466_s2 + $0x124] ss:$24 sps:$4 sm:$0xff]   ;;  %v3250_v3 = vld [vmem:[%s6465_s1 + $0x130] ss:$24 sps:$4 sm:$0xff]  }
  0x12   :  { %v153_v56 = vcombine.low %v144_v51, %v151_v52  ;;  %v3998_v4 = vld [vmem:[%s6466_s2 + $0x120] ss:$24 sps:$4 sm:$0xff]   ;;  %v3258_v5 = vld [vmem:[%s6465_s1 + $0x104] ss:$24 sps:$4 sm:$0xff]   ;;  %v4008_v6 = vld [vmem:[%s6466_s2 + $0xf4] ss:$24 sps:$4 sm:$0xff]  }
  0x13   :  { %419 = vmatpush1.bf16.msra.mxu0 %v3224_v22  ;;  %v160_v58 = vrot.slane %v152_v55, %v3910_v31  ;;  %v3256_v8 = vld [vmem:[%s6465_s1 + $0x100] ss:$24 sps:$4 sm:$0xff]   ;;  %v4018_v9 = vld [vmem:[%s6466_s2 + $0xf0] ss:$24 sps:$4 sm:$0xff]   ;;  %v3264_v10 = vld [vmem:[%s6465_s1 + $0xd4] ss:$24 sps:$4 sm:$0xff]  }
  0x14   :  { %462 = vmatpush1.bf16.msra.mxu1 %v3225_v23  ;;  %420 = vmatprep.subr.bf16.mxu0 %v3226_v24  ;;  %v167_v60 = vrot.slane %v153_v56, %v3910_v31  ;;  %v3262_v11 = vld [vmem:[%s6465_s1 + $0xd0] ss:$24 sps:$4 sm:$0xff]   ;;  %v4036_v12 = vld [vmem:[%s6466_s2 + $0xc0] ss:$24 sps:$4 sm:$0xff]   ;;  %v3270_v13 = vld [vmem:[%s6465_s1 + $0xa4] ss:$24 sps:$4 sm:$0xff]  }
  0x15   :  { %463 = vmatprep.subr.bf16.mxu1 %v3228_v27  ;;  %v4046_v14 = vld [vmem:[%s6466_s2 + $0x94] ss:$24 sps:$4 sm:$0xff]   ;;  %v3268_v15 = vld [vmem:[%s6465_s1 + $0xa0] ss:$24 sps:$4 sm:$0xff]   ;;  %v4054_v16 = vld [vmem:[%s6466_s2 + $0x90] ss:$24 sps:$4 sm:$0xff]  }
  0x16   :  { %v3979_v63 = vcombine.low %v160_v58, %v167_v60  ;;  %v3276_v17 = vld [vmem:[%s6465_s1 + $0x74] ss:$24 sps:$4 sm:$0xff]   ;;  %v4064_v18 = vld [vmem:[%s6466_s2 + $0x64] ss:$24 sps:$4 sm:$0xff]   ;;  %v3274_v19 = vld [vmem:[%s6465_s1 + $0x70] ss:$24 sps:$4 sm:$0xff]  }
  0x17   :  { %421 = vmatpush1.bf16.msra.mxu0 %v3230_v28  ;;  %v4073_v20 = vld [vmem:[%s6466_s2 + $0x60] ss:$24 sps:$4 sm:$0xff]   ;;  %v3282_v21 = vld [vmem:[%s6465_s1 + $0x44] ss:$24 sps:$4 sm:$0xff]   ;;  %v4082_v22 = vld [vmem:[%s6466_s2 + $0x34] ss:$24 sps:$4 sm:$0xff]  }
  0x18   :  { %464 = vmatpush1.bf16.msra.mxu1 %v3231_v29  ;;  %422 = vmatprep.subr.bf16.mxu0 %v3232_v30  ;;  %v3280_v23 = vld [vmem:[%s6465_s1 + $0x40] ss:$24 sps:$4 sm:$0xff]   ;;  %v4090_v24 = vld [vmem:[%s6466_s2 + $0x30] ss:$24 sps:$4 sm:$0xff]   ;;  %v3288_v26 = vld [vmem:[%s6465_s1 + $0x14] ss:$24 sps:$4 sm:$0xff]  }
  0x19   :  { %465 = vmatprep.subr.bf16.mxu1 %v3234_v32  ;;  %v4100_v27 = vld [vmem:[%s6466_s2 + $0x4] ss:$24 sps:$4 sm:$0xff]   ;;  %v3286_v28 = vld [vmem:[%s6465_s1 + $0x10] ss:$24 sps:$4 sm:$0xff]   ;;  %v4109_v29 = vld [vmem:[%s6466_s2] ss:$24 sps:$4 sm:$0xff]  }
  0x1a   :  { %v4114_v30 = vld [vmem:[%s6466_s2 + $0x2d4] ss:$24 sps:$4 sm:$0xff]   ;;  %v4125_v33 = vld [vmem:[%s6466_s2 + $0x2d0] ss:$24 sps:$4 sm:$0xff]   ;;  %v4149_v37 = vld [vmem:[%s6466_s2 + $0x2a0] ss:$24 sps:$4 sm:$0xff]  }
  0x1b   :  { %423 = vmatpush1.bf16.msra.mxu0 %v3236_v35  ;;  %v4120_v32 = vld [vmem:[%s6466_s2 + $0x15c] ss:$24 sps:$4 sm:$0xff]   ;;  %v4156_v38 = vld [vmem:[%s6466_s2 + $0x128] ss:$24 sps:$4 sm:$0xff]   ;;  %v4179_v42 = vld [vmem:[%s6466_s2 + $0xf8] ss:$24 sps:$4 sm:$0xff]  }
  0x1c   :  { %466 = vmatpush1.bf16.msra.mxu1 %v3237_v36  ;;  %424 = vmatprep.subr.bf16.mxu0 %v3238_v45  ;;  %v4136_v35 = vld [vmem:[%s6466_s2 + $0x2a4] ss:$24 sps:$4 sm:$0xff]   ;;  %v4161_v39 = vld [vmem:[%s6466_s2 + $0x274] ss:$24 sps:$4 sm:$0xff]   ;;  %v4174_v41 = vld [vmem:[%s6466_s2 + $0x270] ss:$24 sps:$4 sm:$0xff]  }
  0x1d   :  { %467 = vmatprep.subr.bf16.mxu1 %v3240_v49  ;;  %v4143_v36 = vld [vmem:[%s6466_s2 + $0x12c] ss:$24 sps:$4 sm:$0xff]   ;;  %v4168_v40 = vld [vmem:[%s6466_s2 + $0xfc] ss:$24 sps:$4 sm:$0xff]   ;;  %v4198_v45 = vld [vmem:[%s6466_s2 + $0x240] ss:$24 sps:$4 sm:$0xff]  }
  0x1e   :  { %v4186_v43 = vld [vmem:[%s6466_s2 + $0x244] ss:$24 sps:$4 sm:$0xff]   ;;  %v4205_v46 = vld [vmem:[%s6466_s2 + $0xc8] ss:$24 sps:$4 sm:$0xff]   ;;  %v4210_v47 = vld [vmem:[%s6466_s2 + $0x214] ss:$24 sps:$4 sm:$0xff]  }
  0x1f   :  { %425 = vmatpush1.bf16.msra.mxu0 %v3242_v53  ;;  %v4193_v44 = vld [vmem:[%s6466_s2 + $0xcc] ss:$24 sps:$4 sm:$0xff]   ;;  %6668 = vst [vmem:[#allocation9_spill] sm:$0xff] %v4205_v46  ;;  %v4217_v48 = vld [vmem:[%s6466_s2 + $0x9c] ss:$24 sps:$4 sm:$0xff]  }
  0x20   :  { %468 = vmatpush1.bf16.msra.mxu1 %v3243_v54  ;;  %496 = vmatprep.subr.bf16.mxu0 %v3246_v57  ;;  %6667 = vst [vmem:[#allocation8_spill] sm:$0xff] %v4193_v44  ;;  %6669 = vst [vmem:[#allocation10_spill] sm:$0xff] %v4217_v48  ;;  %v4222_v49 = vld [vmem:[%s6466_s2 + $0x210] ss:$24 sps:$4 sm:$0xff]   ;;  %v4234_v51 = vld [vmem:[%s6466_s2 + $0x1e4] ss:$24 sps:$4 sm:$0xff]  }
  0x21   :  { %1142 = vmatprep.subr.bf16.mxu1 %v3968_v59  ;;  %v4227_v50 = vld [vmem:[%s6466_s2 + $0x98] ss:$24 sps:$4 sm:$0xff]   ;;  %v4241_v52 = vld [vmem:[%s6466_s2 + $0x6c] ss:$24 sps:$4 sm:$0xff]   ;;  %v4253_v54 = vld [vmem:[%s6466_s2 + $0x68] ss:$24 sps:$4 sm:$0xff]  }
  0x22   :  { %443 = vmatmul.mubr.bf16.vlgmr.msra.gmra.mxu0 %v3979_v63  ;;  %6670 = vst [vmem:[#allocation11_spill] sm:$0xff] %v4227_v50  ;;  %6671 = vst [vmem:[#allocation12_spill] sm:$0xff] %v4241_v52  ;;  %v4246_v53 = vld [vmem:[%s6466_s2 + $0x1e0] ss:$24 sps:$4 sm:$0xff]   ;;  %v4258_v55 = vld [vmem:[%s6466_s2 + $0x1b4] ss:$24 sps:$4 sm:$0xff]  }
  0x23   :  { %486 = vmatmul.mubr.bf16.vlgmr.msra.gmra.mxu1 %v3979_v63  ;;  %497 = vmatpush1.bf16.msra.mxu0 %v3244_v61  ;;  %6672 = vst [vmem:[#allocation13_spill] sm:$0xff] %v4253_v54  ;;  %v4265_v56 = vld [vmem:[%s6466_s2 + $0x3c] ss:$24 sps:$4 sm:$0xff]   ;;  %v4270_v57 = vld [vmem:[%s6466_s2 + $0x1b0] ss:$24 sps:$4 sm:$0xff]  }
  0x24   :  { %1143 = vmatpush1.bf16.msra.mxu1 %v3977_v62  ;;  %498 = vmatprep.subr.bf16.mxu0 %v3252_v0  ;;  %6673 = vst [vmem:[#allocation14_spill] sm:$0xff] %v4265_v56  ;;  %v4275_v58 = vld [vmem:[%s6466_s2 + $0x38] ss:$24 sps:$4 sm:$0xff]   ;;  %v4282_v60 = vld [vmem:[%s6466_s2 + $0x184] ss:$24 sps:$4 sm:$0xff]  }
  0x25   :  { %1144 = vmatprep.subr.bf16.mxu1 %v3988_v1  ;;  %528 = vmatprep.mubr.bf16.mxu0 %v3790_v2  ;;  %v4028_v2 = vld [vmem:[%s6466_s2 + $0xc4] ss:$24 sps:$4 sm:$0xff]   ;;  %6674 = vst [vmem:[#allocation15_spill] sm:$0xff] %v4275_v58  ;;  %v4299_v0 = vld [vmem:[%s6466_s2 + $0x8] ss:$24 sps:$4 sm:$0xff]  }
  0x26   :  { %1174 = vmatprep.mubr.bf16.mxu1 %v6471_v7  ;;  %v4289_v61 = vld [vmem:[%s6466_s2 + $0xc] ss:$24 sps:$4 sm:$0xff]   ;;  %6676 = vst [vmem:[#allocation17_spill] sm:$0xff] %v4299_v0 }
  0x27   :  { %499 = vmatpush1.bf16.msra.mxu0 %v3250_v3  ;;  %6675 = vst [vmem:[#allocation16_spill] sm:$0xff] %v4289_v61  ;;  %v4306_v3 = vld [vmem:[%s6466_s2 + $0x2dc] ss:$24 sps:$4 sm:$0xff]  }
  0x28   :  { %1145 = vmatpush1.bf16.msra.mxu1 %v3998_v4  ;;  %500 = vmatprep.subr.bf16.mxu0 %v3258_v5  ;;  %6677 = vst [vmem:[#allocation18_spill] sm:$0xff] %v4306_v3  ;;  %v4313_v5 = vld [vmem:[%s6466_s2 + $0x164] ss:$24 sps:$4 sm:$0xff]  }
  0x29   :  { %1146 = vmatprep.subr.bf16.mxu1 %v4008_v6 }
  0x2b   :  { %501 = vmatpush1.bf16.msra.mxu0 %v3256_v8  ;;  %v4318_v8 = vld [vmem:[%s6466_s2 + $0x2d8] ss:$24 sps:$4 sm:$0xff]  }
  0x2c   :  { %1147 = vmatpush1.bf16.msra.mxu1 %v4018_v9  ;;  %502 = vmatprep.subr.bf16.mxu0 %v3264_v10  ;;  %6678 = vst [vmem:[#allocation19_spill] sm:$0xff] %v4318_v8  ;;  %v4323_v10 = vld [vmem:[%s6466_s2 + $0x160] ss:$24 sps:$4 sm:$0xff]  }
  0x2d   :  { %1148 = vmatprep.subr.bf16.mxu1 %v4028_v2  ;;  %6679 = vst [vmem:[#allocation20_spill] sm:$0xff] %v4323_v10 }
  0x2f   :  { %503 = vmatpush1.bf16.msra.mxu0 %v3262_v11  ;;  %v4330_v11 = vld [vmem:[%s6466_s2 + $0x2ac] ss:$24 sps:$4 sm:$0xff]  }
  0x30   :  { %1149 = vmatpush1.bf16.msra.mxu1 %v4036_v12  ;;  %504 = vmatprep.subr.bf16.mxu0 %v3270_v13  ;;  %6680 = vst [vmem:[#allocation21_spill] sm:$0xff] %v4330_v11  ;;  %v4337_v13 = vld [vmem:[%s6466_s2 + $0x134] ss:$24 sps:$4 sm:$0xff]  }
  0x31   :  { %1150 = vmatprep.subr.bf16.mxu1 %v4046_v14  ;;  %6681 = vst [vmem:[#allocation22_spill] sm:$0xff] %v4337_v13 }
  0x33   :  { %505 = vmatpush1.bf16.msra.mxu0 %v3268_v15 }
  0x34   :  { %1151 = vmatpush1.bf16.msra.mxu1 %v4054_v16  ;;  %506 = vmatprep.subr.bf16.mxu0 %v3276_v17 }
  0x35   :  { %1152 = vmatprep.subr.bf16.mxu1 %v4064_v18 }
  0x37   :  { %507 = vmatpush1.bf16.msra.mxu0 %v3274_v19 }
  0x38   :  { %1153 = vmatpush1.bf16.msra.mxu1 %v4073_v20  ;;  %508 = vmatprep.subr.bf16.mxu0 %v3282_v21 }
  0x39   :  { %1154 = vmatprep.subr.bf16.mxu1 %v4082_v22 }
  0x3b   :  { %509 = vmatpush1.bf16.msra.mxu0 %v3280_v23 }
  0x3c   :  { %1155 = vmatpush1.bf16.msra.mxu1 %v4090_v24  ;;  %510 = vmatprep.subr.bf16.mxu0 %v3288_v26 }
  0x3d   :  { %1156 = vmatprep.subr.bf16.mxu1 %v4100_v27 }
  0x3f   :  { %511 = vmatpush1.bf16.msra.mxu0 %v3286_v28 }
  0x40   :  { %1157 = vmatpush1.bf16.msra.mxu1 %v4109_v29  ;;  %1183 = vmatprep.subr.bf16.mxu0 %v4120_v32 }
  0x41   :  { %1158 = vmatprep.subr.bf16.mxu1 %v4114_v30 }
  0x42   :  { %529 = vmatmul.mubr.bf16.vlgmr.msra.gmra.mxu0 %v3979_v63  ;;  %v4294_v63 = vld [vmem:[%s6466_s2 + $0x180] ss:$24 sps:$4 sm:$0xff]  }
  0x43   :  { %1184 = vmatpush1.bf16.msra.mxu0 %v4130_v34  ;;  %1215 = vmatprep.mubr.bf16.mxu0 %v6471_v7 }
  0x44   :  { %1159 = vmatpush2.bf16.msra.mxu1 %v4125_v33  ;;  %1185 = vmatprep.subr.bf16.mxu0 %v4143_v36 }
  0x45   :  { %1160 = vmatprep.subr.bf16.mxu1 %v4136_v35 }
  0x47   :  { %1186 = vmatpush1.bf16.msra.mxu0 %v4156_v38 }
  0x48   :  { %1161 = vmatpush2.bf16.msra.mxu1 %v4149_v37  ;;  %1187 = vmatprep.subr.bf16.mxu0 %v4168_v40 }
  0x49   :  { %1162 = vmatprep.subr.bf16.mxu1 %v4161_v39 }
  0x4b   :  { %1188 = vmatpush1.bf16.msra.mxu0 %v4179_v42 }
  0x4c   :  { %1163 = vmatpush2.bf16.msra.mxu1 %v4174_v41  ;;  %1189 = vmatprep.subr.bf16.mxu0 %v4193_v44 }
  0x4d   :  { %1164 = vmatprep.subr.bf16.mxu1 %v4186_v43 }
  0x4f   :  { %1190 = vmatpush1.bf16.msra.mxu0 %v4205_v46 }
  0x50   :  { %1165 = vmatpush2.bf16.msra.mxu1 %v4198_v45  ;;  %1191 = vmatprep.subr.bf16.mxu0 %v4217_v48 }
  0x51   :  { %1166 = vmatprep.subr.bf16.mxu1 %v4210_v47 }
  0x53   :  { %1192 = vmatpush1.bf16.msra.mxu0 %v4227_v50 }
  0x54   :  { %1167 = vmatpush2.bf16.msra.mxu1 %v4222_v49  ;;  %1193 = vmatprep.subr.bf16.mxu0 %v4241_v52 }
  0x55   :  { %1168 = vmatprep.subr.bf16.mxu1 %v4234_v51 }
  0x57   :  { %1194 = vmatpush1.bf16.msra.mxu0 %v4253_v54 }
  0x58   :  { %1169 = vmatpush2.bf16.msra.mxu1 %v4246_v53  ;;  %1195 = vmatprep.subr.bf16.mxu0 %v4265_v56 }
  0x59   :  { %1170 = vmatprep.subr.bf16.mxu1 %v4258_v55 }
  0x5b   :  { %1196 = vmatpush1.bf16.msra.mxu0 %v4275_v58 }
  0x5c   :  { %1171 = vmatpush2.bf16.msra.mxu1 %v4270_v57  ;;  %1197 = vmatprep.subr.bf16.mxu0 %v4289_v61 }
  0x5d   :  { %1172 = vmatprep.subr.bf16.mxu1 %v4282_v60 }
  0x5f   :  { %1198 = vmatpush1.bf16.msra.mxu0 %v4299_v0 }
  0x60   :  { %1173 = vmatpush2.bf16.msra.mxu1 %v4294_v63  ;;  %1199 = vmatprep.subr.bf16.mxu0 %v4306_v3 }
  0x61   :  { %1224 = vmatprep.subr.bf16.mxu1 %v4313_v5 }
  0x63   :  { %1175 = vmatmul.mubr.bf16.vlgmr.msra.gmra.mxu1 %v6471_v7 }
  0x64   :  { %12 = vsyncpa [#allocation4], 0  ;;  %1200 = vmatpush2.bf16.msra.mxu0 %v4318_v8  ;;  %1225 = vmatpush1.bf16.msra.mxu1 %v4323_v10  ;;  %v4345_v15 = vld [vmem:[%s6466_s2 + $0x2a8] ss:$24 sps:$4 sm:$0xff]   ;;  %v4357_v19 = vld [vmem:[%s6466_s2 + $0x27c] ss:$24 sps:$4 sm:$0xff]  }
  0x65   :  { %6682 = vst [vmem:[#allocation23_spill] sm:$0xff] %v4345_v15  ;;  %v4350_v17 = vld [vmem:[%s6466_s2 + $0x130] ss:$24 sps:$4 sm:$0xff]   ;;  %1201 = vmatprep.subr.bf16.mxu0 %v4330_v11  ;;  %1226 = vmatprep.subr.bf16.mxu1 %v4337_v13  ;;  %6684 = vst [vmem:[#allocation25_spill] sm:$0xff] %v4357_v19  ;;  %v4362_v21 = vld [vmem:[%s6466_s2 + $0x104] ss:$24 sps:$4 sm:$0xff]  }
  0x66   :  { %6683 = vst [vmem:[#allocation24_spill] sm:$0xff] %v4350_v17  ;;  %6685 = vst [vmem:[#allocation26_spill] sm:$0xff] %v4362_v21  ;;  %1256 = vmatprep.mubr.bf16.mxu1 %v6471_v7  ;;  %v4370_v23 = vld [vmem:[%s6466_s2 + $0x278] ss:$24 sps:$4 sm:$0xff]   ;;  %v4382_v28 = vld [vmem:[%s6466_s2 + $0x24c] ss:$24 sps:$4 sm:$0xff]  }
  0x67   :  { %6686 = vst [vmem:[#allocation27_spill] sm:$0xff] %v4370_v23  ;;  %v4375_v26 = vld [vmem:[%s6466_s2 + $0x100] ss:$24 sps:$4 sm:$0xff]   ;;  %6688 = vst [vmem:[#allocation29_spill] sm:$0xff] %v4382_v28  ;;  %v4387_v7 = vld [vmem:[%s6466_s2 + $0xd4] ss:$24 sps:$4 sm:$0xff]  }
  0x68   :  { %1202 = vmatpush2.bf16.msra.mxu0 %v4345_v15  ;;  %1227 = vmatpush1.bf16.msra.mxu1 %v4350_v17  ;;  %6687 = vst [vmem:[#allocation28_spill] sm:$0xff] %v4375_v26  ;;  %6689 = vst [vmem:[#allocation30_spill] sm:$0xff] %v4387_v7  ;;  %v4394_v17 = vld [vmem:[%s6466_s2 + $0x248] ss:$24 sps:$4 sm:$0xff]   ;;  %v4406_v13 = vld [vmem:[%s6466_s2 + $0x21c] ss:$24 sps:$4 sm:$0xff]  }
  0x69   :  { %1203 = vmatprep.subr.bf16.mxu0 %v4357_v19  ;;  %1228 = vmatprep.subr.bf16.mxu1 %v4362_v21  ;;  %6690 = vst [vmem:[#allocation31_spill] sm:$0xff] %v4394_v17  ;;  %v4399_v21 = vld [vmem:[%s6466_s2 + $0xd0] ss:$24 sps:$4 sm:$0xff]   ;;  %6692 = vst [vmem:[#allocation33_spill] sm:$0xff] %v4406_v13  ;;  %v4430_v31 = vld [vmem:[%s6466_s2 + $0x1ec] ss:$24 sps:$4 sm:$0xff]  }
  0x6a   :  { %6691 = vst [vmem:[#allocation32_spill] sm:$0xff] %v4399_v21  ;;  %v4418_v10 = vld [vmem:[%s6466_s2 + $0x218] ss:$24 sps:$4 sm:$0xff]   ;;  %6696 = vst [vmem:[#allocation37_spill] sm:$0xff] %v4430_v31  ;;  %v4442_v25 = vld [vmem:[%s6466_s2 + $0x1e8] ss:$24 sps:$4 sm:$0xff]  }
  0x6b   :  { %6694 = vst [vmem:[#allocation35_spill] sm:$0xff] %v4418_v10  ;;  %6698 = vst [vmem:[#allocation39_spill] sm:$0xff] %v4442_v25  ;;  %s3794_s18 = smov [#allocation3]  }
  0x6c   :  { %1204 = vmatpush2.bf16.msra.mxu0 %v4370_v23  ;;  %1229 = vmatpush1.bf16.msra.mxu1 %v4375_v26  ;;  %v4411_v26 = vld [vmem:[%s6466_s2 + $0xa4] ss:$24 sps:$4 sm:$0xff]   ;;  %s2985_s19 = sshll.u32 %s3794_s18, 4  ;;  %s2986_s19 = int_to_ptr.vmem [resolvable:$true] %s2985_s19 }
  0x6d   :  { %1205 = vmatprep.subr.bf16.mxu0 %v4382_v28  ;;  %1230 = vmatprep.subr.bf16.mxu1 %v4387_v7  ;;  %6693 = vst [vmem:[#allocation34_spill] sm:$0xff] %v4411_v26  ;;  %v4423_v7 = vld [vmem:[%s6466_s2 + $0xa0] ss:$24 sps:$4 sm:$0xff]   ;;  %s3768_s20 = scalar_lea.vmem %s2986_s19, 64  ;;  %p3773_p1 = scmp.lt.s32.totalorder %s2986_s19, %s2986_s19 }
  0x6e   :  { %6695 = vst [vmem:[#allocation36_spill] sm:$0xff] %v4423_v7  ;;  %p3769_p0 = scmp.ne.s32.totalorder %s2986_s19, %s3768_s20  ;;  %p3774_p2 = scmp.lt.s32.totalorder %s3768_s20, %s3768_s20 }
  0x70   :  { %1206 = vmatpush2.bf16.msra.mxu0 %v4394_v17  ;;  %1231 = vmatpush1.bf16.msra.mxu1 %v4399_v21  ;;  %v4435_v21 = vld [vmem:[%s6466_s2 + $0x74] ss:$24 sps:$4 sm:$0xff]   ;;  %p3775_p3 = por %p3774_p2, %p3773_p1 }
  0x71   :  { %1207 = vmatprep.subr.bf16.mxu0 %v4406_v13  ;;  %1232 = vmatprep.subr.bf16.mxu1 %v4411_v26  ;;  %6697 = vst [vmem:[#allocation38_spill] sm:$0xff] %v4435_v21  ;;  %v4447_v26 = vld [vmem:[%s6466_s2 + $0x70] ss:$24 sps:$4 sm:$0xff]  }
  0x72   :  { %6699 = vst [vmem:[#allocation40_spill] sm:$0xff] %v4447_v26  ;;  %p3776_p4 = pnand %p3775_p3, %p3769_p0 }
  0x74   :  { %1208 = vmatpush2.bf16.msra.mxu0 %v4418_v10  ;;  %1233 = vmatpush1.bf16.msra.mxu1 %v4423_v7  ;;  %v4454_v10 = vld [vmem:[%s6466_s2 + $0x1bc] ss:$24 sps:$4 sm:$0xff]  }
  0x75   :  { %1209 = vmatprep.subr.bf16.mxu0 %v4430_v31  ;;  %1234 = vmatprep.subr.bf16.mxu1 %v4435_v21  ;;  %6700 = vst [vmem:[#allocation41_spill] sm:$0xff] %v4454_v10  ;;  %v4459_v7 = vld [vmem:[%s6466_s2 + $0x44] ss:$24 sps:$4 sm:$0xff]   ;;  %v4466_v31 = vld [vmem:[%s6466_s2 + $0x1b8] ss:$24 sps:$4 sm:$0xff]  }
  0x76   :  { %6701 = vst [vmem:[#allocation42_spill] sm:$0xff] %v4459_v7  ;;  %6702 = vst [vmem:[#allocation43_spill] sm:$0xff] %v4466_v31  ;;  %v4471_v21 = vld [vmem:[%s6466_s2 + $0x40] ss:$24 sps:$4 sm:$0xff]  }
  0x77   :  { %6703 = vst [vmem:[#allocation44_spill] sm:$0xff] %v4471_v21 }
  0x78   :  { %1210 = vmatpush2.bf16.msra.mxu0 %v4442_v25  ;;  %1235 = vmatpush1.bf16.msra.mxu1 %v4447_v26  ;;  %v4478_v25 = vld [vmem:[%s6466_s2 + $0x18c] ss:$24 sps:$4 sm:$0xff]  }
  0x79   :  { %1211 = vmatprep.subr.bf16.mxu0 %v4454_v10  ;;  %1236 = vmatprep.subr.bf16.mxu1 %v4459_v7  ;;  %6704 = vst [vmem:[#allocation45_spill] sm:$0xff] %v4478_v25  ;;  %v4483_v26 = vld [vmem:[%s6466_s2 + $0x14] ss:$24 sps:$4 sm:$0xff]   ;;  %v4490_v10 = vld [vmem:[%s6466_s2 + $0x188] ss:$24 sps:$4 sm:$0xff]  }
  0x7a   :  { %6705 = vst [vmem:[#allocation46_spill] sm:$0xff] %v4483_v26  ;;  %6706 = vst [vmem:[#allocation47_spill] sm:$0xff] %v4490_v10  ;;  %v4495_v7 = vld [vmem:[%s6466_s2 + $0x10] ss:$24 sps:$4 sm:$0xff]  }
  0x7b   :  { %6707 = vst [vmem:[#allocation48_spill] sm:$0xff] %v4495_v7 }
  0x7c   :  { %1212 = vmatpush2.bf16.msra.mxu0 %v4466_v31  ;;  %1237 = vmatpush1.bf16.msra.mxu1 %v4471_v21  ;;  %v4502_v31 = vld [vmem:[%s6466_s2 + $0x2e4] ss:$24 sps:$4 sm:$0xff]   ;;  %v4509_v21 = vld [vmem:[%s6466_s2 + $0x2e0] ss:$24 sps:$4 sm:$0xff]  }
  0x7d   :  { %1213 = vmatprep.subr.bf16.mxu0 %v4478_v25  ;;  %1238 = vmatprep.subr.bf16.mxu1 %v4483_v26  ;;  %6708 = vst [vmem:[#allocation49_spill] sm:$0xff] %v4502_v31  ;;  %6709 = vst [vmem:[#allocation50_spill] sm:$0xff] %v4509_v21  ;;  %v4515_v26 = vld [vmem:[%s6466_s2 + $0x2b4] ss:$24 sps:$4 sm:$0xff]   ;;  %v6710_v25 = vmov 0.0|0.0  }
  0x80   :  { %1214 = vmatpush2.bf16.msra.mxu0 %v4490_v10  ;;  %1239 = vmatpush1.bf16.msra.mxu1 %v4495_v7  ;;  %v4523_v7 = vld [vmem:[%s6466_s2 + $0x2b0] ss:$24 sps:$4 sm:$0xff]  }
  0x81   :  { %1240 = vmatprep.subr.bf16.mxu1 %v4502_v31  ;;  %1351 = vmatprep.subr.bf16.mxu0 %v3968_v59  ;;  %v4530_v31 = vld [vmem:[%s6466_s2 + $0x284] ss:$24 sps:$4 sm:$0xff]  }
  0x83   :  { %1216 = vmatmul.mubr.bf16.vlgmr.msra.gmra.mxu0 %v6710_v25 }
  0x84   :  { %1241 = vmatpush2.bf16.msra.mxu1 %v4509_v21  ;;  %1352 = vmatpush1.bf16.msra.mxu0 %v3977_v62  ;;  %v4537_v21 = vld [vmem:[%s6466_s2 + $0x280] ss:$24 sps:$4 sm:$0xff]   ;;  %v4544_v62 = vld [vmem:[%s6466_s2 + $0x254] ss:$24 sps:$4 sm:$0xff]  }
  0x85   :  { %1242 = vmatprep.subr.bf16.mxu1 %v4515_v26  ;;  %1353 = vmatprep.subr.bf16.mxu0 %v3988_v1  ;;  %v4551_v1 = vld [vmem:[%s6466_s2 + $0x250] ss:$24 sps:$4 sm:$0xff]  }
  0x86   :  { %6711 = vst [vmem:[#allocation51_spill] sm:$0xff] %v4551_v1 }
  0x88   :  { %1243 = vmatpush2.bf16.msra.mxu1 %v4523_v7  ;;  %1354 = vmatpush1.bf16.msra.mxu0 %v3998_v4  ;;  %v4558_v4 = vld [vmem:[%s6466_s2 + $0x224] ss:$24 sps:$4 sm:$0xff]  }
  0x89   :  { %1244 = vmatprep.subr.bf16.mxu1 %v4530_v31  ;;  %1355 = vmatprep.subr.bf16.mxu0 %v4008_v6  ;;  %6712 = vst [vmem:[#allocation52_spill] sm:$0xff] %v4558_v4  ;;  %v4565_v6 = vld [vmem:[%s6466_s2 + $0x220] ss:$24 sps:$4 sm:$0xff]  }
  0x8a   :  { %6713 = vst [vmem:[#allocation53_spill] sm:$0xff] %v4565_v6 }
  0x8c   :  { %1245 = vmatpush2.bf16.msra.mxu1 %v4537_v21  ;;  %1356 = vmatpush1.bf16.msra.mxu0 %v4018_v9  ;;  %v4572_v9 = vld [vmem:[%s6466_s2 + $0x1f4] ss:$24 sps:$4 sm:$0xff]  }
  0x8d   :  { %1246 = vmatprep.subr.bf16.mxu1 %v4544_v62  ;;  %1357 = vmatprep.subr.bf16.mxu0 %v4028_v2  ;;  %6714 = vst [vmem:[#allocation54_spill] sm:$0xff] %v4572_v9 }
  0x90   :  { %1247 = vmatpush2.bf16.msra.mxu1 %v4551_v1  ;;  %1358 = vmatpush1.bf16.msra.mxu0 %v4036_v12  ;;  %v4579_v1 = vld [vmem:[%s6466_s2 + $0x1f0] ss:$24 sps:$4 sm:$0xff]  }
  0x91   :  { %1248 = vmatprep.subr.bf16.mxu1 %v4558_v4  ;;  %1359 = vmatprep.subr.bf16.mxu0 %v4046_v14  ;;  %6715 = vst [vmem:[#allocation55_spill] sm:$0xff] %v4579_v1  ;;  %v4586_v4 = vld [vmem:[%s6466_s2 + $0x1c4] ss:$24 sps:$4 sm:$0xff]  }
  0x94   :  { %1249 = vmatpush2.bf16.msra.mxu1 %v4565_v6  ;;  %1360 = vmatpush1.bf16.msra.mxu0 %v4054_v16  ;;  %v4593_v6 = vld [vmem:[%s6466_s2 + $0x1c0] ss:$24 sps:$4 sm:$0xff]  }
  0x95   :  { %1250 = vmatprep.subr.bf16.mxu1 %v4572_v9  ;;  %1361 = vmatprep.subr.bf16.mxu0 %v4064_v18  ;;  %v4600_v9 = vld [vmem:[%s6466_s2 + $0x194] ss:$24 sps:$4 sm:$0xff]  }
  0x98   :  { %1251 = vmatpush2.bf16.msra.mxu1 %v4579_v1  ;;  %1362 = vmatpush1.bf16.msra.mxu0 %v4073_v20  ;;  %v4607_v1 = vld [vmem:[%s6466_s2 + $0x190] ss:$24 sps:$4 sm:$0xff]  }
  0x99   :  { %1252 = vmatprep.subr.bf16.mxu1 %v4586_v4  ;;  %1363 = vmatprep.subr.bf16.mxu0 %v4082_v22 }
  0x9c   :  { %1253 = vmatpush2.bf16.msra.mxu1 %v4593_v6  ;;  %1364 = vmatpush1.bf16.msra.mxu0 %v4090_v24 }
  0x9d   :  { %1254 = vmatprep.subr.bf16.mxu1 %v4600_v9  ;;  %1365 = vmatprep.subr.bf16.mxu0 %v4100_v27 }
  0xa0   :  { %1255 = vmatpush2.bf16.msra.mxu1 %v4607_v1  ;;  %1366 = vmatpush1.bf16.msra.mxu0 %v4109_v29 }
  0xa1   :  { %1392 = vmatprep.subr.bf16.mxu1 %v4120_v32  ;;  %1367 = vmatprep.subr.bf16.mxu0 %v4114_v30 }
  0xa3   :  { %1257 = vmatmul.mubr.bf16.vlgmr.msra.gmra.mxu1 %v6710_v25  ;;  %v6716_v25 = vld [vmem:[#allocation35_spill] sm:$0xff] }
  0xa4   :  { %1393 = vmatpush1.bf16.msra.mxu1 %v4130_v34  ;;  %1368 = vmatpush2.bf16.msra.mxu0 %v4125_v33 }
  0xa5   :  { %1394 = vmatprep.subr.bf16.mxu1 %v4143_v36  ;;  %1369 = vmatprep.subr.bf16.mxu0 %v4136_v35 }
  0xa8   :  { %1395 = vmatpush1.bf16.msra.mxu1 %v4156_v38  ;;  %1370 = vmatpush2.bf16.msra.mxu0 %v4149_v37 }
  0xa9   :  { %1396 = vmatprep.subr.bf16.mxu1 %v4168_v40  ;;  %1371 = vmatprep.subr.bf16.mxu0 %v4161_v39 }
  0xac   :  { %1397 = vmatpush1.bf16.msra.mxu1 %v4179_v42  ;;  %1372 = vmatpush2.bf16.msra.mxu0 %v4174_v41 }
  0xad   :  { %1398 = vmatprep.subr.bf16.mxu1 %v4193_v44  ;;  %1373 = vmatprep.subr.bf16.mxu0 %v4186_v43 }
  0xb0   :  { %1399 = vmatpush1.bf16.msra.mxu1 %v4205_v46  ;;  %1374 = vmatpush2.bf16.msra.mxu0 %v4198_v45 }
  0xb1   :  { %1400 = vmatprep.subr.bf16.mxu1 %v4217_v48  ;;  %1375 = vmatprep.subr.bf16.mxu0 %v4210_v47 }
  0xb4   :  { %1401 = vmatpush1.bf16.msra.mxu1 %v4227_v50  ;;  %1376 = vmatpush2.bf16.msra.mxu0 %v4222_v49 }
  0xb5   :  { %1402 = vmatprep.subr.bf16.mxu1 %v4241_v52  ;;  %1377 = vmatprep.subr.bf16.mxu0 %v4234_v51 }
  0xb8   :  { %1403 = vmatpush1.bf16.msra.mxu1 %v4253_v54  ;;  %1378 = vmatpush2.bf16.msra.mxu0 %v4246_v53 }
  0xb9   :  { %1404 = vmatprep.subr.bf16.mxu1 %v4265_v56  ;;  %1379 = vmatprep.subr.bf16.mxu0 %v4258_v55 }
  0xbc   :  { %1405 = vmatpush1.bf16.msra.mxu1 %v4275_v58  ;;  %1380 = vmatpush2.bf16.msra.mxu0 %v4270_v57 }
  0xbd   :  { %1406 = vmatprep.subr.bf16.mxu1 %v4289_v61  ;;  %1381 = vmatprep.subr.bf16.mxu0 %v4282_v60  ;;  %v6721_v61 = vld [vmem:[#allocation43_spill] sm:$0xff] }
  0xc0   :  { %1407 = vmatpush1.bf16.msra.mxu1 %v4299_v0  ;;  %1382 = vmatpush2.bf16.msra.mxu0 %v4294_v63  ;;  %v6718_v0 = vld [vmem:[#allocation39_spill] sm:$0xff] }
  0xc1   :  { %1408 = vmatprep.subr.bf16.mxu1 %v4306_v3  ;;  %1433 = vmatprep.subr.bf16.mxu0 %v4313_v5  ;;  %v6717_v3 = vld [vmem:[#allocation37_spill] sm:$0xff] }
  0xc4   :  { %1409 = vmatpush2.bf16.msra.mxu1 %v4318_v8  ;;  %v6719_v8 = vld [vmem:[#allocation41_spill] sm:$0xff] }
  0xc5   :  { %1410 = vmatprep.subr.bf16.mxu1 %v4330_v11  ;;  %v6720_v11 = vld [vmem:[#allocation6_spill] sm:$0xff] }
  0xc8   :  { %1411 = vmatpush2.bf16.msra.mxu1 %v4345_v15  ;;  %v92_v15 = vsub.s32 2, %v6720_v11 }
  0xc9   :  { %1412 = vmatprep.subr.bf16.mxu1 %v4357_v19  ;;  %v84_v19 = vsub.s32 0, %v6720_v11 }
  0xcc   :  { %1413 = vmatpush2.bf16.msra.mxu1 %v4370_v23 }
  0xcd   :  { %1414 = vmatprep.subr.bf16.mxu1 %v4382_v28  ;;  %v6722_v28 = vld [vmem:[#allocation45_spill] sm:$0xff] }
  0xd0   :  { %1415 = vmatpush2.bf16.msra.mxu1 %v4394_v17  ;;  %v80_v17 = vld [vmem:[%s6467_s3] sm:$0x3f] }
  0xd1   :  { %1416 = vmatprep.subr.bf16.mxu1 %v4406_v13  ;;  %v93_v13 = vrot.slane %v80_v17, %v92_v15 }
  0xd4   :  { %1417 = vmatpush2.bf16.msra.mxu1 %v6716_v25  ;;  %v96_v25 = vsub.s32 3, %v6720_v11 }
  0xd5   :  { %1418 = vmatprep.subr.bf16.mxu1 %v6717_v3  ;;  %v88_v3 = vsub.s32 1, %v6720_v11 }
  0xd7   :  { %v89_v23 = vrot.slane %v80_v17, %v88_v3 }
  0xd8   :  { %1419 = vmatpush2.bf16.msra.mxu1 %v6718_v0  ;;  %v85_v0 = vrot.slane %v80_v17, %v84_v19 }
  0xd9   :  { %1420 = vmatprep.subr.bf16.mxu1 %v6719_v8  ;;  %v97_v8 = vrot.slane %v80_v17, %v96_v25 }
  0xdc   :  { %1421 = vmatpush2.bf16.msra.mxu1 %v6721_v61 }
  0xdd   :  { %1422 = vmatprep.subr.bf16.mxu1 %v6722_v28 }
  0xe0   :  { %1423 = vmatpush2.bf16.msra.mxu1 %v4490_v10 }
  0xe1   :  { %1596 = vmatprep.subr.bf16.mxu1 %v3968_v59 }
  0xe2   :  { %v444_v61 = vpop.f32.mrf.mxu0 }
  0xe3   :  { %v487_v58 = vpop.f32.mrf.mxu1  ;;  %v445_v54 = vadd.f32 %v444_v61, %v85_v0 }
  0xe4   :  { %v488_v56 = vadd.f32 %v487_v58, %v93_v13  ;;  %v446_v50 = vpop.f32.mrf.mxu0  ;;  %v100_v58 = vsub.s32 4, %v6720_v11 }
  0xe5   :  { %v489_v52 = vpop.f32.mrf.mxu1  ;;  %539 = vst [vmem:[#allocation2 + $0x30] sm:$0xff] %v445_v54  ;;  %v447_v48 = vadd.f32 %v446_v50, %v89_v23 }
  0xe6   :  { %541 = vst [vmem:[#allocation2 + $0x58] sm:$0xff] %v488_v56  ;;  %v490_v28 = vadd.f32 %v489_v52, %v97_v8  ;;  %v448_v44 = vpop.f32.mrf.mxu0  ;;  %v104_v52 = vsub.s32 5, %v6720_v11  ;;  %v101_v54 = vrot.slane %v80_v17, %v100_v58  ;;  %v6735_v11 = vld [vmem:[#allocation40_spill] sm:$0xff] }
  0xe7   :  { %v491_v46 = vpop.f32.mrf.mxu1  ;;  %540 = vst [vmem:[#allocation2] sm:$0xff] %v447_v48  ;;  %v449_v19 = vadd.f32 %v448_v44, %v85_v0 }
  0xe8   :  { %542 = vst [vmem:[#allocation2 + $0x18] sm:$0xff] %v490_v28  ;;  %v492_v15 = vadd.f32 %v491_v46, %v93_v13  ;;  %v450_v59 = vpop.f32.mrf.mxu0  ;;  %v105_v50 = vrot.slane %v80_v17, %v104_v52 }
  0xe9   :  { %v493_v10 = vpop.f32.mrf.mxu1  ;;  %545 = vst [vmem:[#allocation2 + $0x8] sm:$0xff] %v449_v19  ;;  %v451_v25 = vadd.f32 %v450_v59, %v89_v23 }
  0xea   :  { %547 = vst [vmem:[#allocation2 + $0x28] sm:$0xff] %v492_v15  ;;  %v494_v3 = vadd.f32 %v493_v10, %v97_v8 }
  0xeb   :  { %546 = vst [vmem:[#allocation2 + $0x38] sm:$0xff] %v451_v25 }
  0xec   :  { %548 = vst [vmem:[#allocation2 + $0x48] sm:$0xff] %v494_v3  ;;  %v1265_v13 = vld [vmem:[#allocation2 + $0x30] sm:$0x3] }
  0xee   :  { %v1266_v17 = vld [vmem:[#allocation2] sm:$0x3] }
 0x102   :  { %v530_v56 = vpop.f32.mrf.mxu0 }
 0x103   :  { %v531_v61 = vadd.f32 %v530_v56, %v101_v54 }
 0x104   :  { %v532_v28 = vpop.f32.mrf.mxu0 }
 0x105   :  { %543 = vst [vmem:[#allocation2 + $0x50] sm:$0xff] %v531_v61  ;;  %v533_v46 = vadd.f32 %v532_v28, %v105_v50 }
 0x106   :  { %v534_v44 = vpop.f32.mrf.mxu0 }
 0x107   :  { %544 = vst [vmem:[#allocation2 + $0x20] sm:$0xff] %v533_v46  ;;  %v535_v48 = vadd.f32 %v534_v44, %v101_v54 }
 0x108   :  { %v536_v0 = vpop.f32.mrf.mxu0 }
 0x109   :  { %549 = vst [vmem:[#allocation2 + $0x10] sm:$0xff] %v535_v48  ;;  %v537_v8 = vadd.f32 %v536_v0, %v105_v50  ;;  %v4677_v50 = vld [vmem:[%s6468_s4] ss:$0 sm:$0xff] }
 0x10b   :  { %550 = vst [vmem:[#allocation2 + $0x40] sm:$0xff] %v537_v8 }
 0x123   :  { %v1176_v10 = vpop.f32.mrf.mxu1 }
 0x124   :  { %v1271_v23 = vadd.f32 %v1265_v13, %v1176_v10  ;;  %v1267_v10 = vld [vmem:[#allocation2 + $0x58] sm:$0x3]  ;;  %v1268_v13 = vld [vmem:[#allocation2 + $0x48] sm:$0xc0] }
 0x125   :  { %v1178_v15 = vpop.f32.mrf.mxu1 }
 0x126   :  { %v3141_v19 = vmul.f32 -1.442695, %v1271_v23  ;;  %v1278_v25 = vadd.f32 %v1266_v17, %v1178_v15 }
 0x127   :  { %v1180_v59 = vpop.f32.mrf.mxu1 }
 0x128   :  { %3412 = vpow2.f32 %v3141_v19  ;;  %v3142_v58 = vmul.f32 -1.442695, %v1278_v25 }
 0x129   :  { %v1181_v3 = vpop.f32.mrf.mxu1 }
 0x12a   :  { %3414 = vpow2.f32 %v3142_v58 }
 0x135   :  { %v3413_v52 = vpop.eup %3412 }
 0x136   :  { %v1275_v56 = vadd.f32 1.0, %v3413_v52 }
 0x137   :  { %v3415_v54 = vpop.eup %3414 }
 0x138   :  { %3416 = vrcp.f32 %v1275_v56  ;;  %v1282_v61 = vadd.f32 1.0, %v3415_v54 }
 0x13a   :  { %3418 = vrcp.f32 %v1282_v61 }
 0x143   :  { %v1217_v28 = vpop.f32.mrf.mxu0 }
 0x144   :  { %v1285_v46 = vadd.f32 %v4677_v50, %v1217_v28 }
 0x145   :  { %v3417_v44 = vpop.eup %3416  ;;  %v1219_v48 = vpop.f32.mrf.mxu0 }
 0x146   :  { %v1286_v0 = vmul.f32 %v3417_v44, %v1285_v46  ;;  %v1294_v8 = vrot.slane %v1219_v48, 2 }
 0x147   :  { %v1221_v23 = vpop.f32.mrf.mxu0  ;;  %v3419_v3 = vpop.eup %3418 }
 0x148   :  { %v1287_v15 = vadd.f32 %v1286_v0, %v1267_v10  ;;  %v1296_v19 = vadd.f32 %v1294_v8, %v1268_v13  ;;  %v1289_v25 = vsub.f32 1.0, %v3419_v3  ;;  %v1291_v56 = vmul.f32 0.0, %v3419_v3  ;;  %v1269_v0 = vld [vmem:[#allocation2 + $0x10] sm:$0xc0] }
 0x149   :  { %v1222_v59 = vpop.f32.mrf.mxu0 }
 0x14a   :  { %3420 = vtanh.f32 %v1287_v15  ;;  %v3143_v17 = vmul.f32 -1.442695, %v1296_v19  ;;  %v4693_v15 = vld [vmem:[%s6468_s4 + $0x1] ss:$0 sm:$0xff] }
 0x14c   :  { %3422 = vpow2.f32 %v3143_v17 }
 0x157   :  { %v3421_v58 = vpop.eup %3420 }
 0x158   :  { %v1290_v52 = vmul.f32 %v3421_v58, %v1289_v25 }
 0x159   :  { %v3423_v28 = vpop.eup %3422 }
 0x15a   :  { %v4680_v54 = vadd.f32 %v1291_v56, %v1290_v52  ;;  %v1300_v46 = vadd.f32 1.0, %v3423_v28  ;;  %v1270_v52 = vld [vmem:[#allocation2 + $0x40] sm:$0xc0] }
 0x15c   :  { %v4684_v61 = vpack.c.bf16 %v4680_v54, %v4680_v54  ;;  %3424 = vrcp.f32 %v1300_v46 }
 0x15e   :  { %1325 = vst [vmem:[%s6469_s5] sm:$0x1] %v4684_v61 }
 0x163   :  { %v1258_v44 = vpop.f32.mrf.mxu1 }
 0x164   :  { %v1304_v48 = vrot.slane %v1258_v44, 2 }
 0x165   :  { %v1260_v8 = vpop.f32.mrf.mxu1 }
 0x166   :  { %v1306_v10 = vadd.f32 %v1304_v48, %v1269_v0  ;;  %v1313_v59 = vadd.f32 %v4693_v15, %v1260_v8 }
 0x167   :  { %v1262_v13 = vpop.f32.mrf.mxu1 }
 0x168   :  { %v3144_v23 = vmul.f32 -1.442695, %v1306_v10  ;;  %v1315_v17 = vrot.slane %v1313_v59, 2 }
 0x169   :  { %v1263_v19 = vpop.f32.mrf.mxu1  ;;  %v3425_v3 = vpop.eup %3424 }
 0x16a   :  { %3426 = vpow2.f32 %v3144_v23  ;;  %v1317_v25 = vmul.f32 %v3425_v3, %v1315_v17  ;;  %v6723_v19 = vld [vmem:[#allocation7_spill] sm:$0xff] }
 0x16c   :  { %v1318_v28 = vadd.f32 %v1317_v25, %v1270_v52  ;;  %v6725_v52 = vld [vmem:[#allocation22_spill] sm:$0xff] }
 0x177   :  { %v3427_v58 = vpop.eup %3426 }
 0x178   :  { %v1310_v56 = vadd.f32 1.0, %v3427_v58  ;;  %v6724_v58 = vld [vmem:[#allocation20_spill] sm:$0xff] }
 0x17a   :  { %3428 = vrcp.f32 %v1310_v56  ;;  %v4710_v56 = vld [vmem:[%s6466_s2 + $0x150] ss:$24 sps:$4 sm:$0xff]  }
 0x17b   :  { %3430 = vtanh.f32 %v1318_v28 }
 0x187   :  { %v3429_v46 = vpop.eup %3428 }
 0x188   :  { %v1320_v44 = vsub.f32 1.0, %v3429_v46  ;;  %v3431_v48 = vpop.eup %3430  ;;  %v1322_v10 = vmul.f32 0.0, %v3429_v46  ;;  %v4716_v46 = vld [vmem:[%s6466_s2 + $0x124] ss:$24 sps:$4 sm:$0xff]  }
 0x18a   :  { %v1321_v0 = vmul.f32 %v3431_v48, %v1320_v44  ;;  %v6726_v44 = vld [vmem:[#allocation24_spill] sm:$0xff]  ;;  %v6727_v48 = vld [vmem:[#allocation26_spill] sm:$0xff] }
 0x18c   :  { %v4696_v13 = vadd.f32 %v1322_v10, %v1321_v0  ;;  %v4727_v0 = vld [vmem:[%s6466_s2 + $0x120] ss:$24 sps:$4 sm:$0xff]   ;;  %v4733_v10 = vld [vmem:[%s6466_s2 + $0xf4] ss:$24 sps:$4 sm:$0xff]  }
 0x18e   :  { %v1326_v23 = vpack.c.bf16 %v4696_v13, %v4696_v13  ;;  %v1348_v8 = vrot.slane %v4696_v13, 6 }
 0x190   :  { %v1334_v59 = vrot.slane %v1326_v23, %v6723_v19  ;;  %v1350_v17 = vpack.c.bf16 %v1348_v8, %v1348_v8  ;;  %v6728_v23 = vld [vmem:[#allocation28_spill] sm:$0xff]  ;;  %v6729_v8 = vld [vmem:[#allocation30_spill] sm:$0xff] }
 0x192   :  { %v1335_v3 = vcombine.high %v1334_v59, %v1334_v59  ;;  %1383 = vmatprep.mubr.bf16.mxu0 %v1350_v17  ;;  %1424 = vmatprep.mubr.bf16.mxu1 %v1350_v17  ;;  %v4741_v59 = vld [vmem:[%s6466_s2 + $0xf0] ss:$24 sps:$4 sm:$0xff]  }
 0x193   :  { %1384 = vmatmul.mubr.bf16.vlgmr.msra.gmra.mxu0 %v4684_v61  ;;  %1425 = vmatmul.mubr.bf16.vlgmr.msra.gmra.mxu1 %v4684_v61  ;;  %6730 = vst [vmem:[#allocation7_spill] sm:$0xff] %v4741_v59 }
 0x194   :  { %v1342_v25 = vrot.slane %v1335_v3, %v6723_v19  ;;  %1434 = vmatpush1.bf16.msra.mxu0 %v6724_v58  ;;  %1465 = vmatprep.mubr.bf16.mxu0 %v1350_v17  ;;  %v6731_v17 = vld [vmem:[#allocation32_spill] sm:$0xff]  ;;  %v6732_v3 = vld [vmem:[#allocation34_spill] sm:$0xff] }
 0x195   :  { %1435 = vmatprep.subr.bf16.mxu0 %v6725_v52  ;;  %1597 = vmatpush1.bf16.msra.mxu1 %v4710_v56 }
 0x196   :  { %v1343_v28 = vcombine.high %v1342_v25, %v1342_v25  ;;  %1598 = vmatprep.subr.bf16.mxu1 %v4716_v46  ;;  %v6733_v25 = vld [vmem:[#allocation36_spill] sm:$0xff] }
 0x198   :  { %3145 = vst [vmem:[%s6469_s5 + $0xf] sm:$0x1] %v1343_v28  ;;  %1436 = vmatpush1.bf16.msra.mxu0 %v6726_v44  ;;  %v6734_v28 = vld [vmem:[#allocation38_spill] sm:$0xff] }
 0x199   :  { %1437 = vmatprep.subr.bf16.mxu0 %v6727_v48  ;;  %1599 = vmatpush1.bf16.msra.mxu1 %v4727_v0 }
 0x19a   :  { %1600 = vmatprep.subr.bf16.mxu1 %v4733_v10 }
 0x19c   :  { %1438 = vmatpush1.bf16.msra.mxu0 %v6728_v23 }
 0x19d   :  { %1439 = vmatprep.subr.bf16.mxu0 %v6729_v8  ;;  %1601 = vmatpush1.bf16.msra.mxu1 %v4741_v59  ;;  %v6736_v59 = vld [vmem:[#allocation42_spill] sm:$0xff] }
 0x19e   :  { %1602 = vmatprep.subr.bf16.mxu1 %v4028_v2  ;;  %v6737_v2 = vld [vmem:[#allocation44_spill] sm:$0xff] }
 0x1a0   :  { %1440 = vmatpush1.bf16.msra.mxu0 %v6731_v17 }
 0x1a1   :  { %1441 = vmatprep.subr.bf16.mxu0 %v6732_v3  ;;  %1603 = vmatpush1.bf16.msra.mxu1 %v4036_v12  ;;  %v6738_v12 = vld [vmem:[#allocation46_spill] sm:$0xff] }
 0x1a2   :  { %1604 = vmatprep.subr.bf16.mxu1 %v4046_v14  ;;  %v6739_v14 = vld [vmem:[#allocation48_spill] sm:$0xff] }
 0x1a4   :  { %1442 = vmatpush1.bf16.msra.mxu0 %v6733_v25 }
 0x1a5   :  { %1443 = vmatprep.subr.bf16.mxu0 %v6734_v28  ;;  %1605 = vmatpush1.bf16.msra.mxu1 %v4054_v16  ;;  %v6740_v16 = vld [vmem:[#allocation49_spill] sm:$0xff] }
 0x1a6   :  { %1606 = vmatprep.subr.bf16.mxu1 %v4064_v18  ;;  %v6741_v18 = vld [vmem:[#allocation50_spill] sm:$0xff] }
 0x1a8   :  { %1444 = vmatpush1.bf16.msra.mxu0 %v6735_v11 }
 0x1a9   :  { %1445 = vmatprep.subr.bf16.mxu0 %v6736_v59  ;;  %1607 = vmatpush1.bf16.msra.mxu1 %v4073_v20  ;;  %v6742_v20 = vld [vmem:[#allocation51_spill] sm:$0xff] }
 0x1aa   :  { %1608 = vmatprep.subr.bf16.mxu1 %v4082_v22  ;;  %v6743_v22 = vld [vmem:[#allocation52_spill] sm:$0xff] }
 0x1ac   :  { %1446 = vmatpush1.bf16.msra.mxu0 %v6737_v2 }
 0x1ad   :  { %1447 = vmatprep.subr.bf16.mxu0 %v6738_v12  ;;  %1609 = vmatpush1.bf16.msra.mxu1 %v4090_v24  ;;  %v6744_v24 = vld [vmem:[#allocation53_spill] sm:$0xff] }
 0x1ae   :  { %1610 = vmatprep.subr.bf16.mxu1 %v4100_v27  ;;  %v6745_v27 = vld [vmem:[#allocation54_spill] sm:$0xff] }
 0x1b0   :  { %1448 = vmatpush1.bf16.msra.mxu0 %v6739_v14 }
 0x1b1   :  { %1449 = vmatprep.subr.bf16.mxu0 %v6740_v16  ;;  %1611 = vmatpush1.bf16.msra.mxu1 %v4109_v29  ;;  %v6746_v29 = vld [vmem:[#allocation55_spill] sm:$0xff] }
 0x1b2   :  { %1612 = vmatprep.subr.bf16.mxu1 %v4114_v30  ;;  %v6747_v30 = vld [vmem:[#allocation8_spill] sm:$0xff] }
 0x1b4   :  { %1450 = vmatpush2.bf16.msra.mxu0 %v6741_v18 }
 0x1b5   :  { %1451 = vmatprep.subr.bf16.mxu0 %v4515_v26  ;;  %1613 = vmatpush2.bf16.msra.mxu1 %v4125_v33  ;;  %v6748_v33 = vld [vmem:[#allocation9_spill] sm:$0xff] }
 0x1b6   :  { %1614 = vmatprep.subr.bf16.mxu1 %v4136_v35  ;;  %v6750_v35 = vld [vmem:[#allocation11_spill] sm:$0xff] }
 0x1b8   :  { %1452 = vmatpush2.bf16.msra.mxu0 %v4523_v7 }
 0x1b9   :  { %1453 = vmatprep.subr.bf16.mxu0 %v4530_v31  ;;  %1615 = vmatpush2.bf16.msra.mxu1 %v4149_v37  ;;  %v6751_v37 = vld [vmem:[#allocation12_spill] sm:$0xff] }
 0x1ba   :  { %1616 = vmatprep.subr.bf16.mxu1 %v4161_v39  ;;  %v6752_v39 = vld [vmem:[#allocation13_spill] sm:$0xff] }
 0x1bc   :  { %1454 = vmatpush2.bf16.msra.mxu0 %v4537_v21 }
 0x1bd   :  { %1455 = vmatprep.subr.bf16.mxu0 %v4544_v62  ;;  %1617 = vmatpush2.bf16.msra.mxu1 %v4174_v41  ;;  %v6757_v41 = vld [vmem:[#allocation18_spill] sm:$0xff] }
 0x1be   :  { %1618 = vmatprep.subr.bf16.mxu1 %v4186_v43  ;;  %v6759_v43 = vld [vmem:[#allocation21_spill] sm:$0xff] }
 0x1c0   :  { %1456 = vmatpush2.bf16.msra.mxu0 %v6742_v20 }
 0x1c1   :  { %1457 = vmatprep.subr.bf16.mxu0 %v6743_v22  ;;  %1619 = vmatpush2.bf16.msra.mxu1 %v4198_v45  ;;  %v6760_v45 = vld [vmem:[#allocation23_spill] sm:$0xff] }
 0x1c2   :  { %1620 = vmatprep.subr.bf16.mxu1 %v4210_v47  ;;  %v6761_v47 = vld [vmem:[#allocation25_spill] sm:$0xff] }
 0x1c4   :  { %1458 = vmatpush2.bf16.msra.mxu0 %v6744_v24 }
 0x1c5   :  { %1459 = vmatprep.subr.bf16.mxu0 %v6745_v27  ;;  %1621 = vmatpush2.bf16.msra.mxu1 %v4222_v49  ;;  %v6762_v49 = vld [vmem:[#allocation27_spill] sm:$0xff] }
 0x1c6   :  { %1622 = vmatprep.subr.bf16.mxu1 %v4234_v51  ;;  %v6763_v51 = vld [vmem:[#allocation29_spill] sm:$0xff] }
 0x1c8   :  { %1460 = vmatpush2.bf16.msra.mxu0 %v6746_v29 }
 0x1c9   :  { %1461 = vmatprep.subr.bf16.mxu0 %v4586_v4  ;;  %1623 = vmatpush2.bf16.msra.mxu1 %v4246_v53  ;;  %v6764_v53 = vld [vmem:[#allocation31_spill] sm:$0xff] }
 0x1ca   :  { %1624 = vmatprep.subr.bf16.mxu1 %v4258_v55  ;;  %v6765_v55 = vld [vmem:[#allocation33_spill] sm:$0xff] }
 0x1cc   :  { %1462 = vmatpush2.bf16.msra.mxu0 %v4593_v6 }
 0x1cd   :  { %1463 = vmatprep.subr.bf16.mxu0 %v4600_v9  ;;  %1625 = vmatpush2.bf16.msra.mxu1 %v4270_v57  ;;  %v6766_v57 = vld [vmem:[#allocation35_spill] sm:$0xff] }
 0x1ce   :  { %1626 = vmatprep.subr.bf16.mxu1 %v4282_v60  ;;  %v6767_v60 = vld [vmem:[#allocation37_spill] sm:$0xff] }
 0x1d0   :  { %1464 = vmatpush2.bf16.msra.mxu0 %v4607_v1 }
 0x1d1   :  { %1637 = vmatprep.subr.bf16.mxu0 %v4120_v32  ;;  %1627 = vmatpush2.bf16.msra.mxu1 %v4294_v63  ;;  %v6749_v32 = vld [vmem:[#allocation10_spill] sm:$0xff]  ;;  %v6768_v63 = vld [vmem:[#allocation39_spill] sm:$0xff] }
 0x1d2   :  { %1678 = vmatprep.subr.bf16.mxu1 %v4313_v5  ;;  %v6769_v5 = vld [vmem:[#allocation41_spill] sm:$0xff] }
 0x1d3   :  { %1466 = vmatmul.mubr.bf16.vlgmr.msra.gmra.mxu0 %v4684_v61  ;;  %v6770_v61 = vld [vmem:[#allocation43_spill] sm:$0xff] }
 0x1d4   :  { %1638 = vmatpush1.bf16.msra.mxu0 %v4130_v34  ;;  %v6753_v34 = vld [vmem:[#allocation14_spill] sm:$0xff] }
 0x1d5   :  { %1639 = vmatprep.subr.bf16.mxu0 %v4143_v36  ;;  %v6754_v36 = vld [vmem:[#allocation15_spill] sm:$0xff] }
 0x1d8   :  { %1640 = vmatpush1.bf16.msra.mxu0 %v4156_v38  ;;  %v6755_v38 = vld [vmem:[#allocation16_spill] sm:$0xff] }
 0x1d9   :  { %1641 = vmatprep.subr.bf16.mxu0 %v4168_v40  ;;  %v6756_v40 = vld [vmem:[#allocation17_spill] sm:$0xff] }
 0x1dc   :  { %1642 = vmatpush1.bf16.msra.mxu0 %v4179_v42  ;;  %v6758_v42 = vld [vmem:[#allocation19_spill] sm:$0xff] }
 0x1dd   :  { %1643 = vmatprep.subr.bf16.mxu0 %v6747_v30  ;;  %v6771_v30 = vld [vmem:[#allocation45_spill] sm:$0xff] }
 0x1e0   :  { %1644 = vmatpush1.bf16.msra.mxu0 %v6748_v33  ;;  %v6772_v33 = vld [vmem:[#allocation47_spill] sm:$0xff] }
 0x1e1   :  { %1645 = vmatprep.subr.bf16.mxu0 %v6749_v32  ;;  %v4832_v32 = vld [vmem:[%s6466_s2 + $0x154] ss:$24 sps:$4 sm:$0xff]  }
 0x1e2   :  { %6773 = vst [vmem:[#allocation20_spill] sm:$0xff] %v4832_v32 }
 0x1e4   :  { %1646 = vmatpush1.bf16.msra.mxu0 %v6750_v35 }
 0x1e5   :  { %1647 = vmatprep.subr.bf16.mxu0 %v6751_v37 }
 0x1e8   :  { %1648 = vmatpush1.bf16.msra.mxu0 %v6752_v39 }
 0x1e9   :  { %1649 = vmatprep.subr.bf16.mxu0 %v6753_v34  ;;  %v1474_v34 = vld [vmem:[#allocation2 + $0x30] sm:$0xc] }
 0x1ec   :  { %1650 = vmatpush1.bf16.msra.mxu0 %v6754_v36 }
 0x1ed   :  { %1651 = vmatprep.subr.bf16.mxu0 %v6755_v38 }
 0x1f0   :  { %1652 = vmatpush1.bf16.msra.mxu0 %v6756_v40 }
 0x1f1   :  { %1653 = vmatprep.subr.bf16.mxu0 %v6757_v41 }
 0x1f4   :  { %1654 = vmatpush2.bf16.msra.mxu0 %v6758_v42 }
 0x1f5   :  { %1655 = vmatprep.subr.bf16.mxu0 %v6759_v43 }
 0x1f8   :  { %1656 = vmatpush2.bf16.msra.mxu0 %v6760_v45 }
 0x1f9   :  { %1657 = vmatprep.subr.bf16.mxu0 %v6761_v47 }
 0x1fc   :  { %1658 = vmatpush2.bf16.msra.mxu0 %v6762_v49 }
 0x1fd   :  { %1659 = vmatprep.subr.bf16.mxu0 %v6763_v51  ;;  %v1475_v51 = vld [vmem:[#allocation2] sm:$0xc] }
 0x200   :  { %1660 = vmatpush2.bf16.msra.mxu0 %v6764_v53 }
 0x201   :  { %1661 = vmatprep.subr.bf16.mxu0 %v6765_v55 }
 0x204   :  { %1662 = vmatpush2.bf16.msra.mxu0 %v6766_v57 }
 0x205   :  { %1663 = vmatprep.subr.bf16.mxu0 %v6767_v60 }
 0x208   :  { %1664 = vmatpush2.bf16.msra.mxu0 %v6768_v63 }
 0x209   :  { %1665 = vmatprep.subr.bf16.mxu0 %v6769_v5 }
 0x20c   :  { %1666 = vmatpush2.bf16.msra.mxu0 %v6770_v61 }
 0x20d   :  { %1667 = vmatprep.subr.bf16.mxu0 %v6771_v30 }
 0x210   :  { %1668 = vmatpush2.bf16.msra.mxu0 %v6772_v33 }
 0x211   :  { %1839 = vmatprep.subr.bf16.mxu0 %v4832_v32 }
 0x253   :  { %v1385_v35 = vpop.f32.mrf.mxu0  ;;  %v1426_v37 = vpop.f32.mrf.mxu1 }
 0x254   :  { %v1481_v39 = vrot.slane %v1385_v35, 6  ;;  %v1500_v5 = vadd.f32 %v4677_v50, %v1426_v37 }
 0x255   :  { %v1387_v36 = vpop.f32.mrf.mxu0  ;;  %v1428_v38 = vpop.f32.mrf.mxu1 }
 0x256   :  { %v1483_v40 = vadd.f32 %v1481_v39, %v1474_v34  ;;  %v1491_v45 = vrot.slane %v1387_v36, 6  ;;  %v1502_v30 = vrot.slane %v1500_v5, 6  ;;  %v1515_v33 = vrot.slane %v1428_v38, 4  ;;  %v1476_v34 = vld [vmem:[#allocation2 + $0x58] sm:$0xc] }
 0x257   :  { %v1389_v41 = vpop.f32.mrf.mxu0  ;;  %v1430_v42 = vpop.f32.mrf.mxu1  ;;  %v1477_v36 = vld [vmem:[#allocation2 + $0x48] sm:$0x30] }
 0x258   :  { %v3146_v43 = vmul.f32 -1.442695, %v1483_v40  ;;  %v1493_v53 = vadd.f32 %v1491_v45, %v1475_v51  ;;  %v1517_v41 = vadd.f32 %v1515_v33, %v1477_v36  ;;  %v1510_v45 = vrot.slane %v4680_v54, 6  ;;  %v1478_v54 = vld [vmem:[#allocation2 + $0x10] sm:$0x30] }
 0x259   :  { %v1390_v47 = vpop.f32.mrf.mxu0  ;;  %v1431_v49 = vpop.f32.mrf.mxu1 }
 0x25a   :  { %3432 = vpow2.f32 %v3146_v43  ;;  %v3147_v55 = vmul.f32 -1.442695, %v1493_v53  ;;  %v3148_v42 = vmul.f32 -1.442695, %v1517_v41 }
 0x25c   :  { %3434 = vpow2.f32 %v3147_v55 }
 0x267   :  { %v3433_v57 = vpop.eup %3432 }
 0x268   :  { %v1487_v60 = vadd.f32 1.0, %v3433_v57 }
 0x269   :  { %v3435_v63 = vpop.eup %3434 }
 0x26a   :  { %3436 = vrcp.f32 %v1487_v60  ;;  %v1497_v61 = vadd.f32 1.0, %v3435_v63 }
 0x26c   :  { %3438 = vrcp.f32 %v1497_v61 }
 0x277   :  { %v3437_v35 = vpop.eup %3436 }
 0x278   :  { %v1504_v39 = vmul.f32 %v3437_v35, %v1502_v30 }
 0x279   :  { %v3439_v43 = vpop.eup %3438 }
 0x27a   :  { %v1505_v40 = vadd.f32 %v1504_v39, %v1476_v34  ;;  %v1507_v47 = vsub.f32 1.0, %v3439_v43  ;;  %v1512_v37 = vmul.f32 %v3439_v43, %v1510_v45  ;;  %v1479_v45 = vld [vmem:[#allocation2 + $0x40] sm:$0x30] }
 0x27c   :  { %3440 = vtanh.f32 %v1505_v40 }
 0x27d   :  { %3442 = vpow2.f32 %v3148_v42 }
 0x289   :  { %v3441_v49 = vpop.eup %3440 }
 0x28a   :  { %v1508_v51 = vmul.f32 %v3441_v49, %v1507_v47  ;;  %v3443_v55 = vpop.eup %3442 }
 0x28b   :  { %v1521_v60 = vadd.f32 1.0, %v3443_v55  ;;  %v1543_v55 = vrot.slane %v4696_v13, 2  ;;  %v6774_v13 = vld [vmem:[#allocation7_spill] sm:$0xff] }
 0x28c   :  { %v4837_v53 = vadd.f32 %v1512_v37, %v1508_v51 }
 0x28d   :  { %3444 = vrcp.f32 %v1521_v60 }
 0x28e   :  { %v1547_v38 = vpack.c.bf16 %v4837_v53, %v4837_v53 }
 0x290   :  { %v1555_v57 = vrot.slane %v1547_v38, %v6723_v19 }
 0x292   :  { %v1556_v63 = vcombine.high %v1555_v57, %v1555_v57 }
 0x293   :  { %v1467_v5 = vpop.f32.mrf.mxu0 }
 0x294   :  { %v1525_v61 = vrot.slane %v1467_v5, 4  ;;  %3187 = vst.sshfl [vmem:[%s6469_s5 + $0x2] sm:$0x1 pattern:$0x73625140] %v1556_v63 }
 0x295   :  { %v1469_v30 = vpop.f32.mrf.mxu0 }
 0x296   :  { %v1527_v33 = vadd.f32 %v1525_v61, %v1478_v54  ;;  %v1534_v36 = vadd.f32 %v4693_v15, %v1469_v30 }
 0x297   :  { %v1471_v35 = vpop.f32.mrf.mxu0 }
 0x298   :  { %v3149_v39 = vmul.f32 -1.442695, %v1527_v33  ;;  %v1536_v40 = vrot.slane %v1534_v36, 4 }
 0x299   :  { %v1472_v34 = vpop.f32.mrf.mxu0 }
 0x29a   :  { %3446 = vpow2.f32 %v3149_v39  ;;  %v3445_v41 = vpop.eup %3444  ;;  %v4853_v34 = vrot.slane %v1547_v38, 1  ;;  %v5086_v38 = vld [vmem:[%s6466_s2 + $0xfc] ss:$24 sps:$4 sm:$0xff]  }
 0x29b   :  { %v1538_v42 = vmul.f32 %v3445_v41, %v1536_v40  ;;  %6789 = vst [vmem:[#allocation49_spill] sm:$0xff] %v5086_v38  ;;  %v5092_v40 = vld [vmem:[%s6466_s2 + $0xf8] ss:$24 sps:$4 sm:$0xff]   ;;  %v5098_v41 = vld [vmem:[%s6466_s2 + $0xcc] ss:$24 sps:$4 sm:$0xff]  }
 0x29c   :  { %6790 = vst [vmem:[#allocation50_spill] sm:$0xff] %v5092_v40  ;;  %6791 = vst [vmem:[#allocation51_spill] sm:$0xff] %v5098_v41 }
 0x29d   :  { %v1539_v49 = vadd.f32 %v1538_v42, %v1479_v45  ;;  %v5104_v42 = vld [vmem:[%s6466_s2 + $0xc8] ss:$24 sps:$4 sm:$0xff]   ;;  %v5116_v45 = vld [vmem:[%s6466_s2 + $0x98] ss:$24 sps:$4 sm:$0xff]  }
 0x29e   :  { %6792 = vst [vmem:[#allocation52_spill] sm:$0xff] %v5104_v42  ;;  %6794 = vst [vmem:[#allocation54_spill] sm:$0xff] %v5116_v45 }
 0x2a7   :  { %v3447_v43 = vpop.eup %3446 }
 0x2a8   :  { %v1531_v47 = vadd.f32 1.0, %v3447_v43  ;;  %v5110_v43 = vld [vmem:[%s6466_s2 + $0x9c] ss:$24 sps:$4 sm:$0xff]  }
 0x2a9   :  { %6793 = vst [vmem:[#allocation53_spill] sm:$0xff] %v5110_v43 }
 0x2aa   :  { %3448 = vrcp.f32 %v1531_v47  ;;  %v5122_v47 = vld [vmem:[%s6466_s2 + $0x6c] ss:$24 sps:$4 sm:$0xff]  }
 0x2ab   :  { %3450 = vtanh.f32 %v1539_v49  ;;  %6795 = vst [vmem:[#allocation55_spill] sm:$0xff] %v5122_v47  ;;  %v5128_v49 = vld [vmem:[%s6466_s2 + $0x68] ss:$24 sps:$4 sm:$0xff]  }
 0x2ac   :  { %6796 = vst [vmem:[#allocation8_spill] sm:$0xff] %v5128_v49 }
 0x2b7   :  { %v3449_v51 = vpop.eup %3448 }
 0x2b8   :  { %v1541_v37 = vsub.f32 1.0, %v3449_v51  ;;  %v3451_v57 = vpop.eup %3450  ;;  %v1545_v63 = vmul.f32 %v3449_v51, %v1543_v55  ;;  %v5134_v51 = vld [vmem:[%s6466_s2 + $0x3c] ss:$24 sps:$4 sm:$0xff]   ;;  %v5146_v55 = vld [vmem:[%s6466_s2 + $0xc] ss:$24 sps:$4 sm:$0xff]  }
 0x2b9   :  { %6797 = vst [vmem:[#allocation9_spill] sm:$0xff] %v5134_v51  ;;  %6799 = vst [vmem:[#allocation11_spill] sm:$0xff] %v5146_v55 }
 0x2ba   :  { %v1542_v60 = vmul.f32 %v3451_v57, %v1541_v37  ;;  %v5140_v37 = vld [vmem:[%s6466_s2 + $0x38] ss:$24 sps:$4 sm:$0xff]   ;;  %v5152_v57 = vld [vmem:[%s6466_s2 + $0x8] ss:$24 sps:$4 sm:$0xff]  }
 0x2bb   :  { %6798 = vst [vmem:[#allocation10_spill] sm:$0xff] %v5140_v37  ;;  %6800 = vst [vmem:[#allocation12_spill] sm:$0xff] %v5152_v57 }
 0x2bc   :  { %v1546_v5 = vadd.f32 %v1545_v63, %v1542_v60  ;;  %v5158_v60 = vld [vmem:[%s6466_s2 + $0x2dc] ss:$24 sps:$4 sm:$0xff]   ;;  %v5164_v63 = vld [vmem:[%s6466_s2 + $0x2d8] ss:$24 sps:$4 sm:$0xff]  }
 0x2bd   :  { %6801 = vst [vmem:[#allocation13_spill] sm:$0xff] %v5158_v60  ;;  %6802 = vst [vmem:[#allocation14_spill] sm:$0xff] %v5164_v63 }
 0x2be   :  { %v1567_v61 = vpack.c.bf16 %v1546_v5, %v1546_v5  ;;  %v4847_v54 = vrot.slane %v1546_v5, 2  ;;  %v5170_v5 = vld [vmem:[%s6466_s2 + $0x2ac] ss:$24 sps:$4 sm:$0xff]  }
 0x2bf   :  { %6803 = vst [vmem:[#allocation15_spill] sm:$0xff] %v5170_v5 }
 0x2c0   :  { %v1575_v30 = vrot.slane %v1567_v61, %v6723_v19  ;;  %v1590_v33 = vpack.c.bf16 %v4847_v54, %v4847_v54  ;;  %v5176_v61 = vld [vmem:[%s6466_s2 + $0x2a8] ss:$24 sps:$4 sm:$0xff]  }
 0x2c1   :  { %6804 = vst [vmem:[#allocation16_spill] sm:$0xff] %v5176_v61 }
 0x2c2   :  { %v1582_v35 = vrot.slane %v1575_v30, %v6723_v19  ;;  %v1593_v39 = vrot.slane %v1590_v33, 1  ;;  %v5182_v30 = vld [vmem:[%s6466_s2 + $0x27c] ss:$24 sps:$4 sm:$0xff]   ;;  %v5188_v33 = vld [vmem:[%s6466_s2 + $0x278] ss:$24 sps:$4 sm:$0xff]  }
 0x2c3   :  { %6805 = vst [vmem:[#allocation17_spill] sm:$0xff] %v5182_v30  ;;  %6806 = vst [vmem:[#allocation18_spill] sm:$0xff] %v5188_v33 }
 0x2c4   :  { %v1583_v36 = vcombine.high %v1582_v35, %v1582_v35  ;;  %1628 = vmatprep.mubr.bf16.mxu1 %v1593_v39  ;;  %1669 = vmatprep.mubr.bf16.mxu0 %v1593_v39  ;;  %v5194_v35 = vld [vmem:[%s6466_s2 + $0x24c] ss:$24 sps:$4 sm:$0xff]  }
 0x2c5   :  { %1629 = vmatmul.mubr.bf16.vlgmr.msra.gmra.mxu1 %v4853_v34  ;;  %1670 = vmatmul.mubr.bf16.vlgmr.msra.gmra.mxu0 %v4853_v34  ;;  %6807 = vst [vmem:[#allocation19_spill] sm:$0xff] %v5194_v35 }
 0x2c6   :  { %3151 = vst [vmem:[%s6469_s5 + $0xd] sm:$0x1] %v1583_v36  ;;  %1679 = vmatpush1.bf16.msra.mxu1 %v6724_v58  ;;  %1710 = vmatprep.mubr.bf16.mxu1 %v1593_v39  ;;  %v4874_v58 = vld [vmem:[%s6466_s2 + $0xc4] ss:$24 sps:$4 sm:$0xff]   ;;  %v5200_v39 = vld [vmem:[%s6466_s2 + $0x248] ss:$24 sps:$4 sm:$0xff]  }
 0x2c7   :  { %1680 = vmatprep.subr.bf16.mxu1 %v6725_v52  ;;  %1840 = vmatpush1.bf16.msra.mxu0 %v4710_v56  ;;  %v4882_v52 = vld [vmem:[%s6466_s2 + $0xc0] ss:$24 sps:$4 sm:$0xff]   ;;  %6808 = vst [vmem:[#allocation21_spill] sm:$0xff] %v5200_v39 }
 0x2c8   :  { %1841 = vmatprep.subr.bf16.mxu0 %v4716_v46  ;;  %v5212_v36 = vld [vmem:[%s6466_s2 + $0x218] ss:$24 sps:$4 sm:$0xff]  }
 0x2c9   :  { %6810 = vst [vmem:[#allocation25_spill] sm:$0xff] %v5212_v36 }
 0x2ca   :  { %1681 = vmatpush1.bf16.msra.mxu1 %v6726_v44  ;;  %v4888_v44 = vld [vmem:[%s6466_s2 + $0x94] ss:$24 sps:$4 sm:$0xff]  }
 0x2cb   :  { %1682 = vmatprep.subr.bf16.mxu1 %v6727_v48  ;;  %1842 = vmatpush1.bf16.msra.mxu0 %v4727_v0  ;;  %v4896_v48 = vld [vmem:[%s6466_s2 + $0x90] ss:$24 sps:$4 sm:$0xff]  }
 0x2cc   :  { %1843 = vmatprep.subr.bf16.mxu0 %v4733_v10 }
 0x2ce   :  { %1683 = vmatpush1.bf16.msra.mxu1 %v6728_v23  ;;  %v4902_v23 = vld [vmem:[%s6466_s2 + $0x64] ss:$24 sps:$4 sm:$0xff]  }
 0x2cf   :  { %1684 = vmatprep.subr.bf16.mxu1 %v6729_v8  ;;  %1844 = vmatpush1.bf16.msra.mxu0 %v6774_v13  ;;  %v4910_v8 = vld [vmem:[%s6466_s2 + $0x60] ss:$24 sps:$4 sm:$0xff]  }
 0x2d0   :  { %1845 = vmatprep.subr.bf16.mxu0 %v4874_v58 }
 0x2d2   :  { %1685 = vmatpush1.bf16.msra.mxu1 %v6731_v17  ;;  %v4916_v17 = vld [vmem:[%s6466_s2 + $0x34] ss:$24 sps:$4 sm:$0xff]  }
 0x2d3   :  { %1686 = vmatprep.subr.bf16.mxu1 %v6732_v3  ;;  %1846 = vmatpush1.bf16.msra.mxu0 %v4882_v52  ;;  %v4938_v3 = vld [vmem:[%s6466_s2] ss:$24 sps:$4 sm:$0xff]  }
 0x2d4   :  { %1847 = vmatprep.subr.bf16.mxu0 %v4888_v44 }
 0x2d6   :  { %1687 = vmatpush1.bf16.msra.mxu1 %v6733_v25  ;;  %v4944_v25 = vld [vmem:[%s6466_s2 + $0x2d4] ss:$24 sps:$4 sm:$0xff]  }
 0x2d7   :  { %1688 = vmatprep.subr.bf16.mxu1 %v6734_v28  ;;  %1848 = vmatpush1.bf16.msra.mxu0 %v4896_v48  ;;  %v4952_v28 = vld [vmem:[%s6466_s2 + $0x2d0] ss:$24 sps:$4 sm:$0xff]  }
 0x2d8   :  { %1849 = vmatprep.subr.bf16.mxu0 %v4902_v23 }
 0x2da   :  { %1689 = vmatpush1.bf16.msra.mxu1 %v6735_v11  ;;  %v4924_v11 = vld [vmem:[%s6466_s2 + $0x30] ss:$24 sps:$4 sm:$0xff]  }
 0x2db   :  { %1690 = vmatprep.subr.bf16.mxu1 %v6736_v59  ;;  %1850 = vmatpush1.bf16.msra.mxu0 %v4910_v8  ;;  %v4930_v59 = vld [vmem:[%s6466_s2 + $0x4] ss:$24 sps:$4 sm:$0xff]  }
 0x2dc   :  { %1851 = vmatprep.subr.bf16.mxu0 %v4916_v17 }
 0x2de   :  { %1691 = vmatpush1.bf16.msra.mxu1 %v6737_v2  ;;  %v4958_v2 = vld [vmem:[%s6466_s2 + $0x2a4] ss:$24 sps:$4 sm:$0xff]  }
 0x2df   :  { %1692 = vmatprep.subr.bf16.mxu1 %v6738_v12  ;;  %1852 = vmatpush1.bf16.msra.mxu0 %v4924_v11  ;;  %v4972_v12 = vld [vmem:[%s6466_s2 + $0x274] ss:$24 sps:$4 sm:$0xff]  }
 0x2e0   :  { %1853 = vmatprep.subr.bf16.mxu0 %v4930_v59 }
 0x2e2   :  { %1693 = vmatpush1.bf16.msra.mxu1 %v6739_v14  ;;  %v5008_v14 = vld [vmem:[%s6466_s2 + $0x210] ss:$24 sps:$4 sm:$0xff]  }
 0x2e3   :  { %1694 = vmatprep.subr.bf16.mxu1 %v6740_v16  ;;  %1854 = vmatpush1.bf16.msra.mxu0 %v4938_v3  ;;  %6777 = vst [vmem:[#allocation26_spill] sm:$0xff] %v5008_v14  ;;  %v5014_v16 = vld [vmem:[%s6466_s2 + $0x1e4] ss:$24 sps:$4 sm:$0xff]  }
 0x2e4   :  { %1855 = vmatprep.subr.bf16.mxu0 %v4944_v25  ;;  %6778 = vst [vmem:[#allocation28_spill] sm:$0xff] %v5014_v16 }
 0x2e6   :  { %1695 = vmatpush2.bf16.msra.mxu1 %v6741_v18  ;;  %v5022_v18 = vld [vmem:[%s6466_s2 + $0x1e0] ss:$24 sps:$4 sm:$0xff]  }
 0x2e7   :  { %1696 = vmatprep.subr.bf16.mxu1 %v4515_v26  ;;  %1856 = vmatpush2.bf16.msra.mxu0 %v4952_v28  ;;  %v4966_v26 = vld [vmem:[%s6466_s2 + $0x2a0] ss:$24 sps:$4 sm:$0xff]   ;;  %6779 = vst [vmem:[#allocation30_spill] sm:$0xff] %v5022_v18 }
 0x2e8   :  { %1857 = vmatprep.subr.bf16.mxu0 %v4958_v2 }
 0x2ea   :  { %1697 = vmatpush2.bf16.msra.mxu1 %v4523_v7  ;;  %v4986_v7 = vld [vmem:[%s6466_s2 + $0x244] ss:$24 sps:$4 sm:$0xff]  }
 0x2eb   :  { %1698 = vmatprep.subr.bf16.mxu1 %v4530_v31  ;;  %1858 = vmatpush2.bf16.msra.mxu0 %v4966_v26  ;;  %v4980_v31 = vld [vmem:[%s6466_s2 + $0x270] ss:$24 sps:$4 sm:$0xff]  }
 0x2ec   :  { %1859 = vmatprep.subr.bf16.mxu0 %v4972_v12 }
 0x2ee   :  { %1699 = vmatpush2.bf16.msra.mxu1 %v4537_v21  ;;  %v4994_v21 = vld [vmem:[%s6466_s2 + $0x240] ss:$24 sps:$4 sm:$0xff]  }
 0x2ef   :  { %1700 = vmatprep.subr.bf16.mxu1 %v4544_v62  ;;  %1860 = vmatpush2.bf16.msra.mxu0 %v4980_v31  ;;  %6775 = vst [vmem:[#allocation22_spill] sm:$0xff] %v4994_v21  ;;  %v5000_v62 = vld [vmem:[%s6466_s2 + $0x214] ss:$24 sps:$4 sm:$0xff]  }
 0x2f0   :  { %1861 = vmatprep.subr.bf16.mxu0 %v4986_v7  ;;  %6776 = vst [vmem:[#allocation24_spill] sm:$0xff] %v5000_v62 }
 0x2f2   :  { %1701 = vmatpush2.bf16.msra.mxu1 %v6742_v20  ;;  %v5028_v20 = vld [vmem:[%s6466_s2 + $0x1b4] ss:$24 sps:$4 sm:$0xff]  }
 0x2f3   :  { %1702 = vmatprep.subr.bf16.mxu1 %v6743_v22  ;;  %1862 = vmatpush2.bf16.msra.mxu0 %v4994_v21  ;;  %6780 = vst [vmem:[#allocation32_spill] sm:$0xff] %v5028_v20  ;;  %v5042_v22 = vld [vmem:[%s6466_s2 + $0x184] ss:$24 sps:$4 sm:$0xff]  }
 0x2f4   :  { %1863 = vmatprep.subr.bf16.mxu0 %v5000_v62  ;;  %6782 = vst [vmem:[#allocation36_spill] sm:$0xff] %v5042_v22 }
 0x2f6   :  { %1703 = vmatpush2.bf16.msra.mxu1 %v6744_v24  ;;  %v5061_v24 = vld [vmem:[%s6466_s2 + $0x164] ss:$24 sps:$4 sm:$0xff]  }
 0x2f7   :  { %1704 = vmatprep.subr.bf16.mxu1 %v6745_v27  ;;  %1864 = vmatpush2.bf16.msra.mxu0 %v5008_v14  ;;  %6785 = vst [vmem:[#allocation42_spill] sm:$0xff] %v5061_v24  ;;  %v5074_v27 = vld [vmem:[%s6466_s2 + $0x12c] ss:$24 sps:$4 sm:$0xff]  }
 0x2f8   :  { %1865 = vmatprep.subr.bf16.mxu0 %v5014_v16  ;;  %6787 = vst [vmem:[#allocation46_spill] sm:$0xff] %v5074_v27 }
 0x2fa   :  { %1705 = vmatpush2.bf16.msra.mxu1 %v6746_v29  ;;  %v5080_v29 = vld [vmem:[%s6466_s2 + $0x128] ss:$24 sps:$4 sm:$0xff]  }
 0x2fb   :  { %1706 = vmatprep.subr.bf16.mxu1 %v4586_v4  ;;  %1866 = vmatpush2.bf16.msra.mxu0 %v5022_v18  ;;  %v5036_v4 = vld [vmem:[%s6466_s2 + $0x1b0] ss:$24 sps:$4 sm:$0xff]   ;;  %6788 = vst [vmem:[#allocation48_spill] sm:$0xff] %v5080_v29 }
 0x2fc   :  { %1867 = vmatprep.subr.bf16.mxu0 %v5028_v20  ;;  %6781 = vst [vmem:[#allocation34_spill] sm:$0xff] %v5036_v4 }
 0x2fe   :  { %1707 = vmatpush2.bf16.msra.mxu1 %v4593_v6  ;;  %v5049_v6 = vld [vmem:[%s6466_s2 + $0x15c] ss:$24 sps:$4 sm:$0xff]  }
 0x2ff   :  { %1708 = vmatprep.subr.bf16.mxu1 %v4600_v9  ;;  %1868 = vmatpush2.bf16.msra.mxu0 %v5036_v4  ;;  %6783 = vst [vmem:[#allocation38_spill] sm:$0xff] %v5049_v6  ;;  %v5055_v9 = vld [vmem:[%s6466_s2 + $0x180] ss:$24 sps:$4 sm:$0xff]  }
 0x300   :  { %1869 = vmatprep.subr.bf16.mxu0 %v5042_v22  ;;  %6784 = vst [vmem:[#allocation40_spill] sm:$0xff] %v5055_v9 }
 0x302   :  { %1709 = vmatpush2.bf16.msra.mxu1 %v4607_v1  ;;  %v5068_v1 = vld [vmem:[%s6466_s2 + $0x158] ss:$24 sps:$4 sm:$0xff]  }
 0x303   :  { %1880 = vmatprep.subr.bf16.mxu1 %v5049_v6  ;;  %1870 = vmatpush2.bf16.msra.mxu0 %v5055_v9  ;;  %6786 = vst [vmem:[#allocation44_spill] sm:$0xff] %v5068_v1 }
 0x304   :  { %1921 = vmatprep.subr.bf16.mxu0 %v5061_v24 }
 0x305   :  { %1711 = vmatmul.mubr.bf16.vlgmr.msra.gmra.mxu1 %v4853_v34  ;;  %v5206_v34 = vld [vmem:[%s6466_s2 + $0x21c] ss:$24 sps:$4 sm:$0xff]  }
 0x306   :  { %1881 = vmatpush1.bf16.msra.mxu1 %v5068_v1  ;;  %6809 = vst [vmem:[#allocation23_spill] sm:$0xff] %v5206_v34 }
 0x307   :  { %1882 = vmatprep.subr.bf16.mxu1 %v5074_v27 }
 0x30a   :  { %1883 = vmatpush1.bf16.msra.mxu1 %v5080_v29 }
 0x30b   :  { %1884 = vmatprep.subr.bf16.mxu1 %v5086_v38 }
 0x30e   :  { %1885 = vmatpush1.bf16.msra.mxu1 %v5092_v40 }
 0x30f   :  { %1886 = vmatprep.subr.bf16.mxu1 %v5098_v41 }
 0x312   :  { %1887 = vmatpush1.bf16.msra.mxu1 %v5104_v42 }
 0x313   :  { %1888 = vmatprep.subr.bf16.mxu1 %v5110_v43 }
 0x316   :  { %1889 = vmatpush1.bf16.msra.mxu1 %v5116_v45 }
 0x317   :  { %1890 = vmatprep.subr.bf16.mxu1 %v5122_v47 }
 0x31a   :  { %1891 = vmatpush1.bf16.msra.mxu1 %v5128_v49  ;;  %v1720_v49 = vld [vmem:[#allocation2] sm:$0x30] }
 0x31b   :  { %1892 = vmatprep.subr.bf16.mxu1 %v5134_v51 }
 0x31e   :  { %1893 = vmatpush1.bf16.msra.mxu1 %v5140_v37 }
 0x31f   :  { %1894 = vmatprep.subr.bf16.mxu1 %v5146_v55 }
 0x322   :  { %1895 = vmatpush1.bf16.msra.mxu1 %v5152_v57 }
 0x323   :  { %1896 = vmatprep.subr.bf16.mxu1 %v5158_v60 }
 0x326   :  { %1897 = vmatpush2.bf16.msra.mxu1 %v5164_v63 }
 0x327   :  { %1898 = vmatprep.subr.bf16.mxu1 %v5170_v5 }
 0x32a   :  { %1899 = vmatpush2.bf16.msra.mxu1 %v5176_v61 }
 0x32b   :  { %1900 = vmatprep.subr.bf16.mxu1 %v5182_v30 }
 0x32e   :  { %1901 = vmatpush2.bf16.msra.mxu1 %v5188_v33 }
 0x32f   :  { %1902 = vmatprep.subr.bf16.mxu1 %v5194_v35  ;;  %v5218_v35 = vld [vmem:[%s6466_s2 + $0x1ec] ss:$24 sps:$4 sm:$0xff]  }
 0x330   :  { %6811 = vst [vmem:[#allocation27_spill] sm:$0xff] %v5218_v35 }
 0x332   :  { %1903 = vmatpush2.bf16.msra.mxu1 %v5200_v39  ;;  %v5224_v39 = vld [vmem:[%s6466_s2 + $0x1e8] ss:$24 sps:$4 sm:$0xff]  }
 0x333   :  { %1904 = vmatprep.subr.bf16.mxu1 %v5206_v34  ;;  %6812 = vst [vmem:[#allocation29_spill] sm:$0xff] %v5224_v39  ;;  %v5230_v34 = vld [vmem:[%s6466_s2 + $0x1bc] ss:$24 sps:$4 sm:$0xff]  }
 0x334   :  { %6813 = vst [vmem:[#allocation31_spill] sm:$0xff] %v5230_v34 }
 0x336   :  { %1905 = vmatpush2.bf16.msra.mxu1 %v5212_v36  ;;  %v5236_v36 = vld [vmem:[%s6466_s2 + $0x1b8] ss:$24 sps:$4 sm:$0xff]  }
 0x337   :  { %1906 = vmatprep.subr.bf16.mxu1 %v5218_v35  ;;  %6814 = vst [vmem:[#allocation33_spill] sm:$0xff] %v5236_v36  ;;  %v5242_v35 = vld [vmem:[%s6466_s2 + $0x18c] ss:$24 sps:$4 sm:$0xff]  }
 0x338   :  { %6815 = vst [vmem:[#allocation35_spill] sm:$0xff] %v5242_v35 }
 0x33a   :  { %1907 = vmatpush2.bf16.msra.mxu1 %v5224_v39  ;;  %v5248_v39 = vld [vmem:[%s6466_s2 + $0x188] ss:$24 sps:$4 sm:$0xff]  }
 0x33b   :  { %1908 = vmatprep.subr.bf16.mxu1 %v5230_v34  ;;  %6816 = vst [vmem:[#allocation37_spill] sm:$0xff] %v5248_v39 }
 0x33e   :  { %1909 = vmatpush2.bf16.msra.mxu1 %v5236_v36  ;;  %v1719_v36 = vld [vmem:[#allocation2 + $0x30] sm:$0x30] }
 0x33f   :  { %1910 = vmatprep.subr.bf16.mxu1 %v5242_v35 }
 0x342   :  { %1911 = vmatpush2.bf16.msra.mxu1 %v5248_v39 }
 0x343   :  { %2059 = vmatprep.subr.bf16.mxu1 %v4832_v32 }
 0x385   :  { %v1630_v34 = vpop.f32.mrf.mxu1  ;;  %v1671_v33 = vpop.f32.mrf.mxu0 }
 0x386   :  { %v1726_v30 = vrot.slane %v1630_v34, 4  ;;  %v1745_v34 = vadd.f32 %v4677_v50, %v1671_v33 }
 0x387   :  { %v1632_v61 = vpop.f32.mrf.mxu1  ;;  %v1673_v5 = vpop.f32.mrf.mxu0 }
 0x388   :  { %v1728_v63 = vadd.f32 %v1726_v30, %v1719_v36  ;;  %v1736_v35 = vrot.slane %v1632_v61, 4  ;;  %v1747_v41 = vrot.slane %v1745_v34, 4  ;;  %v1760_v30 = vrot.slane %v1673_v5, 6 }
 0x389   :  { %v1634_v60 = vpop.f32.mrf.mxu1  ;;  %v1675_v57 = vpop.f32.mrf.mxu0 }
 0x38a   :  { %v3152_v55 = vmul.f32 -1.442695, %v1728_v63  ;;  %v1738_v47 = vadd.f32 %v1736_v35, %v1720_v49  ;;  %v1721_v63 = vld [vmem:[#allocation2 + $0x58] sm:$0x30] }
 0x38b   :  { %v1635_v37 = vpop.f32.mrf.mxu1  ;;  %v1676_v51 = vpop.f32.mrf.mxu0 }
 0x38c   :  { %3452 = vpow2.f32 %v3152_v55  ;;  %v3153_v45 = vmul.f32 -1.442695, %v1738_v47  ;;  %v1722_v37 = vld [vmem:[#allocation2 + $0x48] sm:$0xc]  ;;  %v1755_v47 = vrot.slane %v4837_v53, 6 }
 0x38d   :  { %v1762_v55 = vadd.f32 %v1760_v30, %v1722_v37 }
 0x38e   :  { %3454 = vpow2.f32 %v3153_v45 }
 0x38f   :  { %v3154_v49 = vmul.f32 -1.442695, %v1762_v55 }
 0x399   :  { %v3453_v39 = vpop.eup %3452 }
 0x39a   :  { %v1732_v32 = vadd.f32 1.0, %v3453_v39 }
 0x39b   :  { %v3455_v43 = vpop.eup %3454 }
 0x39c   :  { %3456 = vrcp.f32 %v1732_v32  ;;  %v1742_v42 = vadd.f32 1.0, %v3455_v43 }
 0x39e   :  { %3458 = vrcp.f32 %v1742_v42 }
 0x3a9   :  { %v3457_v60 = vpop.eup %3456 }
 0x3aa   :  { %v1749_v57 = vmul.f32 %v3457_v60, %v1747_v41  ;;  %v1723_v60 = vld [vmem:[#allocation2 + $0x10] sm:$0xc] }
 0x3ab   :  { %v3459_v45 = vpop.eup %3458 }
 0x3ac   :  { %v1750_v51 = vadd.f32 %v1749_v57, %v1721_v63  ;;  %v1752_v32 = vsub.f32 1.0, %v3459_v45  ;;  %v1757_v50 = vmul.f32 %v3459_v45, %v1755_v47 }
 0x3ae   :  { %3460 = vtanh.f32 %v1750_v51 }
 0x3af   :  { %3462 = vpow2.f32 %v3154_v49 }
 0x3bb   :  { %v3461_v61 = vpop.eup %3460 }
 0x3bc   :  { %v1753_v35 = vmul.f32 %v3461_v61, %v1752_v32  ;;  %v3463_v42 = vpop.eup %3462  ;;  %v1724_v61 = vld [vmem:[#allocation2 + $0x40] sm:$0xc] }
 0x3bd   :  { %v1766_v33 = vadd.f32 1.0, %v3463_v42 }
 0x3be   :  { %v5254_v43 = vadd.f32 %v1757_v50, %v1753_v35 }
 0x3bf   :  { %3464 = vrcp.f32 %v1766_v33 }
 0x3c0   :  { %v1790_v41 = vpack.c.bf16 %v5254_v43, %v5254_v43 }
 0x3c2   :  { %v1798_v5 = vrot.slane %v1790_v41, %v6723_v19 }
 0x3c4   :  { %v1805_v39 = vrot.slane %v1798_v5, %v6723_v19 }
 0x3c5   :  { %v1712_v36 = vpop.f32.mrf.mxu1 }
 0x3c6   :  { %v1770_v34 = vrot.slane %v1712_v36, 6  ;;  %v1806_v30 = vcombine.high %v1805_v39, %v1805_v39 }
 0x3c7   :  { %v1714_v53 = vpop.f32.mrf.mxu1 }
 0x3c8   :  { %v1772_v57 = vadd.f32 %v1770_v34, %v1723_v60  ;;  %3156 = vst [vmem:[%s6469_s5 + $0x4] sm:$0x1] %v1806_v30  ;;  %v1779_v55 = vadd.f32 %v4693_v15, %v1714_v53 }
 0x3c9   :  { %v1716_v63 = vpop.f32.mrf.mxu1 }
 0x3ca   :  { %v3155_v37 = vmul.f32 -1.442695, %v1772_v57  ;;  %v1781_v49 = vrot.slane %v1779_v55, 6  ;;  %v5301_v55 = vld [vmem:[%s6466_s2 + $0x104] ss:$24 sps:$4 sm:$0xff]  }
 0x3cb   :  { %v1717_v51 = vpop.f32.mrf.mxu1 }
 0x3cc   :  { %3466 = vpow2.f32 %v3155_v37  ;;  %v3465_v45 = vpop.eup %3464  ;;  %v5271_v37 = vrot.slane %v1790_v41, 2  ;;  %v5287_v41 = vld [vmem:[%s6466_s2 + $0x134] ss:$24 sps:$4 sm:$0xff]   ;;  %v5295_v51 = vld [vmem:[%s6466_s2 + $0x130] ss:$24 sps:$4 sm:$0xff]  }
 0x3cd   :  { %v1783_v47 = vmul.f32 %v3465_v45, %v1781_v49  ;;  %v5343_v49 = vld [vmem:[%s6466_s2 + $0x74] ss:$24 sps:$4 sm:$0xff]   ;;  %v5351_v45 = vld [vmem:[%s6466_s2 + $0x70] ss:$24 sps:$4 sm:$0xff]  }
 0x3cf   :  { %v1784_v50 = vadd.f32 %v1783_v47, %v1724_v61  ;;  %v5357_v47 = vld [vmem:[%s6466_s2 + $0x44] ss:$24 sps:$4 sm:$0xff]   ;;  %v5371_v61 = vld [vmem:[%s6466_s2 + $0x14] ss:$24 sps:$4 sm:$0xff]  }
 0x3d9   :  { %v3467_v32 = vpop.eup %3466 }
 0x3da   :  { %v1776_v35 = vadd.f32 1.0, %v3467_v32  ;;  %v5365_v32 = vld [vmem:[%s6466_s2 + $0x40] ss:$24 sps:$4 sm:$0xff]  }
 0x3dc   :  { %3468 = vrcp.f32 %v1776_v35  ;;  %v5379_v35 = vld [vmem:[%s6466_s2 + $0x10] ss:$24 sps:$4 sm:$0xff]  }
 0x3dd   :  { %3470 = vtanh.f32 %v1784_v50  ;;  %v5385_v50 = vld [vmem:[%s6466_s2 + $0x2e4] ss:$24 sps:$4 sm:$0xff]  }
 0x3e9   :  { %v3469_v42 = vpop.eup %3468 }
 0x3ea   :  { %v1786_v5 = vsub.f32 1.0, %v3469_v42  ;;  %v3471_v33 = vpop.eup %3470  ;;  %v1788_v36 = vmul.f32 %v3469_v42, %v4847_v54  ;;  %v5281_v54 = vld [vmem:[%s6466_s2 + $0x160] ss:$24 sps:$4 sm:$0xff]  }
 0x3eb   :  { %v5393_v42 = vld [vmem:[%s6466_s2 + $0x2e0] ss:$24 sps:$4 sm:$0xff]  }
 0x3ec   :  { %v1787_v39 = vmul.f32 %v3471_v33, %v1786_v5  ;;  %v5399_v5 = vld [vmem:[%s6466_s2 + $0x2b4] ss:$24 sps:$4 sm:$0xff]   ;;  %v5407_v33 = vld [vmem:[%s6466_s2 + $0x2b0] ss:$24 sps:$4 sm:$0xff]  }
 0x3ee   :  { %v5265_v34 = vadd.f32 %v1788_v36, %v1787_v39  ;;  %v5413_v39 = vld [vmem:[%s6466_s2 + $0x284] ss:$24 sps:$4 sm:$0xff]   ;;  %v5421_v36 = vld [vmem:[%s6466_s2 + $0x280] ss:$24 sps:$4 sm:$0xff]  }
 0x3f0   :  { %v1810_v15 = vpack.c.bf16 %v5265_v34, %v5265_v34  ;;  %v1831_v30 = vrot.slane %v5265_v34, 6 }
 0x3f2   :  { %v1818_v60 = vrot.slane %v1810_v15, %v6723_v19  ;;  %v1833_v53 = vpack.c.bf16 %v1831_v30, %v1831_v30  ;;  %v5427_v15 = vld [vmem:[%s6466_s2 + $0x254] ss:$24 sps:$4 sm:$0xff]   ;;  %v5435_v30 = vld [vmem:[%s6466_s2 + $0x250] ss:$24 sps:$4 sm:$0xff]  }
 0x3f4   :  { %v1819_v57 = vcombine.high %v1818_v60, %v1818_v60  ;;  %v1836_v63 = vrot.slane %v1833_v53, 2  ;;  %v5441_v60 = vld [vmem:[%s6466_s2 + $0x224] ss:$24 sps:$4 sm:$0xff]   ;;  %v5449_v53 = vld [vmem:[%s6466_s2 + $0x220] ss:$24 sps:$4 sm:$0xff]  }
 0x3f5   :  { %6817 = vst [vmem:[#allocation39_spill] sm:$0xff] %v5449_v53 }
 0x3f6   :  { %3188 = vst.sshfl [vmem:[%s6469_s5 + $0xb] sm:$0x1 pattern:$0x73625140] %v1819_v57  ;;  %1871 = vmatprep.mubr.bf16.mxu0 %v1836_v63  ;;  %1912 = vmatprep.mubr.bf16.mxu1 %v1836_v63  ;;  %v5455_v57 = vld [vmem:[%s6466_s2 + $0x1f4] ss:$24 sps:$4 sm:$0xff]  }
 0x3f7   :  { %1872 = vmatmul.mubr.bf16.vlgmr.msra.gmra.mxu0 %v5271_v37  ;;  %1913 = vmatmul.mubr.bf16.vlgmr.msra.gmra.mxu1 %v5271_v37  ;;  %6818 = vst [vmem:[#allocation41_spill] sm:$0xff] %v5455_v57 }
 0x3f8   :  { %1922 = vmatpush1.bf16.msra.mxu0 %v5281_v54  ;;  %1953 = vmatprep.mubr.bf16.mxu0 %v1836_v63  ;;  %v5463_v63 = vld [vmem:[%s6466_s2 + $0x1f0] ss:$24 sps:$4 sm:$0xff]  }
 0x3f9   :  { %1923 = vmatprep.subr.bf16.mxu0 %v5287_v41  ;;  %2060 = vmatpush1.bf16.msra.mxu1 %v4710_v56  ;;  %v5309_v56 = vld [vmem:[%s6466_s2 + $0x100] ss:$24 sps:$4 sm:$0xff]   ;;  %6819 = vst [vmem:[#allocation43_spill] sm:$0xff] %v5463_v63 }
 0x3fa   :  { %2061 = vmatprep.subr.bf16.mxu1 %v4716_v46  ;;  %v5315_v46 = vld [vmem:[%s6466_s2 + $0xd4] ss:$24 sps:$4 sm:$0xff]  }
 0x3fc   :  { %1924 = vmatpush1.bf16.msra.mxu0 %v5295_v51 }
 0x3fd   :  { %1925 = vmatprep.subr.bf16.mxu0 %v5301_v55  ;;  %2062 = vmatpush1.bf16.msra.mxu1 %v4727_v0  ;;  %v5323_v0 = vld [vmem:[%s6466_s2 + $0xd0] ss:$24 sps:$4 sm:$0xff]  }
 0x3fe   :  { %2063 = vmatprep.subr.bf16.mxu1 %v4733_v10  ;;  %v5329_v10 = vld [vmem:[%s6466_s2 + $0xa4] ss:$24 sps:$4 sm:$0xff]  }
 0x400   :  { %1926 = vmatpush1.bf16.msra.mxu0 %v5309_v56 }
 0x401   :  { %1927 = vmatprep.subr.bf16.mxu0 %v5315_v46  ;;  %2064 = vmatpush1.bf16.msra.mxu1 %v6774_v13  ;;  %v5337_v13 = vld [vmem:[%s6466_s2 + $0xa0] ss:$24 sps:$4 sm:$0xff]  }
 0x402   :  { %2065 = vmatprep.subr.bf16.mxu1 %v4874_v58 }
 0x404   :  { %1928 = vmatpush1.bf16.msra.mxu0 %v5323_v0 }
 0x405   :  { %1929 = vmatprep.subr.bf16.mxu0 %v5329_v10  ;;  %2066 = vmatpush1.bf16.msra.mxu1 %v4882_v52 }
 0x406   :  { %2067 = vmatprep.subr.bf16.mxu1 %v4888_v44 }
 0x408   :  { %1930 = vmatpush1.bf16.msra.mxu0 %v5337_v13 }
 0x409   :  { %1931 = vmatprep.subr.bf16.mxu0 %v5343_v49  ;;  %2068 = vmatpush1.bf16.msra.mxu1 %v4896_v48 }
 0x40a   :  { %2069 = vmatprep.subr.bf16.mxu1 %v4902_v23 }
 0x40c   :  { %1932 = vmatpush1.bf16.msra.mxu0 %v5351_v45 }
 0x40d   :  { %1933 = vmatprep.subr.bf16.mxu0 %v5357_v47  ;;  %2070 = vmatpush1.bf16.msra.mxu1 %v4910_v8 }
 0x40e   :  { %2071 = vmatprep.subr.bf16.mxu1 %v4916_v17 }
 0x410   :  { %1934 = vmatpush1.bf16.msra.mxu0 %v5365_v32 }
 0x411   :  { %1935 = vmatprep.subr.bf16.mxu0 %v5371_v61  ;;  %2072 = vmatpush1.bf16.msra.mxu1 %v4924_v11 }
 0x412   :  { %2073 = vmatprep.subr.bf16.mxu1 %v4930_v59 }
 0x414   :  { %1936 = vmatpush1.bf16.msra.mxu0 %v5379_v35 }
 0x415   :  { %1937 = vmatprep.subr.bf16.mxu0 %v5385_v50  ;;  %2074 = vmatpush1.bf16.msra.mxu1 %v4938_v3 }
 0x416   :  { %2075 = vmatprep.subr.bf16.mxu1 %v4944_v25 }
 0x418   :  { %1938 = vmatpush2.bf16.msra.mxu0 %v5393_v42 }
 0x419   :  { %1939 = vmatprep.subr.bf16.mxu0 %v5399_v5  ;;  %2076 = vmatpush2.bf16.msra.mxu1 %v4952_v28 }
 0x41a   :  { %2077 = vmatprep.subr.bf16.mxu1 %v4958_v2 }
 0x41c   :  { %1940 = vmatpush2.bf16.msra.mxu0 %v5407_v33 }
 0x41d   :  { %1941 = vmatprep.subr.bf16.mxu0 %v5413_v39  ;;  %2078 = vmatpush2.bf16.msra.mxu1 %v4966_v26 }
 0x41e   :  { %2079 = vmatprep.subr.bf16.mxu1 %v4972_v12 }
 0x420   :  { %1942 = vmatpush2.bf16.msra.mxu0 %v5421_v36 }
 0x421   :  { %1943 = vmatprep.subr.bf16.mxu0 %v5427_v15  ;;  %2080 = vmatpush2.bf16.msra.mxu1 %v4980_v31 }
 0x422   :  { %2081 = vmatprep.subr.bf16.mxu1 %v4986_v7 }
 0x424   :  { %1944 = vmatpush2.bf16.msra.mxu0 %v5435_v30 }
 0x425   :  { %1945 = vmatprep.subr.bf16.mxu0 %v5441_v60  ;;  %2082 = vmatpush2.bf16.msra.mxu1 %v4994_v21 }
 0x426   :  { %2083 = vmatprep.subr.bf16.mxu1 %v5000_v62 }
 0x428   :  { %1946 = vmatpush2.bf16.msra.mxu0 %v5449_v53  ;;  %v5469_v53 = vld [vmem:[%s6466_s2 + $0x1c4] ss:$24 sps:$4 sm:$0xff]  }
 0x429   :  { %1947 = vmatprep.subr.bf16.mxu0 %v5455_v57  ;;  %2084 = vmatpush2.bf16.msra.mxu1 %v5008_v14  ;;  %6820 = vst [vmem:[#allocation45_spill] sm:$0xff] %v5469_v53 }
 0x42a   :  { %2085 = vmatprep.subr.bf16.mxu1 %v5014_v16  ;;  %v5477_v16 = vld [vmem:[%s6466_s2 + $0x1c0] ss:$24 sps:$4 sm:$0xff]  }
 0x42b   :  { %6821 = vst [vmem:[#allocation47_spill] sm:$0xff] %v5477_v16 }
 0x42c   :  { %1948 = vmatpush2.bf16.msra.mxu0 %v5463_v63  ;;  %v5483_v63 = vld [vmem:[%s6466_s2 + $0x194] ss:$24 sps:$4 sm:$0xff]  }
 0x42d   :  { %1949 = vmatprep.subr.bf16.mxu0 %v5469_v53  ;;  %2086 = vmatpush2.bf16.msra.mxu1 %v5022_v18  ;;  %6822 = vst [vmem:[#allocation7_spill] sm:$0xff] %v5483_v63 }
 0x42e   :  { %2087 = vmatprep.subr.bf16.mxu1 %v5028_v20  ;;  %v5491_v20 = vld [vmem:[%s6466_s2 + $0x190] ss:$24 sps:$4 sm:$0xff]  }
 0x42f   :  { %6823 = vst [vmem:[#allocation56_spill] sm:$0xff] %v5491_v20 }
 0x430   :  { %1950 = vmatpush2.bf16.msra.mxu0 %v5477_v16 }
 0x431   :  { %1951 = vmatprep.subr.bf16.mxu0 %v5483_v63  ;;  %2088 = vmatpush2.bf16.msra.mxu1 %v5036_v4 }
 0x432   :  { %2089 = vmatprep.subr.bf16.mxu1 %v5042_v22  ;;  %v6824_v22 = vld [vmem:[#allocation51_spill] sm:$0xff] }
 0x434   :  { %1952 = vmatpush2.bf16.msra.mxu0 %v5491_v20  ;;  %v6825_v20 = vld [vmem:[#allocation52_spill] sm:$0xff] }
 0x435   :  { %2100 = vmatprep.subr.bf16.mxu0 %v5049_v6  ;;  %2090 = vmatpush2.bf16.msra.mxu1 %v5055_v9  ;;  %v6826_v6 = vld [vmem:[#allocation53_spill] sm:$0xff]  ;;  %v6827_v9 = vld [vmem:[#allocation54_spill] sm:$0xff] }
 0x436   :  { %2141 = vmatprep.subr.bf16.mxu1 %v5061_v24  ;;  %v6828_v24 = vld [vmem:[#allocation55_spill] sm:$0xff] }
 0x437   :  { %1954 = vmatmul.mubr.bf16.vlgmr.msra.gmra.mxu0 %v5271_v37  ;;  %v6829_v37 = vld [vmem:[#allocation8_spill] sm:$0xff] }
 0x438   :  { %2101 = vmatpush1.bf16.msra.mxu0 %v5068_v1  ;;  %v6830_v1 = vld [vmem:[#allocation9_spill] sm:$0xff] }
 0x439   :  { %2102 = vmatprep.subr.bf16.mxu0 %v5074_v27  ;;  %v6831_v27 = vld [vmem:[#allocation10_spill] sm:$0xff] }
 0x43c   :  { %2103 = vmatpush1.bf16.msra.mxu0 %v5080_v29  ;;  %v6832_v29 = vld [vmem:[#allocation11_spill] sm:$0xff] }
 0x43d   :  { %2104 = vmatprep.subr.bf16.mxu0 %v5086_v38  ;;  %v6833_v38 = vld [vmem:[#allocation12_spill] sm:$0xff] }
 0x440   :  { %2105 = vmatpush1.bf16.msra.mxu0 %v5092_v40  ;;  %v6834_v40 = vld [vmem:[#allocation13_spill] sm:$0xff] }
 0x441   :  { %2106 = vmatprep.subr.bf16.mxu0 %v6824_v22  ;;  %v6835_v22 = vld [vmem:[#allocation14_spill] sm:$0xff] }
 0x444   :  { %2107 = vmatpush1.bf16.msra.mxu0 %v6825_v20  ;;  %v6836_v20 = vld [vmem:[#allocation15_spill] sm:$0xff] }
 0x445   :  { %2108 = vmatprep.subr.bf16.mxu0 %v6826_v6  ;;  %v6837_v6 = vld [vmem:[#allocation16_spill] sm:$0xff] }
 0x448   :  { %2109 = vmatpush1.bf16.msra.mxu0 %v6827_v9  ;;  %v6838_v9 = vld [vmem:[#allocation17_spill] sm:$0xff] }
 0x449   :  { %2110 = vmatprep.subr.bf16.mxu0 %v6828_v24  ;;  %v6839_v24 = vld [vmem:[#allocation18_spill] sm:$0xff] }
 0x44c   :  { %2111 = vmatpush1.bf16.msra.mxu0 %v6829_v37  ;;  %v6840_v37 = vld [vmem:[#allocation19_spill] sm:$0xff] }
 0x44d   :  { %2112 = vmatprep.subr.bf16.mxu0 %v6830_v1  ;;  %v6841_v1 = vld [vmem:[#allocation21_spill] sm:$0xff] }
 0x450   :  { %2113 = vmatpush1.bf16.msra.mxu0 %v6831_v27  ;;  %v6842_v27 = vld [vmem:[#allocation23_spill] sm:$0xff] }
 0x451   :  { %2114 = vmatprep.subr.bf16.mxu0 %v6832_v29  ;;  %v6843_v29 = vld [vmem:[#allocation25_spill] sm:$0xff] }
 0x454   :  { %2115 = vmatpush1.bf16.msra.mxu0 %v6833_v38  ;;  %v6844_v38 = vld [vmem:[#allocation27_spill] sm:$0xff] }
 0x455   :  { %2116 = vmatprep.subr.bf16.mxu0 %v6834_v40  ;;  %v6845_v40 = vld [vmem:[#allocation29_spill] sm:$0xff] }
 0x458   :  { %2117 = vmatpush2.bf16.msra.mxu0 %v6835_v22  ;;  %v6846_v22 = vld [vmem:[#allocation31_spill] sm:$0xff] }
 0x459   :  { %2118 = vmatprep.subr.bf16.mxu0 %v6836_v20  ;;  %v6847_v20 = vld [vmem:[#allocation33_spill] sm:$0xff] }
 0x45c   :  { %2119 = vmatpush2.bf16.msra.mxu0 %v6837_v6  ;;  %v6848_v6 = vld [vmem:[#allocation35_spill] sm:$0xff] }
 0x45d   :  { %2120 = vmatprep.subr.bf16.mxu0 %v6838_v9  ;;  %v6849_v9 = vld [vmem:[#allocation37_spill] sm:$0xff] }
 0x460   :  { %2121 = vmatpush2.bf16.msra.mxu0 %v6839_v24  ;;  %v6850_v24 = vld [vmem:[#allocation20_spill] sm:$0xff] }
 0x461   :  { %2122 = vmatprep.subr.bf16.mxu0 %v6840_v37 }
 0x464   :  { %2123 = vmatpush2.bf16.msra.mxu0 %v6841_v1 }
 0x465   :  { %2124 = vmatprep.subr.bf16.mxu0 %v6842_v27  ;;  %v1962_v27 = vld [vmem:[#allocation2 + $0x30] sm:$0xc0] }
 0x468   :  { %2125 = vmatpush2.bf16.msra.mxu0 %v6843_v29 }
 0x469   :  { %2126 = vmatprep.subr.bf16.mxu0 %v6844_v38 }
 0x46c   :  { %2127 = vmatpush2.bf16.msra.mxu0 %v6845_v40 }
 0x46d   :  { %2128 = vmatprep.subr.bf16.mxu0 %v6846_v22 }
 0x470   :  { %2129 = vmatpush2.bf16.msra.mxu0 %v6847_v20  ;;  %v1963_v20 = vld [vmem:[#allocation2] sm:$0xc0] }
 0x471   :  { %2130 = vmatprep.subr.bf16.mxu0 %v6848_v6 }
 0x474   :  { %2131 = vmatpush2.bf16.msra.mxu0 %v6849_v9 }
 0x475   :  { %2270 = vmatprep.subr.bf16.mxu0 %v6850_v24 }
 0x4b7   :  { %v1873_v37 = vpop.f32.mrf.mxu0  ;;  %v1914_v1 = vpop.f32.mrf.mxu1 }
 0x4b8   :  { %v1969_v4 = vrot.slane %v1873_v37, 2  ;;  %v5533_v37 = vld [vmem:[%s6468_s4] ss:$0 sm:$0xff] }
 0x4b9   :  { %v1875_v63 = vpop.f32.mrf.mxu0  ;;  %v1916_v29 = vpop.f32.mrf.mxu1 }
 0x4ba   :  { %v1971_v16 = vadd.f32 %v1969_v4, %v1962_v27  ;;  %v1979_v53 = vrot.slane %v1875_v63, 2 }
 0x4bb   :  { %v1877_v38 = vpop.f32.mrf.mxu0  ;;  %v1918_v18 = vpop.f32.mrf.mxu1 }
 0x4bc   :  { %v3158_v40 = vmul.f32 -1.442695, %v1971_v16  ;;  %v1981_v6 = vadd.f32 %v1979_v53, %v1963_v20  ;;  %v1988_v18 = vadd.f32 %v5533_v37, %v1914_v1  ;;  %v1998_v53 = vrot.slane %v5254_v43, 6 }
 0x4bd   :  { %v1878_v22 = vpop.f32.mrf.mxu0  ;;  %v1919_v14 = vpop.f32.mrf.mxu1 }
 0x4be   :  { %3472 = vpow2.f32 %v3158_v40  ;;  %v3159_v57 = vmul.f32 -1.442695, %v1981_v6  ;;  %v1990_v4 = vrot.slane %v1988_v18, 2  ;;  %v1965_v14 = vld [vmem:[#allocation2 + $0x48] sm:$0x3] }
 0x4bf   :  { %v2002_v20 = vadd.f32 %v1965_v14, %v1916_v29  ;;  %v1964_v6 = vld [vmem:[#allocation2 + $0x58] sm:$0xc0]  ;;  %v1966_v14 = vld [vmem:[#allocation2 + $0x10] sm:$0x3] }
 0x4c0   :  { %3474 = vpow2.f32 %v3159_v57 }
 0x4cb   :  { %v3473_v9 = vpop.eup %3472 }
 0x4cc   :  { %v1975_v24 = vadd.f32 1.0, %v3473_v9  ;;  %v3160_v9 = vmul.f32 -1.442695, %v2002_v20 }
 0x4cd   :  { %v3475_v62 = vpop.eup %3474 }
 0x4ce   :  { %3476 = vrcp.f32 %v1975_v24  ;;  %v1985_v16 = vadd.f32 1.0, %v3475_v62 }
 0x4d0   :  { %3478 = vrcp.f32 %v1985_v16 }
 0x4db   :  { %v3477_v22 = vpop.eup %3476 }
 0x4dc   :  { %v1992_v27 = vmul.f32 %v3477_v22, %v1990_v4 }
 0x4dd   :  { %v3479_v40 = vpop.eup %3478 }
 0x4de   :  { %v1993_v38 = vadd.f32 %v1992_v27, %v1964_v6  ;;  %v1995_v57 = vsub.f32 1.0, %v3479_v40  ;;  %v2000_v21 = vmul.f32 %v3479_v40, %v1998_v53  ;;  %v5549_v40 = vld [vmem:[%s6468_s4 + $0x1] ss:$0 sm:$0xff] }
 0x4e0   :  { %3480 = vtanh.f32 %v1993_v38 }
 0x4e1   :  { %3482 = vpow2.f32 %v3160_v9 }
 0x4ed   :  { %v3481_v63 = vpop.eup %3480 }
 0x4ee   :  { %v1996_v24 = vmul.f32 %v3481_v63, %v1995_v57  ;;  %v3483_v62 = vpop.eup %3482 }
 0x4ef   :  { %v2006_v16 = vadd.f32 1.0, %v3483_v62  ;;  %v1967_v62 = vld [vmem:[#allocation2 + $0x40] sm:$0x3] }
 0x4f0   :  { %v5537_v1 = vadd.f32 %v2000_v21, %v1996_v24 }
 0x4f1   :  { %3484 = vrcp.f32 %v2006_v16 }
 0x4f2   :  { %v2026_v18 = vpack.c.bf16 %v5537_v1, %v5537_v1 }
 0x4f4   :  { %v2034_v29 = vrot.slane %v2026_v18, %v6723_v19 }
 0x4f6   :  { %v2035_v4 = vcombine.high %v2034_v29, %v2034_v29 }
 0x4f7   :  { %v1955_v22 = vpop.f32.mrf.mxu0 }
 0x4f8   :  { %v2009_v27 = vadd.f32 %v1966_v14, %v1955_v22  ;;  %v2042_v43 = vrot.slane %v2035_v4, %v6723_v19  ;;  %v2022_v14 = vrot.slane %v5265_v34, 2  ;;  %v5569_v34 = vld [vmem:[%s6466_s2 + $0x150] ss:$24 sps:$4 sm:$0xff]  }
 0x4f9   :  { %v1957_v20 = vpop.f32.mrf.mxu0 }
 0x4fa   :  { %v3161_v6 = vmul.f32 -1.442695, %v2009_v27  ;;  %v2043_v38 = vcombine.high %v2042_v43, %v2042_v43  ;;  %v2016_v53 = vadd.f32 %v5549_v40, %v1957_v20 }
 0x4fb   :  { %v1959_v9 = vpop.f32.mrf.mxu0 }
 0x4fc   :  { %3486 = vpow2.f32 %v3161_v6  ;;  %3162 = vst [vmem:[%s6469_s5 + $0x6] sm:$0x1] %v2043_v38 }
 0x4fd   :  { %v1960_v21 = vpop.f32.mrf.mxu0 }
 0x4fe   :  { %v3485_v57 = vpop.eup %3484 }
 0x4ff   :  { %v2017_v63 = vmul.f32 %v3485_v57, %v2016_v53  ;;  %v5560_v57 = vrot.slane %v2026_v18, 3  ;;  %v5575_v18 = vld [vmem:[%s6466_s2 + $0x124] ss:$24 sps:$4 sm:$0xff]  }
 0x501   :  { %v2018_v29 = vadd.f32 %v2017_v63, %v1967_v62  ;;  %v5583_v63 = vld [vmem:[%s6466_s2 + $0x120] ss:$24 sps:$4 sm:$0xff]   ;;  %v5597_v62 = vld [vmem:[%s6466_s2 + $0xf0] ss:$24 sps:$4 sm:$0xff]  }
 0x509   :  { %v3487_v24 = vpop.eup %3486 }
 0x50a   :  { %v2013_v16 = vadd.f32 1.0, %v3487_v24  ;;  %v5589_v24 = vld [vmem:[%s6466_s2 + $0xf4] ss:$24 sps:$4 sm:$0xff]  }
 0x50c   :  { %3488 = vrcp.f32 %v2013_v16  ;;  %v6868_v16 = vld [vmem:[#allocation42_spill] sm:$0xff] }
 0x50d   :  { %3490 = vtanh.f32 %v2018_v29  ;;  %v6869_v29 = vld [vmem:[#allocation44_spill] sm:$0xff] }
 0x519   :  { %v3489_v4 = vpop.eup %3488 }
 0x51a   :  { %v2020_v22 = vsub.f32 1.0, %v3489_v4  ;;  %v3491_v27 = vpop.eup %3490  ;;  %v2024_v6 = vmul.f32 %v3489_v4, %v2022_v14  ;;  %v6870_v4 = vld [vmem:[#allocation46_spill] sm:$0xff]  ;;  %v6872_v14 = vld [vmem:[#allocation49_spill] sm:$0xff] }
 0x51c   :  { %v2021_v43 = vmul.f32 %v3491_v27, %v2020_v22  ;;  %v6871_v22 = vld [vmem:[#allocation48_spill] sm:$0xff]  ;;  %v6873_v27 = vld [vmem:[#allocation50_spill] sm:$0xff] }
 0x51e   :  { %v2025_v38 = vadd.f32 %v2024_v6, %v2021_v43  ;;  %v6874_v43 = vld [vmem:[#allocation51_spill] sm:$0xff]  ;;  %v6875_v6 = vld [vmem:[#allocation52_spill] sm:$0xff] }
 0x520   :  { %v2047_v9 = vpack.c.bf16 %v2025_v38, %v2025_v38  ;;  %v5553_v21 = vrot.slane %v2025_v38, 2  ;;  %v6876_v38 = vld [vmem:[#allocation53_spill] sm:$0xff] }
 0x522   :  { %3163 = vst [vmem:[%s6469_s5 + $0x9] sm:$0x1] %v2047_v9  ;;  %v2053_v20 = vpack.c.bf16 %v5553_v21, %v5553_v21  ;;  %v6877_v9 = vld [vmem:[#allocation54_spill] sm:$0xff] }
 0x524   :  { %v2056_v53 = vrot.slane %v2053_v20, 3  ;;  %v6878_v20 = vld [vmem:[#allocation55_spill] sm:$0xff] }
 0x526   :  { %2091 = vmatprep.mubr.bf16.mxu1 %v2056_v53  ;;  %2132 = vmatprep.mubr.bf16.mxu0 %v2056_v53 }
 0x527   :  { %2092 = vmatmul.mubr.bf16.vlgmr.msra.gmra.mxu1 %v5560_v57  ;;  %2133 = vmatmul.mubr.bf16.vlgmr.msra.gmra.mxu0 %v5560_v57 }
 0x528   :  { %2142 = vmatpush1.bf16.msra.mxu1 %v5281_v54  ;;  %2173 = vmatprep.mubr.bf16.mxu1 %v2056_v53  ;;  %v6879_v53 = vld [vmem:[#allocation8_spill] sm:$0xff] }
 0x529   :  { %2143 = vmatprep.subr.bf16.mxu1 %v5287_v41  ;;  %2271 = vmatpush1.bf16.msra.mxu0 %v5569_v34 }
 0x52a   :  { %2272 = vmatprep.subr.bf16.mxu0 %v5575_v18 }
 0x52c   :  { %2144 = vmatpush1.bf16.msra.mxu1 %v5295_v51 }
 0x52d   :  { %2145 = vmatprep.subr.bf16.mxu1 %v5301_v55  ;;  %2273 = vmatpush1.bf16.msra.mxu0 %v5583_v63 }
 0x52e   :  { %2274 = vmatprep.subr.bf16.mxu0 %v5589_v24 }
 0x530   :  { %2146 = vmatpush1.bf16.msra.mxu1 %v5309_v56 }
 0x531   :  { %2147 = vmatprep.subr.bf16.mxu1 %v5315_v46  ;;  %2275 = vmatpush1.bf16.msra.mxu0 %v5597_v62 }
 0x532   :  { %2276 = vmatprep.subr.bf16.mxu0 %v4874_v58  ;;  %v6851_v58 = vld [vmem:[#allocation22_spill] sm:$0xff] }
 0x534   :  { %2148 = vmatpush1.bf16.msra.mxu1 %v5323_v0 }
 0x535   :  { %2149 = vmatprep.subr.bf16.mxu1 %v5329_v10  ;;  %2277 = vmatpush1.bf16.msra.mxu0 %v4882_v52  ;;  %v6852_v52 = vld [vmem:[#allocation24_spill] sm:$0xff] }
 0x536   :  { %2278 = vmatprep.subr.bf16.mxu0 %v4888_v44  ;;  %v6853_v44 = vld [vmem:[#allocation39_spill] sm:$0xff] }
 0x538   :  { %2150 = vmatpush1.bf16.msra.mxu1 %v5337_v13 }
 0x539   :  { %2151 = vmatprep.subr.bf16.mxu1 %v5343_v49  ;;  %2279 = vmatpush1.bf16.msra.mxu0 %v4896_v48  ;;  %v6854_v48 = vld [vmem:[#allocation41_spill] sm:$0xff] }
 0x53a   :  { %2280 = vmatprep.subr.bf16.mxu0 %v4902_v23  ;;  %v6855_v23 = vld [vmem:[#allocation26_spill] sm:$0xff] }
 0x53c   :  { %2152 = vmatpush1.bf16.msra.mxu1 %v5351_v45 }
 0x53d   :  { %2153 = vmatprep.subr.bf16.mxu1 %v5357_v47  ;;  %2281 = vmatpush1.bf16.msra.mxu0 %v4910_v8  ;;  %v6856_v8 = vld [vmem:[#allocation28_spill] sm:$0xff] }
 0x53e   :  { %2282 = vmatprep.subr.bf16.mxu0 %v4916_v17  ;;  %v6857_v17 = vld [vmem:[#allocation43_spill] sm:$0xff] }
 0x540   :  { %2154 = vmatpush1.bf16.msra.mxu1 %v5365_v32 }
 0x541   :  { %2155 = vmatprep.subr.bf16.mxu1 %v5371_v61  ;;  %2283 = vmatpush1.bf16.msra.mxu0 %v4924_v11  ;;  %v6858_v11 = vld [vmem:[#allocation45_spill] sm:$0xff] }
 0x542   :  { %2284 = vmatprep.subr.bf16.mxu0 %v4930_v59  ;;  %v6859_v59 = vld [vmem:[#allocation30_spill] sm:$0xff] }
 0x544   :  { %2156 = vmatpush1.bf16.msra.mxu1 %v5379_v35 }
 0x545   :  { %2157 = vmatprep.subr.bf16.mxu1 %v5385_v50  ;;  %2285 = vmatpush1.bf16.msra.mxu0 %v4938_v3  ;;  %v6860_v3 = vld [vmem:[#allocation32_spill] sm:$0xff] }
 0x546   :  { %2286 = vmatprep.subr.bf16.mxu0 %v4944_v25  ;;  %v6861_v25 = vld [vmem:[#allocation47_spill] sm:$0xff] }
 0x548   :  { %2158 = vmatpush2.bf16.msra.mxu1 %v5393_v42 }
 0x549   :  { %2159 = vmatprep.subr.bf16.mxu1 %v5399_v5  ;;  %2287 = vmatpush2.bf16.msra.mxu0 %v4952_v28  ;;  %v6862_v28 = vld [vmem:[#allocation7_spill] sm:$0xff] }
 0x54a   :  { %2288 = vmatprep.subr.bf16.mxu0 %v4958_v2  ;;  %v6863_v2 = vld [vmem:[#allocation34_spill] sm:$0xff] }
 0x54c   :  { %2160 = vmatpush2.bf16.msra.mxu1 %v5407_v33 }
 0x54d   :  { %2161 = vmatprep.subr.bf16.mxu1 %v5413_v39  ;;  %2289 = vmatpush2.bf16.msra.mxu0 %v4966_v26  ;;  %v6864_v26 = vld [vmem:[#allocation36_spill] sm:$0xff] }
 0x54e   :  { %2290 = vmatprep.subr.bf16.mxu0 %v4972_v12  ;;  %v6865_v12 = vld [vmem:[#allocation56_spill] sm:$0xff] }
 0x550   :  { %2162 = vmatpush2.bf16.msra.mxu1 %v5421_v36 }
 0x551   :  { %2163 = vmatprep.subr.bf16.mxu1 %v5427_v15  ;;  %2291 = vmatpush2.bf16.msra.mxu0 %v4980_v31  ;;  %v6866_v31 = vld [vmem:[#allocation38_spill] sm:$0xff] }
 0x552   :  { %2292 = vmatprep.subr.bf16.mxu0 %v4986_v7  ;;  %v6867_v7 = vld [vmem:[#allocation40_spill] sm:$0xff] }
 0x554   :  { %2164 = vmatpush2.bf16.msra.mxu1 %v5435_v30 }
 0x555   :  { %2165 = vmatprep.subr.bf16.mxu1 %v5441_v60  ;;  %2293 = vmatpush2.bf16.msra.mxu0 %v6851_v58  ;;  %v6881_v58 = vld [vmem:[#allocation10_spill] sm:$0xff] }
 0x556   :  { %2294 = vmatprep.subr.bf16.mxu0 %v6852_v52  ;;  %v6882_v52 = vld [vmem:[#allocation11_spill] sm:$0xff] }
 0x558   :  { %2166 = vmatpush2.bf16.msra.mxu1 %v6853_v44 }
 0x559   :  { %2167 = vmatprep.subr.bf16.mxu1 %v6854_v48  ;;  %2295 = vmatpush2.bf16.msra.mxu0 %v6855_v23  ;;  %v6883_v23 = vld [vmem:[#allocation12_spill] sm:$0xff] }
 0x55a   :  { %2296 = vmatprep.subr.bf16.mxu0 %v6856_v8  ;;  %v6884_v8 = vld [vmem:[#allocation13_spill] sm:$0xff] }
 0x55c   :  { %2168 = vmatpush2.bf16.msra.mxu1 %v6857_v17 }
 0x55d   :  { %2169 = vmatprep.subr.bf16.mxu1 %v6858_v11  ;;  %2297 = vmatpush2.bf16.msra.mxu0 %v6859_v59  ;;  %v6885_v59 = vld [vmem:[#allocation14_spill] sm:$0xff] }
 0x55e   :  { %2298 = vmatprep.subr.bf16.mxu0 %v6860_v3  ;;  %v6886_v3 = vld [vmem:[#allocation15_spill] sm:$0xff] }
 0x560   :  { %2170 = vmatpush2.bf16.msra.mxu1 %v6861_v25 }
 0x561   :  { %2171 = vmatprep.subr.bf16.mxu1 %v6862_v28  ;;  %2299 = vmatpush2.bf16.msra.mxu0 %v6863_v2  ;;  %v6887_v2 = vld [vmem:[#allocation16_spill] sm:$0xff] }
 0x562   :  { %2300 = vmatprep.subr.bf16.mxu0 %v6864_v26  ;;  %v6888_v26 = vld [vmem:[#allocation17_spill] sm:$0xff] }
 0x564   :  { %2172 = vmatpush2.bf16.msra.mxu1 %v6865_v12 }
 0x565   :  { %2311 = vmatprep.subr.bf16.mxu1 %v6866_v31  ;;  %2301 = vmatpush2.bf16.msra.mxu0 %v6867_v7  ;;  %v6889_v31 = vld [vmem:[#allocation18_spill] sm:$0xff]  ;;  %v6890_v7 = vld [vmem:[#allocation19_spill] sm:$0xff] }
 0x566   :  { %2352 = vmatprep.subr.bf16.mxu0 %v6868_v16  ;;  %v6891_v16 = vld [vmem:[#allocation21_spill] sm:$0xff] }
 0x567   :  { %2174 = vmatmul.mubr.bf16.vlgmr.msra.gmra.mxu1 %v5560_v57  ;;  %v6880_v57 = vld [vmem:[#allocation9_spill] sm:$0xff] }
 0x568   :  { %2312 = vmatpush1.bf16.msra.mxu1 %v6869_v29  ;;  %v6892_v29 = vld [vmem:[#allocation23_spill] sm:$0xff] }
 0x569   :  { %2313 = vmatprep.subr.bf16.mxu1 %v6870_v4  ;;  %v6893_v4 = vld [vmem:[#allocation25_spill] sm:$0xff] }
 0x56c   :  { %2314 = vmatpush1.bf16.msra.mxu1 %v6871_v22  ;;  %v6894_v22 = vld [vmem:[#allocation27_spill] sm:$0xff] }
 0x56d   :  { %2315 = vmatprep.subr.bf16.mxu1 %v6872_v14  ;;  %v6895_v14 = vld [vmem:[#allocation29_spill] sm:$0xff] }
 0x570   :  { %2316 = vmatpush1.bf16.msra.mxu1 %v6873_v27  ;;  %v6896_v27 = vld [vmem:[#allocation31_spill] sm:$0xff] }
 0x571   :  { %2317 = vmatprep.subr.bf16.mxu1 %v6874_v43  ;;  %v6897_v43 = vld [vmem:[#allocation33_spill] sm:$0xff] }
 0x574   :  { %2318 = vmatpush1.bf16.msra.mxu1 %v6875_v6  ;;  %v6898_v6 = vld [vmem:[#allocation35_spill] sm:$0xff] }
 0x575   :  { %2319 = vmatprep.subr.bf16.mxu1 %v6876_v38  ;;  %v6899_v38 = vld [vmem:[#allocation37_spill] sm:$0xff] }
 0x578   :  { %2320 = vmatpush1.bf16.msra.mxu1 %v6877_v9  ;;  %v5688_v9 = vld [vmem:[%s6466_s2 + $0x154] ss:$24 sps:$4 sm:$0xff]  }
 0x579   :  { %2321 = vmatprep.subr.bf16.mxu1 %v6878_v20 }
 0x57c   :  { %2322 = vmatpush1.bf16.msra.mxu1 %v6879_v53  ;;  %v2182_v53 = vld [vmem:[#allocation2 + $0x8] sm:$0x3] }
 0x57d   :  { %2323 = vmatprep.subr.bf16.mxu1 %v6880_v57 }
 0x580   :  { %2324 = vmatpush1.bf16.msra.mxu1 %v6881_v58 }
 0x581   :  { %2325 = vmatprep.subr.bf16.mxu1 %v6882_v52 }
 0x584   :  { %2326 = vmatpush1.bf16.msra.mxu1 %v6883_v23 }
 0x585   :  { %2327 = vmatprep.subr.bf16.mxu1 %v6884_v8 }
 0x588   :  { %2328 = vmatpush2.bf16.msra.mxu1 %v6885_v59 }
 0x589   :  { %2329 = vmatprep.subr.bf16.mxu1 %v6886_v3 }
 0x58c   :  { %2330 = vmatpush2.bf16.msra.mxu1 %v6887_v2  ;;  %v2183_v2 = vld [vmem:[#allocation2 + $0x38] sm:$0x3] }
 0x58d   :  { %2331 = vmatprep.subr.bf16.mxu1 %v6888_v26 }
 0x590   :  { %2332 = vmatpush2.bf16.msra.mxu1 %v6889_v31 }
 0x591   :  { %2333 = vmatprep.subr.bf16.mxu1 %v6890_v7 }
 0x594   :  { %2334 = vmatpush2.bf16.msra.mxu1 %v6891_v16 }
 0x595   :  { %2335 = vmatprep.subr.bf16.mxu1 %v6892_v29 }
 0x598   :  { %2336 = vmatpush2.bf16.msra.mxu1 %v6893_v4 }
 0x599   :  { %2337 = vmatprep.subr.bf16.mxu1 %v6894_v22 }
 0x59c   :  { %2338 = vmatpush2.bf16.msra.mxu1 %v6895_v14 }
 0x59d   :  { %2339 = vmatprep.subr.bf16.mxu1 %v6896_v27 }
 0x5a0   :  { %2340 = vmatpush2.bf16.msra.mxu1 %v6897_v43 }
 0x5a1   :  { %2341 = vmatprep.subr.bf16.mxu1 %v6898_v6 }
 0x5a4   :  { %2342 = vmatpush2.bf16.msra.mxu1 %v6899_v38 }
 0x5a5   :  { %2513 = vmatprep.subr.bf16.mxu1 %v5688_v9 }
 0x5e7   :  { %v2093_v20 = vpop.f32.mrf.mxu1  ;;  %v2134_v57 = vpop.f32.mrf.mxu0 }
 0x5e8   :  { %v2188_v58 = vadd.f32 %v2182_v53, %v2093_v20  ;;  %v2202_v27 = vadd.f32 %v5533_v37, %v2134_v57  ;;  %v2184_v20 = vld [vmem:[#allocation2 + $0x28] sm:$0x3] }
 0x5e9   :  { %v2095_v52 = vpop.f32.mrf.mxu1  ;;  %v2136_v23 = vpop.f32.mrf.mxu0 }
 0x5ea   :  { %v3164_v8 = vmul.f32 -1.442695, %v2188_v58  ;;  %v2195_v7 = vadd.f32 %v2183_v2, %v2095_v52  ;;  %v2214_v38 = vrot.slane %v2136_v23, 2  ;;  %v2185_v58 = vld [vmem:[#allocation2 + $0x18] sm:$0xc0]  ;;  %v2209_v2 = vrot.slane %v5537_v1, 6 }
 0x5eb   :  { %v2097_v59 = vpop.f32.mrf.mxu1  ;;  %v2138_v3 = vpop.f32.mrf.mxu0 }
 0x5ec   :  { %3492 = vpow2.f32 %v3164_v8  ;;  %v3165_v16 = vmul.f32 -1.442695, %v2195_v7  ;;  %v2216_v8 = vadd.f32 %v2214_v38, %v2185_v58 }
 0x5ed   :  { %v2098_v26 = vpop.f32.mrf.mxu1  ;;  %v2139_v31 = vpop.f32.mrf.mxu0 }
 0x5ee   :  { %3494 = vpow2.f32 %v3165_v16  ;;  %v3166_v59 = vmul.f32 -1.442695, %v2216_v8 }
 0x5f9   :  { %v3493_v29 = vpop.eup %3492 }
 0x5fa   :  { %v2192_v4 = vadd.f32 1.0, %v3493_v29 }
 0x5fb   :  { %v3495_v22 = vpop.eup %3494 }
 0x5fc   :  { %3496 = vrcp.f32 %v2192_v4  ;;  %v2199_v14 = vadd.f32 1.0, %v3495_v22 }
 0x5fe   :  { %3498 = vrcp.f32 %v2199_v14  ;;  %v2186_v14 = vld [vmem:[#allocation2 + $0x50] sm:$0xc0] }
 0x609   :  { %v3497_v43 = vpop.eup %3496 }
 0x60a   :  { %v2203_v6 = vmul.f32 %v3497_v43, %v2202_v27 }
 0x60b   :  { %v3499_v52 = vpop.eup %3498 }
 0x60c   :  { %v2204_v53 = vadd.f32 %v2203_v6, %v2184_v20  ;;  %v2206_v3 = vsub.f32 1.0, %v3499_v52  ;;  %v2211_v7 = vmul.f32 %v3499_v52, %v2209_v2  ;;  %v2187_v52 = vld [vmem:[#allocation2 + $0x20] sm:$0xc0] }
 0x60e   :  { %3500 = vtanh.f32 %v2204_v53 }
 0x60f   :  { %3502 = vpow2.f32 %v3166_v59 }
 0x61b   :  { %v3501_v26 = vpop.eup %3500 }
 0x61c   :  { %v2207_v31 = vmul.f32 %v3501_v26, %v2206_v3  ;;  %v3503_v23 = vpop.eup %3502 }
 0x61d   :  { %v2220_v29 = vadd.f32 1.0, %v3503_v23 }
 0x61e   :  { %v5693_v16 = vadd.f32 %v2211_v7, %v2207_v31 }
 0x61f   :  { %3504 = vrcp.f32 %v2220_v29 }
 0x620   :  { %v5697_v57 = vpack.c.bf16 %v5693_v16, %v5693_v16 }
 0x622   :  { %3168 = vst [vmem:[%s6469_s5 + $0x8] sm:$0x1] %v5697_v57 }
 0x627   :  { %v2175_v4 = vpop.f32.mrf.mxu1 }
 0x628   :  { %v2224_v22 = vrot.slane %v2175_v4, 2 }
 0x629   :  { %v2177_v1 = vpop.f32.mrf.mxu1 }
 0x62a   :  { %v2226_v27 = vadd.f32 %v2224_v22, %v2186_v14  ;;  %v2233_v20 = vadd.f32 %v5549_v40, %v2177_v1 }
 0x62b   :  { %v2179_v43 = vpop.f32.mrf.mxu1 }
 0x62c   :  { %v3167_v6 = vmul.f32 -1.442695, %v2226_v27  ;;  %v2235_v53 = vrot.slane %v2233_v20, 2  ;;  %v3505_v58 = vpop.eup %3504  ;;  %v5955_v20 = vld [vmem:[%s6466_s2 + $0xcc] ss:$24 sps:$4 sm:$0xff]  }
 0x62d   :  { %v2180_v38 = vpop.f32.mrf.mxu1  ;;  %6900 = vst [vmem:[#allocation20_spill] sm:$0xff] %v5955_v20 }
 0x62e   :  { %3506 = vpow2.f32 %v3167_v6  ;;  %v2237_v8 = vmul.f32 %v3505_v58, %v2235_v53  ;;  %v5949_v38 = vld [vmem:[%s6466_s2 + $0xf8] ss:$24 sps:$4 sm:$0xff]   ;;  %v5961_v53 = vld [vmem:[%s6466_s2 + $0xc8] ss:$24 sps:$4 sm:$0xff]   ;;  %v5967_v58 = vld [vmem:[%s6466_s2 + $0x9c] ss:$24 sps:$4 sm:$0xff]  }
 0x62f   :  { %6901 = vst [vmem:[#allocation22_spill] sm:$0xff] %v5961_v53  ;;  %6902 = vst [vmem:[#allocation24_spill] sm:$0xff] %v5967_v58 }
 0x630   :  { %v2238_v2 = vadd.f32 %v2237_v8, %v2187_v52  ;;  %v5973_v8 = vld [vmem:[%s6466_s2 + $0x98] ss:$24 sps:$4 sm:$0xff]   ;;  %v5985_v52 = vld [vmem:[%s6466_s2 + $0x68] ss:$24 sps:$4 sm:$0xff]  }
 0x631   :  { %6903 = vst [vmem:[#allocation39_spill] sm:$0xff] %v5973_v8  ;;  %6905 = vst [vmem:[#allocation26_spill] sm:$0xff] %v5985_v52 }
 0x63b   :  { %v3507_v59 = vpop.eup %3506 }
 0x63c   :  { %v2230_v3 = vadd.f32 1.0, %v3507_v59  ;;  %v5979_v59 = vld [vmem:[%s6466_s2 + $0x6c] ss:$24 sps:$4 sm:$0xff]  }
 0x63d   :  { %6904 = vst [vmem:[#allocation41_spill] sm:$0xff] %v5979_v59 }
 0x63e   :  { %3508 = vrcp.f32 %v2230_v3  ;;  %v5991_v3 = vld [vmem:[%s6466_s2 + $0x3c] ss:$24 sps:$4 sm:$0xff]  }
 0x63f   :  { %3510 = vtanh.f32 %v2238_v2  ;;  %6906 = vst [vmem:[#allocation28_spill] sm:$0xff] %v5991_v3  ;;  %v5997_v2 = vld [vmem:[%s6466_s2 + $0x38] ss:$24 sps:$4 sm:$0xff]  }
 0x640   :  { %6907 = vst [vmem:[#allocation43_spill] sm:$0xff] %v5997_v2 }
 0x64b   :  { %v3509_v26 = vpop.eup %3508 }
 0x64c   :  { %v2240_v31 = vsub.f32 1.0, %v3509_v26  ;;  %v3511_v7 = vpop.eup %3510  ;;  %v2242_v29 = vmul.f32 %v3509_v26, %v5553_v21  ;;  %v6003_v26 = vld [vmem:[%s6466_s2 + $0xc] ss:$24 sps:$4 sm:$0xff]  }
 0x64d   :  { %6908 = vst [vmem:[#allocation45_spill] sm:$0xff] %v6003_v26 }
 0x64e   :  { %v2241_v23 = vmul.f32 %v3511_v7, %v2240_v31  ;;  %v6009_v31 = vld [vmem:[%s6466_s2 + $0x8] ss:$24 sps:$4 sm:$0xff]   ;;  %v6015_v7 = vld [vmem:[%s6466_s2 + $0x2dc] ss:$24 sps:$4 sm:$0xff]  }
 0x64f   :  { %6909 = vst [vmem:[#allocation30_spill] sm:$0xff] %v6009_v31  ;;  %6910 = vst [vmem:[#allocation32_spill] sm:$0xff] %v6015_v7 }
 0x650   :  { %v5705_v4 = vadd.f32 %v2242_v29, %v2241_v23  ;;  %v6021_v23 = vld [vmem:[%s6466_s2 + $0x2d8] ss:$24 sps:$4 sm:$0xff]   ;;  %v6027_v29 = vld [vmem:[%s6466_s2 + $0x2ac] ss:$24 sps:$4 sm:$0xff]  }
 0x651   :  { %6911 = vst [vmem:[#allocation47_spill] sm:$0xff] %v6021_v23  ;;  %6912 = vst [vmem:[#allocation7_spill] sm:$0xff] %v6027_v29 }
 0x652   :  { %v2246_v22 = vpack.c.bf16 %v5705_v4, %v5705_v4  ;;  %v2267_v14 = vrot.slane %v5705_v4, 6 }
 0x654   :  { %v2254_v1 = vrot.slane %v2246_v22, %v6723_v19  ;;  %v2269_v27 = vpack.c.bf16 %v2267_v14, %v2267_v14  ;;  %v6033_v22 = vld [vmem:[%s6466_s2 + $0x2a8] ss:$24 sps:$4 sm:$0xff]   ;;  %v6039_v14 = vld [vmem:[%s6466_s2 + $0x27c] ss:$24 sps:$4 sm:$0xff]  }
 0x655   :  { %6913 = vst [vmem:[#allocation34_spill] sm:$0xff] %v6033_v22  ;;  %6914 = vst [vmem:[#allocation36_spill] sm:$0xff] %v6039_v14 }
 0x656   :  { %v2255_v43 = vcombine.high %v2254_v1, %v2254_v1  ;;  %2302 = vmatprep.mubr.bf16.mxu0 %v2269_v27  ;;  %2343 = vmatprep.mubr.bf16.mxu1 %v2269_v27  ;;  %v6045_v1 = vld [vmem:[%s6466_s2 + $0x278] ss:$24 sps:$4 sm:$0xff]  }
 0x657   :  { %2303 = vmatmul.mubr.bf16.vlgmr.msra.gmra.mxu0 %v5697_v57  ;;  %2344 = vmatmul.mubr.bf16.vlgmr.msra.gmra.mxu1 %v5697_v57  ;;  %6915 = vst [vmem:[#allocation56_spill] sm:$0xff] %v6045_v1 }
 0x658   :  { %v2262_v6 = vrot.slane %v2255_v43, %v6723_v19  ;;  %2353 = vmatpush1.bf16.msra.mxu0 %v5281_v54  ;;  %2384 = vmatprep.mubr.bf16.mxu0 %v2269_v27  ;;  %v5731_v54 = vld [vmem:[%s6466_s2 + $0xc4] ss:$24 sps:$4 sm:$0xff]   ;;  %v6057_v43 = vld [vmem:[%s6466_s2 + $0x248] ss:$24 sps:$4 sm:$0xff]  }
 0x659   :  { %2354 = vmatprep.subr.bf16.mxu0 %v5287_v41  ;;  %2514 = vmatpush1.bf16.msra.mxu1 %v5569_v34  ;;  %v5739_v41 = vld [vmem:[%s6466_s2 + $0xc0] ss:$24 sps:$4 sm:$0xff]   ;;  %v6051_v27 = vld [vmem:[%s6466_s2 + $0x24c] ss:$24 sps:$4 sm:$0xff]   ;;  %6917 = vst [vmem:[#allocation40_spill] sm:$0xff] %v6057_v43 }
 0x65a   :  { %v2263_v21 = vcombine.high %v2262_v6, %v2262_v6  ;;  %2515 = vmatprep.subr.bf16.mxu1 %v5575_v18  ;;  %6916 = vst [vmem:[#allocation38_spill] sm:$0xff] %v6051_v27  ;;  %v6063_v6 = vld [vmem:[%s6466_s2 + $0x21c] ss:$24 sps:$4 sm:$0xff]  }
 0x65b   :  { %6918 = vst [vmem:[#allocation42_spill] sm:$0xff] %v6063_v6 }
 0x65c   :  { %3169 = vst [vmem:[%s6469_s5 + $0x7] sm:$0x1] %v2263_v21  ;;  %2355 = vmatpush1.bf16.msra.mxu0 %v5295_v51  ;;  %v5745_v51 = vld [vmem:[%s6466_s2 + $0x94] ss:$24 sps:$4 sm:$0xff]   ;;  %v6069_v21 = vld [vmem:[%s6466_s2 + $0x218] ss:$24 sps:$4 sm:$0xff]  }
 0x65d   :  { %2356 = vmatprep.subr.bf16.mxu0 %v5301_v55  ;;  %2516 = vmatpush1.bf16.msra.mxu1 %v5583_v63  ;;  %v5753_v55 = vld [vmem:[%s6466_s2 + $0x90] ss:$24 sps:$4 sm:$0xff]   ;;  %6919 = vst [vmem:[#allocation44_spill] sm:$0xff] %v6069_v21 }
 0x65e   :  { %2517 = vmatprep.subr.bf16.mxu1 %v5589_v24 }
 0x660   :  { %2357 = vmatpush1.bf16.msra.mxu0 %v5309_v56  ;;  %v5759_v56 = vld [vmem:[%s6466_s2 + $0x64] ss:$24 sps:$4 sm:$0xff]  }
 0x661   :  { %2358 = vmatprep.subr.bf16.mxu0 %v5315_v46  ;;  %2518 = vmatpush1.bf16.msra.mxu1 %v5597_v62  ;;  %v5767_v46 = vld [vmem:[%s6466_s2 + $0x60] ss:$24 sps:$4 sm:$0xff]  }
 0x662   :  { %2519 = vmatprep.subr.bf16.mxu1 %v5731_v54 }
 0x664   :  { %2359 = vmatpush1.bf16.msra.mxu0 %v5323_v0  ;;  %v5773_v0 = vld [vmem:[%s6466_s2 + $0x34] ss:$24 sps:$4 sm:$0xff]  }
 0x665   :  { %2360 = vmatprep.subr.bf16.mxu0 %v5329_v10  ;;  %2520 = vmatpush1.bf16.msra.mxu1 %v5739_v41  ;;  %v5781_v10 = vld [vmem:[%s6466_s2 + $0x30] ss:$24 sps:$4 sm:$0xff]  }
 0x666   :  { %2521 = vmatprep.subr.bf16.mxu1 %v5745_v51 }
 0x668   :  { %2361 = vmatpush1.bf16.msra.mxu0 %v5337_v13  ;;  %v5787_v13 = vld [vmem:[%s6466_s2 + $0x4] ss:$24 sps:$4 sm:$0xff]  }
 0x669   :  { %2362 = vmatprep.subr.bf16.mxu0 %v5343_v49  ;;  %2522 = vmatpush1.bf16.msra.mxu1 %v5753_v55  ;;  %v5795_v49 = vld [vmem:[%s6466_s2] ss:$24 sps:$4 sm:$0xff]  }
 0x66a   :  { %2523 = vmatprep.subr.bf16.mxu1 %v5759_v56 }
 0x66c   :  { %2363 = vmatpush1.bf16.msra.mxu0 %v5351_v45  ;;  %v5801_v45 = vld [vmem:[%s6466_s2 + $0x2d4] ss:$24 sps:$4 sm:$0xff]  }
 0x66d   :  { %2364 = vmatprep.subr.bf16.mxu0 %v5357_v47  ;;  %2524 = vmatpush1.bf16.msra.mxu1 %v5767_v46  ;;  %v5809_v47 = vld [vmem:[%s6466_s2 + $0x2d0] ss:$24 sps:$4 sm:$0xff]  }
 0x66e   :  { %2525 = vmatprep.subr.bf16.mxu1 %v5773_v0 }
 0x670   :  { %2365 = vmatpush1.bf16.msra.mxu0 %v5365_v32  ;;  %v5815_v32 = vld [vmem:[%s6466_s2 + $0x2a4] ss:$24 sps:$4 sm:$0xff]  }
 0x671   :  { %2366 = vmatprep.subr.bf16.mxu0 %v5371_v61  ;;  %2526 = vmatpush1.bf16.msra.mxu1 %v5781_v10  ;;  %v5823_v61 = vld [vmem:[%s6466_s2 + $0x2a0] ss:$24 sps:$4 sm:$0xff]  }
 0x672   :  { %2527 = vmatprep.subr.bf16.mxu1 %v5787_v13 }
 0x674   :  { %2367 = vmatpush1.bf16.msra.mxu0 %v5379_v35  ;;  %v5829_v35 = vld [vmem:[%s6466_s2 + $0x274] ss:$24 sps:$4 sm:$0xff]  }
 0x675   :  { %2368 = vmatprep.subr.bf16.mxu0 %v5385_v50  ;;  %2528 = vmatpush1.bf16.msra.mxu1 %v5795_v49  ;;  %v5837_v50 = vld [vmem:[%s6466_s2 + $0x270] ss:$24 sps:$4 sm:$0xff]  }
 0x676   :  { %2529 = vmatprep.subr.bf16.mxu1 %v5801_v45 }
 0x678   :  { %2369 = vmatpush2.bf16.msra.mxu0 %v5393_v42  ;;  %v5843_v42 = vld [vmem:[%s6466_s2 + $0x244] ss:$24 sps:$4 sm:$0xff]  }
 0x679   :  { %2370 = vmatprep.subr.bf16.mxu0 %v5399_v5  ;;  %2530 = vmatpush2.bf16.msra.mxu1 %v5809_v47  ;;  %v5851_v5 = vld [vmem:[%s6466_s2 + $0x240] ss:$24 sps:$4 sm:$0xff]  }
 0x67a   :  { %2531 = vmatprep.subr.bf16.mxu1 %v5815_v32 }
 0x67c   :  { %2371 = vmatpush2.bf16.msra.mxu0 %v5407_v33  ;;  %v5857_v33 = vld [vmem:[%s6466_s2 + $0x214] ss:$24 sps:$4 sm:$0xff]  }
 0x67d   :  { %2372 = vmatprep.subr.bf16.mxu0 %v5413_v39  ;;  %2532 = vmatpush2.bf16.msra.mxu1 %v5823_v61  ;;  %v5865_v39 = vld [vmem:[%s6466_s2 + $0x210] ss:$24 sps:$4 sm:$0xff]  }
 0x67e   :  { %2533 = vmatprep.subr.bf16.mxu1 %v5829_v35 }
 0x680   :  { %2373 = vmatpush2.bf16.msra.mxu0 %v5421_v36  ;;  %v5871_v36 = vld [vmem:[%s6466_s2 + $0x1e4] ss:$24 sps:$4 sm:$0xff]  }
 0x681   :  { %2374 = vmatprep.subr.bf16.mxu0 %v5427_v15  ;;  %2534 = vmatpush2.bf16.msra.mxu1 %v5837_v50  ;;  %v5879_v15 = vld [vmem:[%s6466_s2 + $0x1e0] ss:$24 sps:$4 sm:$0xff]  }
 0x682   :  { %2535 = vmatprep.subr.bf16.mxu1 %v5843_v42 }
 0x684   :  { %2375 = vmatpush2.bf16.msra.mxu0 %v5435_v30  ;;  %v5885_v30 = vld [vmem:[%s6466_s2 + $0x1b4] ss:$24 sps:$4 sm:$0xff]  }
 0x685   :  { %2376 = vmatprep.subr.bf16.mxu0 %v5441_v60  ;;  %2536 = vmatpush2.bf16.msra.mxu1 %v5851_v5  ;;  %v5893_v60 = vld [vmem:[%s6466_s2 + $0x1b0] ss:$24 sps:$4 sm:$0xff]  }
 0x686   :  { %2537 = vmatprep.subr.bf16.mxu1 %v5857_v33 }
 0x688   :  { %2377 = vmatpush2.bf16.msra.mxu0 %v6853_v44  ;;  %v5899_v44 = vld [vmem:[%s6466_s2 + $0x184] ss:$24 sps:$4 sm:$0xff]  }
 0x689   :  { %2378 = vmatprep.subr.bf16.mxu0 %v6854_v48  ;;  %2538 = vmatpush2.bf16.msra.mxu1 %v5865_v39  ;;  %v5906_v48 = vld [vmem:[%s6466_s2 + $0x15c] ss:$24 sps:$4 sm:$0xff]  }
 0x68a   :  { %2539 = vmatprep.subr.bf16.mxu1 %v5871_v36 }
 0x68c   :  { %2379 = vmatpush2.bf16.msra.mxu0 %v6857_v17  ;;  %v5912_v17 = vld [vmem:[%s6466_s2 + $0x180] ss:$24 sps:$4 sm:$0xff]  }
 0x68d   :  { %2380 = vmatprep.subr.bf16.mxu0 %v6858_v11  ;;  %2540 = vmatpush2.bf16.msra.mxu1 %v5879_v15  ;;  %v5918_v11 = vld [vmem:[%s6466_s2 + $0x164] ss:$24 sps:$4 sm:$0xff]  }
 0x68e   :  { %2541 = vmatprep.subr.bf16.mxu1 %v5885_v30 }
 0x690   :  { %2381 = vmatpush2.bf16.msra.mxu0 %v6861_v25  ;;  %v5925_v25 = vld [vmem:[%s6466_s2 + $0x158] ss:$24 sps:$4 sm:$0xff]  }
 0x691   :  { %2382 = vmatprep.subr.bf16.mxu0 %v6862_v28  ;;  %2542 = vmatpush2.bf16.msra.mxu1 %v5893_v60  ;;  %v5931_v28 = vld [vmem:[%s6466_s2 + $0x12c] ss:$24 sps:$4 sm:$0xff]  }
 0x692   :  { %2543 = vmatprep.subr.bf16.mxu1 %v5899_v44 }
 0x694   :  { %2383 = vmatpush2.bf16.msra.mxu0 %v6865_v12  ;;  %v5937_v12 = vld [vmem:[%s6466_s2 + $0x128] ss:$24 sps:$4 sm:$0xff]  }
 0x695   :  { %2554 = vmatprep.subr.bf16.mxu0 %v5906_v48  ;;  %2544 = vmatpush2.bf16.msra.mxu1 %v5912_v17 }
 0x696   :  { %2595 = vmatprep.subr.bf16.mxu1 %v5918_v11 }
 0x697   :  { %2385 = vmatmul.mubr.bf16.vlgmr.msra.gmra.mxu0 %v5697_v57  ;;  %v5943_v57 = vld [vmem:[%s6466_s2 + $0xfc] ss:$24 sps:$4 sm:$0xff]  }
 0x698   :  { %2555 = vmatpush1.bf16.msra.mxu0 %v5925_v25 }
 0x699   :  { %2556 = vmatprep.subr.bf16.mxu0 %v5931_v28 }
 0x69c   :  { %2557 = vmatpush1.bf16.msra.mxu0 %v5937_v12 }
 0x69d   :  { %2558 = vmatprep.subr.bf16.mxu0 %v5943_v57 }
 0x6a0   :  { %2559 = vmatpush1.bf16.msra.mxu0 %v5949_v38 }
 0x6a1   :  { %2560 = vmatprep.subr.bf16.mxu0 %v5955_v20 }
 0x6a4   :  { %2561 = vmatpush1.bf16.msra.mxu0 %v5961_v53 }
 0x6a5   :  { %2562 = vmatprep.subr.bf16.mxu0 %v5967_v58 }
 0x6a8   :  { %2563 = vmatpush1.bf16.msra.mxu0 %v5973_v8 }
 0x6a9   :  { %2564 = vmatprep.subr.bf16.mxu0 %v5979_v59 }
 0x6ac   :  { %2565 = vmatpush1.bf16.msra.mxu0 %v5985_v52  ;;  %v2394_v52 = vld [vmem:[#allocation2 + $0x38] sm:$0xc] }
 0x6ad   :  { %2566 = vmatprep.subr.bf16.mxu0 %v5991_v3 }
 0x6b0   :  { %2567 = vmatpush1.bf16.msra.mxu0 %v5997_v2 }
 0x6b1   :  { %2568 = vmatprep.subr.bf16.mxu0 %v6003_v26 }
 0x6b4   :  { %2569 = vmatpush1.bf16.msra.mxu0 %v6009_v31 }
 0x6b5   :  { %2570 = vmatprep.subr.bf16.mxu0 %v6015_v7 }
 0x6b8   :  { %2571 = vmatpush2.bf16.msra.mxu0 %v6021_v23 }
 0x6b9   :  { %2572 = vmatprep.subr.bf16.mxu0 %v6027_v29 }
 0x6bc   :  { %2573 = vmatpush2.bf16.msra.mxu0 %v6033_v22 }
 0x6bd   :  { %2574 = vmatprep.subr.bf16.mxu0 %v6039_v14 }
 0x6c0   :  { %2575 = vmatpush2.bf16.msra.mxu0 %v6045_v1 }
 0x6c1   :  { %2576 = vmatprep.subr.bf16.mxu0 %v6051_v27  ;;  %v6075_v27 = vld [vmem:[%s6466_s2 + $0x1ec] ss:$24 sps:$4 sm:$0xff]  }
 0x6c2   :  { %6920 = vst [vmem:[#allocation46_spill] sm:$0xff] %v6075_v27 }
 0x6c4   :  { %2577 = vmatpush2.bf16.msra.mxu0 %v6057_v43  ;;  %v6081_v43 = vld [vmem:[%s6466_s2 + $0x1e8] ss:$24 sps:$4 sm:$0xff]  }
 0x6c5   :  { %2578 = vmatprep.subr.bf16.mxu0 %v6063_v6  ;;  %6921 = vst [vmem:[#allocation48_spill] sm:$0xff] %v6081_v43  ;;  %v6087_v6 = vld [vmem:[%s6466_s2 + $0x1bc] ss:$24 sps:$4 sm:$0xff]  }
 0x6c6   :  { %6922 = vst [vmem:[#allocation49_spill] sm:$0xff] %v6087_v6 }
 0x6c8   :  { %2579 = vmatpush2.bf16.msra.mxu0 %v6069_v21  ;;  %v6093_v21 = vld [vmem:[%s6466_s2 + $0x1b8] ss:$24 sps:$4 sm:$0xff]  }
 0x6c9   :  { %2580 = vmatprep.subr.bf16.mxu0 %v6075_v27  ;;  %6923 = vst [vmem:[#allocation50_spill] sm:$0xff] %v6093_v21  ;;  %v6099_v27 = vld [vmem:[%s6466_s2 + $0x18c] ss:$24 sps:$4 sm:$0xff]  }
 0x6ca   :  { %6924 = vst [vmem:[#allocation51_spill] sm:$0xff] %v6099_v27 }
 0x6cc   :  { %2581 = vmatpush2.bf16.msra.mxu0 %v6081_v43  ;;  %v6105_v43 = vld [vmem:[%s6466_s2 + $0x188] ss:$24 sps:$4 sm:$0xff]  }
 0x6cd   :  { %2582 = vmatprep.subr.bf16.mxu0 %v6087_v6  ;;  %6925 = vst [vmem:[#allocation52_spill] sm:$0xff] %v6105_v43 }
 0x6d0   :  { %2583 = vmatpush2.bf16.msra.mxu0 %v6093_v21  ;;  %v2393_v21 = vld [vmem:[#allocation2 + $0x8] sm:$0xc] }
 0x6d1   :  { %2584 = vmatprep.subr.bf16.mxu0 %v6099_v27 }
 0x6d4   :  { %2585 = vmatpush2.bf16.msra.mxu0 %v6105_v43 }
 0x6d5   :  { %2754 = vmatprep.subr.bf16.mxu0 %v5688_v9 }
 0x717   :  { %v2304_v6 = vpop.f32.mrf.mxu0  ;;  %v2345_v1 = vpop.f32.mrf.mxu1 }
 0x718   :  { %v2400_v14 = vrot.slane %v2304_v6, 6  ;;  %v2419_v6 = vadd.f32 %v5533_v37, %v2345_v1 }
 0x719   :  { %v2306_v22 = vpop.f32.mrf.mxu0  ;;  %v2347_v29 = vpop.f32.mrf.mxu1 }
 0x71a   :  { %v2402_v23 = vadd.f32 %v2400_v14, %v2393_v21  ;;  %v2410_v27 = vrot.slane %v2306_v22, 6  ;;  %v2421_v20 = vrot.slane %v2419_v6, 6  ;;  %v2434_v14 = vrot.slane %v2347_v29, 4 }
 0x71b   :  { %v2308_v7 = vpop.f32.mrf.mxu0  ;;  %v2349_v31 = vpop.f32.mrf.mxu1 }
 0x71c   :  { %v3170_v26 = vmul.f32 -1.442695, %v2402_v23  ;;  %v2412_v59 = vadd.f32 %v2410_v27, %v2394_v52  ;;  %v2395_v23 = vld [vmem:[#allocation2 + $0x28] sm:$0xc] }
 0x71d   :  { %v2309_v2 = vpop.f32.mrf.mxu0  ;;  %v2350_v3 = vpop.f32.mrf.mxu1 }
 0x71e   :  { %3512 = vpow2.f32 %v3170_v26  ;;  %v3171_v8 = vmul.f32 -1.442695, %v2412_v59  ;;  %v2396_v2 = vld [vmem:[#allocation2 + $0x18] sm:$0x30]  ;;  %v2429_v59 = vrot.slane %v5693_v16, 6 }
 0x71f   :  { %v2436_v26 = vadd.f32 %v2434_v14, %v2396_v2  ;;  %v2397_v16 = vld [vmem:[#allocation2 + $0x50] sm:$0x30] }
 0x720   :  { %3514 = vpow2.f32 %v3171_v8 }
 0x721   :  { %v3172_v52 = vmul.f32 -1.442695, %v2436_v26 }
 0x72b   :  { %v3513_v43 = vpop.eup %3512 }
 0x72c   :  { %v2406_v9 = vadd.f32 1.0, %v3513_v43 }
 0x72d   :  { %v3515_v58 = vpop.eup %3514 }
 0x72e   :  { %3516 = vrcp.f32 %v2406_v9  ;;  %v2416_v53 = vadd.f32 1.0, %v3515_v58 }
 0x730   :  { %3518 = vrcp.f32 %v2416_v53 }
 0x73b   :  { %v3517_v7 = vpop.eup %3516 }
 0x73c   :  { %v2423_v31 = vmul.f32 %v3517_v7, %v2421_v20 }
 0x73d   :  { %v3519_v8 = vpop.eup %3518 }
 0x73e   :  { %v2424_v3 = vadd.f32 %v2423_v31, %v2395_v23  ;;  %v2426_v22 = vsub.f32 1.0, %v3519_v8  ;;  %v2431_v37 = vmul.f32 %v3519_v8, %v2429_v59 }
 0x740   :  { %3520 = vtanh.f32 %v2424_v3 }
 0x741   :  { %3522 = vpow2.f32 %v3172_v52 }
 0x74d   :  { %v3521_v27 = vpop.eup %3520 }
 0x74e   :  { %v2427_v43 = vmul.f32 %v3521_v27, %v2426_v22  ;;  %v3523_v53 = vpop.eup %3522  ;;  %v2398_v22 = vld [vmem:[#allocation2 + $0x20] sm:$0x30] }
 0x74f   :  { %v2440_v1 = vadd.f32 1.0, %v3523_v53 }
 0x750   :  { %v6111_v58 = vadd.f32 %v2431_v37, %v2427_v43 }
 0x751   :  { %3524 = vrcp.f32 %v2440_v1 }
 0x752   :  { %v2466_v20 = vpack.c.bf16 %v6111_v58, %v6111_v58 }
 0x754   :  { %v2474_v29 = vrot.slane %v2466_v20, %v6723_v19 }
 0x756   :  { %v2475_v21 = vcombine.high %v2474_v29, %v2474_v29  ;;  %v2462_v29 = vrot.slane %v5705_v4, 2  ;;  %v6137_v4 = vld [vmem:[%s6466_s2 + $0x160] ss:$24 sps:$4 sm:$0xff]  }
 0x757   :  { %v2386_v9 = vpop.f32.mrf.mxu0 }
 0x758   :  { %v2444_v6 = vrot.slane %v2386_v9, 4  ;;  %3189 = vst.sshfl [vmem:[%s6469_s5 + $0xa] sm:$0x1 pattern:$0x73625140] %v2475_v21 }
 0x759   :  { %v2388_v14 = vpop.f32.mrf.mxu0 }
 0x75a   :  { %v2446_v7 = vadd.f32 %v2444_v6, %v2397_v16  ;;  %v2453_v3 = vadd.f32 %v5549_v40, %v2388_v14 }
 0x75b   :  { %v2390_v31 = vpop.f32.mrf.mxu0 }
 0x75c   :  { %v3173_v23 = vmul.f32 -1.442695, %v2446_v7  ;;  %v2455_v26 = vrot.slane %v2453_v3, 4 }
 0x75d   :  { %v2391_v2 = vpop.f32.mrf.mxu0 }
 0x75e   :  { %3526 = vpow2.f32 %v3173_v23  ;;  %v3525_v52 = vpop.eup %3524  ;;  %v6127_v2 = vrot.slane %v2466_v20, 1  ;;  %v6143_v20 = vld [vmem:[%s6466_s2 + $0x134] ss:$24 sps:$4 sm:$0xff]  }
 0x75f   :  { %v2457_v8 = vmul.f32 %v3525_v52, %v2455_v26  ;;  %v6151_v26 = vld [vmem:[%s6466_s2 + $0x130] ss:$24 sps:$4 sm:$0xff]   ;;  %v6157_v52 = vld [vmem:[%s6466_s2 + $0x104] ss:$24 sps:$4 sm:$0xff]  }
 0x761   :  { %v2458_v43 = vadd.f32 %v2457_v8, %v2398_v22  ;;  %v6937_v8 = vld [vmem:[#allocation47_spill] sm:$0xff]  ;;  %v6939_v22 = vld [vmem:[#allocation34_spill] sm:$0xff] }
 0x76b   :  { %v3527_v59 = vpop.eup %3526 }
 0x76c   :  { %v2450_v27 = vadd.f32 1.0, %v3527_v59  ;;  %v6938_v59 = vld [vmem:[#allocation7_spill] sm:$0xff] }
 0x76e   :  { %3528 = vrcp.f32 %v2450_v27  ;;  %v6940_v27 = vld [vmem:[#allocation36_spill] sm:$0xff] }
 0x76f   :  { %3530 = vtanh.f32 %v2458_v43  ;;  %v6941_v43 = vld [vmem:[#allocation56_spill] sm:$0xff] }
 0x77b   :  { %v3529_v37 = vpop.eup %3528 }
 0x77c   :  { %v2460_v53 = vsub.f32 1.0, %v3529_v37  ;;  %v3531_v1 = vpop.eup %3530  ;;  %v2464_v9 = vmul.f32 %v3529_v37, %v2462_v29  ;;  %v6942_v37 = vld [vmem:[#allocation38_spill] sm:$0xff] }
 0x77d   :  { %v6944_v29 = vld [vmem:[#allocation42_spill] sm:$0xff] }
 0x77e   :  { %v2461_v21 = vmul.f32 %v3531_v1, %v2460_v53  ;;  %v6943_v53 = vld [vmem:[#allocation40_spill] sm:$0xff] }
 0x77f   :  { %v6945_v1 = vld [vmem:[#allocation44_spill] sm:$0xff] }
 0x780   :  { %v2465_v6 = vadd.f32 %v2464_v9, %v2461_v21  ;;  %v6946_v21 = vld [vmem:[#allocation46_spill] sm:$0xff]  ;;  %v6947_v9 = vld [vmem:[#allocation48_spill] sm:$0xff] }
 0x782   :  { %v2485_v16 = vpack.c.bf16 %v2465_v6, %v2465_v6  ;;  %v6121_v7 = vrot.slane %v2465_v6, 2  ;;  %v6948_v6 = vld [vmem:[#allocation49_spill] sm:$0xff] }
 0x784   :  { %v2493_v40 = vrot.slane %v2485_v16, %v6723_v19  ;;  %v2507_v14 = vpack.c.bf16 %v6121_v7, %v6121_v7  ;;  %v6949_v16 = vld [vmem:[#allocation50_spill] sm:$0xff] }
 0x786   :  { %v2500_v31 = vrot.slane %v2493_v40, %v6723_v19  ;;  %v2510_v23 = vrot.slane %v2507_v14, 1  ;;  %v6950_v40 = vld [vmem:[#allocation51_spill] sm:$0xff]  ;;  %v6951_v14 = vld [vmem:[#allocation52_spill] sm:$0xff] }
 0x788   :  { %v2501_v3 = vcombine.high %v2500_v31, %v2500_v31  ;;  %2545 = vmatprep.mubr.bf16.mxu1 %v2510_v23  ;;  %2586 = vmatprep.mubr.bf16.mxu0 %v2510_v23 }
 0x789   :  { %2546 = vmatmul.mubr.bf16.vlgmr.msra.gmra.mxu1 %v6127_v2  ;;  %2587 = vmatmul.mubr.bf16.vlgmr.msra.gmra.mxu0 %v6127_v2 }
 0x78a   :  { %3175 = vst [vmem:[%s6469_s5 + $0x5] sm:$0x1] %v2501_v3  ;;  %2596 = vmatpush1.bf16.msra.mxu1 %v6137_v4  ;;  %2627 = vmatprep.mubr.bf16.mxu1 %v2510_v23  ;;  %v2636_v3 = vld [vmem:[#allocation2 + $0x8] sm:$0x30] }
 0x78b   :  { %2597 = vmatprep.subr.bf16.mxu1 %v6143_v20  ;;  %2755 = vmatpush1.bf16.msra.mxu0 %v5569_v34  ;;  %v6165_v34 = vld [vmem:[%s6466_s2 + $0x100] ss:$24 sps:$4 sm:$0xff]  }
 0x78c   :  { %2756 = vmatprep.subr.bf16.mxu0 %v5575_v18  ;;  %v6171_v18 = vld [vmem:[%s6466_s2 + $0xd4] ss:$24 sps:$4 sm:$0xff]  }
 0x78e   :  { %2598 = vmatpush1.bf16.msra.mxu1 %v6151_v26 }
 0x78f   :  { %2599 = vmatprep.subr.bf16.mxu1 %v6157_v52  ;;  %2757 = vmatpush1.bf16.msra.mxu0 %v5583_v63  ;;  %v6179_v63 = vld [vmem:[%s6466_s2 + $0xd0] ss:$24 sps:$4 sm:$0xff]  }
 0x790   :  { %2758 = vmatprep.subr.bf16.mxu0 %v5589_v24  ;;  %v6185_v24 = vld [vmem:[%s6466_s2 + $0xa4] ss:$24 sps:$4 sm:$0xff]  }
 0x792   :  { %2600 = vmatpush1.bf16.msra.mxu1 %v6165_v34 }
 0x793   :  { %2601 = vmatprep.subr.bf16.mxu1 %v6171_v18  ;;  %2759 = vmatpush1.bf16.msra.mxu0 %v5597_v62  ;;  %v6193_v62 = vld [vmem:[%s6466_s2 + $0xa0] ss:$24 sps:$4 sm:$0xff]  }
 0x794   :  { %2760 = vmatprep.subr.bf16.mxu0 %v5731_v54  ;;  %v6199_v54 = vld [vmem:[%s6466_s2 + $0x74] ss:$24 sps:$4 sm:$0xff]  }
 0x796   :  { %2602 = vmatpush1.bf16.msra.mxu1 %v6179_v63 }
 0x797   :  { %2603 = vmatprep.subr.bf16.mxu1 %v6185_v24  ;;  %2761 = vmatpush1.bf16.msra.mxu0 %v5739_v41  ;;  %v6207_v41 = vld [vmem:[%s6466_s2 + $0x70] ss:$24 sps:$4 sm:$0xff]  }
 0x798   :  { %2762 = vmatprep.subr.bf16.mxu0 %v5745_v51  ;;  %v6213_v51 = vld [vmem:[%s6466_s2 + $0x44] ss:$24 sps:$4 sm:$0xff]  }
 0x79a   :  { %2604 = vmatpush1.bf16.msra.mxu1 %v6193_v62 }
 0x79b   :  { %2605 = vmatprep.subr.bf16.mxu1 %v6199_v54  ;;  %2763 = vmatpush1.bf16.msra.mxu0 %v5753_v55  ;;  %v6221_v55 = vld [vmem:[%s6466_s2 + $0x40] ss:$24 sps:$4 sm:$0xff]  }
 0x79c   :  { %2764 = vmatprep.subr.bf16.mxu0 %v5759_v56  ;;  %v6227_v56 = vld [vmem:[%s6466_s2 + $0x14] ss:$24 sps:$4 sm:$0xff]  }
 0x79e   :  { %2606 = vmatpush1.bf16.msra.mxu1 %v6207_v41 }
 0x79f   :  { %2607 = vmatprep.subr.bf16.mxu1 %v6213_v51  ;;  %2765 = vmatpush1.bf16.msra.mxu0 %v5767_v46  ;;  %v6235_v46 = vld [vmem:[%s6466_s2 + $0x10] ss:$24 sps:$4 sm:$0xff]  }
 0x7a0   :  { %2766 = vmatprep.subr.bf16.mxu0 %v5773_v0  ;;  %v6241_v0 = vld [vmem:[%s6466_s2 + $0x2e4] ss:$24 sps:$4 sm:$0xff]  }
 0x7a2   :  { %2608 = vmatpush1.bf16.msra.mxu1 %v6221_v55 }
 0x7a3   :  { %2609 = vmatprep.subr.bf16.mxu1 %v6227_v56  ;;  %2767 = vmatpush1.bf16.msra.mxu0 %v5781_v10  ;;  %v6249_v10 = vld [vmem:[%s6466_s2 + $0x2e0] ss:$24 sps:$4 sm:$0xff]  }
 0x7a4   :  { %2768 = vmatprep.subr.bf16.mxu0 %v5787_v13  ;;  %v6255_v13 = vld [vmem:[%s6466_s2 + $0x2b4] ss:$24 sps:$4 sm:$0xff]  }
 0x7a6   :  { %2610 = vmatpush1.bf16.msra.mxu1 %v6235_v46 }
 0x7a7   :  { %2611 = vmatprep.subr.bf16.mxu1 %v6241_v0  ;;  %2769 = vmatpush1.bf16.msra.mxu0 %v5795_v49  ;;  %v6263_v49 = vld [vmem:[%s6466_s2 + $0x2b0] ss:$24 sps:$4 sm:$0xff]  }
 0x7a8   :  { %2770 = vmatprep.subr.bf16.mxu0 %v5801_v45  ;;  %v6269_v45 = vld [vmem:[%s6466_s2 + $0x284] ss:$24 sps:$4 sm:$0xff]  }
 0x7aa   :  { %2612 = vmatpush2.bf16.msra.mxu1 %v6249_v10 }
 0x7ab   :  { %2613 = vmatprep.subr.bf16.mxu1 %v6255_v13  ;;  %2771 = vmatpush2.bf16.msra.mxu0 %v5809_v47  ;;  %v6277_v47 = vld [vmem:[%s6466_s2 + $0x280] ss:$24 sps:$4 sm:$0xff]  }
 0x7ac   :  { %2772 = vmatprep.subr.bf16.mxu0 %v5815_v32  ;;  %v6283_v32 = vld [vmem:[%s6466_s2 + $0x254] ss:$24 sps:$4 sm:$0xff]  }
 0x7ae   :  { %2614 = vmatpush2.bf16.msra.mxu1 %v6263_v49 }
 0x7af   :  { %2615 = vmatprep.subr.bf16.mxu1 %v6269_v45  ;;  %2773 = vmatpush2.bf16.msra.mxu0 %v5823_v61  ;;  %v6291_v61 = vld [vmem:[%s6466_s2 + $0x250] ss:$24 sps:$4 sm:$0xff]  }
 0x7b0   :  { %2774 = vmatprep.subr.bf16.mxu0 %v5829_v35  ;;  %v6297_v35 = vld [vmem:[%s6466_s2 + $0x224] ss:$24 sps:$4 sm:$0xff]  }
 0x7b2   :  { %2616 = vmatpush2.bf16.msra.mxu1 %v6277_v47 }
 0x7b3   :  { %2617 = vmatprep.subr.bf16.mxu1 %v6283_v32  ;;  %2775 = vmatpush2.bf16.msra.mxu0 %v5837_v50  ;;  %v6305_v50 = vld [vmem:[%s6466_s2 + $0x220] ss:$24 sps:$4 sm:$0xff]  }
 0x7b4   :  { %2776 = vmatprep.subr.bf16.mxu0 %v5843_v42  ;;  %v6311_v42 = vld [vmem:[%s6466_s2 + $0x1f4] ss:$24 sps:$4 sm:$0xff]  }
 0x7b6   :  { %2618 = vmatpush2.bf16.msra.mxu1 %v6291_v61 }
 0x7b7   :  { %2619 = vmatprep.subr.bf16.mxu1 %v6297_v35  ;;  %2777 = vmatpush2.bf16.msra.mxu0 %v5851_v5  ;;  %v6319_v5 = vld [vmem:[%s6466_s2 + $0x1f0] ss:$24 sps:$4 sm:$0xff]  }
 0x7b8   :  { %2778 = vmatprep.subr.bf16.mxu0 %v5857_v33  ;;  %v6325_v33 = vld [vmem:[%s6466_s2 + $0x1c4] ss:$24 sps:$4 sm:$0xff]  }
 0x7ba   :  { %2620 = vmatpush2.bf16.msra.mxu1 %v6305_v50 }
 0x7bb   :  { %2621 = vmatprep.subr.bf16.mxu1 %v6311_v42  ;;  %2779 = vmatpush2.bf16.msra.mxu0 %v5865_v39  ;;  %v6333_v39 = vld [vmem:[%s6466_s2 + $0x1c0] ss:$24 sps:$4 sm:$0xff]  }
 0x7bc   :  { %2780 = vmatprep.subr.bf16.mxu0 %v5871_v36  ;;  %v6339_v36 = vld [vmem:[%s6466_s2 + $0x194] ss:$24 sps:$4 sm:$0xff]  }
 0x7be   :  { %2622 = vmatpush2.bf16.msra.mxu1 %v6319_v5 }
 0x7bf   :  { %2623 = vmatprep.subr.bf16.mxu1 %v6325_v33  ;;  %2781 = vmatpush2.bf16.msra.mxu0 %v5879_v15  ;;  %v6347_v15 = vld [vmem:[%s6466_s2 + $0x190] ss:$24 sps:$4 sm:$0xff]  }
 0x7c0   :  { %2782 = vmatprep.subr.bf16.mxu0 %v5885_v30  ;;  %v6926_v30 = vld [vmem:[#allocation20_spill] sm:$0xff] }
 0x7c2   :  { %2624 = vmatpush2.bf16.msra.mxu1 %v6333_v39 }
 0x7c3   :  { %2625 = vmatprep.subr.bf16.mxu1 %v6339_v36  ;;  %2783 = vmatpush2.bf16.msra.mxu0 %v5893_v60  ;;  %v6927_v60 = vld [vmem:[#allocation22_spill] sm:$0xff] }
 0x7c4   :  { %2784 = vmatprep.subr.bf16.mxu0 %v5899_v44  ;;  %v6928_v44 = vld [vmem:[#allocation24_spill] sm:$0xff] }
 0x7c6   :  { %2626 = vmatpush2.bf16.msra.mxu1 %v6347_v15 }
 0x7c7   :  { %2795 = vmatprep.subr.bf16.mxu1 %v5906_v48  ;;  %2785 = vmatpush2.bf16.msra.mxu0 %v5912_v17  ;;  %v6929_v48 = vld [vmem:[#allocation39_spill] sm:$0xff]  ;;  %v6930_v17 = vld [vmem:[#allocation41_spill] sm:$0xff] }
 0x7c8   :  { %2836 = vmatprep.subr.bf16.mxu0 %v5918_v11  ;;  %v6931_v11 = vld [vmem:[#allocation26_spill] sm:$0xff] }
 0x7c9   :  { %2628 = vmatmul.mubr.bf16.vlgmr.msra.gmra.mxu1 %v6127_v2 }
 0x7ca   :  { %2796 = vmatpush1.bf16.msra.mxu1 %v5925_v25  ;;  %v6932_v25 = vld [vmem:[#allocation28_spill] sm:$0xff] }
 0x7cb   :  { %2797 = vmatprep.subr.bf16.mxu1 %v5931_v28  ;;  %v6933_v28 = vld [vmem:[#allocation43_spill] sm:$0xff] }
 0x7ce   :  { %2798 = vmatpush1.bf16.msra.mxu1 %v5937_v12  ;;  %v6934_v12 = vld [vmem:[#allocation45_spill] sm:$0xff] }
 0x7cf   :  { %2799 = vmatprep.subr.bf16.mxu1 %v5943_v57  ;;  %v6935_v57 = vld [vmem:[#allocation30_spill] sm:$0xff] }
 0x7d2   :  { %2800 = vmatpush1.bf16.msra.mxu1 %v5949_v38  ;;  %v6936_v38 = vld [vmem:[#allocation32_spill] sm:$0xff] }
 0x7d3   :  { %2801 = vmatprep.subr.bf16.mxu1 %v6926_v30 }
 0x7d6   :  { %2802 = vmatpush1.bf16.msra.mxu1 %v6927_v60 }
 0x7d7   :  { %2803 = vmatprep.subr.bf16.mxu1 %v6928_v44 }
 0x7da   :  { %2804 = vmatpush1.bf16.msra.mxu1 %v6929_v48 }
 0x7db   :  { %2805 = vmatprep.subr.bf16.mxu1 %v6930_v17 }
 0x7de   :  { %2806 = vmatpush1.bf16.msra.mxu1 %v6931_v11 }
 0x7df   :  { %2807 = vmatprep.subr.bf16.mxu1 %v6932_v25 }
 0x7e2   :  { %2808 = vmatpush1.bf16.msra.mxu1 %v6933_v28 }
 0x7e3   :  { %2809 = vmatprep.subr.bf16.mxu1 %v6934_v12 }
 0x7e6   :  { %2810 = vmatpush1.bf16.msra.mxu1 %v6935_v57  ;;  %v2637_v57 = vld [vmem:[#allocation2 + $0x38] sm:$0x30] }
 0x7e7   :  { %2811 = vmatprep.subr.bf16.mxu1 %v6936_v38 }
 0x7ea   :  { %2812 = vmatpush2.bf16.msra.mxu1 %v6937_v8 }
 0x7eb   :  { %2813 = vmatprep.subr.bf16.mxu1 %v6938_v59 }
 0x7ee   :  { %2814 = vmatpush2.bf16.msra.mxu1 %v6939_v22 }
 0x7ef   :  { %2815 = vmatprep.subr.bf16.mxu1 %v6940_v27 }
 0x7f2   :  { %2816 = vmatpush2.bf16.msra.mxu1 %v6941_v43  ;;  %v6388_v43 = vld [vmem:[%s6468_s4] ss:$0 sm:$0xff] }
 0x7f3   :  { %2817 = vmatprep.subr.bf16.mxu1 %v6942_v37 }
 0x7f6   :  { %2818 = vmatpush2.bf16.msra.mxu1 %v6943_v53 }
 0x7f7   :  { %2819 = vmatprep.subr.bf16.mxu1 %v6944_v29 }
 0x7fa   :  { %2820 = vmatpush2.bf16.msra.mxu1 %v6945_v1 }
 0x7fb   :  { %2821 = vmatprep.subr.bf16.mxu1 %v6946_v21 }
 0x7fe   :  { %2822 = vmatpush2.bf16.msra.mxu1 %v6947_v9 }
 0x7ff   :  { %2823 = vmatprep.subr.bf16.mxu1 %v6948_v6  ;;  %v2638_v6 = vld [vmem:[#allocation2 + $0x28] sm:$0x30] }
 0x802   :  { %2824 = vmatpush2.bf16.msra.mxu1 %v6949_v16  ;;  %v2639_v16 = vld [vmem:[#allocation2 + $0x18] sm:$0xc] }
 0x803   :  { %2825 = vmatprep.subr.bf16.mxu1 %v6950_v40 }
 0x806   :  { %2826 = vmatpush2.bf16.msra.mxu1 %v6951_v14 }
 0x849   :  { %v2547_v31 = vpop.f32.mrf.mxu1  ;;  %v2588_v23 = vpop.f32.mrf.mxu0 }
 0x84a   :  { %v2643_v2 = vrot.slane %v2547_v31, 4  ;;  %v2662_v37 = vadd.f32 %v6388_v43, %v2588_v23 }
 0x84b   :  { %v2549_v30 = vpop.f32.mrf.mxu1  ;;  %v2590_v60 = vpop.f32.mrf.mxu0 }
 0x84c   :  { %v2645_v44 = vadd.f32 %v2643_v2, %v2636_v3  ;;  %v2653_v25 = vrot.slane %v2549_v30, 4  ;;  %v2664_v29 = vrot.slane %v2662_v37, 4  ;;  %v2677_v1 = vrot.slane %v2590_v60, 6 }
 0x84d   :  { %v2551_v48 = vpop.f32.mrf.mxu1  ;;  %v2592_v17 = vpop.f32.mrf.mxu0  ;;  %v2672_v3 = vrot.slane %v6111_v58, 6 }
 0x84e   :  { %v3176_v11 = vmul.f32 -1.442695, %v2645_v44  ;;  %v2655_v38 = vadd.f32 %v2653_v25, %v2637_v57  ;;  %v2679_v14 = vadd.f32 %v2677_v1, %v2639_v16 }
 0x84f   :  { %v2552_v28 = vpop.f32.mrf.mxu1  ;;  %v2593_v12 = vpop.f32.mrf.mxu0 }
 0x850   :  { %3532 = vpow2.f32 %v3176_v11  ;;  %v3177_v8 = vmul.f32 -1.442695, %v2655_v38  ;;  %v3178_v31 = vmul.f32 -1.442695, %v2679_v14 }
 0x852   :  { %3534 = vpow2.f32 %v3177_v8 }
 0x85d   :  { %v3533_v59 = vpop.eup %3532 }
 0x85e   :  { %v2649_v22 = vadd.f32 1.0, %v3533_v59  ;;  %v2640_v59 = vld [vmem:[#allocation2 + $0x50] sm:$0xc] }
 0x85f   :  { %v3535_v27 = vpop.eup %3534 }
 0x860   :  { %3536 = vrcp.f32 %v2649_v22  ;;  %v2659_v53 = vadd.f32 1.0, %v3535_v27 }
 0x862   :  { %3538 = vrcp.f32 %v2659_v53 }
 0x86d   :  { %v3537_v21 = vpop.eup %3536 }
 0x86e   :  { %v2666_v9 = vmul.f32 %v3537_v21, %v2664_v29  ;;  %v6404_v29 = vld [vmem:[%s6468_s4 + $0x1] ss:$0 sm:$0xff] }
 0x86f   :  { %v3539_v2 = vpop.eup %3538 }
 0x870   :  { %v2667_v40 = vadd.f32 %v2666_v9, %v2638_v6  ;;  %v2669_v30 = vsub.f32 1.0, %v3539_v2  ;;  %v2674_v23 = vmul.f32 %v3539_v2, %v2672_v3 }
 0x872   :  { %3540 = vtanh.f32 %v2667_v40  ;;  %v2641_v40 = vld [vmem:[#allocation2 + $0x20] sm:$0xc] }
 0x873   :  { %3542 = vpow2.f32 %v3178_v31 }
 0x87f   :  { %v3541_v44 = vpop.eup %3540 }
 0x880   :  { %v2670_v48 = vmul.f32 %v3541_v44, %v2669_v30  ;;  %v3543_v11 = vpop.eup %3542 }
 0x881   :  { %v2683_v28 = vadd.f32 1.0, %v3543_v11 }
 0x882   :  { %v6392_v17 = vadd.f32 %v2674_v23, %v2670_v48 }
 0x883   :  { %3544 = vrcp.f32 %v2683_v28 }
 0x884   :  { %v2707_v60 = vpack.c.bf16 %v6392_v17, %v6392_v17 }
 0x886   :  { %v2715_v25 = vrot.slane %v2707_v60, %v6723_v19 }
 0x888   :  { %v2722_v12 = vrot.slane %v2715_v25, %v6723_v19 }
 0x889   :  { %v2629_v57 = vpop.f32.mrf.mxu1 }
 0x88a   :  { %v2687_v38 = vrot.slane %v2629_v57, 6  ;;  %v2723_v8 = vcombine.high %v2722_v12, %v2722_v12 }
 0x88b   :  { %v2631_v58 = vpop.f32.mrf.mxu1 }
 0x88c   :  { %v2689_v22 = vadd.f32 %v2687_v38, %v2640_v59  ;;  %3180 = vst [vmem:[%s6469_s5 + $0xc] sm:$0x1] %v2723_v8  ;;  %v2696_v1 = vadd.f32 %v6404_v29, %v2631_v58  ;;  %v2750_v8 = vrot.slane %v2707_v60, 2 }
 0x88d   :  { %v2633_v27 = vpop.f32.mrf.mxu1 }
 0x88e   :  { %v3179_v37 = vmul.f32 -1.442695, %v2689_v22  ;;  %v2698_v21 = vrot.slane %v2696_v1, 6 }
 0x88f   :  { %v2634_v53 = vpop.f32.mrf.mxu1 }
 0x890   :  { %3546 = vpow2.f32 %v3179_v37  ;;  %v3545_v9 = vpop.eup %3544 }
 0x891   :  { %v2700_v6 = vmul.f32 %v3545_v9, %v2698_v21  ;;  %v2881_v9 = vld [vmem:[#allocation2 + $0x50] sm:$0x3] }
 0x893   :  { %v2701_v31 = vadd.f32 %v2700_v6, %v2641_v40 }
 0x89d   :  { %v3547_v16 = vpop.eup %3546 }
 0x89e   :  { %v2693_v14 = vadd.f32 1.0, %v3547_v16 }
 0x8a0   :  { %3548 = vrcp.f32 %v2693_v14 }
 0x8a1   :  { %3550 = vtanh.f32 %v2701_v31 }
 0x8ad   :  { %v3549_v2 = vpop.eup %3548 }
 0x8ae   :  { %v2703_v3 = vsub.f32 1.0, %v3549_v2  ;;  %v3551_v30 = vpop.eup %3550  ;;  %v2705_v48 = vmul.f32 %v3549_v2, %v6121_v7 }
 0x8b0   :  { %v2704_v44 = vmul.f32 %v3551_v30, %v2703_v3 }
 0x8b2   :  { %v6408_v23 = vadd.f32 %v2705_v48, %v2704_v44 }
 0x8b4   :  { %v2726_v11 = vpack.c.bf16 %v6408_v23, %v6408_v23  ;;  %v2746_v25 = vrot.slane %v6408_v23, 6 }
 0x8b6   :  { %v2734_v28 = vrot.slane %v2726_v11, %v6723_v19  ;;  %v2748_v12 = vpack.c.bf16 %v2746_v25, %v2746_v25  ;;  %v2882_v11 = vld [vmem:[#allocation2 + $0x20] sm:$0x3] }
 0x8b8   :  { %v2735_v57 = vcombine.high %v2734_v28, %v2734_v28  ;;  %v2751_v38 = vrot.slane %v2748_v12, 2 }
 0x8ba   :  { %3190 = vst.sshfl [vmem:[%s6469_s5 + $0x3] sm:$0x1 pattern:$0x73625140] %v2735_v57  ;;  %2786 = vmatprep.mubr.bf16.mxu0 %v2751_v38  ;;  %2827 = vmatprep.mubr.bf16.mxu1 %v2751_v38 }
 0x8bb   :  { %2787 = vmatmul.mubr.bf16.vlgmr.msra.gmra.mxu0 %v2750_v8  ;;  %2828 = vmatmul.mubr.bf16.vlgmr.msra.gmra.mxu1 %v2750_v8 }
 0x8bc   :  { %2837 = vmatpush1.bf16.msra.mxu0 %v6137_v4  ;;  %2868 = vmatprep.mubr.bf16.mxu0 %v2751_v38 }
 0x8bd   :  { %2838 = vmatprep.subr.bf16.mxu0 %v6143_v20 }
 0x8c0   :  { %2839 = vmatpush1.bf16.msra.mxu0 %v6151_v26  ;;  %v2877_v26 = vld [vmem:[#allocation2 + $0x8] sm:$0xc0] }
 0x8c1   :  { %2840 = vmatprep.subr.bf16.mxu0 %v6157_v52 }
 0x8c4   :  { %2841 = vmatpush1.bf16.msra.mxu0 %v6165_v34 }
 0x8c5   :  { %2842 = vmatprep.subr.bf16.mxu0 %v6171_v18 }
 0x8c8   :  { %2843 = vmatpush1.bf16.msra.mxu0 %v6179_v63 }
 0x8c9   :  { %2844 = vmatprep.subr.bf16.mxu0 %v6185_v24 }
 0x8cc   :  { %2845 = vmatpush1.bf16.msra.mxu0 %v6193_v62 }
 0x8cd   :  { %2846 = vmatprep.subr.bf16.mxu0 %v6199_v54 }
 0x8d0   :  { %2847 = vmatpush1.bf16.msra.mxu0 %v6207_v41 }
 0x8d1   :  { %2848 = vmatprep.subr.bf16.mxu0 %v6213_v51 }
 0x8d4   :  { %2849 = vmatpush1.bf16.msra.mxu0 %v6221_v55  ;;  %v2878_v55 = vld [vmem:[#allocation2 + $0x38] sm:$0xc0] }
 0x8d5   :  { %2850 = vmatprep.subr.bf16.mxu0 %v6227_v56 }
 0x8d8   :  { %2851 = vmatpush1.bf16.msra.mxu0 %v6235_v46 }
 0x8d9   :  { %2852 = vmatprep.subr.bf16.mxu0 %v6241_v0 }
 0x8dc   :  { %2853 = vmatpush2.bf16.msra.mxu0 %v6249_v10 }
 0x8dd   :  { %2854 = vmatprep.subr.bf16.mxu0 %v6255_v13 }
 0x8e0   :  { %2855 = vmatpush2.bf16.msra.mxu0 %v6263_v49 }
 0x8e1   :  { %2856 = vmatprep.subr.bf16.mxu0 %v6269_v45 }
 0x8e4   :  { %2857 = vmatpush2.bf16.msra.mxu0 %v6277_v47 }
 0x8e5   :  { %2858 = vmatprep.subr.bf16.mxu0 %v6283_v32 }
 0x8e8   :  { %2859 = vmatpush2.bf16.msra.mxu0 %v6291_v61  ;;  %v2880_v61 = vld [vmem:[#allocation2 + $0x18] sm:$0x3] }
 0x8e9   :  { %2860 = vmatprep.subr.bf16.mxu0 %v6297_v35 }
 0x8ec   :  { %2861 = vmatpush2.bf16.msra.mxu0 %v6305_v50 }
 0x8ed   :  { %2862 = vmatprep.subr.bf16.mxu0 %v6311_v42  ;;  %v2879_v42 = vld [vmem:[#allocation2 + $0x28] sm:$0xc0] }
 0x8f0   :  { %2863 = vmatpush2.bf16.msra.mxu0 %v6319_v5 }
 0x8f1   :  { %2864 = vmatprep.subr.bf16.mxu0 %v6325_v33 }
 0x8f4   :  { %2865 = vmatpush2.bf16.msra.mxu0 %v6333_v39 }
 0x8f5   :  { %2866 = vmatprep.subr.bf16.mxu0 %v6339_v36 }
 0x8f8   :  { %2867 = vmatpush2.bf16.msra.mxu0 %v6347_v15  ;;  %v2913_v15 = vrot.slane %v6392_v17, 6 }
 0x8fb   :  { %2869 = vmatmul.mubr.bf16.vlgmr.msra.gmra.mxu0 %v2750_v8  ;;  %v2937_v8 = vrot.slane %v6408_v23, 2 }
 0x97b   :  { %v2788_v7 = vpop.f32.mrf.mxu0  ;;  %v2829_v4 = vpop.f32.mrf.mxu1 }
 0x97c   :  { %v2884_v20 = vrot.slane %v2788_v7, 2  ;;  %v2903_v49 = vadd.f32 %v6388_v43, %v2829_v4 }
 0x97d   :  { %v2790_v52 = vpop.f32.mrf.mxu0  ;;  %v2831_v34 = vpop.f32.mrf.mxu1 }
 0x97e   :  { %v2886_v18 = vadd.f32 %v2884_v20, %v2877_v26  ;;  %v2894_v54 = vrot.slane %v2790_v52, 2  ;;  %v2905_v47 = vrot.slane %v2903_v49, 2  ;;  %v2917_v50 = vadd.f32 %v2880_v61, %v2831_v34 }
 0x97f   :  { %v2792_v63 = vpop.f32.mrf.mxu0  ;;  %v2833_v24 = vpop.f32.mrf.mxu1 }
 0x980   :  { %v3182_v62 = vmul.f32 -1.442695, %v2886_v18  ;;  %v2896_v56 = vadd.f32 %v2894_v54, %v2878_v55  ;;  %v3184_v33 = vmul.f32 -1.442695, %v2917_v50  ;;  %v6952_v18 = vld [vmem:[#allocation6_spill] sm:$0xff] }
 0x981   :  { %v2793_v41 = vpop.f32.mrf.mxu0  ;;  %v2834_v51 = vpop.f32.mrf.mxu1 }
 0x982   :  { %3552 = vpow2.f32 %v3182_v62  ;;  %v3183_v46 = vmul.f32 -1.442695, %v2896_v56 }
 0x984   :  { %3554 = vpow2.f32 %v3183_v46 }
 0x98f   :  { %v3553_v0 = vpop.eup %3552 }
 0x990   :  { %v2890_v10 = vadd.f32 1.0, %v3553_v0 }
 0x991   :  { %v3555_v13 = vpop.eup %3554 }
 0x992   :  { %3556 = vrcp.f32 %v2890_v10  ;;  %v2900_v45 = vadd.f32 1.0, %v3555_v13 }
 0x994   :  { %3558 = vrcp.f32 %v2900_v45 }
 0x99f   :  { %v3557_v32 = vpop.eup %3556 }
 0x9a0   :  { %v2907_v35 = vmul.f32 %v3557_v32, %v2905_v47 }
 0x9a1   :  { %v3559_v39 = vpop.eup %3558 }
 0x9a2   :  { %v2908_v5 = vadd.f32 %v2907_v35, %v2879_v42  ;;  %v2910_v36 = vsub.f32 1.0, %v3559_v39  ;;  %v2915_v58 = vmul.f32 %v3559_v39, %v2913_v15 }
 0x9a4   :  { %3560 = vtanh.f32 %v2908_v5 }
 0x9a5   :  { %3562 = vpow2.f32 %v3184_v33 }
 0x9b1   :  { %v3561_v60 = vpop.eup %3560 }
 0x9b2   :  { %v2911_v59 = vmul.f32 %v3561_v60, %v2910_v36  ;;  %v3563_v22 = vpop.eup %3562 }
 0x9b3   :  { %v2921_v37 = vadd.f32 1.0, %v3563_v22 }
 0x9b4   :  { %v2916_v43 = vadd.f32 %v2915_v58, %v2911_v59 }
 0x9b5   :  { %3564 = vrcp.f32 %v2921_v37 }
 0x9b6   :  { %v2941_v27 = vpack.c.bf16 %v2916_v43, %v2916_v43 }
 0x9b8   :  { %v2949_v53 = vrot.slane %v2941_v27, %v6723_v19 }
 0x9ba   :  { %v2950_v1 = vcombine.high %v2949_v53, %v2949_v53 }
 0x9bb   :  { %v2870_v21 = vpop.f32.mrf.mxu0 }
 0x9bc   :  { %v2924_v6 = vadd.f32 %v2881_v9, %v2870_v21  ;;  %v2957_v16 = vrot.slane %v2950_v1, %v6723_v19  ;;  %v3793_v19 = vmov 1983009808  }
 0x9bd   :  { %v2872_v40 = vpop.f32.mrf.mxu0  ;;  %v2968_v12 = vunpack.c.l.s4 %v3793_v19 }
 0x9be   :  { %v3185_v14 = vmul.f32 -1.442695, %v2924_v6  ;;  %v2958_v31 = vcombine.high %v2957_v16, %v2957_v16  ;;  %v2931_v3 = vadd.f32 %v6404_v29, %v2872_v40 }
 0x9bf   :  { %v2874_v17 = vpop.f32.mrf.mxu0  ;;  %v2969_v26 = vunpack.c.0.s8 %v2968_v12 }
 0x9c0   :  { %3566 = vpow2.f32 %v3185_v14  ;;  %3186 = vst [vmem:[%s6469_s5 + $0xe] sm:$0x1] %v2958_v31 }
 0x9c1   :  { %v2875_v2 = vpop.f32.mrf.mxu0  ;;  %v2972_v63 = vsub.s32 %v2969_v26, %v6952_v18 }
 0x9c2   :  { %v3565_v30 = vpop.eup %3564 }
 0x9c3   :  { %v2932_v44 = vmul.f32 %v3565_v30, %v2931_v3 }
 0x9c5   :  { %v2933_v28 = vadd.f32 %v2932_v44, %v2882_v11 }
 0x9cd   :  { %v3567_v48 = vpop.eup %3566 }
 0x9ce   :  { %v2928_v25 = vadd.f32 1.0, %v3567_v48 }
 0x9d0   :  { %3568 = vrcp.f32 %v2928_v25 }
 0x9d1   :  { %3570 = vtanh.f32 %v2933_v28 }
 0x9dd   :  { %v3569_v57 = vpop.eup %3568 }
 0x9de   :  { %v2935_v38 = vsub.f32 1.0, %v3569_v57  ;;  %v3571_v7 = vpop.eup %3570  ;;  %v2939_v20 = vmul.f32 %v3569_v57, %v2937_v8 }
 0x9e0   :  { %v2936_v4 = vmul.f32 %v3571_v7, %v2935_v38 }
 0x9e2   :  { %v2940_v52 = vadd.f32 %v2939_v20, %v2936_v4 }
 0x9e4   :  { %v2961_v29 = vpack.c.bf16 %v2940_v52, %v2940_v52  ;;  %v2964_v34 = vrot.slane %v2940_v52, 2 }
 0x9e6   :  { %2962 = vst [vmem:[%s6469_s5 + $0x1] sm:$0x1] %v2961_v29  ;;  %v2966_v24 = vcombine.high %v2916_v43, %v2964_v34 }
 0x9e8   :  { %v2973_v62 = vrot.slane %v2966_v24, %v2972_v63 }
 0x9ea   :  { %v2974_v54 = vcombine.high %v2973_v62, %v2973_v62 }
 0x9ec   :  { %2976 = vst [vmem:[#allocation3] sm:$0xf] %v2974_v54 }
 0x9ed   :  { %3779 = shalt.err (!%p3776_p4)
}
 0x9ee   :  { %2988 = dma.vmem_to_hbm [thread:$0]  %s2986_s19, 64, %s6470_s6, [#allocation4]  }
 0x9ef   :  { %3788 = dma.done.wait [#allocation4], 64  }
 0x9f0   :  { %3789 = vsyncadd [#allocation4], 4294967232 }
 0x9f1   :  { %2994 = vsyncpa [#allocation4], 1 }

// kernel: _lambda_.3
= control target key start
LH: loop header
LB: loop body
LE: loop exit
PB: predicated region body
PF: predicated region fallthrough
CT: control target
= control target key end

     0   :  { %v126_v38 = vlaneseq  ;;  %v3921_v39 = vmov 1966171168   ;;  %s6607_s1 = inlined_call_operand.vmem [shape: bf16[256,768], index: 1, kind: input, shape index: {}]   ;;  %s6608_s0 = inlined_call_operand.vmem [shape: bf16[8,2,256], index: 0, kind: input, shape index: {}]   ;;  %s6609_s2 = inlined_call_operand.vmem [shape: bf16[256,768], index: 2, kind: input, shape index: {}]   ;;  %s6610_s3 = inlined_call_operand.vmem [shape: f32[1,768], index: 3, kind: input, shape index: {}]   ;;  %s6611_s4 = inlined_call_operand.vmem [shape: f32[1,256], index: 4, kind: input, shape index: {}]   ;;  %s6612_s5 = inlined_call_operand.vmem [shape: f32[2,256], index: 5, kind: output, shape index: {}]  }
   0x1   :  { %v3277_v0 = vld [vmem:[%s6607_s1 + $0x154] ss:$24 sps:$4 sm:$0xff]   ;;  %v3281_v2 = vld [vmem:[%s6607_s1 + $0x150] ss:$24 sps:$4 sm:$0xff]   ;;  %v3283_v4 = vld [vmem:[%s6607_s1 + $0x124] ss:$24 sps:$4 sm:$0xff]   ;;  %v169_v40 = vunpack.c.l.s4 %v3921_v39 }
   0x2   :  { %v3279_v1 = vld [vmem:[%s6607_s1 + $0x15c] ss:$24 sps:$4 sm:$0xff]   ;;  %712 = vmatprep.subr.bf16.mxu0 %v3277_v0  ;;  %v3282_v3 = vld [vmem:[%s6607_s1 + $0x158] ss:$24 sps:$4 sm:$0xff]   ;;  %v3285_v5 = vld [vmem:[%s6607_s1 + $0x12c] ss:$24 sps:$4 sm:$0xff]  }
   0x3   :  { %755 = vmatprep.subr.bf16.mxu1 %v3279_v1  ;;  %713 = vmatpush1.bf16.msra.mxu0 %v3281_v2  ;;  %v3287_v6 = vld [vmem:[%s6607_s1 + $0x120] ss:$24 sps:$4 sm:$0xff]   ;;  %v3289_v8 = vld [vmem:[%s6607_s1 + $0xf4] ss:$24 sps:$4 sm:$0xff]   ;;  %v3293_v10 = vld [vmem:[%s6607_s1 + $0xf0] ss:$24 sps:$4 sm:$0xff]   ;;  %v170_v46 = vunpack.c.0.s8 %v169_v40 }
   0x4   :  { %756 = vmatpush1.bf16.msra.mxu1 %v3282_v3  ;;  %714 = vmatprep.subr.bf16.mxu0 %v3283_v4  ;;  %v3288_v7 = vld [vmem:[%s6607_s1 + $0x128] ss:$24 sps:$4 sm:$0xff]   ;;  %v3291_v9 = vld [vmem:[%s6607_s1 + $0xfc] ss:$24 sps:$4 sm:$0xff]   ;;  %v3294_v11 = vld [vmem:[%s6607_s1 + $0xf8] ss:$24 sps:$4 sm:$0xff]  }
   0x5   :  { %757 = vmatprep.subr.bf16.mxu1 %v3285_v5  ;;  %v3295_v12 = vld [vmem:[%s6607_s1 + $0xc4] ss:$24 sps:$4 sm:$0xff]   ;;  %v3299_v14 = vld [vmem:[%s6607_s1 + $0xc0] ss:$24 sps:$4 sm:$0xff]   ;;  %v3301_v16 = vld [vmem:[%s6607_s1 + $0x94] ss:$24 sps:$4 sm:$0xff]  }
   0x6   :  { %v3297_v13 = vld [vmem:[%s6607_s1 + $0xcc] ss:$24 sps:$4 sm:$0xff]   ;;  %v3300_v15 = vld [vmem:[%s6607_s1 + $0xc8] ss:$24 sps:$4 sm:$0xff]   ;;  %v3303_v17 = vld [vmem:[%s6607_s1 + $0x9c] ss:$24 sps:$4 sm:$0xff]  }
   0x7   :  { %715 = vmatpush1.bf16.msra.mxu0 %v3287_v6  ;;  %v3305_v18 = vld [vmem:[%s6607_s1 + $0x90] ss:$24 sps:$4 sm:$0xff]   ;;  %v3307_v20 = vld [vmem:[%s6607_s1 + $0x64] ss:$24 sps:$4 sm:$0xff]   ;;  %v3311_v22 = vld [vmem:[%s6607_s1 + $0x60] ss:$24 sps:$4 sm:$0xff]  }
   0x8   :  { %758 = vmatpush1.bf16.msra.mxu1 %v3288_v7  ;;  %716 = vmatprep.subr.bf16.mxu0 %v3289_v8  ;;  %v3306_v19 = vld [vmem:[%s6607_s1 + $0x98] ss:$24 sps:$4 sm:$0xff]   ;;  %v3309_v21 = vld [vmem:[%s6607_s1 + $0x6c] ss:$24 sps:$4 sm:$0xff]   ;;  %v3312_v23 = vld [vmem:[%s6607_s1 + $0x68] ss:$24 sps:$4 sm:$0xff]  }
   0x9   :  { %759 = vmatprep.subr.bf16.mxu1 %v3291_v9  ;;  %v3313_v24 = vld [vmem:[%s6607_s1 + $0x34] ss:$24 sps:$4 sm:$0xff]   ;;  %v3317_v26 = vld [vmem:[%s6607_s1 + $0x30] ss:$24 sps:$4 sm:$0xff]   ;;  %v3319_v28 = vld [vmem:[%s6607_s1 + $0x4] ss:$24 sps:$4 sm:$0xff]  }
   0xa   :  { %v3315_v25 = vld [vmem:[%s6607_s1 + $0x3c] ss:$24 sps:$4 sm:$0xff]   ;;  %v3318_v27 = vld [vmem:[%s6607_s1 + $0x38] ss:$24 sps:$4 sm:$0xff]   ;;  %v3321_v29 = vld [vmem:[%s6607_s1 + $0xc] ss:$24 sps:$4 sm:$0xff]  }
   0xb   :  { %717 = vmatpush1.bf16.msra.mxu0 %v3293_v10  ;;  %v3323_v30 = vld [vmem:[%s6607_s1] ss:$24 sps:$4 sm:$0xff]   ;;  %v3325_v32 = vld [vmem:[%s6607_s1 + $0x2d4] ss:$24 sps:$4 sm:$0xff]   ;;  %v3329_v34 = vld [vmem:[%s6607_s1 + $0x2d0] ss:$24 sps:$4 sm:$0xff]  }
   0xc   :  { %760 = vmatpush1.bf16.msra.mxu1 %v3294_v11  ;;  %718 = vmatprep.subr.bf16.mxu0 %v3295_v12  ;;  %v3324_v31 = vld [vmem:[%s6607_s1 + $0x8] ss:$24 sps:$4 sm:$0xff]   ;;  %v3327_v33 = vld [vmem:[%s6607_s1 + $0x2dc] ss:$24 sps:$4 sm:$0xff]   ;;  %v3330_v35 = vld [vmem:[%s6607_s1 + $0x2d8] ss:$24 sps:$4 sm:$0xff]  }
   0xd   :  { %761 = vmatprep.subr.bf16.mxu1 %v3297_v13  ;;  %v3331_v36 = vld [vmem:[%s6607_s1 + $0x2a4] ss:$24 sps:$4 sm:$0xff]   ;;  %v3335_v41 = vld [vmem:[%s6607_s1 + $0x2a0] ss:$24 sps:$4 sm:$0xff]   ;;  %v3337_v43 = vld [vmem:[%s6607_s1 + $0x274] ss:$24 sps:$4 sm:$0xff]  }
   0xe   :  { %v3333_v37 = vld [vmem:[%s6607_s1 + $0x2ac] ss:$24 sps:$4 sm:$0xff]   ;;  %v3336_v42 = vld [vmem:[%s6607_s1 + $0x2a8] ss:$24 sps:$4 sm:$0xff]   ;;  %v3339_v44 = vld [vmem:[%s6607_s1 + $0x27c] ss:$24 sps:$4 sm:$0xff]  }
   0xf   :  { %719 = vmatpush1.bf16.msra.mxu0 %v3299_v14  ;;  %v4080_v45 = vshrl.u32 %v126_v38, 7  ;;  %v3341_v47 = vld [vmem:[%s6607_s1 + $0x270] ss:$24 sps:$4 sm:$0xff]   ;;  %v3343_v49 = vld [vmem:[%s6607_s1 + $0x244] ss:$24 sps:$4 sm:$0xff]  }
  0x10   :  { %762 = vmatpush1.bf16.msra.mxu1 %v3300_v15  ;;  %720 = vmatprep.subr.bf16.mxu0 %v3301_v16  ;;  %v3342_v48 = vld [vmem:[%s6607_s1 + $0x278] ss:$24 sps:$4 sm:$0xff]   ;;  %v3345_v50 = vld [vmem:[%s6607_s1 + $0x24c] ss:$24 sps:$4 sm:$0xff]   ;;  %v3348_v52 = vld [vmem:[%s6607_s1 + $0x248] ss:$24 sps:$4 sm:$0xff]  }
  0x11   :  { %763 = vmatprep.subr.bf16.mxu1 %v3303_v17  ;;  %6810 = vst [vmem:[#allocation3_spill] sm:$0xff] %v4080_v45  ;;  %v3347_v51 = vld [vmem:[%s6607_s1 + $0x240] ss:$24 sps:$4 sm:$0xff]   ;;  %v173_v54 = vsub.s32 %v170_v46, %v4080_v45  ;;  %v3349_v55 = vld [vmem:[%s6607_s1 + $0x214] ss:$24 sps:$4 sm:$0xff]  }
  0x12   :  { %v20_v53 = vld [vmem:[%s6608_s0] sm:$0x3]  ;;  %v3351_v56 = vld [vmem:[%s6607_s1 + $0x21c] ss:$24 sps:$4 sm:$0xff]   ;;  %v21_v57 = vld [vmem:[%s6608_s0 + $0x2] sm:$0x3] }
  0x13   :  { %721 = vmatpush1.bf16.msra.mxu0 %v3305_v18  ;;  %v22_v58 = vld [vmem:[%s6608_s0 + $0x4] sm:$0x3]  ;;  %v23_v59 = vld [vmem:[%s6608_s0 + $0x6] sm:$0x3]  ;;  %v24_v60 = vld [vmem:[%s6608_s0 + $0x8] sm:$0x3]  ;;  %v164_v63 = vcombine.low %v20_v53, %v21_v57 }
  0x14   :  { %764 = vmatpush1.bf16.msra.mxu1 %v3306_v19  ;;  %722 = vmatprep.subr.bf16.mxu0 %v3307_v20  ;;  %v25_v61 = vld [vmem:[%s6608_s0 + $0xa] sm:$0x3]  ;;  %v26_v62 = vld [vmem:[%s6608_s0 + $0xc] sm:$0x3]  ;;  %v165_v0 = vcombine.low %v22_v58, %v23_v59  ;;  %v27_v1 = vld [vmem:[%s6608_s0 + $0xe] sm:$0x3] }
  0x15   :  { %765 = vmatprep.subr.bf16.mxu1 %v3309_v21  ;;  %v166_v2 = vcombine.low %v24_v60, %v25_v61  ;;  %v167_v3 = vcombine.low %v26_v62, %v27_v1  ;;  %v174_v4 = vrot.slane %v164_v63, %v173_v54  ;;  %v3353_v6 = vld [vmem:[%s6607_s1 + $0x210] ss:$24 sps:$4 sm:$0xff]   ;;  %v3355_v9 = vld [vmem:[%s6607_s1 + $0x1e4] ss:$24 sps:$4 sm:$0xff]   ;;  %v3359_v15 = vld [vmem:[%s6607_s1 + $0x1e0] ss:$24 sps:$4 sm:$0xff]  }
  0x16   :  { %v181_v5 = vrot.slane %v165_v0, %v173_v54  ;;  %v3354_v7 = vld [vmem:[%s6607_s1 + $0x218] ss:$24 sps:$4 sm:$0xff]   ;;  %v3357_v12 = vld [vmem:[%s6607_s1 + $0x1ec] ss:$24 sps:$4 sm:$0xff]   ;;  %v3360_v16 = vld [vmem:[%s6607_s1 + $0x1e8] ss:$24 sps:$4 sm:$0xff]  }
  0x17   :  { %723 = vmatpush1.bf16.msra.mxu0 %v3311_v22  ;;  %v188_v8 = vrot.slane %v166_v2, %v173_v54  ;;  %v195_v10 = vrot.slane %v167_v3, %v173_v54  ;;  %v3361_v17 = vld [vmem:[%s6607_s1 + $0x1b4] ss:$24 sps:$4 sm:$0xff]   ;;  %v3365_v21 = vld [vmem:[%s6607_s1 + $0x1b0] ss:$24 sps:$4 sm:$0xff]   ;;  %v4208_v39 = vld [vmem:[%s6609_s2 + $0x120] ss:$24 sps:$4 sm:$0xff]  }
  0x18   :  { %766 = vmatpush1.bf16.msra.mxu1 %v3312_v23  ;;  %724 = vmatprep.subr.bf16.mxu0 %v3313_v24  ;;  %v197_v11 = vcombine.high %v174_v4, %v181_v5  ;;  %v3363_v19 = vld [vmem:[%s6607_s1 + $0x1bc] ss:$24 sps:$4 sm:$0xff]   ;;  %v3366_v22 = vld [vmem:[%s6607_s1 + $0x1b8] ss:$24 sps:$4 sm:$0xff]   ;;  %v196_v23 = vcombine.low %v174_v4, %v181_v5  ;;  %v4843_v45 = vld [vmem:[%s6609_s2 + $0x188] ss:$24 sps:$4 sm:$0xff]  }
  0x19   :  { %767 = vmatprep.subr.bf16.mxu1 %v3315_v25  ;;  %v199_v13 = vcombine.high %v188_v8, %v195_v10  ;;  %v198_v24 = vcombine.low %v188_v8, %v195_v10  ;;  %v3367_v25 = vld [vmem:[%s6607_s1 + $0x184] ss:$24 sps:$4 sm:$0xff]   ;;  %v3379_v38 = vld [vmem:[%s6607_s1 + $0x130] ss:$24 sps:$4 sm:$0xff]   ;;  %v3393_v46 = vld [vmem:[%s6607_s1 + $0xd4] ss:$24 sps:$4 sm:$0xff]  }
  0x1a   :  { %v213_v14 = vrot.slane %v197_v11, %v173_v54  ;;  %v3387_v40 = vld [vmem:[%s6607_s1 + $0x104] ss:$24 sps:$4 sm:$0xff]   ;;  %v4263_v53 = vld [vmem:[%s6609_s2 + $0x90] ss:$24 sps:$4 sm:$0xff]   ;;  %v4281_v57 = vld [vmem:[%s6609_s2 + $0x60] ss:$24 sps:$4 sm:$0xff]  }
  0x1b   :  { %725 = vmatpush1.bf16.msra.mxu0 %v3317_v26  ;;  %v227_v18 = vrot.slane %v199_v13, %v173_v54  ;;  %v3369_v26 = vld [vmem:[%s6607_s1 + $0x18c] ss:$24 sps:$4 sm:$0xff]   ;;  %v3409_v60 = vld [vmem:[%s6607_s1 + $0x40] ss:$24 sps:$4 sm:$0xff]   ;;  %v4299_v61 = vld [vmem:[%s6609_s2 + $0x30] ss:$24 sps:$4 sm:$0xff]  }
  0x1c   :  { %768 = vmatpush1.bf16.msra.mxu1 %v3318_v27  ;;  %726 = vmatprep.subr.bf16.mxu0 %v3319_v28  ;;  %v3371_v27 = vld [vmem:[%s6607_s1 + $0x180] ss:$24 sps:$4 sm:$0xff]   ;;  %v3411_v58 = vld [vmem:[%s6607_s1 + $0x44] ss:$24 sps:$4 sm:$0xff]   ;;  %v4291_v59 = vld [vmem:[%s6609_s2 + $0x34] ss:$24 sps:$4 sm:$0xff]  }
  0x1d   :  { %769 = vmatprep.subr.bf16.mxu1 %v3321_v29  ;;  %v229_v20 = vcombine.low %v213_v14, %v227_v18  ;;  %v3372_v28 = vld [vmem:[%s6607_s1 + $0x188] ss:$24 sps:$4 sm:$0xff]   ;;  %v206_v29 = vrot.slane %v196_v23, %v173_v54  ;;  %v3417_v62 = vld [vmem:[%s6607_s1 + $0x14] ss:$24 sps:$4 sm:$0xff]   ;;  %v4309_v63 = vld [vmem:[%s6609_s2 + $0x4] ss:$24 sps:$4 sm:$0xff]  }
  0x1e   :  { %v3415_v0 = vld [vmem:[%s6607_s1 + $0x10] ss:$24 sps:$4 sm:$0xff]   ;;  %v4318_v1 = vld [vmem:[%s6609_s2] ss:$24 sps:$4 sm:$0xff]   ;;  %v3423_v2 = vld [vmem:[%s6607_s1 + $0x2e4] ss:$24 sps:$4 sm:$0xff]  }
  0x1f   :  { %727 = vmatpush1.bf16.msra.mxu0 %v3323_v30  ;;  %744 = vmatprep.mubr.bf16.mxu0 %v229_v20  ;;  %v220_v30 = vrot.slane %v198_v24, %v173_v54  ;;  %v3405_v54 = vld [vmem:[%s6607_s1 + $0x74] ss:$24 sps:$4 sm:$0xff]   ;;  %v3421_v4 = vld [vmem:[%s6607_s1 + $0x2e0] ss:$24 sps:$4 sm:$0xff]   ;;  %v4335_v5 = vld [vmem:[%s6609_s2 + $0x2d0] ss:$24 sps:$4 sm:$0xff]  }
  0x20   :  { %770 = vmatpush1.bf16.msra.mxu1 %v3324_v31  ;;  %728 = vmatprep.subr.bf16.mxu0 %v3325_v32  ;;  %v3375_v31 = vld [vmem:[%s6607_s1 + $0x164] ss:$24 sps:$4 sm:$0xff]   ;;  %v4179_v32 = vld [vmem:[%s6609_s2 + $0x154] ss:$24 sps:$4 sm:$0xff]   ;;  %v3427_v8 = vld [vmem:[%s6607_s1 + $0x2b0] ss:$24 sps:$4 sm:$0xff]  }
  0x21   :  { %771 = vmatprep.subr.bf16.mxu1 %v3327_v33  ;;  %787 = vmatprep.mubr.bf16.mxu1 %v229_v20  ;;  %v4181_v33 = vcombine.low %v206_v29, %v220_v30  ;;  %v4327_v3 = vld [vmem:[%s6609_s2 + $0x2d4] ss:$24 sps:$4 sm:$0xff]   ;;  %v3435_v10 = vld [vmem:[%s6607_s1 + $0x284] ss:$24 sps:$4 sm:$0xff]   ;;  %v4371_v13 = vld [vmem:[%s6609_s2 + $0x270] ss:$24 sps:$4 sm:$0xff]  }
  0x22   :  { %v4363_v11 = vld [vmem:[%s6609_s2 + $0x274] ss:$24 sps:$4 sm:$0xff]   ;;  %v3447_v18 = vld [vmem:[%s6607_s1 + $0x224] ss:$24 sps:$4 sm:$0xff]   ;;  %v3451_v24 = vld [vmem:[%s6607_s1 + $0x1f0] ss:$24 sps:$4 sm:$0xff]  }
  0x23   :  { %729 = vmatpush2.bf16.msra.mxu0 %v3329_v34  ;;  %v3373_v34 = vld [vmem:[%s6607_s1 + $0x160] ss:$24 sps:$4 sm:$0xff]   ;;  %v3441_v14 = vld [vmem:[%s6607_s1 + $0x254] ss:$24 sps:$4 sm:$0xff]   ;;  %v4417_v23 = vld [vmem:[%s6609_s2 + $0x1e4] ss:$24 sps:$4 sm:$0xff]  }
  0x24   :  { %772 = vmatpush2.bf16.msra.mxu1 %v3330_v35  ;;  %730 = vmatprep.subr.bf16.mxu0 %v3331_v36  ;;  %v4189_v35 = vld [vmem:[%s6609_s2 + $0x150] ss:$24 sps:$4 sm:$0xff]   ;;  %v3381_v36 = vld [vmem:[%s6607_s1 + $0x134] ss:$24 sps:$4 sm:$0xff]   ;;  %6859 = vst [vmem:[#allocation52_spill] sm:$0xff] %v4843_v45 }
  0x25   :  { %773 = vmatprep.subr.bf16.mxu1 %v3333_v37  ;;  %v4198_v37 = vld [vmem:[%s6609_s2 + $0x124] ss:$24 sps:$4 sm:$0xff]   ;;  %v4443_v29 = vld [vmem:[%s6609_s2 + $0x1b0] ss:$24 sps:$4 sm:$0xff]   ;;  %v3465_v30 = vld [vmem:[%s6607_s1 + $0x194] ss:$24 sps:$4 sm:$0xff]  }
  0x26   :  { %6811 = vst [vmem:[#allocation4_spill] sm:$0xff] %v4443_v29 }
  0x27   :  { %731 = vmatpush2.bf16.msra.mxu0 %v3335_v41  ;;  %v4218_v41 = vld [vmem:[%s6609_s2 + $0xf4] ss:$24 sps:$4 sm:$0xff]  }
  0x28   :  { %774 = vmatpush2.bf16.msra.mxu1 %v3336_v42  ;;  %732 = vmatprep.subr.bf16.mxu0 %v3337_v43  ;;  %v6613_v42 = vmov 0.0|0.0   ;;  %v3385_v43 = vld [vmem:[%s6607_s1 + $0x100] ss:$24 sps:$4 sm:$0xff]  }
  0x29   :  { %775 = vmatprep.subr.bf16.mxu1 %v3339_v44  ;;  %v4227_v44 = vld [vmem:[%s6609_s2 + $0xf0] ss:$24 sps:$4 sm:$0xff]  }
  0x2b   :  { %733 = vmatpush2.bf16.msra.mxu0 %v3341_v47  ;;  %v4237_v47 = vld [vmem:[%s6609_s2 + $0xc4] ss:$24 sps:$4 sm:$0xff]  }
  0x2c   :  { %776 = vmatpush2.bf16.msra.mxu1 %v3342_v48  ;;  %734 = vmatprep.subr.bf16.mxu0 %v3343_v49  ;;  %v3391_v48 = vld [vmem:[%s6607_s1 + $0xd0] ss:$24 sps:$4 sm:$0xff]   ;;  %v4245_v49 = vld [vmem:[%s6609_s2 + $0xc0] ss:$24 sps:$4 sm:$0xff]  }
  0x2d   :  { %777 = vmatprep.subr.bf16.mxu1 %v3345_v50  ;;  %v3399_v50 = vld [vmem:[%s6607_s1 + $0xa4] ss:$24 sps:$4 sm:$0xff]  }
  0x2f   :  { %735 = vmatpush2.bf16.msra.mxu0 %v3347_v51  ;;  %v4255_v51 = vld [vmem:[%s6609_s2 + $0x94] ss:$24 sps:$4 sm:$0xff]  }
  0x30   :  { %778 = vmatpush2.bf16.msra.mxu1 %v3348_v52  ;;  %736 = vmatprep.subr.bf16.mxu0 %v3349_v55  ;;  %v3397_v52 = vld [vmem:[%s6607_s1 + $0xa0] ss:$24 sps:$4 sm:$0xff]   ;;  %v4273_v55 = vld [vmem:[%s6609_s2 + $0x64] ss:$24 sps:$4 sm:$0xff]  }
  0x31   :  { %779 = vmatprep.subr.bf16.mxu1 %v3351_v56  ;;  %v3403_v56 = vld [vmem:[%s6607_s1 + $0x70] ss:$24 sps:$4 sm:$0xff]  }
  0x33   :  { %737 = vmatpush2.bf16.msra.mxu0 %v3353_v6  ;;  %v3429_v6 = vld [vmem:[%s6607_s1 + $0x2b4] ss:$24 sps:$4 sm:$0xff]  }
  0x34   :  { %780 = vmatpush2.bf16.msra.mxu1 %v3354_v7  ;;  %738 = vmatprep.subr.bf16.mxu0 %v3355_v9  ;;  %v4345_v7 = vld [vmem:[%s6609_s2 + $0x2a4] ss:$24 sps:$4 sm:$0xff]   ;;  %v4354_v9 = vld [vmem:[%s6609_s2 + $0x2a0] ss:$24 sps:$4 sm:$0xff]  }
  0x35   :  { %781 = vmatprep.subr.bf16.mxu1 %v3357_v12  ;;  %v3433_v12 = vld [vmem:[%s6607_s1 + $0x280] ss:$24 sps:$4 sm:$0xff]  }
  0x37   :  { %739 = vmatpush2.bf16.msra.mxu0 %v3359_v15  ;;  %v4381_v15 = vld [vmem:[%s6609_s2 + $0x244] ss:$24 sps:$4 sm:$0xff]  }
  0x38   :  { %782 = vmatpush2.bf16.msra.mxu1 %v3360_v16  ;;  %740 = vmatprep.subr.bf16.mxu0 %v3361_v17  ;;  %v3439_v16 = vld [vmem:[%s6607_s1 + $0x250] ss:$24 sps:$4 sm:$0xff]   ;;  %v4390_v17 = vld [vmem:[%s6609_s2 + $0x240] ss:$24 sps:$4 sm:$0xff]  }
  0x39   :  { %783 = vmatprep.subr.bf16.mxu1 %v3363_v19  ;;  %v4399_v19 = vld [vmem:[%s6609_s2 + $0x214] ss:$24 sps:$4 sm:$0xff]  }
  0x3b   :  { %741 = vmatpush2.bf16.msra.mxu0 %v3365_v21  ;;  %v4407_v21 = vld [vmem:[%s6609_s2 + $0x210] ss:$24 sps:$4 sm:$0xff]  }
  0x3c   :  { %784 = vmatpush2.bf16.msra.mxu1 %v3366_v22  ;;  %742 = vmatprep.subr.bf16.mxu0 %v3367_v25  ;;  %v3453_v22 = vld [vmem:[%s6607_s1 + $0x1f4] ss:$24 sps:$4 sm:$0xff]   ;;  %v4426_v25 = vld [vmem:[%s6609_s2 + $0x1e0] ss:$24 sps:$4 sm:$0xff]  }
  0x3d   :  { %785 = vmatprep.subr.bf16.mxu1 %v3369_v26  ;;  %v3459_v26 = vld [vmem:[%s6607_s1 + $0x1c4] ss:$24 sps:$4 sm:$0xff]  }
  0x3f   :  { %743 = vmatpush2.bf16.msra.mxu0 %v3371_v27  ;;  %v4435_v27 = vld [vmem:[%s6609_s2 + $0x1b4] ss:$24 sps:$4 sm:$0xff]  }
  0x40   :  { %786 = vmatpush2.bf16.msra.mxu1 %v3372_v28  ;;  %798 = vmatprep.subr.bf16.mxu0 %v3375_v31  ;;  %v3457_v28 = vld [vmem:[%s6607_s1 + $0x1c0] ss:$24 sps:$4 sm:$0xff]   ;;  %v4453_v31 = vld [vmem:[%s6609_s2 + $0x184] ss:$24 sps:$4 sm:$0xff]  }
  0x41   :  { %1444 = vmatprep.subr.bf16.mxu1 %v4179_v32  ;;  %6812 = vst [vmem:[#allocation5_spill] sm:$0xff] %v4453_v31 }
  0x42   :  { %745 = vmatmul.mubr.bf16.vlgmr.msra.gmra.mxu0 %v4181_v33 }
  0x43   :  { %788 = vmatmul.mubr.bf16.vlgmr.msra.gmra.mxu1 %v4181_v33  ;;  %799 = vmatpush1.bf16.msra.mxu0 %v3373_v34  ;;  %v3463_v34 = vld [vmem:[%s6607_s1 + $0x190] ss:$24 sps:$4 sm:$0xff]  }
  0x44   :  { %1445 = vmatpush1.bf16.msra.mxu1 %v4189_v35  ;;  %800 = vmatprep.subr.bf16.mxu0 %v3381_v36  ;;  %v4462_v36 = vld [vmem:[%s6609_s2 + $0x180] ss:$24 sps:$4 sm:$0xff]  }
  0x45   :  { %1446 = vmatprep.subr.bf16.mxu1 %v4198_v37  ;;  %830 = vmatprep.mubr.bf16.mxu0 %v229_v20  ;;  %v3445_v20 = vld [vmem:[%s6607_s1 + $0x220] ss:$24 sps:$4 sm:$0xff]   ;;  %6813 = vst [vmem:[#allocation6_spill] sm:$0xff] %v4462_v36 }
  0x46   :  { %1476 = vmatprep.mubr.bf16.mxu1 %v6613_v42 }
  0x47   :  { %801 = vmatpush1.bf16.msra.mxu0 %v3379_v38  ;;  %v4467_v38 = vld [vmem:[%s6609_s2 + $0x15c] ss:$24 sps:$4 sm:$0xff]  }
  0x48   :  { %1447 = vmatpush1.bf16.msra.mxu1 %v4208_v39  ;;  %802 = vmatprep.subr.bf16.mxu0 %v3387_v40  ;;  %v4473_v40 = vld [vmem:[%s6609_s2 + $0x164] ss:$24 sps:$4 sm:$0xff]  }
  0x49   :  { %1448 = vmatprep.subr.bf16.mxu1 %v4218_v41  ;;  %6814 = vst [vmem:[#allocation7_spill] sm:$0xff] %v4473_v40 }
  0x4b   :  { %803 = vmatpush1.bf16.msra.mxu0 %v3385_v43  ;;  %v4478_v43 = vld [vmem:[%s6609_s2 + $0x158] ss:$24 sps:$4 sm:$0xff]  }
  0x4c   :  { %1449 = vmatpush1.bf16.msra.mxu1 %v4227_v44  ;;  %804 = vmatprep.subr.bf16.mxu0 %v3393_v46  ;;  %v4483_v46 = vld [vmem:[%s6609_s2 + $0x160] ss:$24 sps:$4 sm:$0xff]  }
  0x4d   :  { %1450 = vmatprep.subr.bf16.mxu1 %v4237_v47  ;;  %6815 = vst [vmem:[#allocation8_spill] sm:$0xff] %v4483_v46 }
  0x4f   :  { %805 = vmatpush1.bf16.msra.mxu0 %v3391_v48  ;;  %v4489_v48 = vld [vmem:[%s6609_s2 + $0x12c] ss:$24 sps:$4 sm:$0xff]  }
  0x50   :  { %1451 = vmatpush1.bf16.msra.mxu1 %v4245_v49  ;;  %806 = vmatprep.subr.bf16.mxu0 %v3399_v50  ;;  %v4496_v50 = vld [vmem:[%s6609_s2 + $0x134] ss:$24 sps:$4 sm:$0xff]  }
  0x51   :  { %1452 = vmatprep.subr.bf16.mxu1 %v4255_v51  ;;  %6816 = vst [vmem:[#allocation9_spill] sm:$0xff] %v4496_v50 }
  0x53   :  { %807 = vmatpush1.bf16.msra.mxu0 %v3397_v52  ;;  %v4505_v52 = vld [vmem:[%s6609_s2 + $0x128] ss:$24 sps:$4 sm:$0xff]  }
  0x54   :  { %1453 = vmatpush1.bf16.msra.mxu1 %v4263_v53  ;;  %808 = vmatprep.subr.bf16.mxu0 %v3405_v54  ;;  %v4510_v54 = vld [vmem:[%s6609_s2 + $0x130] ss:$24 sps:$4 sm:$0xff]  }
  0x55   :  { %1454 = vmatprep.subr.bf16.mxu1 %v4273_v55  ;;  %6817 = vst [vmem:[#allocation10_spill] sm:$0xff] %v4510_v54 }
  0x57   :  { %809 = vmatpush1.bf16.msra.mxu0 %v3403_v56  ;;  %v4522_v56 = vld [vmem:[%s6609_s2 + $0x104] ss:$24 sps:$4 sm:$0xff]  }
  0x58   :  { %1455 = vmatpush1.bf16.msra.mxu1 %v4281_v57  ;;  %810 = vmatprep.subr.bf16.mxu0 %v3411_v58  ;;  %6818 = vst [vmem:[#allocation11_spill] sm:$0xff] %v4522_v56  ;;  %v4531_v58 = vld [vmem:[%s6609_s2 + $0xf8] ss:$24 sps:$4 sm:$0xff]  }
  0x59   :  { %1456 = vmatprep.subr.bf16.mxu1 %v4291_v59 }
  0x5b   :  { %811 = vmatpush1.bf16.msra.mxu0 %v3409_v60  ;;  %v4536_v60 = vld [vmem:[%s6609_s2 + $0x100] ss:$24 sps:$4 sm:$0xff]  }
  0x5c   :  { %1457 = vmatpush1.bf16.msra.mxu1 %v4299_v61  ;;  %812 = vmatprep.subr.bf16.mxu0 %v3417_v62  ;;  %6819 = vst [vmem:[#allocation12_spill] sm:$0xff] %v4536_v60  ;;  %v4543_v62 = vld [vmem:[%s6609_s2 + $0xcc] ss:$24 sps:$4 sm:$0xff]  }
  0x5d   :  { %1458 = vmatprep.subr.bf16.mxu1 %v4309_v63 }
  0x5f   :  { %813 = vmatpush1.bf16.msra.mxu0 %v3415_v0  ;;  %v4548_v0 = vld [vmem:[%s6609_s2 + $0xd4] ss:$24 sps:$4 sm:$0xff]  }
  0x60   :  { %1459 = vmatpush1.bf16.msra.mxu1 %v4318_v1  ;;  %814 = vmatprep.subr.bf16.mxu0 %v3423_v2  ;;  %6820 = vst [vmem:[#allocation13_spill] sm:$0xff] %v4548_v0  ;;  %v4555_v2 = vld [vmem:[%s6609_s2 + $0xc8] ss:$24 sps:$4 sm:$0xff]  }
  0x61   :  { %1460 = vmatprep.subr.bf16.mxu1 %v4327_v3 }
  0x63   :  { %815 = vmatpush2.bf16.msra.mxu0 %v3421_v4  ;;  %v4560_v4 = vld [vmem:[%s6609_s2 + $0xd0] ss:$24 sps:$4 sm:$0xff]  }
  0x64   :  { %1461 = vmatpush2.bf16.msra.mxu1 %v4335_v5  ;;  %816 = vmatprep.subr.bf16.mxu0 %v3429_v6  ;;  %6821 = vst [vmem:[#allocation14_spill] sm:$0xff] %v4560_v4  ;;  %v4567_v6 = vld [vmem:[%s6609_s2 + $0x9c] ss:$24 sps:$4 sm:$0xff]  }
  0x65   :  { %1462 = vmatprep.subr.bf16.mxu1 %v4345_v7 }
  0x67   :  { %817 = vmatpush2.bf16.msra.mxu0 %v3427_v8  ;;  %v4572_v8 = vld [vmem:[%s6609_s2 + $0xa4] ss:$24 sps:$4 sm:$0xff]  }
  0x68   :  { %1463 = vmatpush2.bf16.msra.mxu1 %v4354_v9  ;;  %818 = vmatprep.subr.bf16.mxu0 %v3435_v10  ;;  %6822 = vst [vmem:[#allocation15_spill] sm:$0xff] %v4572_v8  ;;  %v4579_v10 = vld [vmem:[%s6609_s2 + $0x98] ss:$24 sps:$4 sm:$0xff]  }
  0x69   :  { %1464 = vmatprep.subr.bf16.mxu1 %v4363_v11 }
  0x6b   :  { %819 = vmatpush2.bf16.msra.mxu0 %v3433_v12  ;;  %v4584_v12 = vld [vmem:[%s6609_s2 + $0xa0] ss:$24 sps:$4 sm:$0xff]  }
  0x6c   :  { %1465 = vmatpush2.bf16.msra.mxu1 %v4371_v13  ;;  %820 = vmatprep.subr.bf16.mxu0 %v3441_v14  ;;  %6823 = vst [vmem:[#allocation16_spill] sm:$0xff] %v4584_v12  ;;  %v4591_v14 = vld [vmem:[%s6609_s2 + $0x6c] ss:$24 sps:$4 sm:$0xff]  }
  0x6d   :  { %1466 = vmatprep.subr.bf16.mxu1 %v4381_v15 }
  0x6f   :  { %821 = vmatpush2.bf16.msra.mxu0 %v3439_v16  ;;  %v4596_v16 = vld [vmem:[%s6609_s2 + $0x74] ss:$24 sps:$4 sm:$0xff]  }
  0x70   :  { %1467 = vmatpush2.bf16.msra.mxu1 %v4390_v17  ;;  %822 = vmatprep.subr.bf16.mxu0 %v3447_v18  ;;  %6824 = vst [vmem:[#allocation17_spill] sm:$0xff] %v4596_v16  ;;  %v4603_v18 = vld [vmem:[%s6609_s2 + $0x68] ss:$24 sps:$4 sm:$0xff]  }
  0x71   :  { %1468 = vmatprep.subr.bf16.mxu1 %v4399_v19 }
  0x73   :  { %823 = vmatpush2.bf16.msra.mxu0 %v3445_v20  ;;  %v4608_v20 = vld [vmem:[%s6609_s2 + $0x70] ss:$24 sps:$4 sm:$0xff]  }
  0x74   :  { %1469 = vmatpush2.bf16.msra.mxu1 %v4407_v21  ;;  %824 = vmatprep.subr.bf16.mxu0 %v3453_v22  ;;  %6825 = vst [vmem:[#allocation18_spill] sm:$0xff] %v4608_v20  ;;  %v4615_v22 = vld [vmem:[%s6609_s2 + $0x3c] ss:$24 sps:$4 sm:$0xff]  }
  0x75   :  { %1470 = vmatprep.subr.bf16.mxu1 %v4417_v23 }
  0x77   :  { %825 = vmatpush2.bf16.msra.mxu0 %v3451_v24  ;;  %v4620_v24 = vld [vmem:[%s6609_s2 + $0x44] ss:$24 sps:$4 sm:$0xff]  }
  0x78   :  { %1471 = vmatpush2.bf16.msra.mxu1 %v4426_v25  ;;  %826 = vmatprep.subr.bf16.mxu0 %v3459_v26  ;;  %6826 = vst [vmem:[#allocation19_spill] sm:$0xff] %v4620_v24  ;;  %v4627_v26 = vld [vmem:[%s6609_s2 + $0x38] ss:$24 sps:$4 sm:$0xff]  }
  0x79   :  { %1472 = vmatprep.subr.bf16.mxu1 %v4435_v27 }
  0x7b   :  { %827 = vmatpush2.bf16.msra.mxu0 %v3457_v28  ;;  %v4632_v28 = vld [vmem:[%s6609_s2 + $0x40] ss:$24 sps:$4 sm:$0xff]  }
  0x7c   :  { %1473 = vmatpush2.bf16.msra.mxu1 %v4443_v29  ;;  %828 = vmatprep.subr.bf16.mxu0 %v3465_v30  ;;  %6827 = vst [vmem:[#allocation20_spill] sm:$0xff] %v4632_v28  ;;  %v4639_v30 = vld [vmem:[%s6609_s2 + $0xc] ss:$24 sps:$4 sm:$0xff]  }
  0x7d   :  { %1474 = vmatprep.subr.bf16.mxu1 %v4453_v31  ;;  %v4819_v31 = vld [vmem:[%s6609_s2 + $0x1b8] ss:$24 sps:$4 sm:$0xff]   ;;  %v4831_v29 = vld [vmem:[%s6609_s2 + $0x18c] ss:$24 sps:$4 sm:$0xff]  }
  0x7e   :  { %6856 = vst [vmem:[#allocation49_spill] sm:$0xff] %v4819_v31  ;;  %6858 = vst [vmem:[#allocation51_spill] sm:$0xff] %v4831_v29 }
  0x7f   :  { %829 = vmatpush2.bf16.msra.mxu0 %v3463_v34  ;;  %v4644_v34 = vld [vmem:[%s6609_s2 + $0x14] ss:$24 sps:$4 sm:$0xff]  }
  0x80   :  { %1475 = vmatpush2.bf16.msra.mxu1 %v4462_v36  ;;  %1485 = vmatprep.subr.bf16.mxu0 %v4467_v38  ;;  %6828 = vst [vmem:[#allocation21_spill] sm:$0xff] %v4644_v34  ;;  %v4807_v36 = vld [vmem:[%s6609_s2 + $0x1bc] ss:$24 sps:$4 sm:$0xff]  }
  0x81   :  { %1526 = vmatprep.subr.bf16.mxu1 %v4473_v40  ;;  %v4795_v40 = vld [vmem:[%s6609_s2 + $0x1e8] ss:$24 sps:$4 sm:$0xff]   ;;  %6854 = vst [vmem:[#allocation47_spill] sm:$0xff] %v4807_v36 }
  0x82   :  { %831 = vmatmul.mubr.bf16.vlgmr.msra.gmra.mxu0 %v4181_v33  ;;  %v4517_v33 = vld [vmem:[%s6609_s2 + $0xfc] ss:$24 sps:$4 sm:$0xff]   ;;  %6852 = vst [vmem:[#allocation45_spill] sm:$0xff] %v4795_v40 }
  0x83   :  { %1477 = vmatmul.mubr.bf16.vlgmr.msra.gmra.mxu1 %v6613_v42  ;;  %1486 = vmatpush1.bf16.msra.mxu0 %v4478_v43 }
  0x84   :  { %1527 = vmatpush1.bf16.msra.mxu1 %v4483_v46  ;;  %1487 = vmatprep.subr.bf16.mxu0 %v4489_v48  ;;  %v4783_v46 = vld [vmem:[%s6609_s2 + $0x1ec] ss:$24 sps:$4 sm:$0xff]  }
  0x85   :  { %1528 = vmatprep.subr.bf16.mxu1 %v4496_v50  ;;  %1517 = vmatprep.mubr.bf16.mxu0 %v6613_v42  ;;  %v4771_v50 = vld [vmem:[%s6609_s2 + $0x218] ss:$24 sps:$4 sm:$0xff]   ;;  %6850 = vst [vmem:[#allocation43_spill] sm:$0xff] %v4783_v46 }
  0x86   :  { %1558 = vmatprep.mubr.bf16.mxu1 %v6613_v42  ;;  %v4651_v42 = vld [vmem:[%s6609_s2 + $0x8] ss:$24 sps:$4 sm:$0xff]   ;;  %6848 = vst [vmem:[#allocation41_spill] sm:$0xff] %v4771_v50 }
  0x87   :  { %1488 = vmatpush1.bf16.msra.mxu0 %v4505_v52 }
  0x88   :  { %1529 = vmatpush1.bf16.msra.mxu1 %v4510_v54  ;;  %1489 = vmatprep.subr.bf16.mxu0 %v4517_v33  ;;  %v4759_v54 = vld [vmem:[%s6609_s2 + $0x21c] ss:$24 sps:$4 sm:$0xff]  }
  0x89   :  { %1530 = vmatprep.subr.bf16.mxu1 %v4522_v56  ;;  %v4747_v56 = vld [vmem:[%s6609_s2 + $0x248] ss:$24 sps:$4 sm:$0xff]   ;;  %6846 = vst [vmem:[#allocation39_spill] sm:$0xff] %v4759_v54 }
  0x8a   :  { %6844 = vst [vmem:[#allocation37_spill] sm:$0xff] %v4747_v56 }
  0x8b   :  { %1490 = vmatpush1.bf16.msra.mxu0 %v4531_v58 }
  0x8c   :  { %1531 = vmatpush1.bf16.msra.mxu1 %v4536_v60  ;;  %1491 = vmatprep.subr.bf16.mxu0 %v4543_v62  ;;  %v4735_v60 = vld [vmem:[%s6609_s2 + $0x24c] ss:$24 sps:$4 sm:$0xff]  }
  0x8d   :  { %1532 = vmatprep.subr.bf16.mxu1 %v4548_v0  ;;  %v4723_v0 = vld [vmem:[%s6609_s2 + $0x278] ss:$24 sps:$4 sm:$0xff]   ;;  %6842 = vst [vmem:[#allocation35_spill] sm:$0xff] %v4735_v60 }
  0x8e   :  { %6840 = vst [vmem:[#allocation33_spill] sm:$0xff] %v4723_v0 }
  0x8f   :  { %1492 = vmatpush1.bf16.msra.mxu0 %v4555_v2 }
  0x90   :  { %1533 = vmatpush1.bf16.msra.mxu1 %v4560_v4  ;;  %1493 = vmatprep.subr.bf16.mxu0 %v4567_v6  ;;  %v4711_v4 = vld [vmem:[%s6609_s2 + $0x27c] ss:$24 sps:$4 sm:$0xff]  }
  0x91   :  { %1534 = vmatprep.subr.bf16.mxu1 %v4572_v8  ;;  %v4699_v8 = vld [vmem:[%s6609_s2 + $0x2a8] ss:$24 sps:$4 sm:$0xff]   ;;  %6838 = vst [vmem:[#allocation31_spill] sm:$0xff] %v4711_v4 }
  0x92   :  { %6836 = vst [vmem:[#allocation29_spill] sm:$0xff] %v4699_v8 }
  0x93   :  { %1494 = vmatpush1.bf16.msra.mxu0 %v4579_v10 }
  0x94   :  { %1535 = vmatpush1.bf16.msra.mxu1 %v4584_v12  ;;  %1495 = vmatprep.subr.bf16.mxu0 %v4591_v14  ;;  %v4687_v12 = vld [vmem:[%s6609_s2 + $0x2ac] ss:$24 sps:$4 sm:$0xff]  }
  0x95   :  { %1536 = vmatprep.subr.bf16.mxu1 %v4596_v16  ;;  %v4675_v16 = vld [vmem:[%s6609_s2 + $0x2d8] ss:$24 sps:$4 sm:$0xff]   ;;  %6834 = vst [vmem:[#allocation27_spill] sm:$0xff] %v4687_v12 }
  0x96   :  { %6832 = vst [vmem:[#allocation25_spill] sm:$0xff] %v4675_v16 }
  0x97   :  { %1496 = vmatpush1.bf16.msra.mxu0 %v4603_v18 }
  0x98   :  { %1537 = vmatpush1.bf16.msra.mxu1 %v4608_v20  ;;  %1497 = vmatprep.subr.bf16.mxu0 %v4615_v22  ;;  %v4663_v20 = vld [vmem:[%s6609_s2 + $0x2dc] ss:$24 sps:$4 sm:$0xff]  }
  0x99   :  { %1538 = vmatprep.subr.bf16.mxu1 %v4620_v24  ;;  %v4656_v24 = vld [vmem:[%s6609_s2 + $0x10] ss:$24 sps:$4 sm:$0xff]   ;;  %6830 = vst [vmem:[#allocation23_spill] sm:$0xff] %v4663_v20 }
  0x9a   :  { %6829 = vst [vmem:[#allocation22_spill] sm:$0xff] %v4656_v24 }
  0x9b   :  { %1498 = vmatpush1.bf16.msra.mxu0 %v4627_v26 }
  0x9c   :  { %1539 = vmatpush1.bf16.msra.mxu1 %v4632_v28  ;;  %1499 = vmatprep.subr.bf16.mxu0 %v4639_v30  ;;  %v4668_v28 = vld [vmem:[%s6609_s2 + $0x2e4] ss:$24 sps:$4 sm:$0xff]  }
  0x9d   :  { %1540 = vmatprep.subr.bf16.mxu1 %v4644_v34  ;;  %6831 = vst [vmem:[#allocation24_spill] sm:$0xff] %v4668_v28  ;;  %v4680_v34 = vld [vmem:[%s6609_s2 + $0x2e0] ss:$24 sps:$4 sm:$0xff]  }
  0x9e   :  { %6833 = vst [vmem:[#allocation26_spill] sm:$0xff] %v4680_v34 }
  0x9f   :  { %1500 = vmatpush1.bf16.msra.mxu0 %v4651_v42 }
  0xa0   :  { %1541 = vmatpush1.bf16.msra.mxu1 %v4656_v24  ;;  %1501 = vmatprep.subr.bf16.mxu0 %v4663_v20  ;;  %v4692_v24 = vld [vmem:[%s6609_s2 + $0x2b4] ss:$24 sps:$4 sm:$0xff]  }
  0xa1   :  { %1542 = vmatprep.subr.bf16.mxu1 %v4668_v28  ;;  %6835 = vst [vmem:[#allocation28_spill] sm:$0xff] %v4692_v24  ;;  %v4704_v28 = vld [vmem:[%s6609_s2 + $0x2b0] ss:$24 sps:$4 sm:$0xff]  }
  0xa2   :  { %6837 = vst [vmem:[#allocation30_spill] sm:$0xff] %v4704_v28 }
  0xa3   :  { %1502 = vmatpush2.bf16.msra.mxu0 %v4675_v16 }
  0xa4   :  { %1543 = vmatpush2.bf16.msra.mxu1 %v4680_v34  ;;  %1503 = vmatprep.subr.bf16.mxu0 %v4687_v12  ;;  %v4716_v34 = vld [vmem:[%s6609_s2 + $0x284] ss:$24 sps:$4 sm:$0xff]  }
  0xa5   :  { %1544 = vmatprep.subr.bf16.mxu1 %v4692_v24  ;;  %6839 = vst [vmem:[#allocation32_spill] sm:$0xff] %v4716_v34  ;;  %v4728_v24 = vld [vmem:[%s6609_s2 + $0x280] ss:$24 sps:$4 sm:$0xff]  }
  0xa6   :  { %6841 = vst [vmem:[#allocation34_spill] sm:$0xff] %v4728_v24 }
  0xa7   :  { %1504 = vmatpush2.bf16.msra.mxu0 %v4699_v8 }
  0xa8   :  { %1545 = vmatpush2.bf16.msra.mxu1 %v4704_v28  ;;  %1505 = vmatprep.subr.bf16.mxu0 %v4711_v4  ;;  %v4740_v28 = vld [vmem:[%s6609_s2 + $0x254] ss:$24 sps:$4 sm:$0xff]  }
  0xa9   :  { %1546 = vmatprep.subr.bf16.mxu1 %v4716_v34  ;;  %6843 = vst [vmem:[#allocation36_spill] sm:$0xff] %v4740_v28  ;;  %v4752_v34 = vld [vmem:[%s6609_s2 + $0x250] ss:$24 sps:$4 sm:$0xff]  }
  0xaa   :  { %6845 = vst [vmem:[#allocation38_spill] sm:$0xff] %v4752_v34 }
  0xab   :  { %1506 = vmatpush2.bf16.msra.mxu0 %v4723_v0 }
  0xac   :  { %1547 = vmatpush2.bf16.msra.mxu1 %v4728_v24  ;;  %1507 = vmatprep.subr.bf16.mxu0 %v4735_v60  ;;  %v4764_v24 = vld [vmem:[%s6609_s2 + $0x224] ss:$24 sps:$4 sm:$0xff]  }
  0xad   :  { %1548 = vmatprep.subr.bf16.mxu1 %v4740_v28  ;;  %6847 = vst [vmem:[#allocation40_spill] sm:$0xff] %v4764_v24  ;;  %v4776_v28 = vld [vmem:[%s6609_s2 + $0x220] ss:$24 sps:$4 sm:$0xff]  }
  0xae   :  { %6849 = vst [vmem:[#allocation42_spill] sm:$0xff] %v4776_v28 }
  0xaf   :  { %1508 = vmatpush2.bf16.msra.mxu0 %v4747_v56 }
  0xb0   :  { %1549 = vmatpush2.bf16.msra.mxu1 %v4752_v34  ;;  %1509 = vmatprep.subr.bf16.mxu0 %v4759_v54  ;;  %v4788_v34 = vld [vmem:[%s6609_s2 + $0x1f4] ss:$24 sps:$4 sm:$0xff]  }
  0xb1   :  { %1550 = vmatprep.subr.bf16.mxu1 %v4764_v24  ;;  %6851 = vst [vmem:[#allocation44_spill] sm:$0xff] %v4788_v34  ;;  %v4800_v24 = vld [vmem:[%s6609_s2 + $0x1f0] ss:$24 sps:$4 sm:$0xff]  }
  0xb2   :  { %6853 = vst [vmem:[#allocation46_spill] sm:$0xff] %v4800_v24 }
  0xb3   :  { %1510 = vmatpush2.bf16.msra.mxu0 %v4771_v50 }
  0xb4   :  { %1551 = vmatpush2.bf16.msra.mxu1 %v4776_v28  ;;  %1511 = vmatprep.subr.bf16.mxu0 %v4783_v46  ;;  %v4812_v28 = vld [vmem:[%s6609_s2 + $0x1c4] ss:$24 sps:$4 sm:$0xff]  }
  0xb5   :  { %1552 = vmatprep.subr.bf16.mxu1 %v4788_v34  ;;  %6855 = vst [vmem:[#allocation48_spill] sm:$0xff] %v4812_v28  ;;  %v4824_v34 = vld [vmem:[%s6609_s2 + $0x1c0] ss:$24 sps:$4 sm:$0xff]  }
  0xb6   :  { %6857 = vst [vmem:[#allocation50_spill] sm:$0xff] %v4824_v34 }
  0xb7   :  { %1512 = vmatpush2.bf16.msra.mxu0 %v4795_v40 }
  0xb8   :  { %1553 = vmatpush2.bf16.msra.mxu1 %v4800_v24  ;;  %1513 = vmatprep.subr.bf16.mxu0 %v4807_v36  ;;  %v4836_v24 = vld [vmem:[%s6609_s2 + $0x194] ss:$24 sps:$4 sm:$0xff]  }
  0xb9   :  { %1554 = vmatprep.subr.bf16.mxu1 %v4812_v28  ;;  %v4848_v28 = vld [vmem:[%s6609_s2 + $0x190] ss:$24 sps:$4 sm:$0xff]  }
  0xbb   :  { %1514 = vmatpush2.bf16.msra.mxu0 %v4819_v31 }
  0xbc   :  { %1555 = vmatpush2.bf16.msra.mxu1 %v4824_v34  ;;  %1515 = vmatprep.subr.bf16.mxu0 %v4831_v29  ;;  %v6860_v34 = vmov 0.0|0.0  }
  0xbd   :  { %1556 = vmatprep.subr.bf16.mxu1 %v4836_v24 }
  0xbf   :  { %1516 = vmatpush2.bf16.msra.mxu0 %v4843_v45 }
  0xc0   :  { %1557 = vmatpush2.bf16.msra.mxu1 %v4848_v28  ;;  %1631 = vmatprep.subr.bf16.mxu0 %v4179_v32 }
  0xc1   :  { %1672 = vmatprep.subr.bf16.mxu1 %v4467_v38 }
  0xc2   :  { %1518 = vmatmul.mubr.bf16.vlgmr.msra.gmra.mxu0 %v6860_v34 }
  0xc3   :  { %1559 = vmatmul.mubr.bf16.vlgmr.msra.gmra.mxu1 %v6860_v34  ;;  %1632 = vmatpush1.bf16.msra.mxu0 %v4189_v35  ;;  %v6861_v35 = vld [vmem:[#allocation3_spill] sm:$0xff] }
  0xc4   :  { %1673 = vmatpush1.bf16.msra.mxu1 %v4478_v43  ;;  %1633 = vmatprep.subr.bf16.mxu0 %v4198_v37  ;;  %v128_v37 = vsub.s32 0, %v6861_v35 }
  0xc5   :  { %1674 = vmatprep.subr.bf16.mxu1 %v4489_v48 }
  0xc7   :  { %1634 = vmatpush1.bf16.msra.mxu0 %v4208_v39  ;;  %v136_v39 = vsub.s32 2, %v6861_v35 }
  0xc8   :  { %1675 = vmatpush1.bf16.msra.mxu1 %v4505_v52  ;;  %1635 = vmatprep.subr.bf16.mxu0 %v4218_v41  ;;  %v6862_v41 = vld [vmem:[#allocation4_spill] sm:$0xff] }
  0xc9   :  { %1676 = vmatprep.subr.bf16.mxu1 %v4517_v33 }
  0xcb   :  { %1636 = vmatpush1.bf16.msra.mxu0 %v4227_v44  ;;  %v124_v44 = vld [vmem:[%s6610_s3] sm:$0x3f] }
  0xcc   :  { %1677 = vmatpush1.bf16.msra.mxu1 %v4531_v58  ;;  %1637 = vmatprep.subr.bf16.mxu0 %v4237_v47  ;;  %v6863_v47 = vld [vmem:[#allocation5_spill] sm:$0xff]  ;;  %v137_v34 = vrot.slane %v124_v44, %v136_v39 }
  0xcd   :  { %1678 = vmatprep.subr.bf16.mxu1 %v4543_v62 }
  0xcf   :  { %1638 = vmatpush1.bf16.msra.mxu0 %v4245_v49  ;;  %v132_v49 = vsub.s32 1, %v6861_v35 }
  0xd0   :  { %1679 = vmatpush1.bf16.msra.mxu1 %v4555_v2  ;;  %1639 = vmatprep.subr.bf16.mxu0 %v4255_v51  ;;  %v140_v51 = vsub.s32 3, %v6861_v35 }
  0xd1   :  { %1680 = vmatprep.subr.bf16.mxu1 %v4567_v6 }
  0xd3   :  { %1640 = vmatpush1.bf16.msra.mxu0 %v4263_v53  ;;  %v129_v53 = vrot.slane %v124_v44, %v128_v37 }
  0xd4   :  { %1681 = vmatpush1.bf16.msra.mxu1 %v4579_v10  ;;  %1641 = vmatprep.subr.bf16.mxu0 %v4273_v55 }
  0xd5   :  { %1682 = vmatprep.subr.bf16.mxu1 %v4591_v14 }
  0xd7   :  { %1642 = vmatpush1.bf16.msra.mxu0 %v4281_v57 }
  0xd8   :  { %1683 = vmatpush1.bf16.msra.mxu1 %v4603_v18  ;;  %1643 = vmatprep.subr.bf16.mxu0 %v4291_v59 }
  0xd9   :  { %1684 = vmatprep.subr.bf16.mxu1 %v4615_v22 }
  0xdb   :  { %1644 = vmatpush1.bf16.msra.mxu0 %v4299_v61 }
  0xdc   :  { %1685 = vmatpush1.bf16.msra.mxu1 %v4627_v26  ;;  %1645 = vmatprep.subr.bf16.mxu0 %v4309_v63 }
  0xdd   :  { %1686 = vmatprep.subr.bf16.mxu1 %v4639_v30 }
  0xdf   :  { %1646 = vmatpush1.bf16.msra.mxu0 %v4318_v1 }
  0xe0   :  { %1687 = vmatpush1.bf16.msra.mxu1 %v4651_v42  ;;  %1647 = vmatprep.subr.bf16.mxu0 %v4327_v3 }
  0xe1   :  { %1688 = vmatprep.subr.bf16.mxu1 %v4663_v20 }
  0xe3   :  { %1648 = vmatpush2.bf16.msra.mxu0 %v4335_v5 }
  0xe4   :  { %1689 = vmatpush2.bf16.msra.mxu1 %v4675_v16  ;;  %1649 = vmatprep.subr.bf16.mxu0 %v4345_v7 }
  0xe5   :  { %1690 = vmatprep.subr.bf16.mxu1 %v4687_v12 }
  0xe7   :  { %1650 = vmatpush2.bf16.msra.mxu0 %v4354_v9 }
  0xe8   :  { %1691 = vmatpush2.bf16.msra.mxu1 %v4699_v8  ;;  %1651 = vmatprep.subr.bf16.mxu0 %v4363_v11 }
  0xe9   :  { %1692 = vmatprep.subr.bf16.mxu1 %v4711_v4 }
  0xeb   :  { %1652 = vmatpush2.bf16.msra.mxu0 %v4371_v13 }
  0xec   :  { %1693 = vmatpush2.bf16.msra.mxu1 %v4723_v0  ;;  %1653 = vmatprep.subr.bf16.mxu0 %v4381_v15 }
  0xed   :  { %1694 = vmatprep.subr.bf16.mxu1 %v4735_v60 }
  0xef   :  { %1654 = vmatpush2.bf16.msra.mxu0 %v4390_v17 }
  0xf0   :  { %1695 = vmatpush2.bf16.msra.mxu1 %v4747_v56  ;;  %1655 = vmatprep.subr.bf16.mxu0 %v4399_v19 }
  0xf1   :  { %1696 = vmatprep.subr.bf16.mxu1 %v4759_v54 }
  0xf3   :  { %1656 = vmatpush2.bf16.msra.mxu0 %v4407_v21 }
  0xf4   :  { %1697 = vmatpush2.bf16.msra.mxu1 %v4771_v50  ;;  %1657 = vmatprep.subr.bf16.mxu0 %v4417_v23 }
  0xf5   :  { %1698 = vmatprep.subr.bf16.mxu1 %v4783_v46  ;;  %v141_v46 = vrot.slane %v124_v44, %v140_v51 }
  0xf7   :  { %1658 = vmatpush2.bf16.msra.mxu0 %v4426_v25 }
  0xf8   :  { %1699 = vmatpush2.bf16.msra.mxu1 %v4795_v40  ;;  %1659 = vmatprep.subr.bf16.mxu0 %v4435_v27  ;;  %v6865_v40 = vld [vmem:[#allocation7_spill] sm:$0xff] }
  0xf9   :  { %1700 = vmatprep.subr.bf16.mxu1 %v4807_v36  ;;  %v6864_v36 = vld [vmem:[#allocation6_spill] sm:$0xff] }
  0xfb   :  { %1660 = vmatpush2.bf16.msra.mxu0 %v6862_v41 }
  0xfc   :  { %1701 = vmatpush2.bf16.msra.mxu1 %v4819_v31  ;;  %1661 = vmatprep.subr.bf16.mxu0 %v6863_v47  ;;  %v133_v31 = vrot.slane %v124_v44, %v132_v49 }
  0xfd   :  { %1702 = vmatprep.subr.bf16.mxu1 %v4831_v29 }
  0xff   :  { %1662 = vmatpush2.bf16.msra.mxu0 %v6864_v36 }
 0x100   :  { %1703 = vmatpush2.bf16.msra.mxu1 %v4843_v45  ;;  %1713 = vmatprep.subr.bf16.mxu0 %v6865_v40 }
 0x101   :  { %1838 = vmatprep.subr.bf16.mxu1 %v4179_v32 }
 0x102   :  { %v746_v50 = vpop.f32.mrf.mxu0 }
 0x103   :  { %v789_v54 = vpop.f32.mrf.mxu1  ;;  %v747_v56 = vadd.f32 %v746_v50, %v129_v53  ;;  %v144_v50 = vsub.s32 4, %v6861_v35 }
 0x104   :  { %v790_v29 = vadd.f32 %v789_v54, %v137_v34  ;;  %v748_v60 = vpop.f32.mrf.mxu0  ;;  %v148_v54 = vsub.s32 5, %v6861_v35 }
 0x105   :  { %v791_v0 = vpop.f32.mrf.mxu1  ;;  %841 = vst [vmem:[#allocation2 + $0x30] sm:$0xff] %v747_v56  ;;  %v749_v4 = vadd.f32 %v748_v60, %v133_v31 }
 0x106   :  { %843 = vst [vmem:[#allocation2 + $0x58] sm:$0xff] %v790_v29  ;;  %v792_v37 = vadd.f32 %v791_v0, %v141_v46  ;;  %v750_v39 = vpop.f32.mrf.mxu0  ;;  %v145_v29 = vrot.slane %v124_v44, %v144_v50  ;;  %v149_v56 = vrot.slane %v124_v44, %v148_v54 }
 0x107   :  { %v793_v8 = vpop.f32.mrf.mxu1  ;;  %842 = vst [vmem:[#allocation2] sm:$0xff] %v749_v4  ;;  %v751_v45 = vadd.f32 %v750_v39, %v129_v53 }
 0x108   :  { %844 = vst [vmem:[#allocation2 + $0x18] sm:$0xff] %v792_v37  ;;  %v794_v12 = vadd.f32 %v793_v8, %v137_v34  ;;  %v752_v16 = vpop.f32.mrf.mxu0 }
 0x109   :  { %v795_v32 = vpop.f32.mrf.mxu1  ;;  %847 = vst [vmem:[#allocation2 + $0x8] sm:$0xff] %v751_v45  ;;  %v753_v49 = vadd.f32 %v752_v16, %v133_v31 }
 0x10a   :  { %849 = vst [vmem:[#allocation2 + $0x28] sm:$0xff] %v794_v12  ;;  %v796_v51 = vadd.f32 %v795_v32, %v141_v46 }
 0x10b   :  { %848 = vst [vmem:[#allocation2 + $0x38] sm:$0xff] %v753_v49 }
 0x10c   :  { %850 = vst [vmem:[#allocation2 + $0x48] sm:$0xff] %v796_v51  ;;  %v1567_v39 = vld [vmem:[#allocation2 + $0x30] sm:$0x3] }
 0x10e   :  { %v1568_v44 = vld [vmem:[#allocation2] sm:$0x3] }
 0x142   :  { %v832_v60 = vpop.f32.mrf.mxu0 }
 0x143   :  { %v1478_v0 = vpop.f32.mrf.mxu1  ;;  %v833_v4 = vadd.f32 %v832_v60, %v145_v29 }
 0x144   :  { %v834_v53 = vpop.f32.mrf.mxu0  ;;  %v1573_v32 = vadd.f32 %v1567_v39, %v1478_v0 }
 0x145   :  { %v1480_v37 = vpop.f32.mrf.mxu1  ;;  %845 = vst [vmem:[#allocation2 + $0x50] sm:$0xff] %v833_v4  ;;  %v835_v8 = vadd.f32 %v834_v53, %v149_v56 }
 0x146   :  { %v836_v34 = vpop.f32.mrf.mxu0  ;;  %v3242_v49 = vmul.f32 -1.442695, %v1573_v32  ;;  %v1580_v51 = vadd.f32 %v1568_v44, %v1480_v37 }
 0x147   :  { %v1482_v45 = vpop.f32.mrf.mxu1  ;;  %846 = vst [vmem:[#allocation2 + $0x20] sm:$0xff] %v835_v8  ;;  %v837_v31 = vadd.f32 %v836_v34, %v145_v29  ;;  %v4934_v29 = vld [vmem:[%s6611_s4] ss:$0 sm:$0xff] }
 0x148   :  { %v838_v46 = vpop.f32.mrf.mxu0  ;;  %3565 = vpow2.f32 %v3242_v49  ;;  %v3243_v50 = vmul.f32 -1.442695, %v1580_v51  ;;  %6866 = vst [vmem:[#allocation4_spill] sm:$0xff] %v4934_v29 }
 0x149   :  { %v1483_v12 = vpop.f32.mrf.mxu1  ;;  %851 = vst [vmem:[#allocation2 + $0x10] sm:$0xff] %v837_v31  ;;  %v839_v16 = vadd.f32 %v838_v46, %v149_v56 }
 0x14a   :  { %3567 = vpow2.f32 %v3243_v50  ;;  %v1569_v12 = vld [vmem:[#allocation2 + $0x58] sm:$0x3] }
 0x14b   :  { %852 = vst [vmem:[#allocation2 + $0x40] sm:$0xff] %v839_v16  ;;  %v1570_v16 = vld [vmem:[#allocation2 + $0x48] sm:$0xc0] }
 0x155   :  { %v3566_v54 = vpop.eup %3565 }
 0x156   :  { %v1577_v60 = vadd.f32 1.0, %v3566_v54 }
 0x157   :  { %v3568_v4 = vpop.eup %3567 }
 0x158   :  { %3569 = vrcp.f32 %v1577_v60  ;;  %v1584_v53 = vadd.f32 1.0, %v3568_v4  ;;  %v1571_v4 = vld [vmem:[#allocation2 + $0x10] sm:$0xc0] }
 0x15a   :  { %3571 = vrcp.f32 %v1584_v53 }
 0x165   :  { %v3570_v34 = vpop.eup %3569 }
 0x182   :  { %v1519_v56 = vpop.f32.mrf.mxu0 }
 0x183   :  { %v1560_v8 = vpop.f32.mrf.mxu1  ;;  %v1587_v0 = vadd.f32 %v4934_v29, %v1519_v56  ;;  %v3572_v29 = vpop.eup %3571 }
 0x184   :  { %v1521_v45 = vpop.f32.mrf.mxu0  ;;  %v1606_v54 = vrot.slane %v1560_v8, 2  ;;  %v1591_v53 = vsub.f32 1.0, %v3572_v29  ;;  %v4942_v8 = vld [vmem:[%s6611_s4 + $0x1] ss:$0 sm:$0xff] }
 0x185   :  { %v1562_v31 = vpop.f32.mrf.mxu1  ;;  %v1588_v37 = vmul.f32 %v3570_v34, %v1587_v0  ;;  %v1596_v46 = vrot.slane %v1521_v45, 2  ;;  %v1593_v45 = vmul.f32 0.0, %v3572_v29 }
 0x186   :  { %v1523_v39 = vpop.f32.mrf.mxu0  ;;  %v1608_v56 = vadd.f32 %v1606_v54, %v1571_v4 }
 0x187   :  { %v1564_v32 = vpop.f32.mrf.mxu1  ;;  %v1589_v49 = vadd.f32 %v1588_v37, %v1569_v12  ;;  %v1598_v44 = vadd.f32 %v1596_v46, %v1570_v16  ;;  %v1615_v46 = vadd.f32 %v4942_v8, %v1562_v31 }
 0x188   :  { %v1524_v51 = vpop.f32.mrf.mxu0  ;;  %v3245_v35 = vmul.f32 -1.442695, %v1608_v56 }
 0x189   :  { %v1565_v50 = vpop.f32.mrf.mxu1  ;;  %3573 = vtanh.f32 %v1589_v49  ;;  %v3244_v60 = vmul.f32 -1.442695, %v1598_v44  ;;  %v1617_v16 = vrot.slane %v1615_v46, 2  ;;  %v1572_v44 = vld [vmem:[#allocation2 + $0x40] sm:$0xc0] }
 0x18a   :  { %v6870_v46 = vld [vmem:[#allocation11_spill] sm:$0xff] }
 0x18b   :  { %3575 = vpow2.f32 %v3244_v60 }
 0x18c   :  { %3577 = vpow2.f32 %v3245_v35 }
 0x196   :  { %v3574_v0 = vpop.eup %3573 }
 0x197   :  { %v1592_v34 = vmul.f32 %v3574_v0, %v1591_v53  ;;  %v6867_v0 = vld [vmem:[#allocation8_spill] sm:$0xff] }
 0x198   :  { %v3576_v20 = vpop.eup %3575 }
 0x199   :  { %v1602_v39 = vadd.f32 1.0, %v3576_v20  ;;  %v4937_v32 = vadd.f32 %v1593_v45, %v1592_v34  ;;  %v3578_v37 = vpop.eup %3577  ;;  %v6868_v34 = vld [vmem:[#allocation9_spill] sm:$0xff] }
 0x19a   :  { %v1612_v12 = vadd.f32 1.0, %v3578_v37  ;;  %v4959_v45 = vld [vmem:[%s6609_s2 + $0x150] ss:$24 sps:$4 sm:$0xff]   ;;  %v6869_v37 = vld [vmem:[#allocation10_spill] sm:$0xff] }
 0x19b   :  { %3579 = vrcp.f32 %v1602_v39  ;;  %v4950_v31 = vpack.c.bf16 %v4937_v32, %v4937_v32  ;;  %v4965_v39 = vld [vmem:[%s6609_s2 + $0x124] ss:$24 sps:$4 sm:$0xff]  }
 0x19c   :  { %3581 = vrcp.f32 %v1612_v12  ;;  %v4973_v12 = vld [vmem:[%s6609_s2 + $0x120] ss:$24 sps:$4 sm:$0xff]  }
 0x1a8   :  { %v3580_v35 = vpop.eup %3579 }
 0x1a9   :  { %v1619_v49 = vmul.f32 %v3580_v35, %v1617_v16  ;;  %v3582_v20 = vpop.eup %3581  ;;  %v4979_v16 = vld [vmem:[%s6609_s2 + $0xf4] ss:$24 sps:$4 sm:$0xff]  }
 0x1aa   :  { %v1622_v51 = vsub.f32 1.0, %v3582_v20  ;;  %v1624_v60 = vmul.f32 0.0, %v3582_v20  ;;  %v6871_v35 = vld [vmem:[#allocation12_spill] sm:$0xff]  ;;  %v6873_v20 = vld [vmem:[#allocation14_spill] sm:$0xff] }
 0x1ab   :  { %v1620_v29 = vadd.f32 %v1619_v49, %v1572_v44  ;;  %v6872_v49 = vld [vmem:[#allocation13_spill] sm:$0xff] }
 0x1ac   :  { %v4987_v44 = vld [vmem:[%s6609_s2 + $0xf0] ss:$24 sps:$4 sm:$0xff]  }
 0x1ad   :  { %3583 = vtanh.f32 %v1620_v29  ;;  %v4993_v29 = vld [vmem:[%s6609_s2 + $0xc4] ss:$24 sps:$4 sm:$0xff]  }
 0x1ba   :  { %v3584_v50 = vpop.eup %3583 }
 0x1bb   :  { %v1623_v54 = vmul.f32 %v3584_v50, %v1622_v51  ;;  %v6874_v51 = vld [vmem:[#allocation15_spill] sm:$0xff] }
 0x1bc   :  { %v5001_v50 = vld [vmem:[%s6609_s2 + $0xc0] ss:$24 sps:$4 sm:$0xff]  }
 0x1bd   :  { %v4945_v4 = vadd.f32 %v1624_v60, %v1623_v54  ;;  %6875 = vst [vmem:[#allocation5_spill] sm:$0xff] %v5001_v50  ;;  %v5007_v54 = vld [vmem:[%s6609_s2 + $0x94] ss:$24 sps:$4 sm:$0xff]  }
 0x1be   :  { %6876 = vst [vmem:[#allocation6_spill] sm:$0xff] %v5007_v54  ;;  %v6877_v60 = vld [vmem:[#allocation16_spill] sm:$0xff] }
 0x1bf   :  { %v1627_v56 = vrot.slane %v4945_v4, 6 }
 0x1c1   :  { %v1630_v53 = vpack.c.bf16 %v1627_v56, %v1627_v56  ;;  %v6878_v56 = vld [vmem:[#allocation17_spill] sm:$0xff] }
 0x1c3   :  { %1663 = vmatprep.mubr.bf16.mxu0 %v1630_v53  ;;  %1704 = vmatprep.mubr.bf16.mxu1 %v1630_v53 }
 0x1c4   :  { %1664 = vmatmul.mubr.bf16.vlgmr.msra.gmra.mxu0 %v4950_v31  ;;  %1705 = vmatmul.mubr.bf16.vlgmr.msra.gmra.mxu1 %v4950_v31 }
 0x1c5   :  { %1714 = vmatpush1.bf16.msra.mxu0 %v6867_v0  ;;  %1745 = vmatprep.mubr.bf16.mxu0 %v1630_v53  ;;  %v5015_v53 = vld [vmem:[%s6609_s2 + $0x90] ss:$24 sps:$4 sm:$0xff]  }
 0x1c6   :  { %1715 = vmatprep.subr.bf16.mxu0 %v6868_v34  ;;  %1839 = vmatpush1.bf16.msra.mxu1 %v4959_v45  ;;  %6879 = vst [vmem:[#allocation7_spill] sm:$0xff] %v5015_v53 }
 0x1c7   :  { %1840 = vmatprep.subr.bf16.mxu1 %v4965_v39 }
 0x1c9   :  { %1716 = vmatpush1.bf16.msra.mxu0 %v6869_v37 }
 0x1ca   :  { %1717 = vmatprep.subr.bf16.mxu0 %v6870_v46  ;;  %1841 = vmatpush1.bf16.msra.mxu1 %v4973_v12 }
 0x1cb   :  { %1842 = vmatprep.subr.bf16.mxu1 %v4979_v16 }
 0x1cd   :  { %1718 = vmatpush1.bf16.msra.mxu0 %v6871_v35 }
 0x1ce   :  { %1719 = vmatprep.subr.bf16.mxu0 %v6872_v49  ;;  %1843 = vmatpush1.bf16.msra.mxu1 %v4987_v44 }
 0x1cf   :  { %1844 = vmatprep.subr.bf16.mxu1 %v4993_v29 }
 0x1d1   :  { %1720 = vmatpush1.bf16.msra.mxu0 %v6873_v20 }
 0x1d2   :  { %1721 = vmatprep.subr.bf16.mxu0 %v6874_v51  ;;  %1845 = vmatpush1.bf16.msra.mxu1 %v5001_v50  ;;  %v6880_v50 = vld [vmem:[#allocation18_spill] sm:$0xff]  ;;  %v6881_v51 = vld [vmem:[#allocation19_spill] sm:$0xff] }
 0x1d3   :  { %1846 = vmatprep.subr.bf16.mxu1 %v5007_v54  ;;  %v6884_v54 = vld [vmem:[#allocation22_spill] sm:$0xff] }
 0x1d5   :  { %1722 = vmatpush1.bf16.msra.mxu0 %v6877_v60  ;;  %v6882_v60 = vld [vmem:[#allocation20_spill] sm:$0xff] }
 0x1d6   :  { %1723 = vmatprep.subr.bf16.mxu0 %v6878_v56  ;;  %1847 = vmatpush1.bf16.msra.mxu1 %v5015_v53  ;;  %v6883_v56 = vld [vmem:[#allocation21_spill] sm:$0xff]  ;;  %v6885_v53 = vld [vmem:[#allocation24_spill] sm:$0xff] }
 0x1d7   :  { %1848 = vmatprep.subr.bf16.mxu1 %v4273_v55  ;;  %v6886_v55 = vld [vmem:[#allocation26_spill] sm:$0xff] }
 0x1d9   :  { %1724 = vmatpush1.bf16.msra.mxu0 %v6880_v50 }
 0x1da   :  { %1725 = vmatprep.subr.bf16.mxu0 %v6881_v51  ;;  %1849 = vmatpush1.bf16.msra.mxu1 %v4281_v57  ;;  %v6887_v57 = vld [vmem:[#allocation28_spill] sm:$0xff] }
 0x1db   :  { %1850 = vmatprep.subr.bf16.mxu1 %v4291_v59  ;;  %v6888_v59 = vld [vmem:[#allocation30_spill] sm:$0xff] }
 0x1dd   :  { %1726 = vmatpush1.bf16.msra.mxu0 %v6882_v60 }
 0x1de   :  { %1727 = vmatprep.subr.bf16.mxu0 %v6883_v56  ;;  %1851 = vmatpush1.bf16.msra.mxu1 %v4299_v61  ;;  %v6889_v61 = vld [vmem:[#allocation32_spill] sm:$0xff] }
 0x1df   :  { %1852 = vmatprep.subr.bf16.mxu1 %v4309_v63  ;;  %v6890_v63 = vld [vmem:[#allocation34_spill] sm:$0xff] }
 0x1e1   :  { %1728 = vmatpush1.bf16.msra.mxu0 %v6884_v54 }
 0x1e2   :  { %1729 = vmatprep.subr.bf16.mxu0 %v6885_v53  ;;  %1853 = vmatpush1.bf16.msra.mxu1 %v4318_v1  ;;  %v6891_v1 = vld [vmem:[#allocation36_spill] sm:$0xff] }
 0x1e3   :  { %1854 = vmatprep.subr.bf16.mxu1 %v4327_v3  ;;  %v6892_v3 = vld [vmem:[#allocation38_spill] sm:$0xff] }
 0x1e5   :  { %1730 = vmatpush2.bf16.msra.mxu0 %v6886_v55 }
 0x1e6   :  { %1731 = vmatprep.subr.bf16.mxu0 %v6887_v57  ;;  %1855 = vmatpush2.bf16.msra.mxu1 %v4335_v5  ;;  %v6893_v5 = vld [vmem:[#allocation40_spill] sm:$0xff] }
 0x1e7   :  { %1856 = vmatprep.subr.bf16.mxu1 %v4345_v7  ;;  %v6894_v7 = vld [vmem:[#allocation42_spill] sm:$0xff] }
 0x1e9   :  { %1732 = vmatpush2.bf16.msra.mxu0 %v6888_v59 }
 0x1ea   :  { %1733 = vmatprep.subr.bf16.mxu0 %v6889_v61  ;;  %1857 = vmatpush2.bf16.msra.mxu1 %v4354_v9  ;;  %v6895_v9 = vld [vmem:[#allocation44_spill] sm:$0xff] }
 0x1eb   :  { %1858 = vmatprep.subr.bf16.mxu1 %v4363_v11  ;;  %v6896_v11 = vld [vmem:[#allocation46_spill] sm:$0xff] }
 0x1ed   :  { %1734 = vmatpush2.bf16.msra.mxu0 %v6890_v63 }
 0x1ee   :  { %1735 = vmatprep.subr.bf16.mxu0 %v6891_v1  ;;  %1859 = vmatpush2.bf16.msra.mxu1 %v4371_v13  ;;  %v6897_v13 = vld [vmem:[#allocation48_spill] sm:$0xff] }
 0x1ef   :  { %1860 = vmatprep.subr.bf16.mxu1 %v4381_v15  ;;  %v6898_v15 = vld [vmem:[#allocation50_spill] sm:$0xff] }
 0x1f1   :  { %1736 = vmatpush2.bf16.msra.mxu0 %v6892_v3 }
 0x1f2   :  { %1737 = vmatprep.subr.bf16.mxu0 %v6893_v5  ;;  %1861 = vmatpush2.bf16.msra.mxu1 %v4390_v17  ;;  %v6899_v17 = vld [vmem:[#allocation23_spill] sm:$0xff] }
 0x1f3   :  { %1862 = vmatprep.subr.bf16.mxu1 %v4399_v19  ;;  %v6900_v19 = vld [vmem:[#allocation25_spill] sm:$0xff] }
 0x1f5   :  { %1738 = vmatpush2.bf16.msra.mxu0 %v6894_v7 }
 0x1f6   :  { %1739 = vmatprep.subr.bf16.mxu0 %v6895_v9  ;;  %1863 = vmatpush2.bf16.msra.mxu1 %v4407_v21  ;;  %v6901_v21 = vld [vmem:[#allocation27_spill] sm:$0xff] }
 0x1f7   :  { %1864 = vmatprep.subr.bf16.mxu1 %v4417_v23  ;;  %v6902_v23 = vld [vmem:[#allocation29_spill] sm:$0xff] }
 0x1f9   :  { %1740 = vmatpush2.bf16.msra.mxu0 %v6896_v11 }
 0x1fa   :  { %1741 = vmatprep.subr.bf16.mxu0 %v6897_v13  ;;  %1865 = vmatpush2.bf16.msra.mxu1 %v4426_v25  ;;  %v6903_v25 = vld [vmem:[#allocation31_spill] sm:$0xff] }
 0x1fb   :  { %1866 = vmatprep.subr.bf16.mxu1 %v4435_v27  ;;  %v6904_v27 = vld [vmem:[#allocation33_spill] sm:$0xff] }
 0x1fd   :  { %1742 = vmatpush2.bf16.msra.mxu0 %v6898_v15 }
 0x1fe   :  { %1743 = vmatprep.subr.bf16.mxu0 %v4836_v24  ;;  %1867 = vmatpush2.bf16.msra.mxu1 %v6862_v41 }
 0x1ff   :  { %1868 = vmatprep.subr.bf16.mxu1 %v6863_v47  ;;  %v1755_v47 = vld [vmem:[#allocation2] sm:$0xc] }
 0x201   :  { %1744 = vmatpush2.bf16.msra.mxu0 %v4848_v28 }
 0x202   :  { %1879 = vmatprep.subr.bf16.mxu0 %v4467_v38  ;;  %1869 = vmatpush2.bf16.msra.mxu1 %v6864_v36  ;;  %v6905_v36 = vld [vmem:[#allocation35_spill] sm:$0xff]  ;;  %v6906_v38 = vld [vmem:[#allocation37_spill] sm:$0xff] }
 0x203   :  { %1920 = vmatprep.subr.bf16.mxu1 %v6865_v40  ;;  %v6907_v40 = vld [vmem:[#allocation39_spill] sm:$0xff] }
 0x204   :  { %1746 = vmatmul.mubr.bf16.vlgmr.msra.gmra.mxu0 %v4950_v31 }
 0x205   :  { %1880 = vmatpush1.bf16.msra.mxu0 %v4478_v43  ;;  %v6908_v43 = vld [vmem:[#allocation41_spill] sm:$0xff] }
 0x206   :  { %1881 = vmatprep.subr.bf16.mxu0 %v4489_v48  ;;  %v6910_v48 = vld [vmem:[#allocation45_spill] sm:$0xff] }
 0x209   :  { %1882 = vmatpush1.bf16.msra.mxu0 %v4505_v52  ;;  %v6911_v52 = vld [vmem:[#allocation47_spill] sm:$0xff] }
 0x20a   :  { %1883 = vmatprep.subr.bf16.mxu0 %v4517_v33  ;;  %v6912_v33 = vld [vmem:[#allocation49_spill] sm:$0xff] }
 0x20d   :  { %1884 = vmatpush1.bf16.msra.mxu0 %v4531_v58  ;;  %v6913_v58 = vld [vmem:[#allocation51_spill] sm:$0xff] }
 0x20e   :  { %1885 = vmatprep.subr.bf16.mxu0 %v4543_v62  ;;  %v6914_v62 = vld [vmem:[#allocation52_spill] sm:$0xff] }
 0x211   :  { %1886 = vmatpush1.bf16.msra.mxu0 %v4555_v2  ;;  %v5098_v2 = vld [vmem:[%s6609_s2 + $0x154] ss:$24 sps:$4 sm:$0xff]  }
 0x212   :  { %1887 = vmatprep.subr.bf16.mxu0 %v4567_v6  ;;  %6915 = vst [vmem:[#allocation8_spill] sm:$0xff] %v5098_v2 }
 0x215   :  { %1888 = vmatpush1.bf16.msra.mxu0 %v4579_v10 }
 0x216   :  { %1889 = vmatprep.subr.bf16.mxu0 %v4591_v14 }
 0x219   :  { %1890 = vmatpush1.bf16.msra.mxu0 %v4603_v18  ;;  %v1754_v18 = vld [vmem:[#allocation2 + $0x30] sm:$0xc] }
 0x21a   :  { %1891 = vmatprep.subr.bf16.mxu0 %v4615_v22 }
 0x21d   :  { %1892 = vmatpush1.bf16.msra.mxu0 %v4627_v26 }
 0x21e   :  { %1893 = vmatprep.subr.bf16.mxu0 %v4639_v30 }
 0x221   :  { %1894 = vmatpush1.bf16.msra.mxu0 %v4651_v42  ;;  %v6909_v42 = vld [vmem:[#allocation43_spill] sm:$0xff] }
 0x222   :  { %1895 = vmatprep.subr.bf16.mxu0 %v6899_v17 }
 0x225   :  { %1896 = vmatpush2.bf16.msra.mxu0 %v6900_v19 }
 0x226   :  { %1897 = vmatprep.subr.bf16.mxu0 %v6901_v21 }
 0x229   :  { %1898 = vmatpush2.bf16.msra.mxu0 %v6902_v23 }
 0x22a   :  { %1899 = vmatprep.subr.bf16.mxu0 %v6903_v25 }
 0x22d   :  { %1900 = vmatpush2.bf16.msra.mxu0 %v6904_v27 }
 0x22e   :  { %1901 = vmatprep.subr.bf16.mxu0 %v6905_v36 }
 0x231   :  { %1902 = vmatpush2.bf16.msra.mxu0 %v6906_v38 }
 0x232   :  { %1903 = vmatprep.subr.bf16.mxu0 %v6907_v40 }
 0x235   :  { %1904 = vmatpush2.bf16.msra.mxu0 %v6908_v43 }
 0x236   :  { %1905 = vmatprep.subr.bf16.mxu0 %v6909_v42 }
 0x239   :  { %1906 = vmatpush2.bf16.msra.mxu0 %v6910_v48  ;;  %v6916_v48 = vld [vmem:[#allocation4_spill] sm:$0xff] }
 0x23a   :  { %1907 = vmatprep.subr.bf16.mxu0 %v6911_v52 }
 0x23d   :  { %1908 = vmatpush2.bf16.msra.mxu0 %v6912_v33 }
 0x23e   :  { %1909 = vmatprep.subr.bf16.mxu0 %v6913_v58 }
 0x241   :  { %1910 = vmatpush2.bf16.msra.mxu0 %v6914_v62 }
 0x242   :  { %2043 = vmatprep.subr.bf16.mxu0 %v5098_v2 }
 0x284   :  { %v1665_v6 = vpop.f32.mrf.mxu0  ;;  %v1706_v10 = vpop.f32.mrf.mxu1 }
 0x285   :  { %v1761_v14 = vrot.slane %v1665_v6, 6  ;;  %v1780_v42 = vadd.f32 %v6916_v48, %v1706_v10 }
 0x286   :  { %v1667_v22 = vpop.f32.mrf.mxu0  ;;  %v1708_v26 = vpop.f32.mrf.mxu1 }
 0x287   :  { %v1763_v30 = vadd.f32 %v1761_v14, %v1754_v18  ;;  %v1771_v41 = vrot.slane %v1667_v22, 6  ;;  %v1782_v14 = vrot.slane %v1780_v42, 6  ;;  %v1795_v18 = vrot.slane %v1708_v26, 4 }
 0x288   :  { %v1669_v31 = vpop.f32.mrf.mxu0  ;;  %v1710_v17 = vpop.f32.mrf.mxu1 }
 0x289   :  { %v3246_v19 = vmul.f32 -1.442695, %v1763_v30  ;;  %v1773_v21 = vadd.f32 %v1771_v41, %v1755_v47  ;;  %v1790_v31 = vrot.slane %v4937_v32, 6  ;;  %v1756_v47 = vld [vmem:[#allocation2 + $0x58] sm:$0xc] }
 0x28a   :  { %v1670_v23 = vpop.f32.mrf.mxu0  ;;  %v1711_v62 = vpop.f32.mrf.mxu1  ;;  %v1758_v32 = vld [vmem:[#allocation2 + $0x10] sm:$0x30] }
 0x28b   :  { %3585 = vpow2.f32 %v3246_v19  ;;  %v3247_v58 = vmul.f32 -1.442695, %v1773_v21  ;;  %v1757_v62 = vld [vmem:[#allocation2 + $0x48] sm:$0x30] }
 0x28c   :  { %v1797_v19 = vadd.f32 %v1795_v18, %v1757_v62 }
 0x28d   :  { %3587 = vpow2.f32 %v3247_v58 }
 0x298   :  { %v3586_v33 = vpop.eup %3585 }
 0x299   :  { %v1767_v2 = vadd.f32 1.0, %v3586_v33  ;;  %v3248_v33 = vmul.f32 -1.442695, %v1797_v19  ;;  %v1759_v19 = vld [vmem:[#allocation2 + $0x40] sm:$0x30] }
 0x29a   :  { %v3588_v52 = vpop.eup %3587 }
 0x29b   :  { %3589 = vrcp.f32 %v1767_v2  ;;  %v1777_v6 = vadd.f32 1.0, %v3588_v52 }
 0x29d   :  { %3591 = vrcp.f32 %v1777_v6 }
 0x2a8   :  { %v3590_v22 = vpop.eup %3589 }
 0x2a9   :  { %v1784_v30 = vmul.f32 %v3590_v22, %v1782_v14 }
 0x2aa   :  { %v3592_v41 = vpop.eup %3591 }
 0x2ab   :  { %v1785_v17 = vadd.f32 %v1784_v30, %v1756_v47  ;;  %v1792_v58 = vmul.f32 %v3592_v41, %v1790_v31  ;;  %v1787_v2 = vsub.f32 1.0, %v3592_v41 }
 0x2ad   :  { %3593 = vtanh.f32 %v1785_v17 }
 0x2ae   :  { %3595 = vpow2.f32 %v3248_v33 }
 0x2ba   :  { %v3594_v52 = vpop.eup %3593 }
 0x2bb   :  { %v1788_v21 = vmul.f32 %v3594_v52, %v1787_v2  ;;  %v3596_v42 = vpop.eup %3595  ;;  %v1823_v52 = vrot.slane %v4945_v4, 2  ;;  %v6917_v4 = vld [vmem:[#allocation15_spill] sm:$0xff] }
 0x2bc   :  { %v1801_v10 = vadd.f32 1.0, %v3596_v42 }
 0x2bd   :  { %v5103_v23 = vadd.f32 %v1792_v58, %v1788_v21 }
 0x2be   :  { %3597 = vrcp.f32 %v1801_v10 }
 0x2c4   :  { %v1747_v26 = vpop.f32.mrf.mxu0 }
 0x2c5   :  { %v1805_v6 = vrot.slane %v1747_v26, 4 }
 0x2c6   :  { %v1749_v14 = vpop.f32.mrf.mxu0 }
 0x2c7   :  { %v1807_v22 = vadd.f32 %v1805_v6, %v1758_v32  ;;  %v1814_v31 = vadd.f32 %v4942_v8, %v1749_v14  ;;  %v1830_v32 = vpack.c.bf16 %v5103_v23, %v5103_v23 }
 0x2c8   :  { %v1751_v48 = vpop.f32.mrf.mxu0 }
 0x2c9   :  { %v3249_v30 = vmul.f32 -1.442695, %v1807_v22  ;;  %v1816_v47 = vrot.slane %v1814_v31, 4  ;;  %v5298_v31 = vld [vmem:[%s6609_s2 + $0x164] ss:$24 sps:$4 sm:$0xff]  }
 0x2ca   :  { %v1752_v18 = vpop.f32.mrf.mxu0  ;;  %6930 = vst [vmem:[#allocation19_spill] sm:$0xff] %v5298_v31 }
 0x2cb   :  { %3599 = vpow2.f32 %v3249_v30  ;;  %v3598_v41 = vpop.eup %3597  ;;  %v5113_v30 = vrot.slane %v1830_v32, 1  ;;  %v6922_v18 = vld [vmem:[#allocation7_spill] sm:$0xff]  ;;  %v5395_v32 = vld [vmem:[%s6609_s2 + $0x2dc] ss:$24 sps:$4 sm:$0xff]  }
 0x2cc   :  { %v1818_v62 = vmul.f32 %v3598_v41, %v1816_v47  ;;  %v5311_v47 = vld [vmem:[%s6609_s2 + $0x12c] ss:$24 sps:$4 sm:$0xff]   ;;  %v5317_v41 = vld [vmem:[%s6609_s2 + $0x128] ss:$24 sps:$4 sm:$0xff]   ;;  %6946 = vst [vmem:[#allocation48_spill] sm:$0xff] %v5395_v32 }
 0x2cd   :  { %6932 = vst [vmem:[#allocation21_spill] sm:$0xff] %v5311_v47  ;;  %6933 = vst [vmem:[#allocation22_spill] sm:$0xff] %v5317_v41 }
 0x2ce   :  { %v1819_v33 = vadd.f32 %v1818_v62, %v1759_v19  ;;  %v5323_v62 = vld [vmem:[%s6609_s2 + $0xfc] ss:$24 sps:$4 sm:$0xff]   ;;  %v5335_v19 = vld [vmem:[%s6609_s2 + $0xcc] ss:$24 sps:$4 sm:$0xff]  }
 0x2cf   :  { %6934 = vst [vmem:[#allocation24_spill] sm:$0xff] %v5323_v62  ;;  %6936 = vst [vmem:[#allocation28_spill] sm:$0xff] %v5335_v19 }
 0x2d8   :  { %v3600_v17 = vpop.eup %3599 }
 0x2d9   :  { %v1811_v58 = vadd.f32 1.0, %v3600_v17  ;;  %v5329_v17 = vld [vmem:[%s6609_s2 + $0xf8] ss:$24 sps:$4 sm:$0xff]  }
 0x2da   :  { %6935 = vst [vmem:[#allocation26_spill] sm:$0xff] %v5329_v17 }
 0x2db   :  { %3601 = vrcp.f32 %v1811_v58  ;;  %v5341_v58 = vld [vmem:[%s6609_s2 + $0xc8] ss:$24 sps:$4 sm:$0xff]  }
 0x2dc   :  { %3603 = vtanh.f32 %v1819_v33  ;;  %6937 = vst [vmem:[#allocation30_spill] sm:$0xff] %v5341_v58  ;;  %v5347_v33 = vld [vmem:[%s6609_s2 + $0x9c] ss:$24 sps:$4 sm:$0xff]  }
 0x2dd   :  { %6938 = vst [vmem:[#allocation32_spill] sm:$0xff] %v5347_v33 }
 0x2e8   :  { %v3602_v2 = vpop.eup %3601 }
 0x2e9   :  { %v1821_v21 = vsub.f32 1.0, %v3602_v2  ;;  %v3604_v42 = vpop.eup %3603  ;;  %v1825_v10 = vmul.f32 %v3602_v2, %v1823_v52  ;;  %v5353_v2 = vld [vmem:[%s6609_s2 + $0x98] ss:$24 sps:$4 sm:$0xff]   ;;  %v5359_v52 = vld [vmem:[%s6609_s2 + $0x6c] ss:$24 sps:$4 sm:$0xff]  }
 0x2ea   :  { %6939 = vst [vmem:[#allocation34_spill] sm:$0xff] %v5353_v2  ;;  %6940 = vst [vmem:[#allocation36_spill] sm:$0xff] %v5359_v52 }
 0x2eb   :  { %v1822_v48 = vmul.f32 %v3604_v42, %v1821_v21  ;;  %v5365_v21 = vld [vmem:[%s6609_s2 + $0x68] ss:$24 sps:$4 sm:$0xff]   ;;  %v5371_v42 = vld [vmem:[%s6609_s2 + $0x3c] ss:$24 sps:$4 sm:$0xff]  }
 0x2ec   :  { %6941 = vst [vmem:[#allocation38_spill] sm:$0xff] %v5365_v21  ;;  %6942 = vst [vmem:[#allocation40_spill] sm:$0xff] %v5371_v42 }
 0x2ed   :  { %v1826_v26 = vadd.f32 %v1825_v10, %v1822_v48  ;;  %v5377_v48 = vld [vmem:[%s6609_s2 + $0x38] ss:$24 sps:$4 sm:$0xff]   ;;  %v5383_v10 = vld [vmem:[%s6609_s2 + $0xc] ss:$24 sps:$4 sm:$0xff]  }
 0x2ee   :  { %6943 = vst [vmem:[#allocation42_spill] sm:$0xff] %v5377_v48  ;;  %6944 = vst [vmem:[#allocation44_spill] sm:$0xff] %v5383_v10 }
 0x2ef   :  { %v5107_v6 = vrot.slane %v1826_v26, 2  ;;  %v5389_v26 = vld [vmem:[%s6609_s2 + $0x8] ss:$24 sps:$4 sm:$0xff]  }
 0x2f0   :  { %6945 = vst [vmem:[#allocation46_spill] sm:$0xff] %v5389_v26 }
 0x2f1   :  { %v1831_v14 = vpack.c.bf16 %v5107_v6, %v5107_v6 }
 0x2f3   :  { %v1835_v22 = vrot.slane %v1831_v14, 1  ;;  %v5401_v14 = vld [vmem:[%s6609_s2 + $0x2d8] ss:$24 sps:$4 sm:$0xff]  }
 0x2f4   :  { %6947 = vst [vmem:[#allocation50_spill] sm:$0xff] %v5401_v14 }
 0x2f5   :  { %1870 = vmatprep.mubr.bf16.mxu1 %v1835_v22  ;;  %1911 = vmatprep.mubr.bf16.mxu0 %v1835_v22 }
 0x2f6   :  { %1871 = vmatmul.mubr.bf16.vlgmr.msra.gmra.mxu1 %v5113_v30  ;;  %1912 = vmatmul.mubr.bf16.vlgmr.msra.gmra.mxu0 %v5113_v30 }
 0x2f7   :  { %1921 = vmatpush1.bf16.msra.mxu1 %v6867_v0  ;;  %1952 = vmatprep.mubr.bf16.mxu1 %v1835_v22  ;;  %v6918_v0 = vld [vmem:[#allocation5_spill] sm:$0xff]  ;;  %v5407_v22 = vld [vmem:[%s6609_s2 + $0x2ac] ss:$24 sps:$4 sm:$0xff]  }
 0x2f8   :  { %1922 = vmatprep.subr.bf16.mxu1 %v6868_v34  ;;  %2044 = vmatpush1.bf16.msra.mxu0 %v4959_v45  ;;  %v6919_v34 = vld [vmem:[#allocation6_spill] sm:$0xff]  ;;  %6948 = vst [vmem:[#allocation23_spill] sm:$0xff] %v5407_v22 }
 0x2f9   :  { %2045 = vmatprep.subr.bf16.mxu0 %v4965_v39 }
 0x2fb   :  { %1923 = vmatpush1.bf16.msra.mxu1 %v6869_v37  ;;  %v6920_v37 = vld [vmem:[#allocation16_spill] sm:$0xff] }
 0x2fc   :  { %1924 = vmatprep.subr.bf16.mxu1 %v6870_v46  ;;  %2046 = vmatpush1.bf16.msra.mxu0 %v4973_v12  ;;  %v6921_v46 = vld [vmem:[#allocation17_spill] sm:$0xff] }
 0x2fd   :  { %2047 = vmatprep.subr.bf16.mxu0 %v4979_v16 }
 0x2ff   :  { %1925 = vmatpush1.bf16.msra.mxu1 %v6871_v35  ;;  %v5139_v35 = vld [vmem:[%s6609_s2 + $0x64] ss:$24 sps:$4 sm:$0xff]  }
 0x300   :  { %1926 = vmatprep.subr.bf16.mxu1 %v6872_v49  ;;  %2048 = vmatpush1.bf16.msra.mxu0 %v4987_v44  ;;  %v5147_v49 = vld [vmem:[%s6609_s2 + $0x60] ss:$24 sps:$4 sm:$0xff]  }
 0x301   :  { %2049 = vmatprep.subr.bf16.mxu0 %v4993_v29 }
 0x303   :  { %1927 = vmatpush1.bf16.msra.mxu1 %v6873_v20  ;;  %v5153_v20 = vld [vmem:[%s6609_s2 + $0x34] ss:$24 sps:$4 sm:$0xff]  }
 0x304   :  { %1928 = vmatprep.subr.bf16.mxu1 %v6917_v4  ;;  %2050 = vmatpush1.bf16.msra.mxu0 %v6918_v0  ;;  %v6950_v4 = vld [vmem:[#allocation43_spill] sm:$0xff] }
 0x305   :  { %2051 = vmatprep.subr.bf16.mxu0 %v6919_v34 }
 0x307   :  { %1929 = vmatpush1.bf16.msra.mxu1 %v6920_v37  ;;  %v6951_v37 = vld [vmem:[#allocation45_spill] sm:$0xff] }
 0x308   :  { %1930 = vmatprep.subr.bf16.mxu1 %v6921_v46  ;;  %2052 = vmatpush1.bf16.msra.mxu0 %v6922_v18  ;;  %v6952_v46 = vld [vmem:[#allocation47_spill] sm:$0xff] }
 0x309   :  { %2053 = vmatprep.subr.bf16.mxu0 %v5139_v35 }
 0x30b   :  { %1931 = vmatpush1.bf16.msra.mxu1 %v6880_v50  ;;  %v5167_v50 = vld [vmem:[%s6609_s2 + $0x4] ss:$24 sps:$4 sm:$0xff]  }
 0x30c   :  { %1932 = vmatprep.subr.bf16.mxu1 %v6881_v51  ;;  %2054 = vmatpush1.bf16.msra.mxu0 %v5147_v49  ;;  %v5161_v51 = vld [vmem:[%s6609_s2 + $0x30] ss:$24 sps:$4 sm:$0xff]  }
 0x30d   :  { %2055 = vmatprep.subr.bf16.mxu0 %v5153_v20 }
 0x30f   :  { %1933 = vmatpush1.bf16.msra.mxu1 %v6882_v60  ;;  %v5175_v60 = vld [vmem:[%s6609_s2] ss:$24 sps:$4 sm:$0xff]  }
 0x310   :  { %1934 = vmatprep.subr.bf16.mxu1 %v6883_v56  ;;  %2056 = vmatpush1.bf16.msra.mxu0 %v5161_v51  ;;  %v5181_v56 = vld [vmem:[%s6609_s2 + $0x2d4] ss:$24 sps:$4 sm:$0xff]  }
 0x311   :  { %2057 = vmatprep.subr.bf16.mxu0 %v5167_v50 }
 0x313   :  { %1935 = vmatpush1.bf16.msra.mxu1 %v6884_v54  ;;  %v5189_v54 = vld [vmem:[%s6609_s2 + $0x2d0] ss:$24 sps:$4 sm:$0xff]  }
 0x314   :  { %1936 = vmatprep.subr.bf16.mxu1 %v6885_v53  ;;  %2058 = vmatpush1.bf16.msra.mxu0 %v5175_v60  ;;  %v5195_v53 = vld [vmem:[%s6609_s2 + $0x2a4] ss:$24 sps:$4 sm:$0xff]  }
 0x315   :  { %2059 = vmatprep.subr.bf16.mxu0 %v5181_v56 }
 0x317   :  { %1937 = vmatpush2.bf16.msra.mxu1 %v6886_v55  ;;  %v5203_v55 = vld [vmem:[%s6609_s2 + $0x2a0] ss:$24 sps:$4 sm:$0xff]  }
 0x318   :  { %1938 = vmatprep.subr.bf16.mxu1 %v6887_v57  ;;  %2060 = vmatpush2.bf16.msra.mxu0 %v5189_v54  ;;  %v5209_v57 = vld [vmem:[%s6609_s2 + $0x274] ss:$24 sps:$4 sm:$0xff]  }
 0x319   :  { %2061 = vmatprep.subr.bf16.mxu0 %v5195_v53 }
 0x31b   :  { %1939 = vmatpush2.bf16.msra.mxu1 %v6888_v59  ;;  %v5217_v59 = vld [vmem:[%s6609_s2 + $0x270] ss:$24 sps:$4 sm:$0xff]  }
 0x31c   :  { %1940 = vmatprep.subr.bf16.mxu1 %v6889_v61  ;;  %2062 = vmatpush2.bf16.msra.mxu0 %v5203_v55  ;;  %v5223_v61 = vld [vmem:[%s6609_s2 + $0x244] ss:$24 sps:$4 sm:$0xff]  }
 0x31d   :  { %2063 = vmatprep.subr.bf16.mxu0 %v5209_v57 }
 0x31f   :  { %1941 = vmatpush2.bf16.msra.mxu1 %v6890_v63  ;;  %v5231_v63 = vld [vmem:[%s6609_s2 + $0x240] ss:$24 sps:$4 sm:$0xff]  }
 0x320   :  { %1942 = vmatprep.subr.bf16.mxu1 %v6891_v1  ;;  %2064 = vmatpush2.bf16.msra.mxu0 %v5217_v59  ;;  %v5237_v1 = vld [vmem:[%s6609_s2 + $0x214] ss:$24 sps:$4 sm:$0xff]  }
 0x321   :  { %2065 = vmatprep.subr.bf16.mxu0 %v5223_v61 }
 0x323   :  { %1943 = vmatpush2.bf16.msra.mxu1 %v6892_v3  ;;  %v5245_v3 = vld [vmem:[%s6609_s2 + $0x210] ss:$24 sps:$4 sm:$0xff]  }
 0x324   :  { %1944 = vmatprep.subr.bf16.mxu1 %v6893_v5  ;;  %2066 = vmatpush2.bf16.msra.mxu0 %v5231_v63  ;;  %v5251_v5 = vld [vmem:[%s6609_s2 + $0x1e4] ss:$24 sps:$4 sm:$0xff]  }
 0x325   :  { %2067 = vmatprep.subr.bf16.mxu0 %v5237_v1  ;;  %6923 = vst [vmem:[#allocation9_spill] sm:$0xff] %v5251_v5 }
 0x327   :  { %1945 = vmatpush2.bf16.msra.mxu1 %v6894_v7  ;;  %v5259_v7 = vld [vmem:[%s6609_s2 + $0x1e0] ss:$24 sps:$4 sm:$0xff]  }
 0x328   :  { %1946 = vmatprep.subr.bf16.mxu1 %v6895_v9  ;;  %2068 = vmatpush2.bf16.msra.mxu0 %v5245_v3  ;;  %6924 = vst [vmem:[#allocation10_spill] sm:$0xff] %v5259_v7  ;;  %v5265_v9 = vld [vmem:[%s6609_s2 + $0x1b4] ss:$24 sps:$4 sm:$0xff]  }
 0x329   :  { %2069 = vmatprep.subr.bf16.mxu0 %v5251_v5  ;;  %6925 = vst [vmem:[#allocation11_spill] sm:$0xff] %v5265_v9 }
 0x32b   :  { %1947 = vmatpush2.bf16.msra.mxu1 %v6896_v11  ;;  %v5273_v11 = vld [vmem:[%s6609_s2 + $0x1b0] ss:$24 sps:$4 sm:$0xff]  }
 0x32c   :  { %1948 = vmatprep.subr.bf16.mxu1 %v6897_v13  ;;  %2070 = vmatpush2.bf16.msra.mxu0 %v5259_v7  ;;  %6926 = vst [vmem:[#allocation12_spill] sm:$0xff] %v5273_v11  ;;  %v5279_v13 = vld [vmem:[%s6609_s2 + $0x184] ss:$24 sps:$4 sm:$0xff]  }
 0x32d   :  { %2071 = vmatprep.subr.bf16.mxu0 %v5265_v9  ;;  %6927 = vst [vmem:[#allocation13_spill] sm:$0xff] %v5279_v13 }
 0x32f   :  { %1949 = vmatpush2.bf16.msra.mxu1 %v6898_v15  ;;  %v5292_v15 = vld [vmem:[%s6609_s2 + $0x180] ss:$24 sps:$4 sm:$0xff]  }
 0x330   :  { %1950 = vmatprep.subr.bf16.mxu1 %v4836_v24  ;;  %2072 = vmatpush2.bf16.msra.mxu0 %v5273_v11  ;;  %v5286_v24 = vld [vmem:[%s6609_s2 + $0x15c] ss:$24 sps:$4 sm:$0xff]   ;;  %6929 = vst [vmem:[#allocation18_spill] sm:$0xff] %v5292_v15 }
 0x331   :  { %2073 = vmatprep.subr.bf16.mxu0 %v5279_v13  ;;  %6928 = vst [vmem:[#allocation14_spill] sm:$0xff] %v5286_v24 }
 0x333   :  { %1951 = vmatpush2.bf16.msra.mxu1 %v4848_v28  ;;  %v5305_v28 = vld [vmem:[%s6609_s2 + $0x158] ss:$24 sps:$4 sm:$0xff]  }
 0x334   :  { %2084 = vmatprep.subr.bf16.mxu1 %v5286_v24  ;;  %2074 = vmatpush2.bf16.msra.mxu0 %v5292_v15  ;;  %6931 = vst [vmem:[#allocation20_spill] sm:$0xff] %v5305_v28 }
 0x335   :  { %2125 = vmatprep.subr.bf16.mxu0 %v5298_v31 }
 0x336   :  { %1953 = vmatmul.mubr.bf16.vlgmr.msra.gmra.mxu1 %v5113_v30  ;;  %v5413_v30 = vld [vmem:[%s6609_s2 + $0x2a8] ss:$24 sps:$4 sm:$0xff]  }
 0x337   :  { %2085 = vmatpush1.bf16.msra.mxu1 %v5305_v28  ;;  %6949 = vst [vmem:[#allocation25_spill] sm:$0xff] %v5413_v30 }
 0x338   :  { %2086 = vmatprep.subr.bf16.mxu1 %v5311_v47 }
 0x33b   :  { %2087 = vmatpush1.bf16.msra.mxu1 %v5317_v41 }
 0x33c   :  { %2088 = vmatprep.subr.bf16.mxu1 %v5323_v62 }
 0x33f   :  { %2089 = vmatpush1.bf16.msra.mxu1 %v5329_v17 }
 0x340   :  { %2090 = vmatprep.subr.bf16.mxu1 %v5335_v19 }
 0x343   :  { %2091 = vmatpush1.bf16.msra.mxu1 %v5341_v58 }
 0x344   :  { %2092 = vmatprep.subr.bf16.mxu1 %v5347_v33 }
 0x347   :  { %2093 = vmatpush1.bf16.msra.mxu1 %v5353_v2  ;;  %v6957_v2 = vld [vmem:[#allocation4_spill] sm:$0xff] }
 0x348   :  { %2094 = vmatprep.subr.bf16.mxu1 %v5359_v52 }
 0x34b   :  { %2095 = vmatpush1.bf16.msra.mxu1 %v5365_v21 }
 0x34c   :  { %2096 = vmatprep.subr.bf16.mxu1 %v5371_v42 }
 0x34f   :  { %2097 = vmatpush1.bf16.msra.mxu1 %v5377_v48 }
 0x350   :  { %2098 = vmatprep.subr.bf16.mxu1 %v5383_v10  ;;  %v1962_v10 = vld [vmem:[#allocation2] sm:$0x30] }
 0x353   :  { %2099 = vmatpush1.bf16.msra.mxu1 %v5389_v26 }
 0x354   :  { %2100 = vmatprep.subr.bf16.mxu1 %v5395_v32 }
 0x357   :  { %2101 = vmatpush2.bf16.msra.mxu1 %v5401_v14 }
 0x358   :  { %2102 = vmatprep.subr.bf16.mxu1 %v5407_v22  ;;  %v6953_v22 = vld [vmem:[#allocation49_spill] sm:$0xff] }
 0x35b   :  { %2103 = vmatpush2.bf16.msra.mxu1 %v5413_v30  ;;  %v6954_v30 = vld [vmem:[#allocation51_spill] sm:$0xff] }
 0x35c   :  { %2104 = vmatprep.subr.bf16.mxu1 %v6903_v25  ;;  %v6955_v25 = vld [vmem:[#allocation52_spill] sm:$0xff] }
 0x35f   :  { %2105 = vmatpush2.bf16.msra.mxu1 %v6904_v27  ;;  %v6956_v27 = vld [vmem:[#allocation8_spill] sm:$0xff] }
 0x360   :  { %2106 = vmatprep.subr.bf16.mxu1 %v6905_v36 }
 0x363   :  { %2107 = vmatpush2.bf16.msra.mxu1 %v6906_v38 }
 0x364   :  { %2108 = vmatprep.subr.bf16.mxu1 %v6907_v40  ;;  %v1961_v40 = vld [vmem:[#allocation2 + $0x30] sm:$0x30] }
 0x367   :  { %2109 = vmatpush2.bf16.msra.mxu1 %v6908_v43 }
 0x368   :  { %2110 = vmatprep.subr.bf16.mxu1 %v6950_v4 }
 0x36b   :  { %2111 = vmatpush2.bf16.msra.mxu1 %v6951_v37 }
 0x36c   :  { %2112 = vmatprep.subr.bf16.mxu1 %v6952_v46 }
 0x36f   :  { %2113 = vmatpush2.bf16.msra.mxu1 %v6953_v22 }
 0x370   :  { %2114 = vmatprep.subr.bf16.mxu1 %v6954_v30 }
 0x373   :  { %2115 = vmatpush2.bf16.msra.mxu1 %v6955_v25 }
 0x374   :  { %2241 = vmatprep.subr.bf16.mxu1 %v6956_v27 }
 0x3b6   :  { %v1872_v36 = vpop.f32.mrf.mxu1  ;;  %v1913_v38 = vpop.f32.mrf.mxu0 }
 0x3b7   :  { %v1968_v14 = vrot.slane %v1872_v36, 4  ;;  %v1987_v33 = vadd.f32 %v6957_v2, %v1913_v38 }
 0x3b8   :  { %v1874_v32 = vpop.f32.mrf.mxu1  ;;  %v1915_v43 = vpop.f32.mrf.mxu0 }
 0x3b9   :  { %v1970_v26 = vadd.f32 %v1968_v14, %v1961_v40  ;;  %v1978_v4 = vrot.slane %v1874_v32, 4  ;;  %v1989_v14 = vrot.slane %v1987_v33, 4  ;;  %v2002_v32 = vrot.slane %v1915_v43, 6 }
 0x3ba   :  { %v1876_v37 = vpop.f32.mrf.mxu1  ;;  %v1917_v48 = vpop.f32.mrf.mxu0 }
 0x3bb   :  { %v3250_v46 = vmul.f32 -1.442695, %v1970_v26  ;;  %v1980_v42 = vadd.f32 %v1978_v4, %v1962_v10  ;;  %v1997_v48 = vrot.slane %v5103_v23, 6  ;;  %v1963_v4 = vld [vmem:[#allocation2 + $0x58] sm:$0x30] }
 0x3bc   :  { %v1877_v22 = vpop.f32.mrf.mxu1  ;;  %v1918_v21 = vpop.f32.mrf.mxu0  ;;  %v1965_v23 = vld [vmem:[#allocation2 + $0x10] sm:$0xc] }
 0x3bd   :  { %3605 = vpow2.f32 %v3250_v46  ;;  %v3251_v30 = vmul.f32 -1.442695, %v1980_v42  ;;  %v1964_v21 = vld [vmem:[#allocation2 + $0x48] sm:$0xc] }
 0x3be   :  { %v2004_v42 = vadd.f32 %v2002_v32, %v1964_v21 }
 0x3bf   :  { %3607 = vpow2.f32 %v3251_v30 }
 0x3c0   :  { %v3252_v22 = vmul.f32 -1.442695, %v2004_v42  ;;  %v1966_v42 = vld [vmem:[#allocation2 + $0x40] sm:$0xc] }
 0x3ca   :  { %v3606_v25 = vpop.eup %3605 }
 0x3cb   :  { %v1974_v27 = vadd.f32 1.0, %v3606_v25 }
 0x3cc   :  { %v3608_v52 = vpop.eup %3607 }
 0x3cd   :  { %3609 = vrcp.f32 %v1974_v27  ;;  %v1984_v36 = vadd.f32 1.0, %v3608_v52 }
 0x3cf   :  { %3611 = vrcp.f32 %v1984_v36 }
 0x3da   :  { %v3610_v40 = vpop.eup %3609 }
 0x3db   :  { %v1991_v26 = vmul.f32 %v3610_v40, %v1989_v14 }
 0x3dc   :  { %v3612_v10 = vpop.eup %3611 }
 0x3dd   :  { %v1992_v37 = vadd.f32 %v1991_v26, %v1963_v4  ;;  %v1999_v46 = vmul.f32 %v3612_v10, %v1997_v48  ;;  %v1994_v27 = vsub.f32 1.0, %v3612_v10 }
 0x3df   :  { %3613 = vtanh.f32 %v1992_v37 }
 0x3e0   :  { %3615 = vpow2.f32 %v3252_v22 }
 0x3ec   :  { %v3614_v52 = vpop.eup %3613 }
 0x3ed   :  { %v1995_v30 = vmul.f32 %v3614_v52, %v1994_v27  ;;  %v3616_v33 = vpop.eup %3615 }
 0x3ee   :  { %v2008_v2 = vadd.f32 1.0, %v3616_v33 }
 0x3ef   :  { %v5431_v25 = vadd.f32 %v1999_v46, %v1995_v30 }
 0x3f0   :  { %3617 = vrcp.f32 %v2008_v2 }
 0x3f6   :  { %v1954_v38 = vpop.f32.mrf.mxu1 }
 0x3f7   :  { %v2012_v43 = vrot.slane %v1954_v38, 6 }
 0x3f8   :  { %v1956_v36 = vpop.f32.mrf.mxu1 }
 0x3f9   :  { %v2014_v14 = vadd.f32 %v2012_v43, %v1965_v23  ;;  %v2021_v48 = vadd.f32 %v4942_v8, %v1956_v36  ;;  %v2035_v8 = vpack.c.bf16 %v5431_v25, %v5431_v25 }
 0x3fa   :  { %v1958_v40 = vpop.f32.mrf.mxu1 }
 0x3fb   :  { %v3253_v26 = vmul.f32 -1.442695, %v2014_v14  ;;  %v2023_v4 = vrot.slane %v2021_v48, 6  ;;  %v5440_v14 = vrot.slane %v2035_v8, 2  ;;  %v5453_v40 = vld [vmem:[%s6609_s2 + $0x134] ss:$24 sps:$4 sm:$0xff]  }
 0x3fc   :  { %v1959_v32 = vpop.f32.mrf.mxu1  ;;  %v5537_v48 = vld [vmem:[%s6609_s2 + $0x14] ss:$24 sps:$4 sm:$0xff]   ;;  %v5635_v8 = vld [vmem:[%s6609_s2 + $0x1c4] ss:$24 sps:$4 sm:$0xff]  }
 0x3fd   :  { %3619 = vpow2.f32 %v3253_v26  ;;  %v3618_v10 = vpop.eup %3617  ;;  %v5461_v26 = vld [vmem:[%s6609_s2 + $0x130] ss:$24 sps:$4 sm:$0xff]   ;;  %v5467_v32 = vld [vmem:[%s6609_s2 + $0x104] ss:$24 sps:$4 sm:$0xff]   ;;  %6959 = vst [vmem:[#allocation29_spill] sm:$0xff] %v5635_v8 }
 0x3fe   :  { %v2025_v21 = vmul.f32 %v3618_v10, %v2023_v4  ;;  %v5545_v4 = vld [vmem:[%s6609_s2 + $0x10] ss:$24 sps:$4 sm:$0xff]   ;;  %v5551_v10 = vld [vmem:[%s6609_s2 + $0x2e4] ss:$24 sps:$4 sm:$0xff]  }
 0x400   :  { %v2026_v22 = vadd.f32 %v2025_v21, %v1966_v42  ;;  %v5559_v21 = vld [vmem:[%s6609_s2 + $0x2e0] ss:$24 sps:$4 sm:$0xff]   ;;  %v5573_v42 = vld [vmem:[%s6609_s2 + $0x2b0] ss:$24 sps:$4 sm:$0xff]  }
 0x40a   :  { %v3620_v37 = vpop.eup %3619 }
 0x40b   :  { %v2018_v46 = vadd.f32 1.0, %v3620_v37  ;;  %v5565_v37 = vld [vmem:[%s6609_s2 + $0x2b4] ss:$24 sps:$4 sm:$0xff]  }
 0x40d   :  { %3621 = vrcp.f32 %v2018_v46  ;;  %v5579_v46 = vld [vmem:[%s6609_s2 + $0x284] ss:$24 sps:$4 sm:$0xff]  }
 0x40e   :  { %3623 = vtanh.f32 %v2026_v22  ;;  %v5587_v22 = vld [vmem:[%s6609_s2 + $0x280] ss:$24 sps:$4 sm:$0xff]  }
 0x41a   :  { %v3622_v27 = vpop.eup %3621 }
 0x41b   :  { %v2028_v52 = vsub.f32 1.0, %v3622_v27  ;;  %v3624_v30 = vpop.eup %3623  ;;  %v2030_v2 = vmul.f32 %v3622_v27, %v5107_v6  ;;  %v5447_v6 = vld [vmem:[%s6609_s2 + $0x160] ss:$24 sps:$4 sm:$0xff]   ;;  %v5593_v27 = vld [vmem:[%s6609_s2 + $0x254] ss:$24 sps:$4 sm:$0xff]  }
 0x41d   :  { %v2029_v33 = vmul.f32 %v3624_v30, %v2028_v52  ;;  %v5601_v52 = vld [vmem:[%s6609_s2 + $0x250] ss:$24 sps:$4 sm:$0xff]   ;;  %v5607_v30 = vld [vmem:[%s6609_s2 + $0x224] ss:$24 sps:$4 sm:$0xff]  }
 0x41f   :  { %v5435_v38 = vadd.f32 %v2030_v2, %v2029_v33  ;;  %v5615_v33 = vld [vmem:[%s6609_s2 + $0x220] ss:$24 sps:$4 sm:$0xff]   ;;  %v5621_v2 = vld [vmem:[%s6609_s2 + $0x1f4] ss:$24 sps:$4 sm:$0xff]  }
 0x421   :  { %v2033_v43 = vrot.slane %v5435_v38, 6 }
 0x423   :  { %v2036_v23 = vpack.c.bf16 %v2033_v43, %v2033_v43  ;;  %v5629_v43 = vld [vmem:[%s6609_s2 + $0x1f0] ss:$24 sps:$4 sm:$0xff]  }
 0x424   :  { %6958 = vst [vmem:[#allocation27_spill] sm:$0xff] %v5629_v43 }
 0x425   :  { %v2040_v36 = vrot.slane %v2036_v23, 2  ;;  %v5643_v23 = vld [vmem:[%s6609_s2 + $0x1c0] ss:$24 sps:$4 sm:$0xff]  }
 0x426   :  { %6960 = vst [vmem:[#allocation31_spill] sm:$0xff] %v5643_v23 }
 0x427   :  { %2075 = vmatprep.mubr.bf16.mxu0 %v2040_v36  ;;  %2116 = vmatprep.mubr.bf16.mxu1 %v2040_v36 }
 0x428   :  { %2076 = vmatmul.mubr.bf16.vlgmr.msra.gmra.mxu0 %v5440_v14  ;;  %2117 = vmatmul.mubr.bf16.vlgmr.msra.gmra.mxu1 %v5440_v14 }
 0x429   :  { %2126 = vmatpush1.bf16.msra.mxu0 %v5447_v6  ;;  %2157 = vmatprep.mubr.bf16.mxu0 %v2040_v36  ;;  %v5649_v36 = vld [vmem:[%s6609_s2 + $0x194] ss:$24 sps:$4 sm:$0xff]  }
 0x42a   :  { %2127 = vmatprep.subr.bf16.mxu0 %v5453_v40  ;;  %2242 = vmatpush1.bf16.msra.mxu1 %v4959_v45  ;;  %v5475_v45 = vld [vmem:[%s6609_s2 + $0x100] ss:$24 sps:$4 sm:$0xff]   ;;  %6961 = vst [vmem:[#allocation33_spill] sm:$0xff] %v5649_v36 }
 0x42b   :  { %2243 = vmatprep.subr.bf16.mxu1 %v4965_v39  ;;  %v5481_v39 = vld [vmem:[%s6609_s2 + $0xd4] ss:$24 sps:$4 sm:$0xff]  }
 0x42d   :  { %2128 = vmatpush1.bf16.msra.mxu0 %v5461_v26 }
 0x42e   :  { %2129 = vmatprep.subr.bf16.mxu0 %v5467_v32  ;;  %2244 = vmatpush1.bf16.msra.mxu1 %v4973_v12  ;;  %v5489_v12 = vld [vmem:[%s6609_s2 + $0xd0] ss:$24 sps:$4 sm:$0xff]  }
 0x42f   :  { %2245 = vmatprep.subr.bf16.mxu1 %v4979_v16  ;;  %v5495_v16 = vld [vmem:[%s6609_s2 + $0xa4] ss:$24 sps:$4 sm:$0xff]  }
 0x431   :  { %2130 = vmatpush1.bf16.msra.mxu0 %v5475_v45 }
 0x432   :  { %2131 = vmatprep.subr.bf16.mxu0 %v5481_v39  ;;  %2246 = vmatpush1.bf16.msra.mxu1 %v4987_v44  ;;  %v5503_v44 = vld [vmem:[%s6609_s2 + $0xa0] ss:$24 sps:$4 sm:$0xff]  }
 0x433   :  { %2247 = vmatprep.subr.bf16.mxu1 %v4993_v29  ;;  %v5509_v29 = vld [vmem:[%s6609_s2 + $0x74] ss:$24 sps:$4 sm:$0xff]  }
 0x435   :  { %2132 = vmatpush1.bf16.msra.mxu0 %v5489_v12 }
 0x436   :  { %2133 = vmatprep.subr.bf16.mxu0 %v5495_v16  ;;  %2248 = vmatpush1.bf16.msra.mxu1 %v6918_v0  ;;  %v5517_v0 = vld [vmem:[%s6609_s2 + $0x70] ss:$24 sps:$4 sm:$0xff]  }
 0x437   :  { %2249 = vmatprep.subr.bf16.mxu1 %v6919_v34  ;;  %v5523_v34 = vld [vmem:[%s6609_s2 + $0x44] ss:$24 sps:$4 sm:$0xff]  }
 0x439   :  { %2134 = vmatpush1.bf16.msra.mxu0 %v5503_v44 }
 0x43a   :  { %2135 = vmatprep.subr.bf16.mxu0 %v5509_v29  ;;  %2250 = vmatpush1.bf16.msra.mxu1 %v6922_v18  ;;  %v5531_v18 = vld [vmem:[%s6609_s2 + $0x40] ss:$24 sps:$4 sm:$0xff]  }
 0x43b   :  { %2251 = vmatprep.subr.bf16.mxu1 %v5139_v35 }
 0x43d   :  { %2136 = vmatpush1.bf16.msra.mxu0 %v5517_v0 }
 0x43e   :  { %2137 = vmatprep.subr.bf16.mxu0 %v5523_v34  ;;  %2252 = vmatpush1.bf16.msra.mxu1 %v5147_v49 }
 0x43f   :  { %2253 = vmatprep.subr.bf16.mxu1 %v5153_v20 }
 0x441   :  { %2138 = vmatpush1.bf16.msra.mxu0 %v5531_v18 }
 0x442   :  { %2139 = vmatprep.subr.bf16.mxu0 %v5537_v48  ;;  %2254 = vmatpush1.bf16.msra.mxu1 %v5161_v51 }
 0x443   :  { %2255 = vmatprep.subr.bf16.mxu1 %v5167_v50 }
 0x445   :  { %2140 = vmatpush1.bf16.msra.mxu0 %v5545_v4 }
 0x446   :  { %2141 = vmatprep.subr.bf16.mxu0 %v5551_v10  ;;  %2256 = vmatpush1.bf16.msra.mxu1 %v5175_v60 }
 0x447   :  { %2257 = vmatprep.subr.bf16.mxu1 %v5181_v56 }
 0x449   :  { %2142 = vmatpush2.bf16.msra.mxu0 %v5559_v21 }
 0x44a   :  { %2143 = vmatprep.subr.bf16.mxu0 %v5565_v37  ;;  %2258 = vmatpush2.bf16.msra.mxu1 %v5189_v54 }
 0x44b   :  { %2259 = vmatprep.subr.bf16.mxu1 %v5195_v53 }
 0x44d   :  { %2144 = vmatpush2.bf16.msra.mxu0 %v5573_v42 }
 0x44e   :  { %2145 = vmatprep.subr.bf16.mxu0 %v5579_v46  ;;  %2260 = vmatpush2.bf16.msra.mxu1 %v5203_v55 }
 0x44f   :  { %2261 = vmatprep.subr.bf16.mxu1 %v5209_v57 }
 0x451   :  { %2146 = vmatpush2.bf16.msra.mxu0 %v5587_v22 }
 0x452   :  { %2147 = vmatprep.subr.bf16.mxu0 %v5593_v27  ;;  %2262 = vmatpush2.bf16.msra.mxu1 %v5217_v59 }
 0x453   :  { %2263 = vmatprep.subr.bf16.mxu1 %v5223_v61 }
 0x455   :  { %2148 = vmatpush2.bf16.msra.mxu0 %v5601_v52 }
 0x456   :  { %2149 = vmatprep.subr.bf16.mxu0 %v5607_v30  ;;  %2264 = vmatpush2.bf16.msra.mxu1 %v5231_v63 }
 0x457   :  { %2265 = vmatprep.subr.bf16.mxu1 %v5237_v1 }
 0x459   :  { %2150 = vmatpush2.bf16.msra.mxu0 %v5615_v33 }
 0x45a   :  { %2151 = vmatprep.subr.bf16.mxu0 %v5621_v2  ;;  %2266 = vmatpush2.bf16.msra.mxu1 %v5245_v3 }
 0x45b   :  { %2267 = vmatprep.subr.bf16.mxu1 %v5251_v5 }
 0x45d   :  { %2152 = vmatpush2.bf16.msra.mxu0 %v5629_v43 }
 0x45e   :  { %2153 = vmatprep.subr.bf16.mxu0 %v5635_v8  ;;  %2268 = vmatpush2.bf16.msra.mxu1 %v5259_v7 }
 0x45f   :  { %2269 = vmatprep.subr.bf16.mxu1 %v5265_v9  ;;  %v5657_v9 = vld [vmem:[%s6609_s2 + $0x190] ss:$24 sps:$4 sm:$0xff]  }
 0x460   :  { %6962 = vst [vmem:[#allocation35_spill] sm:$0xff] %v5657_v9 }
 0x461   :  { %2154 = vmatpush2.bf16.msra.mxu0 %v5643_v23  ;;  %v2167_v23 = vld [vmem:[#allocation2] sm:$0xc0] }
 0x462   :  { %2155 = vmatprep.subr.bf16.mxu0 %v5649_v36  ;;  %2270 = vmatpush2.bf16.msra.mxu1 %v5273_v11 }
 0x463   :  { %2271 = vmatprep.subr.bf16.mxu1 %v5279_v13 }
 0x465   :  { %2156 = vmatpush2.bf16.msra.mxu0 %v5657_v9 }
 0x466   :  { %2282 = vmatprep.subr.bf16.mxu0 %v5286_v24  ;;  %2272 = vmatpush2.bf16.msra.mxu1 %v5292_v15  ;;  %v6963_v24 = vld [vmem:[#allocation32_spill] sm:$0xff]  ;;  %v6964_v15 = vld [vmem:[#allocation34_spill] sm:$0xff] }
 0x467   :  { %2323 = vmatprep.subr.bf16.mxu1 %v5298_v31  ;;  %v6965_v31 = vld [vmem:[#allocation36_spill] sm:$0xff] }
 0x468   :  { %2158 = vmatmul.mubr.bf16.vlgmr.msra.gmra.mxu0 %v5440_v14  ;;  %v6966_v14 = vld [vmem:[#allocation38_spill] sm:$0xff] }
 0x469   :  { %2283 = vmatpush1.bf16.msra.mxu0 %v5305_v28  ;;  %v6967_v28 = vld [vmem:[#allocation40_spill] sm:$0xff] }
 0x46a   :  { %2284 = vmatprep.subr.bf16.mxu0 %v5311_v47  ;;  %v6968_v47 = vld [vmem:[#allocation42_spill] sm:$0xff] }
 0x46d   :  { %2285 = vmatpush1.bf16.msra.mxu0 %v5317_v41  ;;  %v6969_v41 = vld [vmem:[#allocation44_spill] sm:$0xff] }
 0x46e   :  { %2286 = vmatprep.subr.bf16.mxu0 %v5323_v62  ;;  %v6970_v62 = vld [vmem:[#allocation46_spill] sm:$0xff] }
 0x471   :  { %2287 = vmatpush1.bf16.msra.mxu0 %v5329_v17  ;;  %v6971_v17 = vld [vmem:[#allocation48_spill] sm:$0xff] }
 0x472   :  { %2288 = vmatprep.subr.bf16.mxu0 %v5335_v19  ;;  %v6972_v19 = vld [vmem:[#allocation50_spill] sm:$0xff] }
 0x475   :  { %2289 = vmatpush1.bf16.msra.mxu0 %v5341_v58  ;;  %v6973_v58 = vld [vmem:[#allocation23_spill] sm:$0xff] }
 0x476   :  { %2290 = vmatprep.subr.bf16.mxu0 %v6963_v24  ;;  %v6974_v24 = vld [vmem:[#allocation25_spill] sm:$0xff] }
 0x479   :  { %2291 = vmatpush1.bf16.msra.mxu0 %v6964_v15 }
 0x47a   :  { %2292 = vmatprep.subr.bf16.mxu0 %v6965_v31 }
 0x47d   :  { %2293 = vmatpush1.bf16.msra.mxu0 %v6966_v14  ;;  %v5686_v14 = vld [vmem:[%s6609_s2 + $0x27c] ss:$24 sps:$4 sm:$0xff]  }
 0x47e   :  { %2294 = vmatprep.subr.bf16.mxu0 %v6967_v28  ;;  %6975 = vst [vmem:[#allocation37_spill] sm:$0xff] %v5686_v14 }
 0x481   :  { %2295 = vmatpush1.bf16.msra.mxu0 %v6968_v47 }
 0x482   :  { %2296 = vmatprep.subr.bf16.mxu0 %v6969_v41  ;;  %v5692_v41 = vld [vmem:[%s6609_s2 + $0x278] ss:$24 sps:$4 sm:$0xff]  }
 0x483   :  { %6976 = vst [vmem:[#allocation39_spill] sm:$0xff] %v5692_v41 }
 0x485   :  { %2297 = vmatpush1.bf16.msra.mxu0 %v6970_v62 }
 0x486   :  { %2298 = vmatprep.subr.bf16.mxu0 %v6971_v17 }
 0x489   :  { %2299 = vmatpush2.bf16.msra.mxu0 %v6972_v19 }
 0x48a   :  { %2300 = vmatprep.subr.bf16.mxu0 %v6973_v58  ;;  %v5698_v58 = vld [vmem:[%s6609_s2 + $0x24c] ss:$24 sps:$4 sm:$0xff]  }
 0x48b   :  { %6977 = vst [vmem:[#allocation41_spill] sm:$0xff] %v5698_v58 }
 0x48d   :  { %2301 = vmatpush2.bf16.msra.mxu0 %v6974_v24  ;;  %v5704_v24 = vld [vmem:[%s6609_s2 + $0x248] ss:$24 sps:$4 sm:$0xff]  }
 0x48e   :  { %2302 = vmatprep.subr.bf16.mxu0 %v5686_v14  ;;  %6978 = vst [vmem:[#allocation15_spill] sm:$0xff] %v5704_v24  ;;  %v5710_v14 = vld [vmem:[%s6609_s2 + $0x21c] ss:$24 sps:$4 sm:$0xff]  }
 0x48f   :  { %6979 = vst [vmem:[#allocation5_spill] sm:$0xff] %v5710_v14 }
 0x491   :  { %2303 = vmatpush2.bf16.msra.mxu0 %v5692_v41  ;;  %v5716_v41 = vld [vmem:[%s6609_s2 + $0x218] ss:$24 sps:$4 sm:$0xff]  }
 0x492   :  { %2304 = vmatprep.subr.bf16.mxu0 %v5698_v58  ;;  %6980 = vst [vmem:[#allocation6_spill] sm:$0xff] %v5716_v41  ;;  %v5722_v58 = vld [vmem:[%s6609_s2 + $0x1ec] ss:$24 sps:$4 sm:$0xff]  }
 0x493   :  { %6981 = vst [vmem:[#allocation16_spill] sm:$0xff] %v5722_v58 }
 0x495   :  { %2305 = vmatpush2.bf16.msra.mxu0 %v5704_v24  ;;  %v5728_v24 = vld [vmem:[%s6609_s2 + $0x1e8] ss:$24 sps:$4 sm:$0xff]  }
 0x496   :  { %2306 = vmatprep.subr.bf16.mxu0 %v5710_v14  ;;  %6982 = vst [vmem:[#allocation17_spill] sm:$0xff] %v5728_v24  ;;  %v5734_v14 = vld [vmem:[%s6609_s2 + $0x1bc] ss:$24 sps:$4 sm:$0xff]  }
 0x497   :  { %6983 = vst [vmem:[#allocation7_spill] sm:$0xff] %v5734_v14 }
 0x499   :  { %2307 = vmatpush2.bf16.msra.mxu0 %v5716_v41  ;;  %v5740_v41 = vld [vmem:[%s6609_s2 + $0x1b8] ss:$24 sps:$4 sm:$0xff]  }
 0x49a   :  { %2308 = vmatprep.subr.bf16.mxu0 %v5722_v58  ;;  %6984 = vst [vmem:[#allocation43_spill] sm:$0xff] %v5740_v41  ;;  %v5746_v58 = vld [vmem:[%s6609_s2 + $0x18c] ss:$24 sps:$4 sm:$0xff]  }
 0x49b   :  { %6985 = vst [vmem:[#allocation45_spill] sm:$0xff] %v5746_v58 }
 0x49d   :  { %2309 = vmatpush2.bf16.msra.mxu0 %v5728_v24  ;;  %v5752_v24 = vld [vmem:[%s6609_s2 + $0x188] ss:$24 sps:$4 sm:$0xff]  }
 0x49e   :  { %2310 = vmatprep.subr.bf16.mxu0 %v5734_v14  ;;  %6986 = vst [vmem:[#allocation47_spill] sm:$0xff] %v5752_v24  ;;  %v6987_v14 = vld [vmem:[#allocation8_spill] sm:$0xff] }
 0x4a1   :  { %2311 = vmatpush2.bf16.msra.mxu0 %v5740_v41  ;;  %v2166_v41 = vld [vmem:[#allocation2 + $0x30] sm:$0xc0] }
 0x4a2   :  { %2312 = vmatprep.subr.bf16.mxu0 %v5746_v58 }
 0x4a5   :  { %2313 = vmatpush2.bf16.msra.mxu0 %v5752_v24 }
 0x4a6   :  { %2431 = vmatprep.subr.bf16.mxu0 %v6987_v14 }
 0x4e8   :  { %v2077_v19 = vpop.f32.mrf.mxu0  ;;  %v2118_v17 = vpop.f32.mrf.mxu1 }
 0x4e9   :  { %v2173_v62 = vrot.slane %v2077_v19, 2  ;;  %v5759_v19 = vld [vmem:[%s6611_s4] ss:$0 sm:$0xff] }
 0x4ea   :  { %v2079_v47 = vpop.f32.mrf.mxu0  ;;  %v2120_v28 = vpop.f32.mrf.mxu1  ;;  %6988 = vst [vmem:[#allocation49_spill] sm:$0xff] %v5759_v19 }
 0x4eb   :  { %v2175_v31 = vadd.f32 %v2173_v62, %v2166_v41  ;;  %v2183_v58 = vrot.slane %v2079_v47, 2  ;;  %v2169_v47 = vld [vmem:[#allocation2 + $0x48] sm:$0x3] }
 0x4ec   :  { %v2081_v15 = vpop.f32.mrf.mxu0  ;;  %v2122_v9 = vpop.f32.mrf.mxu1  ;;  %v2206_v41 = vadd.f32 %v2169_v47, %v2120_v28 }
 0x4ed   :  { %v3254_v13 = vmul.f32 -1.442695, %v2175_v31  ;;  %v2185_v7 = vadd.f32 %v2183_v58, %v2167_v23  ;;  %v2192_v9 = vadd.f32 %v5759_v19, %v2118_v17 }
 0x4ee   :  { %v2082_v11 = vpop.f32.mrf.mxu0  ;;  %v2123_v36 = vpop.f32.mrf.mxu1 }
 0x4ef   :  { %3625 = vpow2.f32 %v3254_v13  ;;  %v3255_v8 = vmul.f32 -1.442695, %v2185_v7  ;;  %v2194_v31 = vrot.slane %v2192_v9, 2  ;;  %v2168_v7 = vld [vmem:[#allocation2 + $0x58] sm:$0xc0] }
 0x4f1   :  { %3627 = vpow2.f32 %v3255_v8  ;;  %v2202_v8 = vrot.slane %v5431_v25, 6  ;;  %v5768_v25 = vld [vmem:[%s6611_s4 + $0x1] ss:$0 sm:$0xff] }
 0x4fc   :  { %v3626_v24 = vpop.eup %3625 }
 0x4fd   :  { %v2179_v14 = vadd.f32 1.0, %v3626_v24  ;;  %v3256_v24 = vmul.f32 -1.442695, %v2206_v41 }
 0x4fe   :  { %v3628_v43 = vpop.eup %3627 }
 0x4ff   :  { %3629 = vrcp.f32 %v2179_v14  ;;  %v2189_v15 = vadd.f32 1.0, %v3628_v43 }
 0x501   :  { %3631 = vrcp.f32 %v2189_v15 }
 0x50c   :  { %v3630_v11 = vpop.eup %3629 }
 0x50d   :  { %v2196_v13 = vmul.f32 %v3630_v11, %v2194_v31  ;;  %v2170_v31 = vld [vmem:[#allocation2 + $0x10] sm:$0x3] }
 0x50e   :  { %v3632_v58 = vpop.eup %3631 }
 0x50f   :  { %v2197_v62 = vadd.f32 %v2196_v13, %v2168_v7  ;;  %v2199_v23 = vsub.f32 1.0, %v3632_v58  ;;  %v2204_v5 = vmul.f32 %v3632_v58, %v2202_v8 }
 0x511   :  { %3633 = vtanh.f32 %v2197_v62 }
 0x512   :  { %3635 = vpow2.f32 %v3256_v24  ;;  %v2171_v24 = vld [vmem:[#allocation2 + $0x40] sm:$0x3] }
 0x51e   :  { %v3634_v36 = vpop.eup %3633 }
 0x51f   :  { %v2200_v14 = vmul.f32 %v3634_v36, %v2199_v23  ;;  %v3636_v43 = vpop.eup %3635  ;;  %v2226_v23 = vrot.slane %v5435_v38, 2  ;;  %v5787_v38 = vld [vmem:[%s6609_s2 + $0x150] ss:$24 sps:$4 sm:$0xff]  }
 0x520   :  { %v2210_v9 = vadd.f32 1.0, %v3636_v43 }
 0x521   :  { %v5763_v17 = vadd.f32 %v2204_v5, %v2200_v14 }
 0x522   :  { %3637 = vrcp.f32 %v2210_v9 }
 0x528   :  { %v2159_v19 = vpop.f32.mrf.mxu0 }
 0x529   :  { %v2213_v28 = vadd.f32 %v2170_v31, %v2159_v19 }
 0x52a   :  { %v2161_v15 = vpop.f32.mrf.mxu0 }
 0x52b   :  { %v3257_v11 = vmul.f32 -1.442695, %v2213_v28  ;;  %v2220_v41 = vadd.f32 %v5768_v25, %v2161_v15  ;;  %v2233_v15 = vpack.c.bf16 %v5763_v17, %v5763_v17 }
 0x52c   :  { %v2163_v47 = vpop.f32.mrf.mxu0 }
 0x52d   :  { %3639 = vpow2.f32 %v3257_v11 }
 0x52e   :  { %v2164_v13 = vpop.f32.mrf.mxu0 }
 0x52f   :  { %v3638_v5 = vpop.eup %3637  ;;  %v5778_v13 = vrot.slane %v2233_v15, 3  ;;  %v7011_v15 = vld [vmem:[#allocation36_spill] sm:$0xff] }
 0x530   :  { %v2221_v7 = vmul.f32 %v3638_v5, %v2220_v41  ;;  %v5793_v41 = vld [vmem:[%s6609_s2 + $0x124] ss:$24 sps:$4 sm:$0xff]   ;;  %v5801_v5 = vld [vmem:[%s6609_s2 + $0x120] ss:$24 sps:$4 sm:$0xff]  }
 0x532   :  { %v2222_v8 = vadd.f32 %v2221_v7, %v2171_v24  ;;  %v5807_v7 = vld [vmem:[%s6609_s2 + $0xf4] ss:$24 sps:$4 sm:$0xff]   ;;  %v5821_v24 = vld [vmem:[%s6609_s2 + $0xc4] ss:$24 sps:$4 sm:$0xff]  }
 0x53a   :  { %v3640_v62 = vpop.eup %3639 }
 0x53b   :  { %v2217_v58 = vadd.f32 1.0, %v3640_v62  ;;  %v5815_v62 = vld [vmem:[%s6609_s2 + $0xf0] ss:$24 sps:$4 sm:$0xff]  }
 0x53d   :  { %3641 = vrcp.f32 %v2217_v58  ;;  %v5829_v58 = vld [vmem:[%s6609_s2 + $0xc0] ss:$24 sps:$4 sm:$0xff]  }
 0x53e   :  { %3643 = vtanh.f32 %v2222_v8  ;;  %v5835_v8 = vld [vmem:[%s6609_s2 + $0x94] ss:$24 sps:$4 sm:$0xff]  }
 0x54a   :  { %v3642_v19 = vpop.eup %3641 }
 0x54b   :  { %v2224_v36 = vsub.f32 1.0, %v3642_v19  ;;  %v3644_v14 = vpop.eup %3643  ;;  %v2228_v9 = vmul.f32 %v3642_v19, %v2226_v23  ;;  %v5843_v19 = vld [vmem:[%s6609_s2 + $0x90] ss:$24 sps:$4 sm:$0xff]  }
 0x54c   :  { %v7005_v23 = vld [vmem:[#allocation24_spill] sm:$0xff] }
 0x54d   :  { %v2225_v43 = vmul.f32 %v3644_v14, %v2224_v36  ;;  %v7006_v36 = vld [vmem:[#allocation26_spill] sm:$0xff]  ;;  %v7007_v14 = vld [vmem:[#allocation28_spill] sm:$0xff] }
 0x54f   :  { %v2229_v31 = vadd.f32 %v2228_v9, %v2225_v43  ;;  %v7008_v43 = vld [vmem:[#allocation30_spill] sm:$0xff]  ;;  %v7009_v9 = vld [vmem:[#allocation32_spill] sm:$0xff] }
 0x551   :  { %v5772_v28 = vrot.slane %v2229_v31, 2  ;;  %v7010_v31 = vld [vmem:[#allocation34_spill] sm:$0xff] }
 0x553   :  { %v2234_v11 = vpack.c.bf16 %v5772_v28, %v5772_v28 }
 0x555   :  { %v2238_v47 = vrot.slane %v2234_v11, 3  ;;  %v7012_v11 = vld [vmem:[#allocation38_spill] sm:$0xff] }
 0x557   :  { %2273 = vmatprep.mubr.bf16.mxu1 %v2238_v47  ;;  %2314 = vmatprep.mubr.bf16.mxu0 %v2238_v47 }
 0x558   :  { %2274 = vmatmul.mubr.bf16.vlgmr.msra.gmra.mxu1 %v5778_v13  ;;  %2315 = vmatmul.mubr.bf16.vlgmr.msra.gmra.mxu0 %v5778_v13 }
 0x559   :  { %2324 = vmatpush1.bf16.msra.mxu1 %v5447_v6  ;;  %2355 = vmatprep.mubr.bf16.mxu1 %v2238_v47  ;;  %v7013_v47 = vld [vmem:[#allocation40_spill] sm:$0xff] }
 0x55a   :  { %2325 = vmatprep.subr.bf16.mxu1 %v5453_v40  ;;  %2432 = vmatpush1.bf16.msra.mxu0 %v5787_v38 }
 0x55b   :  { %2433 = vmatprep.subr.bf16.mxu0 %v5793_v41 }
 0x55d   :  { %2326 = vmatpush1.bf16.msra.mxu1 %v5461_v26 }
 0x55e   :  { %2327 = vmatprep.subr.bf16.mxu1 %v5467_v32  ;;  %2434 = vmatpush1.bf16.msra.mxu0 %v5801_v5 }
 0x55f   :  { %2435 = vmatprep.subr.bf16.mxu0 %v5807_v7 }
 0x561   :  { %2328 = vmatpush1.bf16.msra.mxu1 %v5475_v45 }
 0x562   :  { %2329 = vmatprep.subr.bf16.mxu1 %v5481_v39  ;;  %2436 = vmatpush1.bf16.msra.mxu0 %v5815_v62 }
 0x563   :  { %2437 = vmatprep.subr.bf16.mxu0 %v5821_v24 }
 0x565   :  { %2330 = vmatpush1.bf16.msra.mxu1 %v5489_v12 }
 0x566   :  { %2331 = vmatprep.subr.bf16.mxu1 %v5495_v16  ;;  %2438 = vmatpush1.bf16.msra.mxu0 %v5829_v58 }
 0x567   :  { %2439 = vmatprep.subr.bf16.mxu0 %v5835_v8 }
 0x569   :  { %2332 = vmatpush1.bf16.msra.mxu1 %v5503_v44 }
 0x56a   :  { %2333 = vmatprep.subr.bf16.mxu1 %v5509_v29  ;;  %2440 = vmatpush1.bf16.msra.mxu0 %v5843_v19 }
 0x56b   :  { %2441 = vmatprep.subr.bf16.mxu0 %v5139_v35  ;;  %v6989_v35 = vld [vmem:[#allocation9_spill] sm:$0xff] }
 0x56d   :  { %2334 = vmatpush1.bf16.msra.mxu1 %v5517_v0 }
 0x56e   :  { %2335 = vmatprep.subr.bf16.mxu1 %v5523_v34  ;;  %2442 = vmatpush1.bf16.msra.mxu0 %v5147_v49  ;;  %v6990_v49 = vld [vmem:[#allocation27_spill] sm:$0xff] }
 0x56f   :  { %2443 = vmatprep.subr.bf16.mxu0 %v5153_v20  ;;  %v6991_v20 = vld [vmem:[#allocation29_spill] sm:$0xff] }
 0x571   :  { %2336 = vmatpush1.bf16.msra.mxu1 %v5531_v18 }
 0x572   :  { %2337 = vmatprep.subr.bf16.mxu1 %v5537_v48  ;;  %2444 = vmatpush1.bf16.msra.mxu0 %v5161_v51  ;;  %v6992_v51 = vld [vmem:[#allocation10_spill] sm:$0xff] }
 0x573   :  { %2445 = vmatprep.subr.bf16.mxu0 %v5167_v50  ;;  %v6993_v50 = vld [vmem:[#allocation11_spill] sm:$0xff] }
 0x575   :  { %2338 = vmatpush1.bf16.msra.mxu1 %v5545_v4 }
 0x576   :  { %2339 = vmatprep.subr.bf16.mxu1 %v5551_v10  ;;  %2446 = vmatpush1.bf16.msra.mxu0 %v5175_v60  ;;  %v6994_v60 = vld [vmem:[#allocation31_spill] sm:$0xff] }
 0x577   :  { %2447 = vmatprep.subr.bf16.mxu0 %v5181_v56  ;;  %v6995_v56 = vld [vmem:[#allocation33_spill] sm:$0xff] }
 0x579   :  { %2340 = vmatpush2.bf16.msra.mxu1 %v5559_v21 }
 0x57a   :  { %2341 = vmatprep.subr.bf16.mxu1 %v5565_v37  ;;  %2448 = vmatpush2.bf16.msra.mxu0 %v5189_v54  ;;  %v6996_v54 = vld [vmem:[#allocation12_spill] sm:$0xff] }
 0x57b   :  { %2449 = vmatprep.subr.bf16.mxu0 %v5195_v53  ;;  %v6997_v53 = vld [vmem:[#allocation13_spill] sm:$0xff] }
 0x57d   :  { %2342 = vmatpush2.bf16.msra.mxu1 %v5573_v42 }
 0x57e   :  { %2343 = vmatprep.subr.bf16.mxu1 %v5579_v46  ;;  %2450 = vmatpush2.bf16.msra.mxu0 %v5203_v55  ;;  %v6998_v55 = vld [vmem:[#allocation35_spill] sm:$0xff] }
 0x57f   :  { %2451 = vmatprep.subr.bf16.mxu0 %v5209_v57  ;;  %v6999_v57 = vld [vmem:[#allocation14_spill] sm:$0xff] }
 0x581   :  { %2344 = vmatpush2.bf16.msra.mxu1 %v5587_v22 }
 0x582   :  { %2345 = vmatprep.subr.bf16.mxu1 %v5593_v27  ;;  %2452 = vmatpush2.bf16.msra.mxu0 %v5217_v59  ;;  %v7000_v59 = vld [vmem:[#allocation18_spill] sm:$0xff] }
 0x583   :  { %2453 = vmatprep.subr.bf16.mxu0 %v5223_v61  ;;  %v7001_v61 = vld [vmem:[#allocation19_spill] sm:$0xff] }
 0x585   :  { %2346 = vmatpush2.bf16.msra.mxu1 %v5601_v52 }
 0x586   :  { %2347 = vmatprep.subr.bf16.mxu1 %v5607_v30  ;;  %2454 = vmatpush2.bf16.msra.mxu0 %v5231_v63  ;;  %v7002_v63 = vld [vmem:[#allocation20_spill] sm:$0xff] }
 0x587   :  { %2455 = vmatprep.subr.bf16.mxu0 %v5237_v1  ;;  %v7003_v1 = vld [vmem:[#allocation21_spill] sm:$0xff] }
 0x589   :  { %2348 = vmatpush2.bf16.msra.mxu1 %v5615_v33 }
 0x58a   :  { %2349 = vmatprep.subr.bf16.mxu1 %v5621_v2  ;;  %2456 = vmatpush2.bf16.msra.mxu0 %v5245_v3  ;;  %v7004_v3 = vld [vmem:[#allocation22_spill] sm:$0xff] }
 0x58b   :  { %2457 = vmatprep.subr.bf16.mxu0 %v6989_v35  ;;  %v7015_v35 = vld [vmem:[#allocation44_spill] sm:$0xff] }
 0x58d   :  { %2350 = vmatpush2.bf16.msra.mxu1 %v6990_v49 }
 0x58e   :  { %2351 = vmatprep.subr.bf16.mxu1 %v6991_v20  ;;  %2458 = vmatpush2.bf16.msra.mxu0 %v6992_v51  ;;  %v7016_v51 = vld [vmem:[#allocation46_spill] sm:$0xff] }
 0x58f   :  { %2459 = vmatprep.subr.bf16.mxu0 %v6993_v50  ;;  %v7017_v50 = vld [vmem:[#allocation48_spill] sm:$0xff] }
 0x591   :  { %2352 = vmatpush2.bf16.msra.mxu1 %v6994_v60 }
 0x592   :  { %2353 = vmatprep.subr.bf16.mxu1 %v6995_v56  ;;  %2460 = vmatpush2.bf16.msra.mxu0 %v6996_v54  ;;  %v7018_v54 = vld [vmem:[#allocation50_spill] sm:$0xff] }
 0x593   :  { %2461 = vmatprep.subr.bf16.mxu0 %v6997_v53  ;;  %v7019_v53 = vld [vmem:[#allocation23_spill] sm:$0xff] }
 0x595   :  { %2354 = vmatpush2.bf16.msra.mxu1 %v6998_v55 }
 0x596   :  { %2472 = vmatprep.subr.bf16.mxu1 %v6999_v57  ;;  %2462 = vmatpush2.bf16.msra.mxu0 %v7000_v59  ;;  %v7020_v57 = vld [vmem:[#allocation25_spill] sm:$0xff] }
 0x597   :  { %2513 = vmatprep.subr.bf16.mxu0 %v7001_v61  ;;  %v7021_v59 = vld [vmem:[#allocation37_spill] sm:$0xff]  ;;  %v7022_v61 = vld [vmem:[#allocation39_spill] sm:$0xff] }
 0x598   :  { %2356 = vmatmul.mubr.bf16.vlgmr.msra.gmra.mxu1 %v5778_v13  ;;  %v7014_v13 = vld [vmem:[#allocation42_spill] sm:$0xff] }
 0x599   :  { %2473 = vmatpush1.bf16.msra.mxu1 %v7002_v63  ;;  %v7023_v63 = vld [vmem:[#allocation41_spill] sm:$0xff] }
 0x59a   :  { %2474 = vmatprep.subr.bf16.mxu1 %v7003_v1  ;;  %v7024_v1 = vld [vmem:[#allocation15_spill] sm:$0xff] }
 0x59d   :  { %2475 = vmatpush1.bf16.msra.mxu1 %v7004_v3  ;;  %v7025_v3 = vld [vmem:[#allocation5_spill] sm:$0xff] }
 0x59e   :  { %2476 = vmatprep.subr.bf16.mxu1 %v7005_v23  ;;  %v7026_v23 = vld [vmem:[#allocation6_spill] sm:$0xff] }
 0x5a1   :  { %2477 = vmatpush1.bf16.msra.mxu1 %v7006_v36  ;;  %v7027_v36 = vld [vmem:[#allocation16_spill] sm:$0xff] }
 0x5a2   :  { %2478 = vmatprep.subr.bf16.mxu1 %v7007_v14  ;;  %v7028_v14 = vld [vmem:[#allocation17_spill] sm:$0xff] }
 0x5a5   :  { %2479 = vmatpush1.bf16.msra.mxu1 %v7008_v43  ;;  %v7029_v43 = vld [vmem:[#allocation7_spill] sm:$0xff] }
 0x5a6   :  { %2480 = vmatprep.subr.bf16.mxu1 %v7009_v9  ;;  %v7030_v9 = vld [vmem:[#allocation43_spill] sm:$0xff] }
 0x5a9   :  { %2481 = vmatpush1.bf16.msra.mxu1 %v7010_v31  ;;  %v7031_v31 = vld [vmem:[#allocation45_spill] sm:$0xff] }
 0x5aa   :  { %2482 = vmatprep.subr.bf16.mxu1 %v7011_v15  ;;  %v7032_v15 = vld [vmem:[#allocation47_spill] sm:$0xff] }
 0x5ad   :  { %2483 = vmatpush1.bf16.msra.mxu1 %v7012_v11  ;;  %v5926_v11 = vld [vmem:[%s6609_s2 + $0x154] ss:$24 sps:$4 sm:$0xff]  }
 0x5ae   :  { %2484 = vmatprep.subr.bf16.mxu1 %v7013_v47  ;;  %7033 = vst [vmem:[#allocation51_spill] sm:$0xff] %v5926_v11 }
 0x5b1   :  { %2485 = vmatpush1.bf16.msra.mxu1 %v7014_v13  ;;  %v2364_v13 = vld [vmem:[#allocation2 + $0x8] sm:$0x3] }
 0x5b2   :  { %2486 = vmatprep.subr.bf16.mxu1 %v7015_v35 }
 0x5b5   :  { %2487 = vmatpush1.bf16.msra.mxu1 %v7016_v51 }
 0x5b6   :  { %2488 = vmatprep.subr.bf16.mxu1 %v7017_v50 }
 0x5b9   :  { %2489 = vmatpush2.bf16.msra.mxu1 %v7018_v54  ;;  %v2365_v54 = vld [vmem:[#allocation2 + $0x38] sm:$0x3] }
 0x5ba   :  { %2490 = vmatprep.subr.bf16.mxu1 %v7019_v53 }
 0x5bd   :  { %2491 = vmatpush2.bf16.msra.mxu1 %v7020_v57 }
 0x5be   :  { %2492 = vmatprep.subr.bf16.mxu1 %v7021_v59 }
 0x5c1   :  { %2493 = vmatpush2.bf16.msra.mxu1 %v7022_v61  ;;  %v2391_v61 = vrot.slane %v5763_v17, 6 }
 0x5c2   :  { %2494 = vmatprep.subr.bf16.mxu1 %v7023_v63  ;;  %v7034_v63 = vld [vmem:[#allocation49_spill] sm:$0xff] }
 0x5c5   :  { %2495 = vmatpush2.bf16.msra.mxu1 %v7024_v1 }
 0x5c6   :  { %2496 = vmatprep.subr.bf16.mxu1 %v7025_v3 }
 0x5c9   :  { %2497 = vmatpush2.bf16.msra.mxu1 %v7026_v23 }
 0x5ca   :  { %2498 = vmatprep.subr.bf16.mxu1 %v7027_v36 }
 0x5cd   :  { %2499 = vmatpush2.bf16.msra.mxu1 %v7028_v14 }
 0x5ce   :  { %2500 = vmatprep.subr.bf16.mxu1 %v7029_v43 }
 0x5d1   :  { %2501 = vmatpush2.bf16.msra.mxu1 %v7030_v9 }
 0x5d2   :  { %2502 = vmatprep.subr.bf16.mxu1 %v7031_v31 }
 0x5d5   :  { %2503 = vmatpush2.bf16.msra.mxu1 %v7032_v15 }
 0x5d6   :  { %2638 = vmatprep.subr.bf16.mxu1 %v5926_v11 }
 0x618   :  { %v2275_v47 = vpop.f32.mrf.mxu1  ;;  %v2316_v35 = vpop.f32.mrf.mxu0 }
 0x619   :  { %v2370_v51 = vadd.f32 %v2364_v13, %v2275_v47  ;;  %v2384_v47 = vadd.f32 %v7034_v63, %v2316_v35 }
 0x61a   :  { %v2277_v50 = vpop.f32.mrf.mxu1  ;;  %v2318_v53 = vpop.f32.mrf.mxu0 }
 0x61b   :  { %v3258_v57 = vmul.f32 -1.442695, %v2370_v51  ;;  %v2377_v9 = vadd.f32 %v2365_v54, %v2277_v50  ;;  %v2396_v50 = vrot.slane %v2318_v53, 2 }
 0x61c   :  { %v2279_v43 = vpop.f32.mrf.mxu1  ;;  %v2320_v31 = vpop.f32.mrf.mxu0 }
 0x61d   :  { %3645 = vpow2.f32 %v3258_v57  ;;  %v3259_v15 = vmul.f32 -1.442695, %v2377_v9  ;;  %v2366_v31 = vld [vmem:[#allocation2 + $0x28] sm:$0x3] }
 0x61e   :  { %v2280_v14 = vpop.f32.mrf.mxu1  ;;  %v2321_v36 = vpop.f32.mrf.mxu0 }
 0x61f   :  { %3647 = vpow2.f32 %v3259_v15  ;;  %v2367_v14 = vld [vmem:[#allocation2 + $0x18] sm:$0xc0] }
 0x620   :  { %v2398_v36 = vadd.f32 %v2396_v50, %v2367_v14 }
 0x622   :  { %v3260_v15 = vmul.f32 -1.442695, %v2398_v36 }
 0x62a   :  { %v3646_v23 = vpop.eup %3645 }
 0x62b   :  { %v2374_v3 = vadd.f32 1.0, %v3646_v23 }
 0x62c   :  { %v3648_v1 = vpop.eup %3647 }
 0x62d   :  { %3649 = vrcp.f32 %v2374_v3  ;;  %v2381_v11 = vadd.f32 1.0, %v3648_v1 }
 0x62f   :  { %3651 = vrcp.f32 %v2381_v11 }
 0x63a   :  { %v3650_v13 = vpop.eup %3649 }
 0x63b   :  { %v2385_v51 = vmul.f32 %v3650_v13, %v2384_v47  ;;  %v2368_v47 = vld [vmem:[#allocation2 + $0x50] sm:$0xc0] }
 0x63c   :  { %v3652_v43 = vpop.eup %3651 }
 0x63d   :  { %v2386_v54 = vadd.f32 %v2385_v51, %v2366_v31  ;;  %v2393_v9 = vmul.f32 %v3652_v43, %v2391_v61  ;;  %v2388_v23 = vsub.f32 1.0, %v3652_v43 }
 0x63f   :  { %3653 = vtanh.f32 %v2386_v54 }
 0x640   :  { %3655 = vpow2.f32 %v3260_v15 }
 0x64c   :  { %v3654_v3 = vpop.eup %3653 }
 0x64d   :  { %v2389_v1 = vmul.f32 %v3654_v3, %v2388_v23  ;;  %v3656_v35 = vpop.eup %3655 }
 0x64e   :  { %v2402_v57 = vadd.f32 1.0, %v3656_v35 }
 0x64f   :  { %v5931_v11 = vadd.f32 %v2393_v9, %v2389_v1  ;;  %v2369_v9 = vld [vmem:[#allocation2 + $0x20] sm:$0xc0] }
 0x650   :  { %3657 = vrcp.f32 %v2402_v57 }
 0x658   :  { %v2357_v63 = vpop.f32.mrf.mxu1 }
 0x659   :  { %v2406_v17 = vrot.slane %v2357_v63, 2 }
 0x65a   :  { %v2359_v53 = vpop.f32.mrf.mxu1 }
 0x65b   :  { %v2408_v13 = vadd.f32 %v2406_v17, %v2368_v47  ;;  %v2415_v50 = vadd.f32 %v5768_v25, %v2359_v53 }
 0x65c   :  { %v2361_v51 = vpop.f32.mrf.mxu1 }
 0x65d   :  { %v3261_v61 = vmul.f32 -1.442695, %v2408_v13  ;;  %v2417_v54 = vrot.slane %v2415_v50, 2  ;;  %v3658_v43 = vpop.eup %3657  ;;  %v5940_v13 = vpack.c.bf16 %v5931_v11, %v5931_v11  ;;  %v6180_v51 = vld [vmem:[%s6609_s2 + $0x98] ss:$24 sps:$4 sm:$0xff]  }
 0x65e   :  { %v2362_v31 = vpop.f32.mrf.mxu1  ;;  %7036 = vst [vmem:[#allocation4_spill] sm:$0xff] %v6180_v51  ;;  %v6198_v50 = vld [vmem:[%s6609_s2 + $0x3c] ss:$24 sps:$4 sm:$0xff]  }
 0x65f   :  { %3659 = vpow2.f32 %v3261_v61  ;;  %v2419_v14 = vmul.f32 %v3658_v43, %v2417_v54  ;;  %v6186_v61 = vld [vmem:[%s6609_s2 + $0x6c] ss:$24 sps:$4 sm:$0xff]   ;;  %v6192_v31 = vld [vmem:[%s6609_s2 + $0x68] ss:$24 sps:$4 sm:$0xff]   ;;  %7039 = vst [vmem:[#allocation27_spill] sm:$0xff] %v6198_v50 }
 0x660   :  { %7037 = vst [vmem:[#allocation8_spill] sm:$0xff] %v6186_v61  ;;  %7038 = vst [vmem:[#allocation9_spill] sm:$0xff] %v6192_v31  ;;  %v6204_v54 = vld [vmem:[%s6609_s2 + $0x38] ss:$24 sps:$4 sm:$0xff]   ;;  %v6210_v43 = vld [vmem:[%s6609_s2 + $0xc] ss:$24 sps:$4 sm:$0xff]  }
 0x661   :  { %v2420_v23 = vadd.f32 %v2419_v14, %v2369_v9  ;;  %7040 = vst [vmem:[#allocation29_spill] sm:$0xff] %v6204_v54  ;;  %7041 = vst [vmem:[#allocation10_spill] sm:$0xff] %v6210_v43  ;;  %v6216_v14 = vld [vmem:[%s6609_s2 + $0x8] ss:$24 sps:$4 sm:$0xff]   ;;  %v6228_v9 = vld [vmem:[%s6609_s2 + $0x2d8] ss:$24 sps:$4 sm:$0xff]  }
 0x662   :  { %7042 = vst [vmem:[#allocation11_spill] sm:$0xff] %v6216_v14  ;;  %7044 = vst [vmem:[#allocation33_spill] sm:$0xff] %v6228_v9 }
 0x66c   :  { %v3660_v36 = vpop.eup %3659 }
 0x66d   :  { %v2412_v15 = vadd.f32 1.0, %v3660_v36  ;;  %v6222_v36 = vld [vmem:[%s6609_s2 + $0x2dc] ss:$24 sps:$4 sm:$0xff]  }
 0x66e   :  { %7043 = vst [vmem:[#allocation31_spill] sm:$0xff] %v6222_v36 }
 0x66f   :  { %3661 = vrcp.f32 %v2412_v15  ;;  %v6234_v15 = vld [vmem:[%s6609_s2 + $0x2ac] ss:$24 sps:$4 sm:$0xff]  }
 0x670   :  { %3663 = vtanh.f32 %v2420_v23  ;;  %7045 = vst [vmem:[#allocation12_spill] sm:$0xff] %v6234_v15  ;;  %v6240_v23 = vld [vmem:[%s6609_s2 + $0x2a8] ss:$24 sps:$4 sm:$0xff]  }
 0x671   :  { %7046 = vst [vmem:[#allocation13_spill] sm:$0xff] %v6240_v23 }
 0x67c   :  { %v3662_v63 = vpop.eup %3661 }
 0x67d   :  { %v2422_v3 = vsub.f32 1.0, %v3662_v63  ;;  %v3664_v1 = vpop.eup %3663  ;;  %v2424_v57 = vmul.f32 %v3662_v63, %v5772_v28  ;;  %v6144_v28 = vld [vmem:[%s6609_s2 + $0x128] ss:$24 sps:$4 sm:$0xff]  }
 0x67e   :  { %v7047_v63 = vld [vmem:[#allocation39_spill] sm:$0xff] }
 0x67f   :  { %v2423_v35 = vmul.f32 %v3664_v1, %v2422_v3  ;;  %v7048_v3 = vld [vmem:[#allocation41_spill] sm:$0xff]  ;;  %v7049_v1 = vld [vmem:[#allocation15_spill] sm:$0xff] }
 0x681   :  { %v5935_v17 = vadd.f32 %v2424_v57, %v2423_v35  ;;  %v7050_v35 = vld [vmem:[#allocation5_spill] sm:$0xff]  ;;  %v7051_v57 = vld [vmem:[#allocation6_spill] sm:$0xff] }
 0x683   :  { %v2427_v47 = vrot.slane %v5935_v17, 6 }
 0x685   :  { %v2430_v53 = vpack.c.bf16 %v2427_v47, %v2427_v47  ;;  %v7052_v47 = vld [vmem:[#allocation16_spill] sm:$0xff] }
 0x687   :  { %2463 = vmatprep.mubr.bf16.mxu0 %v2430_v53  ;;  %2504 = vmatprep.mubr.bf16.mxu1 %v2430_v53 }
 0x688   :  { %2464 = vmatmul.mubr.bf16.vlgmr.msra.gmra.mxu0 %v5940_v13  ;;  %2505 = vmatmul.mubr.bf16.vlgmr.msra.gmra.mxu1 %v5940_v13 }
 0x689   :  { %2514 = vmatpush1.bf16.msra.mxu0 %v5447_v6  ;;  %2545 = vmatprep.mubr.bf16.mxu0 %v2430_v53  ;;  %v5966_v6 = vld [vmem:[%s6609_s2 + $0x64] ss:$24 sps:$4 sm:$0xff]   ;;  %v7053_v53 = vld [vmem:[#allocation17_spill] sm:$0xff] }
 0x68a   :  { %2515 = vmatprep.subr.bf16.mxu0 %v5453_v40  ;;  %2639 = vmatpush1.bf16.msra.mxu1 %v5787_v38  ;;  %v5974_v40 = vld [vmem:[%s6609_s2 + $0x60] ss:$24 sps:$4 sm:$0xff]  }
 0x68b   :  { %2640 = vmatprep.subr.bf16.mxu1 %v5793_v41 }
 0x68d   :  { %2516 = vmatpush1.bf16.msra.mxu0 %v5461_v26  ;;  %v5980_v26 = vld [vmem:[%s6609_s2 + $0x34] ss:$24 sps:$4 sm:$0xff]  }
 0x68e   :  { %2517 = vmatprep.subr.bf16.mxu0 %v5467_v32  ;;  %2641 = vmatpush1.bf16.msra.mxu1 %v5801_v5  ;;  %v5988_v32 = vld [vmem:[%s6609_s2 + $0x30] ss:$24 sps:$4 sm:$0xff]  }
 0x68f   :  { %2642 = vmatprep.subr.bf16.mxu1 %v5807_v7 }
 0x691   :  { %2518 = vmatpush1.bf16.msra.mxu0 %v5475_v45  ;;  %v5994_v45 = vld [vmem:[%s6609_s2 + $0x4] ss:$24 sps:$4 sm:$0xff]  }
 0x692   :  { %2519 = vmatprep.subr.bf16.mxu0 %v5481_v39  ;;  %2643 = vmatpush1.bf16.msra.mxu1 %v5815_v62  ;;  %v6002_v39 = vld [vmem:[%s6609_s2] ss:$24 sps:$4 sm:$0xff]  }
 0x693   :  { %2644 = vmatprep.subr.bf16.mxu1 %v5821_v24 }
 0x695   :  { %2520 = vmatpush1.bf16.msra.mxu0 %v5489_v12  ;;  %v6008_v12 = vld [vmem:[%s6609_s2 + $0x2d4] ss:$24 sps:$4 sm:$0xff]  }
 0x696   :  { %2521 = vmatprep.subr.bf16.mxu0 %v5495_v16  ;;  %2645 = vmatpush1.bf16.msra.mxu1 %v5829_v58  ;;  %v6016_v16 = vld [vmem:[%s6609_s2 + $0x2d0] ss:$24 sps:$4 sm:$0xff]  }
 0x697   :  { %2646 = vmatprep.subr.bf16.mxu1 %v5835_v8 }
 0x699   :  { %2522 = vmatpush1.bf16.msra.mxu0 %v5503_v44  ;;  %v6022_v44 = vld [vmem:[%s6609_s2 + $0x2a4] ss:$24 sps:$4 sm:$0xff]  }
 0x69a   :  { %2523 = vmatprep.subr.bf16.mxu0 %v5509_v29  ;;  %2647 = vmatpush1.bf16.msra.mxu1 %v5843_v19  ;;  %v6030_v29 = vld [vmem:[%s6609_s2 + $0x2a0] ss:$24 sps:$4 sm:$0xff]  }
 0x69b   :  { %2648 = vmatprep.subr.bf16.mxu1 %v5966_v6 }
 0x69d   :  { %2524 = vmatpush1.bf16.msra.mxu0 %v5517_v0  ;;  %v6036_v0 = vld [vmem:[%s6609_s2 + $0x274] ss:$24 sps:$4 sm:$0xff]  }
 0x69e   :  { %2525 = vmatprep.subr.bf16.mxu0 %v5523_v34  ;;  %2649 = vmatpush1.bf16.msra.mxu1 %v5974_v40  ;;  %v6044_v34 = vld [vmem:[%s6609_s2 + $0x270] ss:$24 sps:$4 sm:$0xff]  }
 0x69f   :  { %2650 = vmatprep.subr.bf16.mxu1 %v5980_v26 }
 0x6a1   :  { %2526 = vmatpush1.bf16.msra.mxu0 %v5531_v18  ;;  %v6050_v18 = vld [vmem:[%s6609_s2 + $0x244] ss:$24 sps:$4 sm:$0xff]  }
 0x6a2   :  { %2527 = vmatprep.subr.bf16.mxu0 %v5537_v48  ;;  %2651 = vmatpush1.bf16.msra.mxu1 %v5988_v32  ;;  %v6058_v48 = vld [vmem:[%s6609_s2 + $0x240] ss:$24 sps:$4 sm:$0xff]  }
 0x6a3   :  { %2652 = vmatprep.subr.bf16.mxu1 %v5994_v45 }
 0x6a5   :  { %2528 = vmatpush1.bf16.msra.mxu0 %v5545_v4  ;;  %v6064_v4 = vld [vmem:[%s6609_s2 + $0x214] ss:$24 sps:$4 sm:$0xff]  }
 0x6a6   :  { %2529 = vmatprep.subr.bf16.mxu0 %v5551_v10  ;;  %2653 = vmatpush1.bf16.msra.mxu1 %v6002_v39  ;;  %v6072_v10 = vld [vmem:[%s6609_s2 + $0x210] ss:$24 sps:$4 sm:$0xff]  }
 0x6a7   :  { %2654 = vmatprep.subr.bf16.mxu1 %v6008_v12 }
 0x6a9   :  { %2530 = vmatpush2.bf16.msra.mxu0 %v5559_v21  ;;  %v6078_v21 = vld [vmem:[%s6609_s2 + $0x1e4] ss:$24 sps:$4 sm:$0xff]  }
 0x6aa   :  { %2531 = vmatprep.subr.bf16.mxu0 %v5565_v37  ;;  %2655 = vmatpush2.bf16.msra.mxu1 %v6016_v16  ;;  %v6086_v37 = vld [vmem:[%s6609_s2 + $0x1e0] ss:$24 sps:$4 sm:$0xff]  }
 0x6ab   :  { %2656 = vmatprep.subr.bf16.mxu1 %v6022_v44 }
 0x6ad   :  { %2532 = vmatpush2.bf16.msra.mxu0 %v5573_v42  ;;  %v6092_v42 = vld [vmem:[%s6609_s2 + $0x1b4] ss:$24 sps:$4 sm:$0xff]  }
 0x6ae   :  { %2533 = vmatprep.subr.bf16.mxu0 %v5579_v46  ;;  %2657 = vmatpush2.bf16.msra.mxu1 %v6030_v29  ;;  %v6100_v46 = vld [vmem:[%s6609_s2 + $0x1b0] ss:$24 sps:$4 sm:$0xff]  }
 0x6af   :  { %2658 = vmatprep.subr.bf16.mxu1 %v6036_v0 }
 0x6b1   :  { %2534 = vmatpush2.bf16.msra.mxu0 %v5587_v22  ;;  %v6106_v22 = vld [vmem:[%s6609_s2 + $0x184] ss:$24 sps:$4 sm:$0xff]  }
 0x6b2   :  { %2535 = vmatprep.subr.bf16.mxu0 %v5593_v27  ;;  %2659 = vmatpush2.bf16.msra.mxu1 %v6044_v34  ;;  %v6113_v27 = vld [vmem:[%s6609_s2 + $0x15c] ss:$24 sps:$4 sm:$0xff]  }
 0x6b3   :  { %2660 = vmatprep.subr.bf16.mxu1 %v6050_v18 }
 0x6b5   :  { %2536 = vmatpush2.bf16.msra.mxu0 %v5601_v52  ;;  %v6119_v52 = vld [vmem:[%s6609_s2 + $0x180] ss:$24 sps:$4 sm:$0xff]  }
 0x6b6   :  { %2537 = vmatprep.subr.bf16.mxu0 %v5607_v30  ;;  %2661 = vmatpush2.bf16.msra.mxu1 %v6058_v48  ;;  %v6125_v30 = vld [vmem:[%s6609_s2 + $0x164] ss:$24 sps:$4 sm:$0xff]  }
 0x6b7   :  { %2662 = vmatprep.subr.bf16.mxu1 %v6064_v4 }
 0x6b9   :  { %2538 = vmatpush2.bf16.msra.mxu0 %v5615_v33  ;;  %v6132_v33 = vld [vmem:[%s6609_s2 + $0x158] ss:$24 sps:$4 sm:$0xff]  }
 0x6ba   :  { %2539 = vmatprep.subr.bf16.mxu0 %v5621_v2  ;;  %2663 = vmatpush2.bf16.msra.mxu1 %v6072_v10  ;;  %v6138_v2 = vld [vmem:[%s6609_s2 + $0x12c] ss:$24 sps:$4 sm:$0xff]  }
 0x6bb   :  { %2664 = vmatprep.subr.bf16.mxu1 %v6078_v21 }
 0x6bd   :  { %2540 = vmatpush2.bf16.msra.mxu0 %v6990_v49  ;;  %v6150_v49 = vld [vmem:[%s6609_s2 + $0xfc] ss:$24 sps:$4 sm:$0xff]  }
 0x6be   :  { %2541 = vmatprep.subr.bf16.mxu0 %v6991_v20  ;;  %2665 = vmatpush2.bf16.msra.mxu1 %v6086_v37  ;;  %v6156_v20 = vld [vmem:[%s6609_s2 + $0xf8] ss:$24 sps:$4 sm:$0xff]  }
 0x6bf   :  { %2666 = vmatprep.subr.bf16.mxu1 %v6092_v42 }
 0x6c1   :  { %2542 = vmatpush2.bf16.msra.mxu0 %v6994_v60  ;;  %v6162_v60 = vld [vmem:[%s6609_s2 + $0xcc] ss:$24 sps:$4 sm:$0xff]  }
 0x6c2   :  { %2543 = vmatprep.subr.bf16.mxu0 %v6995_v56  ;;  %2667 = vmatpush2.bf16.msra.mxu1 %v6100_v46  ;;  %v6168_v56 = vld [vmem:[%s6609_s2 + $0xc8] ss:$24 sps:$4 sm:$0xff]  }
 0x6c3   :  { %2668 = vmatprep.subr.bf16.mxu1 %v6106_v22 }
 0x6c5   :  { %2544 = vmatpush2.bf16.msra.mxu0 %v6998_v55  ;;  %v6174_v55 = vld [vmem:[%s6609_s2 + $0x9c] ss:$24 sps:$4 sm:$0xff]  }
 0x6c6   :  { %2679 = vmatprep.subr.bf16.mxu0 %v6113_v27  ;;  %2669 = vmatpush2.bf16.msra.mxu1 %v6119_v52  ;;  %7035 = vst [vmem:[#allocation52_spill] sm:$0xff] %v6174_v55 }
 0x6c7   :  { %2720 = vmatprep.subr.bf16.mxu1 %v6125_v30 }
 0x6c8   :  { %2546 = vmatmul.mubr.bf16.vlgmr.msra.gmra.mxu0 %v5940_v13  ;;  %v7054_v13 = vld [vmem:[#allocation7_spill] sm:$0xff] }
 0x6c9   :  { %2680 = vmatpush1.bf16.msra.mxu0 %v6132_v33 }
 0x6ca   :  { %2681 = vmatprep.subr.bf16.mxu0 %v6138_v2 }
 0x6cd   :  { %2682 = vmatpush1.bf16.msra.mxu0 %v6144_v28 }
 0x6ce   :  { %2683 = vmatprep.subr.bf16.mxu0 %v6150_v49 }
 0x6d1   :  { %2684 = vmatpush1.bf16.msra.mxu0 %v6156_v20 }
 0x6d2   :  { %2685 = vmatprep.subr.bf16.mxu0 %v6162_v60 }
 0x6d5   :  { %2686 = vmatpush1.bf16.msra.mxu0 %v6168_v56 }
 0x6d6   :  { %2687 = vmatprep.subr.bf16.mxu0 %v6174_v55 }
 0x6d9   :  { %2688 = vmatpush1.bf16.msra.mxu0 %v6180_v51  ;;  %v7059_v51 = vld [vmem:[#allocation49_spill] sm:$0xff] }
 0x6da   :  { %2689 = vmatprep.subr.bf16.mxu0 %v6186_v61 }
 0x6dd   :  { %2690 = vmatpush1.bf16.msra.mxu0 %v6192_v31 }
 0x6de   :  { %2691 = vmatprep.subr.bf16.mxu0 %v6198_v50 }
 0x6e1   :  { %2692 = vmatpush1.bf16.msra.mxu0 %v6204_v54 }
 0x6e2   :  { %2693 = vmatprep.subr.bf16.mxu0 %v6210_v43  ;;  %v2555_v43 = vld [vmem:[#allocation2 + $0x38] sm:$0xc] }
 0x6e5   :  { %2694 = vmatpush1.bf16.msra.mxu0 %v6216_v14 }
 0x6e6   :  { %2695 = vmatprep.subr.bf16.mxu0 %v6222_v36 }
 0x6e9   :  { %2696 = vmatpush2.bf16.msra.mxu0 %v6228_v9 }
 0x6ea   :  { %2697 = vmatprep.subr.bf16.mxu0 %v6234_v15  ;;  %v7055_v15 = vld [vmem:[#allocation43_spill] sm:$0xff] }
 0x6ed   :  { %2698 = vmatpush2.bf16.msra.mxu0 %v6240_v23  ;;  %v7056_v23 = vld [vmem:[#allocation45_spill] sm:$0xff] }
 0x6ee   :  { %2699 = vmatprep.subr.bf16.mxu0 %v7021_v59  ;;  %v7057_v59 = vld [vmem:[#allocation47_spill] sm:$0xff] }
 0x6f1   :  { %2700 = vmatpush2.bf16.msra.mxu0 %v7047_v63  ;;  %v7058_v63 = vld [vmem:[#allocation51_spill] sm:$0xff] }
 0x6f2   :  { %2701 = vmatprep.subr.bf16.mxu0 %v7048_v3 }
 0x6f5   :  { %2702 = vmatpush2.bf16.msra.mxu0 %v7049_v1 }
 0x6f6   :  { %2703 = vmatprep.subr.bf16.mxu0 %v7050_v35  ;;  %v2554_v35 = vld [vmem:[#allocation2 + $0x8] sm:$0xc] }
 0x6f9   :  { %2704 = vmatpush2.bf16.msra.mxu0 %v7051_v57 }
 0x6fa   :  { %2705 = vmatprep.subr.bf16.mxu0 %v7052_v47 }
 0x6fd   :  { %2706 = vmatpush2.bf16.msra.mxu0 %v7053_v53 }
 0x6fe   :  { %2707 = vmatprep.subr.bf16.mxu0 %v7054_v13 }
 0x701   :  { %2708 = vmatpush2.bf16.msra.mxu0 %v7055_v15 }
 0x702   :  { %2709 = vmatprep.subr.bf16.mxu0 %v7056_v23 }
 0x705   :  { %2710 = vmatpush2.bf16.msra.mxu0 %v7057_v59 }
 0x706   :  { %2843 = vmatprep.subr.bf16.mxu0 %v7058_v63 }
 0x748   :  { %v2465_v3 = vpop.f32.mrf.mxu0  ;;  %v2506_v1 = vpop.f32.mrf.mxu1 }
 0x749   :  { %v2561_v9 = vrot.slane %v2465_v3, 6  ;;  %v2580_v55 = vadd.f32 %v7059_v51, %v2506_v1 }
 0x74a   :  { %v2467_v36 = vpop.f32.mrf.mxu0  ;;  %v2508_v57 = vpop.f32.mrf.mxu1 }
 0x74b   :  { %v2563_v14 = vadd.f32 %v2561_v9, %v2554_v35  ;;  %v2571_v47 = vrot.slane %v2467_v36, 6  ;;  %v2582_v9 = vrot.slane %v2580_v55, 6  ;;  %v2595_v36 = vrot.slane %v2508_v57, 4 }
 0x74c   :  { %v2469_v53 = vpop.f32.mrf.mxu0  ;;  %v2510_v54 = vpop.f32.mrf.mxu1 }
 0x74d   :  { %v3262_v13 = vmul.f32 -1.442695, %v2563_v14  ;;  %v2573_v50 = vadd.f32 %v2571_v47, %v2555_v43  ;;  %v2590_v54 = vrot.slane %v5931_v11, 6  ;;  %v2556_v47 = vld [vmem:[#allocation2 + $0x28] sm:$0xc] }
 0x74e   :  { %v2470_v15 = vpop.f32.mrf.mxu0  ;;  %v2511_v31 = vpop.f32.mrf.mxu1  ;;  %v2558_v11 = vld [vmem:[#allocation2 + $0x50] sm:$0x30] }
 0x74f   :  { %3665 = vpow2.f32 %v3262_v13  ;;  %v3263_v23 = vmul.f32 -1.442695, %v2573_v50  ;;  %v2557_v31 = vld [vmem:[#allocation2 + $0x18] sm:$0x30] }
 0x750   :  { %v2597_v50 = vadd.f32 %v2595_v36, %v2557_v31 }
 0x751   :  { %3667 = vpow2.f32 %v3263_v23 }
 0x752   :  { %v3264_v15 = vmul.f32 -1.442695, %v2597_v50  ;;  %v2559_v50 = vld [vmem:[#allocation2 + $0x20] sm:$0x30] }
 0x75c   :  { %v3666_v59 = vpop.eup %3665 }
 0x75d   :  { %v2567_v63 = vadd.f32 1.0, %v3666_v59 }
 0x75e   :  { %v3668_v61 = vpop.eup %3667 }
 0x75f   :  { %3669 = vrcp.f32 %v2567_v63  ;;  %v2577_v3 = vadd.f32 1.0, %v3668_v61 }
 0x761   :  { %3671 = vrcp.f32 %v2577_v3 }
 0x76c   :  { %v3670_v35 = vpop.eup %3669 }
 0x76d   :  { %v2584_v14 = vmul.f32 %v3670_v35, %v2582_v9 }
 0x76e   :  { %v3672_v43 = vpop.eup %3671 }
 0x76f   :  { %v2585_v53 = vadd.f32 %v2584_v14, %v2556_v47  ;;  %v2592_v13 = vmul.f32 %v3672_v43, %v2590_v54  ;;  %v2587_v23 = vsub.f32 1.0, %v3672_v43 }
 0x771   :  { %3673 = vtanh.f32 %v2585_v53 }
 0x772   :  { %3675 = vpow2.f32 %v3264_v15 }
 0x77e   :  { %v3674_v61 = vpop.eup %3673 }
 0x77f   :  { %v2588_v59 = vmul.f32 %v3674_v61, %v2587_v23  ;;  %v3676_v55 = vpop.eup %3675  ;;  %v2623_v61 = vrot.slane %v5935_v17, 2  ;;  %v6275_v17 = vld [vmem:[%s6609_s2 + $0x160] ss:$24 sps:$4 sm:$0xff]  }
 0x780   :  { %v2601_v51 = vadd.f32 1.0, %v3676_v55 }
 0x781   :  { %v6258_v63 = vadd.f32 %v2592_v13, %v2588_v59 }
 0x782   :  { %3677 = vrcp.f32 %v2601_v51 }
 0x788   :  { %v2547_v1 = vpop.f32.mrf.mxu0 }
 0x789   :  { %v2605_v57 = vrot.slane %v2547_v1, 4 }
 0x78a   :  { %v2549_v3 = vpop.f32.mrf.mxu0 }
 0x78b   :  { %v2607_v9 = vadd.f32 %v2605_v57, %v2558_v11  ;;  %v2614_v54 = vadd.f32 %v5768_v25, %v2549_v3  ;;  %v2630_v25 = vpack.c.bf16 %v6258_v63, %v6258_v63 }
 0x78c   :  { %v2551_v35 = vpop.f32.mrf.mxu0 }
 0x78d   :  { %v3265_v14 = vmul.f32 -1.442695, %v2607_v9  ;;  %v2616_v47 = vrot.slane %v2614_v54, 4  ;;  %v6268_v35 = vrot.slane %v2630_v25, 1  ;;  %v6295_v54 = vld [vmem:[%s6609_s2 + $0x104] ss:$24 sps:$4 sm:$0xff]  }
 0x78e   :  { %v2552_v36 = vpop.f32.mrf.mxu0  ;;  %v2761_v25 = vld [vmem:[#allocation2 + $0x8] sm:$0x30] }
 0x78f   :  { %3679 = vpow2.f32 %v3265_v14  ;;  %v3678_v43 = vpop.eup %3677  ;;  %v6281_v14 = vld [vmem:[%s6609_s2 + $0x134] ss:$24 sps:$4 sm:$0xff]   ;;  %v6289_v36 = vld [vmem:[%s6609_s2 + $0x130] ss:$24 sps:$4 sm:$0xff]  }
 0x790   :  { %v2618_v31 = vmul.f32 %v3678_v43, %v2616_v47  ;;  %v3908_v47 = vld [vmem:[%s6609_s2 + $0x278] ss:$24 sps:$4 sm:$0xff]   ;;  %v3909_v43 = vld [vmem:[%s6609_s2 + $0x24c] ss:$24 sps:$4 sm:$0xff]  }
 0x792   :  { %v2619_v15 = vadd.f32 %v2618_v31, %v2559_v50  ;;  %v3910_v31 = vld [vmem:[%s6609_s2 + $0x248] ss:$24 sps:$4 sm:$0xff]   ;;  %v3912_v50 = vld [vmem:[%s6609_s2 + $0x218] ss:$24 sps:$4 sm:$0xff]  }
 0x79c   :  { %v3680_v53 = vpop.eup %3679 }
 0x79d   :  { %v2611_v13 = vadd.f32 1.0, %v3680_v53  ;;  %v3911_v53 = vld [vmem:[%s6609_s2 + $0x21c] ss:$24 sps:$4 sm:$0xff]  }
 0x79f   :  { %3681 = vrcp.f32 %v2611_v13  ;;  %v3913_v13 = vld [vmem:[%s6609_s2 + $0x1ec] ss:$24 sps:$4 sm:$0xff]  }
 0x7a0   :  { %3683 = vtanh.f32 %v2619_v15  ;;  %v3914_v15 = vld [vmem:[%s6609_s2 + $0x1e8] ss:$24 sps:$4 sm:$0xff]  }
 0x7ac   :  { %v3682_v23 = vpop.eup %3681 }
 0x7ad   :  { %v2621_v59 = vsub.f32 1.0, %v3682_v23  ;;  %v3684_v55 = vpop.eup %3683  ;;  %v2625_v1 = vmul.f32 %v3682_v23, %v2623_v61  ;;  %v3915_v23 = vld [vmem:[%s6609_s2 + $0x1bc] ss:$24 sps:$4 sm:$0xff]   ;;  %v3916_v61 = vld [vmem:[%s6609_s2 + $0x1b8] ss:$24 sps:$4 sm:$0xff]  }
 0x7af   :  { %v2622_v51 = vmul.f32 %v3684_v55, %v2621_v59  ;;  %v3917_v59 = vld [vmem:[%s6609_s2 + $0x18c] ss:$24 sps:$4 sm:$0xff]   ;;  %v3918_v55 = vld [vmem:[%s6609_s2 + $0x188] ss:$24 sps:$4 sm:$0xff]  }
 0x7b1   :  { %v2626_v57 = vadd.f32 %v2625_v1, %v2622_v51 }
 0x7b3   :  { %v6262_v11 = vrot.slane %v2626_v57, 2 }
 0x7b5   :  { %v2631_v3 = vpack.c.bf16 %v6262_v11, %v6262_v11 }
 0x7b7   :  { %v2635_v9 = vrot.slane %v2631_v3, 1 }
 0x7b9   :  { %2670 = vmatprep.mubr.bf16.mxu1 %v2635_v9  ;;  %2711 = vmatprep.mubr.bf16.mxu0 %v2635_v9 }
 0x7ba   :  { %2671 = vmatmul.mubr.bf16.vlgmr.msra.gmra.mxu1 %v6268_v35  ;;  %2712 = vmatmul.mubr.bf16.vlgmr.msra.gmra.mxu0 %v6268_v35 }
 0x7bb   :  { %2721 = vmatpush1.bf16.msra.mxu1 %v6275_v17  ;;  %2752 = vmatprep.mubr.bf16.mxu1 %v2635_v9 }
 0x7bc   :  { %2722 = vmatprep.subr.bf16.mxu1 %v6281_v14  ;;  %2844 = vmatpush1.bf16.msra.mxu0 %v5787_v38  ;;  %v6303_v38 = vld [vmem:[%s6609_s2 + $0x100] ss:$24 sps:$4 sm:$0xff]  }
 0x7bd   :  { %2845 = vmatprep.subr.bf16.mxu0 %v5793_v41  ;;  %v6309_v41 = vld [vmem:[%s6609_s2 + $0xd4] ss:$24 sps:$4 sm:$0xff]  }
 0x7bf   :  { %2723 = vmatpush1.bf16.msra.mxu1 %v6289_v36 }
 0x7c0   :  { %2724 = vmatprep.subr.bf16.mxu1 %v6295_v54  ;;  %2846 = vmatpush1.bf16.msra.mxu0 %v5801_v5  ;;  %v6317_v5 = vld [vmem:[%s6609_s2 + $0xd0] ss:$24 sps:$4 sm:$0xff]  }
 0x7c1   :  { %2847 = vmatprep.subr.bf16.mxu0 %v5807_v7  ;;  %v6323_v7 = vld [vmem:[%s6609_s2 + $0xa4] ss:$24 sps:$4 sm:$0xff]  }
 0x7c3   :  { %2725 = vmatpush1.bf16.msra.mxu1 %v6303_v38 }
 0x7c4   :  { %2726 = vmatprep.subr.bf16.mxu1 %v6309_v41  ;;  %2848 = vmatpush1.bf16.msra.mxu0 %v5815_v62  ;;  %v6331_v62 = vld [vmem:[%s6609_s2 + $0xa0] ss:$24 sps:$4 sm:$0xff]  }
 0x7c5   :  { %2849 = vmatprep.subr.bf16.mxu0 %v5821_v24  ;;  %v6337_v24 = vld [vmem:[%s6609_s2 + $0x74] ss:$24 sps:$4 sm:$0xff]  }
 0x7c7   :  { %2727 = vmatpush1.bf16.msra.mxu1 %v6317_v5 }
 0x7c8   :  { %2728 = vmatprep.subr.bf16.mxu1 %v6323_v7  ;;  %2850 = vmatpush1.bf16.msra.mxu0 %v5829_v58  ;;  %v6345_v58 = vld [vmem:[%s6609_s2 + $0x70] ss:$24 sps:$4 sm:$0xff]  }
 0x7c9   :  { %2851 = vmatprep.subr.bf16.mxu0 %v5835_v8  ;;  %v6351_v8 = vld [vmem:[%s6609_s2 + $0x44] ss:$24 sps:$4 sm:$0xff]  }
 0x7cb   :  { %2729 = vmatpush1.bf16.msra.mxu1 %v6331_v62 }
 0x7cc   :  { %2730 = vmatprep.subr.bf16.mxu1 %v6337_v24  ;;  %2852 = vmatpush1.bf16.msra.mxu0 %v5843_v19  ;;  %v6359_v19 = vld [vmem:[%s6609_s2 + $0x40] ss:$24 sps:$4 sm:$0xff]  }
 0x7cd   :  { %2853 = vmatprep.subr.bf16.mxu0 %v5966_v6  ;;  %v6365_v6 = vld [vmem:[%s6609_s2 + $0x14] ss:$24 sps:$4 sm:$0xff]  }
 0x7cf   :  { %2731 = vmatpush1.bf16.msra.mxu1 %v6345_v58 }
 0x7d0   :  { %2732 = vmatprep.subr.bf16.mxu1 %v6351_v8  ;;  %2854 = vmatpush1.bf16.msra.mxu0 %v5974_v40  ;;  %v6373_v40 = vld [vmem:[%s6609_s2 + $0x10] ss:$24 sps:$4 sm:$0xff]  }
 0x7d1   :  { %2855 = vmatprep.subr.bf16.mxu0 %v5980_v26  ;;  %v6379_v26 = vld [vmem:[%s6609_s2 + $0x2e4] ss:$24 sps:$4 sm:$0xff]  }
 0x7d3   :  { %2733 = vmatpush1.bf16.msra.mxu1 %v6359_v19 }
 0x7d4   :  { %2734 = vmatprep.subr.bf16.mxu1 %v6365_v6  ;;  %2856 = vmatpush1.bf16.msra.mxu0 %v5988_v32  ;;  %v6387_v32 = vld [vmem:[%s6609_s2 + $0x2e0] ss:$24 sps:$4 sm:$0xff]  }
 0x7d5   :  { %2857 = vmatprep.subr.bf16.mxu0 %v5994_v45  ;;  %v6393_v45 = vld [vmem:[%s6609_s2 + $0x2b4] ss:$24 sps:$4 sm:$0xff]  }
 0x7d7   :  { %2735 = vmatpush1.bf16.msra.mxu1 %v6373_v40 }
 0x7d8   :  { %2736 = vmatprep.subr.bf16.mxu1 %v6379_v26  ;;  %2858 = vmatpush1.bf16.msra.mxu0 %v6002_v39  ;;  %v6401_v39 = vld [vmem:[%s6609_s2 + $0x2b0] ss:$24 sps:$4 sm:$0xff]  }
 0x7d9   :  { %2859 = vmatprep.subr.bf16.mxu0 %v6008_v12  ;;  %v6407_v12 = vld [vmem:[%s6609_s2 + $0x284] ss:$24 sps:$4 sm:$0xff]  }
 0x7db   :  { %2737 = vmatpush2.bf16.msra.mxu1 %v6387_v32 }
 0x7dc   :  { %2738 = vmatprep.subr.bf16.mxu1 %v6393_v45  ;;  %2860 = vmatpush2.bf16.msra.mxu0 %v6016_v16  ;;  %v6415_v16 = vld [vmem:[%s6609_s2 + $0x280] ss:$24 sps:$4 sm:$0xff]  }
 0x7dd   :  { %2861 = vmatprep.subr.bf16.mxu0 %v6022_v44  ;;  %v6421_v44 = vld [vmem:[%s6609_s2 + $0x254] ss:$24 sps:$4 sm:$0xff]  }
 0x7df   :  { %2739 = vmatpush2.bf16.msra.mxu1 %v6401_v39 }
 0x7e0   :  { %2740 = vmatprep.subr.bf16.mxu1 %v6407_v12  ;;  %2862 = vmatpush2.bf16.msra.mxu0 %v6030_v29  ;;  %v6429_v29 = vld [vmem:[%s6609_s2 + $0x250] ss:$24 sps:$4 sm:$0xff]  }
 0x7e1   :  { %2863 = vmatprep.subr.bf16.mxu0 %v6036_v0  ;;  %v6435_v0 = vld [vmem:[%s6609_s2 + $0x224] ss:$24 sps:$4 sm:$0xff]  }
 0x7e3   :  { %2741 = vmatpush2.bf16.msra.mxu1 %v6415_v16 }
 0x7e4   :  { %2742 = vmatprep.subr.bf16.mxu1 %v6421_v44  ;;  %2864 = vmatpush2.bf16.msra.mxu0 %v6044_v34  ;;  %v6443_v34 = vld [vmem:[%s6609_s2 + $0x220] ss:$24 sps:$4 sm:$0xff]  }
 0x7e5   :  { %2865 = vmatprep.subr.bf16.mxu0 %v6050_v18  ;;  %v6449_v18 = vld [vmem:[%s6609_s2 + $0x1f4] ss:$24 sps:$4 sm:$0xff]  }
 0x7e7   :  { %2743 = vmatpush2.bf16.msra.mxu1 %v6429_v29 }
 0x7e8   :  { %2744 = vmatprep.subr.bf16.mxu1 %v6435_v0  ;;  %2866 = vmatpush2.bf16.msra.mxu0 %v6058_v48  ;;  %v6457_v48 = vld [vmem:[%s6609_s2 + $0x1f0] ss:$24 sps:$4 sm:$0xff]  }
 0x7e9   :  { %2867 = vmatprep.subr.bf16.mxu0 %v6064_v4  ;;  %v6463_v4 = vld [vmem:[%s6609_s2 + $0x1c4] ss:$24 sps:$4 sm:$0xff]  }
 0x7eb   :  { %2745 = vmatpush2.bf16.msra.mxu1 %v6443_v34 }
 0x7ec   :  { %2746 = vmatprep.subr.bf16.mxu1 %v6449_v18  ;;  %2868 = vmatpush2.bf16.msra.mxu0 %v6072_v10  ;;  %v6471_v10 = vld [vmem:[%s6609_s2 + $0x1c0] ss:$24 sps:$4 sm:$0xff]  }
 0x7ed   :  { %2869 = vmatprep.subr.bf16.mxu0 %v6078_v21  ;;  %v6477_v21 = vld [vmem:[%s6609_s2 + $0x194] ss:$24 sps:$4 sm:$0xff]  }
 0x7ef   :  { %2747 = vmatpush2.bf16.msra.mxu1 %v6457_v48 }
 0x7f0   :  { %2748 = vmatprep.subr.bf16.mxu1 %v6463_v4  ;;  %2870 = vmatpush2.bf16.msra.mxu0 %v6086_v37  ;;  %v6485_v37 = vld [vmem:[%s6609_s2 + $0x190] ss:$24 sps:$4 sm:$0xff]  }
 0x7f1   :  { %2871 = vmatprep.subr.bf16.mxu0 %v6092_v42  ;;  %v7060_v42 = vld [vmem:[#allocation52_spill] sm:$0xff] }
 0x7f3   :  { %2749 = vmatpush2.bf16.msra.mxu1 %v6471_v10 }
 0x7f4   :  { %2750 = vmatprep.subr.bf16.mxu1 %v6477_v21  ;;  %2872 = vmatpush2.bf16.msra.mxu0 %v6100_v46  ;;  %v7061_v46 = vld [vmem:[#allocation4_spill] sm:$0xff] }
 0x7f5   :  { %2873 = vmatprep.subr.bf16.mxu0 %v6106_v22  ;;  %v7062_v22 = vld [vmem:[#allocation8_spill] sm:$0xff] }
 0x7f7   :  { %2751 = vmatpush2.bf16.msra.mxu1 %v6485_v37 }
 0x7f8   :  { %2884 = vmatprep.subr.bf16.mxu1 %v6113_v27  ;;  %2874 = vmatpush2.bf16.msra.mxu0 %v6119_v52  ;;  %v7063_v27 = vld [vmem:[#allocation9_spill] sm:$0xff]  ;;  %v7064_v52 = vld [vmem:[#allocation27_spill] sm:$0xff] }
 0x7f9   :  { %2925 = vmatprep.subr.bf16.mxu0 %v6125_v30  ;;  %v7065_v30 = vld [vmem:[#allocation29_spill] sm:$0xff] }
 0x7fa   :  { %2753 = vmatmul.mubr.bf16.vlgmr.msra.gmra.mxu1 %v6268_v35 }
 0x7fb   :  { %2885 = vmatpush1.bf16.msra.mxu1 %v6132_v33  ;;  %v7066_v33 = vld [vmem:[#allocation10_spill] sm:$0xff] }
 0x7fc   :  { %2886 = vmatprep.subr.bf16.mxu1 %v6138_v2  ;;  %v7067_v2 = vld [vmem:[#allocation11_spill] sm:$0xff] }
 0x7ff   :  { %2887 = vmatpush1.bf16.msra.mxu1 %v6144_v28  ;;  %v7068_v28 = vld [vmem:[#allocation31_spill] sm:$0xff] }
 0x800   :  { %2888 = vmatprep.subr.bf16.mxu1 %v6150_v49  ;;  %v7069_v49 = vld [vmem:[#allocation33_spill] sm:$0xff] }
 0x803   :  { %2889 = vmatpush1.bf16.msra.mxu1 %v6156_v20  ;;  %v7070_v20 = vld [vmem:[#allocation12_spill] sm:$0xff] }
 0x804   :  { %2890 = vmatprep.subr.bf16.mxu1 %v6162_v60  ;;  %v7071_v60 = vld [vmem:[#allocation13_spill] sm:$0xff] }
 0x807   :  { %2891 = vmatpush1.bf16.msra.mxu1 %v6168_v56  ;;  %v3907_v56 = vld [vmem:[%s6609_s2 + $0x27c] ss:$24 sps:$4 sm:$0xff]  }
 0x808   :  { %2892 = vmatprep.subr.bf16.mxu1 %v7060_v42 }
 0x80b   :  { %2893 = vmatpush1.bf16.msra.mxu1 %v7061_v46  ;;  %v2762_v46 = vld [vmem:[#allocation2 + $0x38] sm:$0x30] }
 0x80c   :  { %2894 = vmatprep.subr.bf16.mxu1 %v7062_v22 }
 0x80f   :  { %2895 = vmatpush1.bf16.msra.mxu1 %v7063_v27 }
 0x810   :  { %2896 = vmatprep.subr.bf16.mxu1 %v7064_v52 }
 0x813   :  { %2897 = vmatpush1.bf16.msra.mxu1 %v7065_v30 }
 0x814   :  { %2898 = vmatprep.subr.bf16.mxu1 %v7066_v33 }
 0x817   :  { %2899 = vmatpush1.bf16.msra.mxu1 %v7067_v2 }
 0x818   :  { %2900 = vmatprep.subr.bf16.mxu1 %v7068_v28 }
 0x81b   :  { %2901 = vmatpush2.bf16.msra.mxu1 %v7069_v49 }
 0x81c   :  { %2902 = vmatprep.subr.bf16.mxu1 %v7070_v20 }
 0x81f   :  { %2903 = vmatpush2.bf16.msra.mxu1 %v7071_v60 }
 0x820   :  { %2904 = vmatprep.subr.bf16.mxu1 %v3907_v56 }
 0x823   :  { %2905 = vmatpush2.bf16.msra.mxu1 %v3908_v47  ;;  %v6550_v47 = vld [vmem:[%s6611_s4] ss:$0 sm:$0xff] }
 0x824   :  { %2906 = vmatprep.subr.bf16.mxu1 %v3909_v43 }
 0x827   :  { %2907 = vmatpush2.bf16.msra.mxu1 %v3910_v31 }
 0x828   :  { %2908 = vmatprep.subr.bf16.mxu1 %v3911_v53 }
 0x82b   :  { %2909 = vmatpush2.bf16.msra.mxu1 %v3912_v50 }
 0x82c   :  { %2910 = vmatprep.subr.bf16.mxu1 %v3913_v13  ;;  %v2797_v13 = vrot.slane %v6258_v63, 6  ;;  %v2765_v63 = vld [vmem:[#allocation2 + $0x50] sm:$0xc] }
 0x82f   :  { %2911 = vmatpush2.bf16.msra.mxu1 %v3914_v15 }
 0x830   :  { %2912 = vmatprep.subr.bf16.mxu1 %v3915_v23 }
 0x833   :  { %2913 = vmatpush2.bf16.msra.mxu1 %v3916_v61  ;;  %v2763_v61 = vld [vmem:[#allocation2 + $0x28] sm:$0x30] }
 0x834   :  { %2914 = vmatprep.subr.bf16.mxu1 %v3917_v59  ;;  %v2764_v59 = vld [vmem:[#allocation2 + $0x18] sm:$0xc] }
 0x837   :  { %2915 = vmatpush2.bf16.msra.mxu1 %v3918_v55 }
 0x87a   :  { %v2672_v51 = vpop.f32.mrf.mxu1  ;;  %v2713_v1 = vpop.f32.mrf.mxu0 }
 0x87b   :  { %v2768_v57 = vrot.slane %v2672_v51, 4  ;;  %v2787_v43 = vadd.f32 %v6550_v47, %v2713_v1 }
 0x87c   :  { %v2674_v3 = vpop.f32.mrf.mxu1  ;;  %v2715_v9 = vpop.f32.mrf.mxu0 }
 0x87d   :  { %v2770_v35 = vadd.f32 %v2768_v57, %v2761_v25  ;;  %v2778_v42 = vrot.slane %v2674_v3, 4  ;;  %v2789_v31 = vrot.slane %v2787_v43, 4  ;;  %v2802_v53 = vrot.slane %v2715_v9, 6 }
 0x87e   :  { %v2676_v22 = vpop.f32.mrf.mxu1  ;;  %v2717_v27 = vpop.f32.mrf.mxu0 }
 0x87f   :  { %v3266_v52 = vmul.f32 -1.442695, %v2770_v35  ;;  %v2780_v30 = vadd.f32 %v2778_v42, %v2762_v46  ;;  %v2804_v51 = vadd.f32 %v2802_v53, %v2764_v59  ;;  %v2766_v53 = vld [vmem:[#allocation2 + $0x20] sm:$0xc] }
 0x880   :  { %v2677_v33 = vpop.f32.mrf.mxu1  ;;  %v2718_v2 = vpop.f32.mrf.mxu0 }
 0x881   :  { %3685 = vpow2.f32 %v3266_v52  ;;  %v3267_v28 = vmul.f32 -1.442695, %v2780_v30  ;;  %v3268_v25 = vmul.f32 -1.442695, %v2804_v51 }
 0x883   :  { %3687 = vpow2.f32 %v3267_v28 }
 0x88e   :  { %v3686_v49 = vpop.eup %3685 }
 0x88f   :  { %v2774_v20 = vadd.f32 1.0, %v3686_v49  ;;  %v6559_v49 = vld [vmem:[%s6611_s4 + $0x1] ss:$0 sm:$0xff] }
 0x890   :  { %v3688_v60 = vpop.eup %3687 }
 0x891   :  { %3689 = vrcp.f32 %v2774_v20  ;;  %v2784_v56 = vadd.f32 1.0, %v3688_v60 }
 0x893   :  { %3691 = vrcp.f32 %v2784_v56 }
 0x89e   :  { %v3690_v50 = vpop.eup %3689 }
 0x89f   :  { %v2791_v15 = vmul.f32 %v3690_v50, %v2789_v31 }
 0x8a0   :  { %v3692_v23 = vpop.eup %3691 }
 0x8a1   :  { %v2792_v55 = vadd.f32 %v2791_v15, %v2763_v61  ;;  %v2799_v57 = vmul.f32 %v3692_v23, %v2797_v13  ;;  %v2794_v3 = vsub.f32 1.0, %v3692_v23 }
 0x8a3   :  { %3693 = vtanh.f32 %v2792_v55 }
 0x8a4   :  { %3695 = vpow2.f32 %v3268_v25 }
 0x8b0   :  { %v3694_v35 = vpop.eup %3693 }
 0x8b1   :  { %v2795_v42 = vmul.f32 %v3694_v35, %v2794_v3  ;;  %v3696_v1 = vpop.eup %3695 }
 0x8b2   :  { %v2808_v9 = vadd.f32 1.0, %v3696_v1 }
 0x8b3   :  { %v6554_v46 = vadd.f32 %v2799_v57, %v2795_v42 }
 0x8b4   :  { %3697 = vrcp.f32 %v2808_v9 }
 0x8b5   :  { %v2835_v25 = vpack.c.bf16 %v6554_v46, %v6554_v46 }
 0x8b7   :  { %v2839_v42 = vrot.slane %v2835_v25, 2 }
 0x8ba   :  { %v2754_v22 = vpop.f32.mrf.mxu1 }
 0x8bb   :  { %v2812_v27 = vrot.slane %v2754_v22, 6 }
 0x8bc   :  { %v2756_v52 = vpop.f32.mrf.mxu1 }
 0x8bd   :  { %v2814_v30 = vadd.f32 %v2812_v27, %v2765_v63  ;;  %v2821_v20 = vadd.f32 %v6559_v49, %v2756_v52 }
 0x8be   :  { %v2758_v33 = vpop.f32.mrf.mxu1 }
 0x8bf   :  { %v3269_v2 = vmul.f32 -1.442695, %v2814_v30  ;;  %v2823_v60 = vrot.slane %v2821_v20, 6  ;;  %v2970_v30 = vld [vmem:[#allocation2 + $0x50] sm:$0x3] }
 0x8c0   :  { %v2759_v28 = vpop.f32.mrf.mxu1 }
 0x8c1   :  { %3699 = vpow2.f32 %v3269_v2  ;;  %v3698_v56 = vpop.eup %3697 }
 0x8c2   :  { %v2825_v43 = vmul.f32 %v3698_v56, %v2823_v60 }
 0x8c4   :  { %v2826_v13 = vadd.f32 %v2825_v43, %v2766_v53  ;;  %v2971_v53 = vld [vmem:[#allocation2 + $0x20] sm:$0x3] }
 0x8ce   :  { %v3700_v31 = vpop.eup %3699 }
 0x8cf   :  { %v2818_v50 = vadd.f32 1.0, %v3700_v31 }
 0x8d1   :  { %3701 = vrcp.f32 %v2818_v50 }
 0x8d2   :  { %3703 = vtanh.f32 %v2826_v13 }
 0x8de   :  { %v3702_v15 = vpop.eup %3701 }
 0x8df   :  { %v2828_v23 = vsub.f32 1.0, %v3702_v15  ;;  %v3704_v61 = vpop.eup %3703  ;;  %v2830_v55 = vmul.f32 %v3702_v15, %v6262_v11  ;;  %v3923_v15 = vmov 1983009808  }
 0x8e1   :  { %v2829_v59 = vmul.f32 %v3704_v61, %v2828_v23  ;;  %v3035_v23 = vunpack.c.l.s4 %v3923_v15 }
 0x8e3   :  { %v6563_v51 = vadd.f32 %v2830_v55, %v2829_v59 }
 0x8e5   :  { %v2833_v57 = vrot.slane %v6563_v51, 6  ;;  %v3026_v59 = vrot.slane %v6563_v51, 2 }
 0x8e7   :  { %v2836_v3 = vpack.c.bf16 %v2833_v57, %v2833_v57 }
 0x8e9   :  { %v2840_v35 = vrot.slane %v2836_v3, 2 }
 0x8eb   :  { %2875 = vmatprep.mubr.bf16.mxu0 %v2840_v35  ;;  %2916 = vmatprep.mubr.bf16.mxu1 %v2840_v35 }
 0x8ec   :  { %2876 = vmatmul.mubr.bf16.vlgmr.msra.gmra.mxu0 %v2839_v42  ;;  %2917 = vmatmul.mubr.bf16.vlgmr.msra.gmra.mxu1 %v2839_v42 }
 0x8ed   :  { %2926 = vmatpush1.bf16.msra.mxu0 %v6275_v17  ;;  %2957 = vmatprep.mubr.bf16.mxu0 %v2840_v35  ;;  %v3036_v35 = vunpack.c.0.s8 %v3035_v23 }
 0x8ee   :  { %2927 = vmatprep.subr.bf16.mxu0 %v6281_v14 }
 0x8f1   :  { %2928 = vmatpush1.bf16.msra.mxu0 %v6289_v36  ;;  %v2966_v36 = vld [vmem:[#allocation2 + $0x8] sm:$0xc0] }
 0x8f2   :  { %2929 = vmatprep.subr.bf16.mxu0 %v6295_v54 }
 0x8f5   :  { %2930 = vmatpush1.bf16.msra.mxu0 %v6303_v38 }
 0x8f6   :  { %2931 = vmatprep.subr.bf16.mxu0 %v6309_v41 }
 0x8f9   :  { %2932 = vmatpush1.bf16.msra.mxu0 %v6317_v5 }
 0x8fa   :  { %2933 = vmatprep.subr.bf16.mxu0 %v6323_v7 }
 0x8fd   :  { %2934 = vmatpush1.bf16.msra.mxu0 %v6331_v62 }
 0x8fe   :  { %2935 = vmatprep.subr.bf16.mxu0 %v6337_v24 }
 0x901   :  { %2936 = vmatpush1.bf16.msra.mxu0 %v6345_v58 }
 0x902   :  { %2937 = vmatprep.subr.bf16.mxu0 %v6351_v8 }
 0x905   :  { %2938 = vmatpush1.bf16.msra.mxu0 %v6359_v19  ;;  %v2967_v19 = vld [vmem:[#allocation2 + $0x38] sm:$0xc0] }
 0x906   :  { %2939 = vmatprep.subr.bf16.mxu0 %v6365_v6 }
 0x909   :  { %2940 = vmatpush1.bf16.msra.mxu0 %v6373_v40 }
 0x90a   :  { %2941 = vmatprep.subr.bf16.mxu0 %v6379_v26 }
 0x90d   :  { %2942 = vmatpush2.bf16.msra.mxu0 %v6387_v32 }
 0x90e   :  { %2943 = vmatprep.subr.bf16.mxu0 %v6393_v45 }
 0x911   :  { %2944 = vmatpush2.bf16.msra.mxu0 %v6401_v39 }
 0x912   :  { %2945 = vmatprep.subr.bf16.mxu0 %v6407_v12 }
 0x915   :  { %2946 = vmatpush2.bf16.msra.mxu0 %v6415_v16 }
 0x916   :  { %2947 = vmatprep.subr.bf16.mxu0 %v6421_v44 }
 0x919   :  { %2948 = vmatpush2.bf16.msra.mxu0 %v6429_v29  ;;  %v2969_v29 = vld [vmem:[#allocation2 + $0x18] sm:$0x3] }
 0x91a   :  { %2949 = vmatprep.subr.bf16.mxu0 %v6435_v0 }
 0x91d   :  { %2950 = vmatpush2.bf16.msra.mxu0 %v6443_v34 }
 0x91e   :  { %2951 = vmatprep.subr.bf16.mxu0 %v6449_v18  ;;  %v2968_v18 = vld [vmem:[#allocation2 + $0x28] sm:$0xc0] }
 0x921   :  { %2952 = vmatpush2.bf16.msra.mxu0 %v6457_v48 }
 0x922   :  { %2953 = vmatprep.subr.bf16.mxu0 %v6463_v4 }
 0x925   :  { %2954 = vmatpush2.bf16.msra.mxu0 %v6471_v10 }
 0x926   :  { %2955 = vmatprep.subr.bf16.mxu0 %v6477_v21  ;;  %v3002_v21 = vrot.slane %v6554_v46, 6 }
 0x929   :  { %2956 = vmatpush2.bf16.msra.mxu0 %v6485_v37 }
 0x92c   :  { %2958 = vmatmul.mubr.bf16.vlgmr.msra.gmra.mxu0 %v2839_v42 }
 0x9ac   :  { %v2877_v11 = vpop.f32.mrf.mxu0  ;;  %v2918_v17 = vpop.f32.mrf.mxu1 }
 0x9ad   :  { %v2973_v14 = vrot.slane %v2877_v11, 2  ;;  %v2992_v39 = vadd.f32 %v6550_v47, %v2918_v17  ;;  %v7072_v11 = vld [vmem:[#allocation3_spill] sm:$0xff] }
 0x9ae   :  { %v2879_v54 = vpop.f32.mrf.mxu0  ;;  %v2920_v38 = vpop.f32.mrf.mxu1  ;;  %v3039_v17 = vsub.s32 %v3036_v35, %v7072_v11 }
 0x9af   :  { %v2975_v41 = vadd.f32 %v2973_v14, %v2966_v36  ;;  %v2983_v24 = vrot.slane %v2879_v54, 2  ;;  %v2994_v16 = vrot.slane %v2992_v39, 2  ;;  %v3006_v34 = vadd.f32 %v2969_v29, %v2920_v38 }
 0x9b0   :  { %v2881_v5 = vpop.f32.mrf.mxu0  ;;  %v2922_v7 = vpop.f32.mrf.mxu1 }
 0x9b1   :  { %v3270_v62 = vmul.f32 -1.442695, %v2975_v41  ;;  %v2985_v6 = vadd.f32 %v2983_v24, %v2967_v19  ;;  %v3272_v4 = vmul.f32 -1.442695, %v3006_v34 }
 0x9b2   :  { %v2882_v58 = vpop.f32.mrf.mxu0  ;;  %v2923_v8 = vpop.f32.mrf.mxu1 }
 0x9b3   :  { %3705 = vpow2.f32 %v3270_v62  ;;  %v3271_v40 = vmul.f32 -1.442695, %v2985_v6 }
 0x9b5   :  { %3707 = vpow2.f32 %v3271_v40 }
 0x9c0   :  { %v3706_v26 = vpop.eup %3705 }
 0x9c1   :  { %v2979_v32 = vadd.f32 1.0, %v3706_v26 }
 0x9c2   :  { %v3708_v45 = vpop.eup %3707 }
 0x9c3   :  { %3709 = vrcp.f32 %v2979_v32  ;;  %v2989_v12 = vadd.f32 1.0, %v3708_v45 }
 0x9c5   :  { %3711 = vrcp.f32 %v2989_v12 }
 0x9d0   :  { %v3710_v44 = vpop.eup %3709 }
 0x9d1   :  { %v2996_v0 = vmul.f32 %v3710_v44, %v2994_v16 }
 0x9d2   :  { %v3712_v10 = vpop.eup %3711 }
 0x9d3   :  { %v2997_v48 = vadd.f32 %v2996_v0, %v2968_v18  ;;  %v2999_v37 = vsub.f32 1.0, %v3712_v10  ;;  %v3004_v22 = vmul.f32 %v3712_v10, %v3002_v21 }
 0x9d5   :  { %3713 = vtanh.f32 %v2997_v48 }
 0x9d6   :  { %3715 = vpow2.f32 %v3272_v4 }
 0x9e2   :  { %v3714_v1 = vpop.eup %3713 }
 0x9e3   :  { %v3000_v9 = vmul.f32 %v3714_v1, %v2999_v37  ;;  %v3716_v27 = vpop.eup %3715 }
 0x9e4   :  { %v3010_v63 = vadd.f32 1.0, %v3716_v27 }
 0x9e5   :  { %v3005_v47 = vadd.f32 %v3004_v22, %v3000_v9 }
 0x9e6   :  { %3717 = vrcp.f32 %v3010_v63 }
 0x9ec   :  { %v2959_v52 = vpop.f32.mrf.mxu0 }
 0x9ed   :  { %v3013_v33 = vadd.f32 %v2970_v30, %v2959_v52 }
 0x9ee   :  { %v2961_v2 = vpop.f32.mrf.mxu0 }
 0x9ef   :  { %v3273_v28 = vmul.f32 -1.442695, %v3013_v33  ;;  %v3020_v56 = vadd.f32 %v6559_v49, %v2961_v2 }
 0x9f0   :  { %v2963_v20 = vpop.f32.mrf.mxu0 }
 0x9f1   :  { %3719 = vpow2.f32 %v3273_v28 }
 0x9f2   :  { %v2964_v60 = vpop.f32.mrf.mxu0 }
 0x9f3   :  { %v3718_v43 = vpop.eup %3717 }
 0x9f4   :  { %v3021_v46 = vmul.f32 %v3718_v43, %v3020_v56 }
 0x9f6   :  { %v3022_v13 = vadd.f32 %v3021_v46, %v2971_v53 }
 0x9fe   :  { %v3720_v31 = vpop.eup %3719 }
 0x9ff   :  { %v3017_v50 = vadd.f32 1.0, %v3720_v31 }
 0xa01   :  { %3721 = vrcp.f32 %v3017_v50 }
 0xa02   :  { %3723 = vtanh.f32 %v3022_v13 }
 0xa0e   :  { %v3722_v61 = vpop.eup %3721 }
 0xa0f   :  { %v3024_v55 = vsub.f32 1.0, %v3722_v61  ;;  %v3724_v57 = vpop.eup %3723  ;;  %v3028_v25 = vmul.f32 %v3722_v61, %v3026_v59 }
 0xa11   :  { %v3025_v3 = vmul.f32 %v3724_v57, %v3024_v55 }
 0xa13   :  { %v3029_v42 = vadd.f32 %v3028_v25, %v3025_v3 }
 0xa15   :  { %v3031_v49 = vrot.slane %v3029_v42, 2 }
 0xa17   :  { %v3033_v14 = vcombine.high %v3005_v47, %v3031_v49 }
 0xa19   :  { %v3040_v36 = vrot.slane %v3033_v14, %v3039_v17 }
 0xa1b   :  { %v3041_v54 = vcombine.high %v3040_v36, %v3040_v36 }
 0xa1d   :  { %3043 = vst [vmem:[%s6612_s5] sm:$0xf] %v3041_v54 }

</bundles_post_ra>
